<compile_context>
chip_gen: v7x
topology: tpu7x:2x2x1
jax: 0.10.0
libtpu: 0.0.40
codegen_flags: <defaults>
</compile_context>

<pallas_src>
import functools

import jax
import jax.numpy as jnp
from jax.experimental import pallas as pl
from jax.experimental.pallas import tpu as pltpu

LANE = 128      # every feature / hidden dim is padded to this lane width
SUBLANE = 8     # batch is padded to a multiple of this


# --------------------------------- kernel -------------------------------------------
def _fused_lstm_ae_kernel(x_ref,
                          wx1_ref, wh1_ref, b1_ref,
                          wx2_ref, wh2_ref, b2_ref,
                          wx3_ref, wh3_ref, b3_ref,
                          wx4_ref, wh4_ref, b4_ref,
                          out_ref,
                          hseq_a, hseq_b, gx_ref):
    T, BP, _ = x_ref.shape
    HP = LANE

    def run_layer(in_seq_ref, out_seq_ref, wx_ref, wh_ref, b_ref):
        # ---- off-critical-path: batched input projection for all T timesteps + bias ----
        x_all = in_seq_ref[...].reshape(T * BP, HP)                    # (T*BP, 128), no relayout
        gx = jnp.dot(x_all, wx_ref[...], preferred_element_type=jnp.float32)
        gx_ref[...] = gx.reshape(T, BP, 4 * HP) + b_ref[...]           # bias folded in once

        # ---- serial recurrence: only h @ W_hh + nonlinearities on the critical path ----
        wh = wh_ref[...]                                               # hoisted, loop-invariant
        zeros = jnp.zeros((BP, HP), jnp.float32)

        def step(t, carry):
            h, c = carry
            gates = gx_ref[t] + jnp.dot(h, wh, preferred_element_type=jnp.float32)
            # packed gate order [i, f, o, g]: one sigmoid slab (3 blocks) + one tanh block
            sig = jax.nn.sigmoid(gates[:, 0:3 * HP])
            i = sig[:, 0 * HP:1 * HP]
            f = sig[:, 1 * HP:2 * HP]
            o = sig[:, 2 * HP:3 * HP]
            g = jnp.tanh(gates[:, 3 * HP:4 * HP])
            c_new = f * c + i * g
            h_new = o * jnp.tanh(c_new)
            out_seq_ref[t] = h_new                                     # lane-dense (BP,128) store
            return h_new, c_new

        jax.lax.fori_loop(0, T, step, (zeros, zeros), unroll=True)

    run_layer(x_ref,  hseq_a, wx1_ref, wh1_ref, b1_ref)   # enc lstm1: F  -> 32
    run_layer(hseq_a, hseq_b, wx2_ref, wh2_ref, b2_ref)   # enc lstm2: 32 -> 16
    run_layer(hseq_b, hseq_a, wx3_ref, wh3_ref, b3_ref)   # dec lstm1: 16 -> 32
    run_layer(hseq_a, out_ref, wx4_ref, wh4_ref, b4_ref)  # dec lstm2: 32 -> F


# ------------------------------ params & packing ------------------------------------
def _pad_up(n, m):
    return ((n + m - 1) // m) * m


def init_lstm_params(key, input_size, hidden_size):
    """Raw PyTorch-style nn.LSTM params: U(-1/sqrt(H), 1/sqrt(H))."""
    k = 1.0 / float(hidden_size) ** 0.5
    k0, k1, k2, k3 = jax.random.split(key, 4)
    return {
        "w_ih": jax.random.uniform(k0, (4 * hidden_size, input_size), jnp.float32, -k, k),
        "w_hh": jax.random.uniform(k1, (4 * hidden_size, hidden_size), jnp.float32, -k, k),
        "b_ih": jax.random.uniform(k2, (4 * hidden_size,), jnp.float32, -k, k),
        "b_hh": jax.random.uniform(k3, (4 * hidden_size,), jnp.float32, -k, k),
    }


def init_autoencoder_params(key, n_features, embedding_dim=16):
    hidden = 2 * embedding_dim
    keys = jax.random.split(key, 4)
    return {
        "enc1": init_lstm_params(keys[0], n_features, hidden),      # F  -> 2E
        "enc2": init_lstm_params(keys[1], hidden, embedding_dim),   # 2E -> E
        "dec1": init_lstm_params(keys[2], embedding_dim, hidden),   # E  -> 2E
        "dec2": init_lstm_params(keys[3], hidden, n_features),      # 2E -> F
    }


# kernel gate slots 0..3 = [i, f, o, g]; PyTorch stores [i, f, g, o]
_GATE_SRC = (0, 1, 3, 2)


def _pack_layer(p, din, h, batch_pad):
    """Pack one LSTM layer into lane-padded (LANE, 4*LANE) W_x and W_h plus a
    pre-broadcast bias (batch_pad, 4*LANE), kernel gate order [i, f, o, g].

    x_pad @ W_x + h_pad @ W_h reproduces x @ W_ih.T + h @ W_hh.T in lanes
    [k*LANE : k*LANE+h] of gate slot k, and exact zeros in every padded lane
    (zero weight rows/cols + zero bias => padded h/c lanes stay exactly 0:
    c' = sigmoid(0)*c + sigmoid(0)*tanh(0) = 0, h' = sigmoid(0)*tanh(0) = 0).
    """
    assert din <= LANE and h <= LANE
    wx = jnp.zeros((LANE, 4 * LANE), jnp.float32)
    wh = jnp.zeros((LANE, 4 * LANE), jnp.float32)
    b = jnp.zeros((4 * LANE,), jnp.float32)
    wih_t = jnp.transpose(p["w_ih"])      # (din, 4h)
    whh_t = jnp.transpose(p["w_hh"])      # (h,   4h)
    bias = p["b_ih"] + p["b_hh"]
    for slot, src in enumerate(_GATE_SRC):
        wx = wx.at[0:din, slot * LANE:slot * LANE + h].set(wih_t[:, src * h:(src + 1) * h])
        wh = wh.at[0:h,   slot * LANE:slot * LANE + h].set(whh_t[:, src * h:(src + 1) * h])
        b = b.at[slot * LANE:slot * LANE + h].set(bias[src * h:(src + 1) * h])
    b_bcast = jnp.broadcast_to(b[None, :], (batch_pad, 4 * LANE))
    return wx, wh, b_bcast


def pack_autoencoder_params(params, n_features, embedding_dim, batch_pad):
    """Done ONCE at init (not inside the per-call jitted forward)."""
    hidden = 2 * embedding_dim
    dims = [("enc1", n_features, hidden),
            ("enc2", hidden, embedding_dim),
            ("dec1", embedding_dim, hidden),
            ("dec2", hidden, n_features)]
    packed = []
    for name, din, h in dims:
        packed.extend(_pack_layer(params[name], din, h, batch_pad))
    return tuple(packed)   # (wx1, wh1, b1, ..., wx4, wh4, b4)


# ---------------------------------- forward ------------------------------------------
@jax.jit
def lstm_autoencoder_forward(packed, x_btf):
    """x_btf: (B, T, n_features) batch-first (like the PyTorch module). Returns same shape.
    `packed` must have been built with batch_pad == pad_up(B, SUBLANE)."""
    B, T, F = x_btf.shape
    BP = _pad_up(B, SUBLANE)

    x = jnp.transpose(x_btf, (1, 0, 2)).astype(jnp.float32)             # time-major (T, B, F)
    x_pad = jnp.zeros((T, BP, LANE), jnp.float32).at[:, :B, :F].set(x)  # lane/sublane padded

    vmem = pl.BlockSpec(memory_space=pltpu.MemorySpace.VMEM)

    out_pad = pl.pallas_call(
        _fused_lstm_ae_kernel,
        out_shape=jax.ShapeDtypeStruct((T, BP, LANE), jnp.float32),
        in_specs=[vmem] * (1 + len(packed)),
        out_specs=vmem,
        scratch_shapes=[
            pltpu.VMEM((T, BP, LANE), jnp.float32),       # h-sequence ping
            pltpu.VMEM((T, BP, LANE), jnp.float32),       # h-sequence pong
            pltpu.VMEM((T, BP, 4 * LANE), jnp.float32),   # per-layer batched input gates
        ],
    )(x_pad, *packed)

    out = out_pad[:, :B, :F]                          # drop batch/lane padding
    return jnp.transpose(out, (1, 0, 2))              # back to (B, T, n_features)


# ----------------------------- pure-JAX reference ------------------------------------
def _lstm_layer_ref(x_tbd, p):
    H = p["w_hh"].shape[1]
    wih_t = jnp.transpose(p["w_ih"])
    whh_t = jnp.transpose(p["w_hh"])
    bias = (p["b_ih"] + p["b_hh"])[None, :]

    def step(carry, x_t):
        h, c = carry
        gates = x_t @ wih_t + h @ whh_t + bias
        i = jax.nn.sigmoid(gates[:, 0 * H:1 * H])
        f = jax.nn.sigmoid(gates[:, 1 * H:2 * H])
        g = jnp.tanh(gates[:, 2 * H:3 * H])
        o = jax.nn.sigmoid(gates[:, 3 * H:4 * H])
        c_new = f * c + i * g
        h_new = o * jnp.tanh(c_new)
        return (h_new, c_new), h_new

    B = x_tbd.shape[1]
    init = (jnp.zeros((B, H), jnp.float32), jnp.zeros((B, H), jnp.float32))
    _, hs = jax.lax.scan(step, init, x_tbd)
    return hs


def _autoencoder_ref(params, x_btf):
    h = jnp.transpose(x_btf, (1, 0, 2)).astype(jnp.float32)
    for name in ("enc1", "enc2", "dec1", "dec2"):
        h = _lstm_layer_ref(h, params[name])
    return jnp.transpose(h, (1, 0, 2))


# ------------------------------------ main --------------------------------------------
if __name__ == "__main__":
    B, T, F, E = 2, 8, 4, 16   # batch, seq_len, n_features, embedding_dim (hidden = 32)

    key = jax.random.PRNGKey(0)
    k_params, k_x = jax.random.split(key)
    params = init_autoencoder_params(k_params, n_features=F, embedding_dim=E)
    x = jax.random.normal(k_x, (B, T, F), jnp.float32)

    # Pack weights ONCE at init (out of the per-call path).
    BP = _pad_up(B, SUBLANE)
    packed = pack_autoencoder_params(params, n_features=F, embedding_dim=E, batch_pad=BP)
    packed = tuple(jax.block_until_ready(w) for w in packed)

    out = jax.block_until_ready(lstm_autoencoder_forward(packed, x))
    assert out.shape == (B, T, F), out.shape

    ref = jax.block_until_ready(_autoencoder_ref(params, x))
    assert jnp.allclose(out, ref, atol=1e-5, rtol=1e-5), float(jnp.max(jnp.abs(out - ref)))

    print("KERNEL_OK")
</pallas_src>

<mosaic_0001>
module attributes {stable_mosaic.version = 11 : i64} {
  func.func @_fused_lstm_ae_kernel(%arg0: memref<8x8x128xf32, #tpu.memory_space<vmem>>, %arg1: memref<128x512xf32, #tpu.memory_space<vmem>>, %arg2: memref<128x512xf32, #tpu.memory_space<vmem>>, %arg3: memref<8x512xf32, #tpu.memory_space<vmem>>, %arg4: memref<128x512xf32, #tpu.memory_space<vmem>>, %arg5: memref<128x512xf32, #tpu.memory_space<vmem>>, %arg6: memref<8x512xf32, #tpu.memory_space<vmem>>, %arg7: memref<128x512xf32, #tpu.memory_space<vmem>>, %arg8: memref<128x512xf32, #tpu.memory_space<vmem>>, %arg9: memref<8x512xf32, #tpu.memory_space<vmem>>, %arg10: memref<128x512xf32, #tpu.memory_space<vmem>>, %arg11: memref<128x512xf32, #tpu.memory_space<vmem>>, %arg12: memref<8x512xf32, #tpu.memory_space<vmem>>, %arg13: memref<8x8x128xf32, #tpu.memory_space<vmem>>, %arg14: memref<8x8x128xf32, #tpu.memory_space<vmem>>, %arg15: memref<8x8x128xf32, #tpu.memory_space<vmem>>, %arg16: memref<8x8x512xf32, #tpu.memory_space<vmem>>) attributes {dimension_semantics = [], scalar_prefetch = 0 : i64, scratch_operands = 3 : i64, tpu.core_type = #tpu.core_type<tc>} {
    %c0 = arith.constant 0 : index
    %c0_0 = arith.constant 0 : index
    %c0_1 = arith.constant 0 : index
    %0 = vector.load %arg0[%c0, %c0_0, %c0_1] : memref<8x8x128xf32, #tpu.memory_space<vmem>>, vector<8x8x128xf32>
    %1 = vector.shape_cast %0 : vector<8x8x128xf32> to vector<64x128xf32>
    %c0_2 = arith.constant 0 : index
    %c0_3 = arith.constant 0 : index
    %2 = vector.load %arg1[%c0_2, %c0_3] : memref<128x512xf32, #tpu.memory_space<vmem>>, vector<128x512xf32>
    %cst = arith.constant dense<0.000000e+00> : vector<64x512xf32>
    %3 = tpu.matmul %1, %2, %cst {dimension_numbers = #tpu.dot_dimension_numbers<[1], [0], [0], [1], [0, 0, 1, 1], [], []>} : vector<64x128xf32>, vector<128x512xf32>, vector<64x512xf32> -> vector<64x512xf32>
    %4 = vector.shape_cast %3 : vector<64x512xf32> to vector<8x8x512xf32>
    %c0_4 = arith.constant 0 : index
    %c0_5 = arith.constant 0 : index
    %5 = vector.load %arg3[%c0_4, %c0_5] : memref<8x512xf32, #tpu.memory_space<vmem>>, vector<8x512xf32>
    %6 = vector.shape_cast %5 : vector<8x512xf32> to vector<1x8x512xf32>
    %7 = vector.broadcast %6 : vector<1x8x512xf32> to vector<8x8x512xf32>
    %8 = arith.addf %4, %7 : vector<8x8x512xf32>
    %c0_6 = arith.constant 0 : index
    %c0_7 = arith.constant 0 : index
    %c0_8 = arith.constant 0 : index
    %9 = vector.load %arg16[%c0_6, %c0_7, %c0_8] : memref<8x8x512xf32, #tpu.memory_space<vmem>>, vector<8x8x512xf32>
    tpu.vector_store %arg16[%c0_6, %c0_7, %c0_8], %8 {strides = array<i32>} : memref<8x8x512xf32, #tpu.memory_space<vmem>>, vector<8x8x512xf32>,
    %c0_9 = arith.constant 0 : index
    %c0_10 = arith.constant 0 : index
    %10 = vector.load %arg2[%c0_9, %c0_10] : memref<128x512xf32, #tpu.memory_space<vmem>>, vector<128x512xf32>
    %cst_11 = arith.constant 0.000000e+00 : f32
    %11 = vector.broadcast %cst_11 : f32 to vector<8x128xf32>
    %c0_i32 = arith.constant 0 : i32
    %12 = arith.index_cast %c0_i32 : i32 to index
    %c0_12 = arith.constant 0 : index
    %c0_13 = arith.constant 0 : index
    %13 = vector.load %arg16[%12, %c0_12, %c0_13] : memref<8x8x512xf32, #tpu.memory_space<vmem>>, vector<1x8x512xf32>
    %14 = vector.shape_cast %13 : vector<1x8x512xf32> to vector<8x512xf32>
    %cst_14 = arith.constant dense<0.000000e+00> : vector<8x512xf32>
    %15 = tpu.matmul %11, %10, %cst_14 {dimension_numbers = #tpu.dot_dimension_numbers<[1], [0], [0], [1], [0, 0, 1, 1], [], []>} : vector<8x128xf32>, vector<128x512xf32>, vector<8x512xf32> -> vector<8x512xf32>
    %16 = arith.addf %14, %15 : vector<8x512xf32>
    %17 = vector.extract_strided_slice %16 {offsets = [0, 0], sizes = [8, 384], strides = [1, 1]} : vector<8x512xf32> to vector<8x384xf32>
    %18 = arith.negf %17 : vector<8x384xf32>
    %19 = math.exp %18 : vector<8x384xf32>
    %cst_15 = arith.constant 1.000000e+00 : f32
    %20 = vector.broadcast %cst_15 : f32 to vector<8x384xf32>
    %21 = arith.addf %20, %19 : vector<8x384xf32>
    %22 = arith.divf %20, %21 : vector<8x384xf32>
    %23 = vector.extract_strided_slice %22 {offsets = [0, 0], sizes = [8, 128], strides = [1, 1]} : vector<8x384xf32> to vector<8x128xf32>
    %24 = vector.extract_strided_slice %22 {offsets = [0, 128], sizes = [8, 128], strides = [1, 1]} : vector<8x384xf32> to vector<8x128xf32>
    %25 = vector.extract_strided_slice %22 {offsets = [0, 256], sizes = [8, 128], strides = [1, 1]} : vector<8x384xf32> to vector<8x128xf32>
    %26 = vector.extract_strided_slice %16 {offsets = [0, 384], sizes = [8, 128], strides = [1, 1]} : vector<8x512xf32> to vector<8x128xf32>
    %27 = math.tanh %26 : vector<8x128xf32>
    %28 = arith.mulf %24, %11 : vector<8x128xf32>
    %29 = arith.mulf %23, %27 : vector<8x128xf32>
    %30 = arith.addf %28, %29 : vector<8x128xf32>
    %31 = math.tanh %30 : vector<8x128xf32>
    %32 = arith.mulf %25, %31 : vector<8x128xf32>
    %33 = arith.index_cast %c0_i32 : i32 to index
    %c0_16 = arith.constant 0 : index
    %c0_17 = arith.constant 0 : index
    %34 = vector.load %arg14[%33, %c0_16, %c0_17] : memref<8x8x128xf32, #tpu.memory_space<vmem>>, vector<1x8x128xf32>
    %35 = vector.shape_cast %34 : vector<1x8x128xf32> to vector<8x128xf32>
    %36 = vector.shape_cast %32 : vector<8x128xf32> to vector<1x8x128xf32>
    tpu.vector_store %arg14[%33, %c0_16, %c0_17], %36 {strides = array<i32>} : memref<8x8x128xf32, #tpu.memory_space<vmem>>, vector<1x8x128xf32>,
    %c1_i32 = arith.constant 1 : i32
    %37 = arith.index_cast %c1_i32 : i32 to index
    %c0_18 = arith.constant 0 : index
    %c0_19 = arith.constant 0 : index
    %38 = vector.load %arg16[%37, %c0_18, %c0_19] : memref<8x8x512xf32, #tpu.memory_space<vmem>>, vector<1x8x512xf32>
    %39 = vector.shape_cast %38 : vector<1x8x512xf32> to vector<8x512xf32>
    %cst_20 = arith.constant dense<0.000000e+00> : vector<8x512xf32>
    %40 = tpu.matmul %32, %10, %cst_20 {dimension_numbers = #tpu.dot_dimension_numbers<[1], [0], [0], [1], [0, 0, 1, 1], [], []>} : vector<8x128xf32>, vector<128x512xf32>, vector<8x512xf32> -> vector<8x512xf32>
    %41 = arith.addf %39, %40 : vector<8x512xf32>
    %42 = vector.extract_strided_slice %41 {offsets = [0, 0], sizes = [8, 384], strides = [1, 1]} : vector<8x512xf32> to vector<8x384xf32>
    %43 = arith.negf %42 : vector<8x384xf32>
    %44 = math.exp %43 : vector<8x384xf32>
    %cst_21 = arith.constant 1.000000e+00 : f32
    %45 = vector.broadcast %cst_21 : f32 to vector<8x384xf32>
    %46 = arith.addf %45, %44 : vector<8x384xf32>
    %47 = arith.divf %45, %46 : vector<8x384xf32>
    %48 = vector.extract_strided_slice %47 {offsets = [0, 0], sizes = [8, 128], strides = [1, 1]} : vector<8x384xf32> to vector<8x128xf32>
    %49 = vector.extract_strided_slice %47 {offsets = [0, 128], sizes = [8, 128], strides = [1, 1]} : vector<8x384xf32> to vector<8x128xf32>
    %50 = vector.extract_strided_slice %47 {offsets = [0, 256], sizes = [8, 128], strides = [1, 1]} : vector<8x384xf32> to vector<8x128xf32>
    %51 = vector.extract_strided_slice %41 {offsets = [0, 384], sizes = [8, 128], strides = [1, 1]} : vector<8x512xf32> to vector<8x128xf32>
    %52 = math.tanh %51 : vector<8x128xf32>
    %53 = arith.mulf %49, %30 : vector<8x128xf32>
    %54 = arith.mulf %48, %52 : vector<8x128xf32>
    %55 = arith.addf %53, %54 : vector<8x128xf32>
    %56 = math.tanh %55 : vector<8x128xf32>
    %57 = arith.mulf %50, %56 : vector<8x128xf32>
    %58 = arith.index_cast %c1_i32 : i32 to index
    %c0_22 = arith.constant 0 : index
    %c0_23 = arith.constant 0 : index
    %59 = vector.load %arg14[%58, %c0_22, %c0_23] : memref<8x8x128xf32, #tpu.memory_space<vmem>>, vector<1x8x128xf32>
    %60 = vector.shape_cast %59 : vector<1x8x128xf32> to vector<8x128xf32>
    %61 = vector.shape_cast %57 : vector<8x128xf32> to vector<1x8x128xf32>
    tpu.vector_store %arg14[%58, %c0_22, %c0_23], %61 {strides = array<i32>} : memref<8x8x128xf32, #tpu.memory_space<vmem>>, vector<1x8x128xf32>,
    %c2_i32 = arith.constant 2 : i32
    %62 = arith.index_cast %c2_i32 : i32 to index
    %c0_24 = arith.constant 0 : index
    %c0_25 = arith.constant 0 : index
    %63 = vector.load %arg16[%62, %c0_24, %c0_25] : memref<8x8x512xf32, #tpu.memory_space<vmem>>, vector<1x8x512xf32>
    %64 = vector.shape_cast %63 : vector<1x8x512xf32> to vector<8x512xf32>
    %cst_26 = arith.constant dense<0.000000e+00> : vector<8x512xf32>
    %65 = tpu.matmul %57, %10, %cst_26 {dimension_numbers = #tpu.dot_dimension_numbers<[1], [0], [0], [1], [0, 0, 1, 1], [], []>} : vector<8x128xf32>, vector<128x512xf32>, vector<8x512xf32> -> vector<8x512xf32>
    %66 = arith.addf %64, %65 : vector<8x512xf32>
    %67 = vector.extract_strided_slice %66 {offsets = [0, 0], sizes = [8, 384], strides = [1, 1]} : vector<8x512xf32> to vector<8x384xf32>
    %68 = arith.negf %67 : vector<8x384xf32>
    %69 = math.exp %68 : vector<8x384xf32>
    %cst_27 = arith.constant 1.000000e+00 : f32
    %70 = vector.broadcast %cst_27 : f32 to vector<8x384xf32>
    %71 = arith.addf %70, %69 : vector<8x384xf32>
    %72 = arith.divf %70, %71 : vector<8x384xf32>
    %73 = vector.extract_strided_slice %72 {offsets = [0, 0], sizes = [8, 128], strides = [1, 1]} : vector<8x384xf32> to vector<8x128xf32>
    %74 = vector.extract_strided_slice %72 {offsets = [0, 128], sizes = [8, 128], strides = [1, 1]} : vector<8x384xf32> to vector<8x128xf32>
    %75 = vector.extract_strided_slice %72 {offsets = [0, 256], sizes = [8, 128], strides = [1, 1]} : vector<8x384xf32> to vector<8x128xf32>
    %76 = vector.extract_strided_slice %66 {offsets = [0, 384], sizes = [8, 128], strides = [1, 1]} : vector<8x512xf32> to vector<8x128xf32>
    %77 = math.tanh %76 : vector<8x128xf32>
    %78 = arith.mulf %74, %55 : vector<8x128xf32>
    %79 = arith.mulf %73, %77 : vector<8x128xf32>
    %80 = arith.addf %78, %79 : vector<8x128xf32>
    %81 = math.tanh %80 : vector<8x128xf32>
    %82 = arith.mulf %75, %81 : vector<8x128xf32>
    %83 = arith.index_cast %c2_i32 : i32 to index
    %c0_28 = arith.constant 0 : index
    %c0_29 = arith.constant 0 : index
    %84 = vector.load %arg14[%83, %c0_28, %c0_29] : memref<8x8x128xf32, #tpu.memory_space<vmem>>, vector<1x8x128xf32>
    %85 = vector.shape_cast %84 : vector<1x8x128xf32> to vector<8x128xf32>
    %86 = vector.shape_cast %82 : vector<8x128xf32> to vector<1x8x128xf32>
    tpu.vector_store %arg14[%83, %c0_28, %c0_29], %86 {strides = array<i32>} : memref<8x8x128xf32, #tpu.memory_space<vmem>>, vector<1x8x128xf32>,
    %c3_i32 = arith.constant 3 : i32
    %87 = arith.index_cast %c3_i32 : i32 to index
    %c0_30 = arith.constant 0 : index
    %c0_31 = arith.constant 0 : index
    %88 = vector.load %arg16[%87, %c0_30, %c0_31] : memref<8x8x512xf32, #tpu.memory_space<vmem>>, vector<1x8x512xf32>
    %89 = vector.shape_cast %88 : vector<1x8x512xf32> to vector<8x512xf32>
    %cst_32 = arith.constant dense<0.000000e+00> : vector<8x512xf32>
    %90 = tpu.matmul %82, %10, %cst_32 {dimension_numbers = #tpu.dot_dimension_numbers<[1], [0], [0], [1], [0, 0, 1, 1], [], []>} : vector<8x128xf32>, vector<128x512xf32>, vector<8x512xf32> -> vector<8x512xf32>
    %91 = arith.addf %89, %90 : vector<8x512xf32>
    %92 = vector.extract_strided_slice %91 {offsets = [0, 0], sizes = [8, 384], strides = [1, 1]} : vector<8x512xf32> to vector<8x384xf32>
    %93 = arith.negf %92 : vector<8x384xf32>
    %94 = math.exp %93 : vector<8x384xf32>
    %cst_33 = arith.constant 1.000000e+00 : f32
    %95 = vector.broadcast %cst_33 : f32 to vector<8x384xf32>
    %96 = arith.addf %95, %94 : vector<8x384xf32>
    %97 = arith.divf %95, %96 : vector<8x384xf32>
    %98 = vector.extract_strided_slice %97 {offsets = [0, 0], sizes = [8, 128], strides = [1, 1]} : vector<8x384xf32> to vector<8x128xf32>
    %99 = vector.extract_strided_slice %97 {offsets = [0, 128], sizes = [8, 128], strides = [1, 1]} : vector<8x384xf32> to vector<8x128xf32>
    %100 = vector.extract_strided_slice %97 {offsets = [0, 256], sizes = [8, 128], strides = [1, 1]} : vector<8x384xf32> to vector<8x128xf32>
    %101 = vector.extract_strided_slice %91 {offsets = [0, 384], sizes = [8, 128], strides = [1, 1]} : vector<8x512xf32> to vector<8x128xf32>
    %102 = math.tanh %101 : vector<8x128xf32>
    %103 = arith.mulf %99, %80 : vector<8x128xf32>
    %104 = arith.mulf %98, %102 : vector<8x128xf32>
    %105 = arith.addf %103, %104 : vector<8x128xf32>
    %106 = math.tanh %105 : vector<8x128xf32>
    %107 = arith.mulf %100, %106 : vector<8x128xf32>
    %108 = arith.index_cast %c3_i32 : i32 to index
    %c0_34 = arith.constant 0 : index
    %c0_35 = arith.constant 0 : index
    %109 = vector.load %arg14[%108, %c0_34, %c0_35] : memref<8x8x128xf32, #tpu.memory_space<vmem>>, vector<1x8x128xf32>
    %110 = vector.shape_cast %109 : vector<1x8x128xf32> to vector<8x128xf32>
    %111 = vector.shape_cast %107 : vector<8x128xf32> to vector<1x8x128xf32>
    tpu.vector_store %arg14[%108, %c0_34, %c0_35], %111 {strides = array<i32>} : memref<8x8x128xf32, #tpu.memory_space<vmem>>, vector<1x8x128xf32>,
    %c4_i32 = arith.constant 4 : i32
    %112 = arith.index_cast %c4_i32 : i32 to index
    %c0_36 = arith.constant 0 : index
    %c0_37 = arith.constant 0 : index
    %113 = vector.load %arg16[%112, %c0_36, %c0_37] : memref<8x8x512xf32, #tpu.memory_space<vmem>>, vector<1x8x512xf32>
    %114 = vector.shape_cast %113 : vector<1x8x512xf32> to vector<8x512xf32>
    %cst_38 = arith.constant dense<0.000000e+00> : vector<8x512xf32>
    %115 = tpu.matmul %107, %10, %cst_38 {dimension_numbers = #tpu.dot_dimension_numbers<[1], [0], [0], [1], [0, 0, 1, 1], [], []>} : vector<8x128xf32>, vector<128x512xf32>, vector<8x512xf32> -> vector<8x512xf32>
    %116 = arith.addf %114, %115 : vector<8x512xf32>
    %117 = vector.extract_strided_slice %116 {offsets = [0, 0], sizes = [8, 384], strides = [1, 1]} : vector<8x512xf32> to vector<8x384xf32>
    %118 = arith.negf %117 : vector<8x384xf32>
    %119 = math.exp %118 : vector<8x384xf32>
    %cst_39 = arith.constant 1.000000e+00 : f32
    %120 = vector.broadcast %cst_39 : f32 to vector<8x384xf32>
    %121 = arith.addf %120, %119 : vector<8x384xf32>
    %122 = arith.divf %120, %121 : vector<8x384xf32>
    %123 = vector.extract_strided_slice %122 {offsets = [0, 0], sizes = [8, 128], strides = [1, 1]} : vector<8x384xf32> to vector<8x128xf32>
    %124 = vector.extract_strided_slice %122 {offsets = [0, 128], sizes = [8, 128], strides = [1, 1]} : vector<8x384xf32> to vector<8x128xf32>
    %125 = vector.extract_strided_slice %122 {offsets = [0, 256], sizes = [8, 128], strides = [1, 1]} : vector<8x384xf32> to vector<8x128xf32>
    %126 = vector.extract_strided_slice %116 {offsets = [0, 384], sizes = [8, 128], strides = [1, 1]} : vector<8x512xf32> to vector<8x128xf32>
    %127 = math.tanh %126 : vector<8x128xf32>
    %128 = arith.mulf %124, %105 : vector<8x128xf32>
    %129 = arith.mulf %123, %127 : vector<8x128xf32>
    %130 = arith.addf %128, %129 : vector<8x128xf32>
    %131 = math.tanh %130 : vector<8x128xf32>
    %132 = arith.mulf %125, %131 : vector<8x128xf32>
    %133 = arith.index_cast %c4_i32 : i32 to index
    %c0_40 = arith.constant 0 : index
    %c0_41 = arith.constant 0 : index
    %134 = vector.load %arg14[%133, %c0_40, %c0_41] : memref<8x8x128xf32, #tpu.memory_space<vmem>>, vector<1x8x128xf32>
    %135 = vector.shape_cast %134 : vector<1x8x128xf32> to vector<8x128xf32>
    %136 = vector.shape_cast %132 : vector<8x128xf32> to vector<1x8x128xf32>
    tpu.vector_store %arg14[%133, %c0_40, %c0_41], %136 {strides = array<i32>} : memref<8x8x128xf32, #tpu.memory_space<vmem>>, vector<1x8x128xf32>,
    %c5_i32 = arith.constant 5 : i32
    %137 = arith.index_cast %c5_i32 : i32 to index
    %c0_42 = arith.constant 0 : index
    %c0_43 = arith.constant 0 : index
    %138 = vector.load %arg16[%137, %c0_42, %c0_43] : memref<8x8x512xf32, #tpu.memory_space<vmem>>, vector<1x8x512xf32>
    %139 = vector.shape_cast %138 : vector<1x8x512xf32> to vector<8x512xf32>
    %cst_44 = arith.constant dense<0.000000e+00> : vector<8x512xf32>
    %140 = tpu.matmul %132, %10, %cst_44 {dimension_numbers = #tpu.dot_dimension_numbers<[1], [0], [0], [1], [0, 0, 1, 1], [], []>} : vector<8x128xf32>, vector<128x512xf32>, vector<8x512xf32> -> vector<8x512xf32>
    %141 = arith.addf %139, %140 : vector<8x512xf32>
    %142 = vector.extract_strided_slice %141 {offsets = [0, 0], sizes = [8, 384], strides = [1, 1]} : vector<8x512xf32> to vector<8x384xf32>
    %143 = arith.negf %142 : vector<8x384xf32>
    %144 = math.exp %143 : vector<8x384xf32>
    %cst_45 = arith.constant 1.000000e+00 : f32
    %145 = vector.broadcast %cst_45 : f32 to vector<8x384xf32>
    %146 = arith.addf %145, %144 : vector<8x384xf32>
    %147 = arith.divf %145, %146 : vector<8x384xf32>
    %148 = vector.extract_strided_slice %147 {offsets = [0, 0], sizes = [8, 128], strides = [1, 1]} : vector<8x384xf32> to vector<8x128xf32>
    %149 = vector.extract_strided_slice %147 {offsets = [0, 128], sizes = [8, 128], strides = [1, 1]} : vector<8x384xf32> to vector<8x128xf32>
    %150 = vector.extract_strided_slice %147 {offsets = [0, 256], sizes = [8, 128], strides = [1, 1]} : vector<8x384xf32> to vector<8x128xf32>
    %151 = vector.extract_strided_slice %141 {offsets = [0, 384], sizes = [8, 128], strides = [1, 1]} : vector<8x512xf32> to vector<8x128xf32>
    %152 = math.tanh %151 : vector<8x128xf32>
    %153 = arith.mulf %149, %130 : vector<8x128xf32>
    %154 = arith.mulf %148, %152 : vector<8x128xf32>
    %155 = arith.addf %153, %154 : vector<8x128xf32>
    %156 = math.tanh %155 : vector<8x128xf32>
    %157 = arith.mulf %150, %156 : vector<8x128xf32>
    %158 = arith.index_cast %c5_i32 : i32 to index
    %c0_46 = arith.constant 0 : index
    %c0_47 = arith.constant 0 : index
    %159 = vector.load %arg14[%158, %c0_46, %c0_47] : memref<8x8x128xf32, #tpu.memory_space<vmem>>, vector<1x8x128xf32>
    %160 = vector.shape_cast %159 : vector<1x8x128xf32> to vector<8x128xf32>
    %161 = vector.shape_cast %157 : vector<8x128xf32> to vector<1x8x128xf32>
    tpu.vector_store %arg14[%158, %c0_46, %c0_47], %161 {strides = array<i32>} : memref<8x8x128xf32, #tpu.memory_space<vmem>>, vector<1x8x128xf32>,
    %c6_i32 = arith.constant 6 : i32
    %162 = arith.index_cast %c6_i32 : i32 to index
    %c0_48 = arith.constant 0 : index
    %c0_49 = arith.constant 0 : index
    %163 = vector.load %arg16[%162, %c0_48, %c0_49] : memref<8x8x512xf32, #tpu.memory_space<vmem>>, vector<1x8x512xf32>
    %164 = vector.shape_cast %163 : vector<1x8x512xf32> to vector<8x512xf32>
    %cst_50 = arith.constant dense<0.000000e+00> : vector<8x512xf32>
    %165 = tpu.matmul %157, %10, %cst_50 {dimension_numbers = #tpu.dot_dimension_numbers<[1], [0], [0], [1], [0, 0, 1, 1], [], []>} : vector<8x128xf32>, vector<128x512xf32>, vector<8x512xf32> -> vector<8x512xf32>
    %166 = arith.addf %164, %165 : vector<8x512xf32>
    %167 = vector.extract_strided_slice %166 {offsets = [0, 0], sizes = [8, 384], strides = [1, 1]} : vector<8x512xf32> to vector<8x384xf32>
    %168 = arith.negf %167 : vector<8x384xf32>
    %169 = math.exp %168 : vector<8x384xf32>
    %cst_51 = arith.constant 1.000000e+00 : f32
    %170 = vector.broadcast %cst_51 : f32 to vector<8x384xf32>
    %171 = arith.addf %170, %169 : vector<8x384xf32>
    %172 = arith.divf %170, %171 : vector<8x384xf32>
    %173 = vector.extract_strided_slice %172 {offsets = [0, 0], sizes = [8, 128], strides = [1, 1]} : vector<8x384xf32> to vector<8x128xf32>
    %174 = vector.extract_strided_slice %172 {offsets = [0, 128], sizes = [8, 128], strides = [1, 1]} : vector<8x384xf32> to vector<8x128xf32>
    %175 = vector.extract_strided_slice %172 {offsets = [0, 256], sizes = [8, 128], strides = [1, 1]} : vector<8x384xf32> to vector<8x128xf32>
    %176 = vector.extract_strided_slice %166 {offsets = [0, 384], sizes = [8, 128], strides = [1, 1]} : vector<8x512xf32> to vector<8x128xf32>
    %177 = math.tanh %176 : vector<8x128xf32>
    %178 = arith.mulf %174, %155 : vector<8x128xf32>
    %179 = arith.mulf %173, %177 : vector<8x128xf32>
    %180 = arith.addf %178, %179 : vector<8x128xf32>
    %181 = math.tanh %180 : vector<8x128xf32>
    %182 = arith.mulf %175, %181 : vector<8x128xf32>
    %183 = arith.index_cast %c6_i32 : i32 to index
    %c0_52 = arith.constant 0 : index
    %c0_53 = arith.constant 0 : index
    %184 = vector.load %arg14[%183, %c0_52, %c0_53] : memref<8x8x128xf32, #tpu.memory_space<vmem>>, vector<1x8x128xf32>
    %185 = vector.shape_cast %184 : vector<1x8x128xf32> to vector<8x128xf32>
    %186 = vector.shape_cast %182 : vector<8x128xf32> to vector<1x8x128xf32>
    tpu.vector_store %arg14[%183, %c0_52, %c0_53], %186 {strides = array<i32>} : memref<8x8x128xf32, #tpu.memory_space<vmem>>, vector<1x8x128xf32>,
    %c7_i32 = arith.constant 7 : i32
    %187 = arith.index_cast %c7_i32 : i32 to index
    %c0_54 = arith.constant 0 : index
    %c0_55 = arith.constant 0 : index
    %188 = vector.load %arg16[%187, %c0_54, %c0_55] : memref<8x8x512xf32, #tpu.memory_space<vmem>>, vector<1x8x512xf32>
    %189 = vector.shape_cast %188 : vector<1x8x512xf32> to vector<8x512xf32>
    %cst_56 = arith.constant dense<0.000000e+00> : vector<8x512xf32>
    %190 = tpu.matmul %182, %10, %cst_56 {dimension_numbers = #tpu.dot_dimension_numbers<[1], [0], [0], [1], [0, 0, 1, 1], [], []>} : vector<8x128xf32>, vector<128x512xf32>, vector<8x512xf32> -> vector<8x512xf32>
    %191 = arith.addf %189, %190 : vector<8x512xf32>
    %192 = vector.extract_strided_slice %191 {offsets = [0, 0], sizes = [8, 384], strides = [1, 1]} : vector<8x512xf32> to vector<8x384xf32>
    %193 = arith.negf %192 : vector<8x384xf32>
    %194 = math.exp %193 : vector<8x384xf32>
    %cst_57 = arith.constant 1.000000e+00 : f32
    %195 = vector.broadcast %cst_57 : f32 to vector<8x384xf32>
    %196 = arith.addf %195, %194 : vector<8x384xf32>
    %197 = arith.divf %195, %196 : vector<8x384xf32>
    %198 = vector.extract_strided_slice %197 {offsets = [0, 0], sizes = [8, 128], strides = [1, 1]} : vector<8x384xf32> to vector<8x128xf32>
    %199 = vector.extract_strided_slice %197 {offsets = [0, 128], sizes = [8, 128], strides = [1, 1]} : vector<8x384xf32> to vector<8x128xf32>
    %200 = vector.extract_strided_slice %197 {offsets = [0, 256], sizes = [8, 128], strides = [1, 1]} : vector<8x384xf32> to vector<8x128xf32>
    %201 = vector.extract_strided_slice %191 {offsets = [0, 384], sizes = [8, 128], strides = [1, 1]} : vector<8x512xf32> to vector<8x128xf32>
    %202 = math.tanh %201 : vector<8x128xf32>
    %203 = arith.mulf %199, %180 : vector<8x128xf32>
    %204 = arith.mulf %198, %202 : vector<8x128xf32>
    %205 = arith.addf %203, %204 : vector<8x128xf32>
    %206 = math.tanh %205 : vector<8x128xf32>
    %207 = arith.mulf %200, %206 : vector<8x128xf32>
    %208 = arith.index_cast %c7_i32 : i32 to index
    %c0_58 = arith.constant 0 : index
    %c0_59 = arith.constant 0 : index
    %209 = vector.load %arg14[%208, %c0_58, %c0_59] : memref<8x8x128xf32, #tpu.memory_space<vmem>>, vector<1x8x128xf32>
    %210 = vector.shape_cast %209 : vector<1x8x128xf32> to vector<8x128xf32>
    %211 = vector.shape_cast %207 : vector<8x128xf32> to vector<1x8x128xf32>
    tpu.vector_store %arg14[%208, %c0_58, %c0_59], %211 {strides = array<i32>} : memref<8x8x128xf32, #tpu.memory_space<vmem>>, vector<1x8x128xf32>,
    %c8_i32 = arith.constant 8 : i32
    %c0_60 = arith.constant 0 : index
    %c0_61 = arith.constant 0 : index
    %c0_62 = arith.constant 0 : index
    %212 = vector.load %arg14[%c0_60, %c0_61, %c0_62] : memref<8x8x128xf32, #tpu.memory_space<vmem>>, vector<8x8x128xf32>
    %213 = vector.shape_cast %212 : vector<8x8x128xf32> to vector<64x128xf32>
    %c0_63 = arith.constant 0 : index
    %c0_64 = arith.constant 0 : index
    %214 = vector.load %arg4[%c0_63, %c0_64] : memref<128x512xf32, #tpu.memory_space<vmem>>, vector<128x512xf32>
    %cst_65 = arith.constant dense<0.000000e+00> : vector<64x512xf32>
    %215 = tpu.matmul %213, %214, %cst_65 {dimension_numbers = #tpu.dot_dimension_numbers<[1], [0], [0], [1], [0, 0, 1, 1], [], []>} : vector<64x128xf32>, vector<128x512xf32>, vector<64x512xf32> -> vector<64x512xf32>
    %216 = vector.shape_cast %215 : vector<64x512xf32> to vector<8x8x512xf32>
    %c0_66 = arith.constant 0 : index
    %c0_67 = arith.constant 0 : index
    %217 = vector.load %arg6[%c0_66, %c0_67] : memref<8x512xf32, #tpu.memory_space<vmem>>, vector<8x512xf32>
    %218 = vector.shape_cast %217 : vector<8x512xf32> to vector<1x8x512xf32>
    %219 = vector.broadcast %218 : vector<1x8x512xf32> to vector<8x8x512xf32>
    %220 = arith.addf %216, %219 : vector<8x8x512xf32>
    %c0_68 = arith.constant 0 : index
    %c0_69 = arith.constant 0 : index
    %c0_70 = arith.constant 0 : index
    %221 = vector.load %arg16[%c0_68, %c0_69, %c0_70] : memref<8x8x512xf32, #tpu.memory_space<vmem>>, vector<8x8x512xf32>
    tpu.vector_store %arg16[%c0_68, %c0_69, %c0_70], %220 {strides = array<i32>} : memref<8x8x512xf32, #tpu.memory_space<vmem>>, vector<8x8x512xf32>,
    %c0_71 = arith.constant 0 : index
    %c0_72 = arith.constant 0 : index
    %222 = vector.load %arg5[%c0_71, %c0_72] : memref<128x512xf32, #tpu.memory_space<vmem>>, vector<128x512xf32>
    %cst_73 = arith.constant 0.000000e+00 : f32
    %223 = vector.broadcast %cst_73 : f32 to vector<8x128xf32>
    %c0_i32_74 = arith.constant 0 : i32
    %224 = arith.index_cast %c0_i32_74 : i32 to index
    %c0_75 = arith.constant 0 : index
    %c0_76 = arith.constant 0 : index
    %225 = vector.load %arg16[%224, %c0_75, %c0_76] : memref<8x8x512xf32, #tpu.memory_space<vmem>>, vector<1x8x512xf32>
    %226 = vector.shape_cast %225 : vector<1x8x512xf32> to vector<8x512xf32>
    %cst_77 = arith.constant dense<0.000000e+00> : vector<8x512xf32>
    %227 = tpu.matmul %223, %222, %cst_77 {dimension_numbers = #tpu.dot_dimension_numbers<[1], [0], [0], [1], [0, 0, 1, 1], [], []>} : vector<8x128xf32>, vector<128x512xf32>, vector<8x512xf32> -> vector<8x512xf32>
    %228 = arith.addf %226, %227 : vector<8x512xf32>
    %229 = vector.extract_strided_slice %228 {offsets = [0, 0], sizes = [8, 384], strides = [1, 1]} : vector<8x512xf32> to vector<8x384xf32>
    %230 = arith.negf %229 : vector<8x384xf32>
    %231 = math.exp %230 : vector<8x384xf32>
    %cst_78 = arith.constant 1.000000e+00 : f32
    %232 = vector.broadcast %cst_78 : f32 to vector<8x384xf32>
    %233 = arith.addf %232, %231 : vector<8x384xf32>
    %234 = arith.divf %232, %233 : vector<8x384xf32>
    %235 = vector.extract_strided_slice %234 {offsets = [0, 0], sizes = [8, 128], strides = [1, 1]} : vector<8x384xf32> to vector<8x128xf32>
    %236 = vector.extract_strided_slice %234 {offsets = [0, 128], sizes = [8, 128], strides = [1, 1]} : vector<8x384xf32> to vector<8x128xf32>
    %237 = vector.extract_strided_slice %234 {offsets = [0, 256], sizes = [8, 128], strides = [1, 1]} : vector<8x384xf32> to vector<8x128xf32>
    %238 = vector.extract_strided_slice %228 {offsets = [0, 384], sizes = [8, 128], strides = [1, 1]} : vector<8x512xf32> to vector<8x128xf32>
    %239 = math.tanh %238 : vector<8x128xf32>
    %240 = arith.mulf %236, %223 : vector<8x128xf32>
    %241 = arith.mulf %235, %239 : vector<8x128xf32>
    %242 = arith.addf %240, %241 : vector<8x128xf32>
    %243 = math.tanh %242 : vector<8x128xf32>
    %244 = arith.mulf %237, %243 : vector<8x128xf32>
    %245 = arith.index_cast %c0_i32_74 : i32 to index
    %c0_79 = arith.constant 0 : index
    %c0_80 = arith.constant 0 : index
    %246 = vector.load %arg15[%245, %c0_79, %c0_80] : memref<8x8x128xf32, #tpu.memory_space<vmem>>, vector<1x8x128xf32>
    %247 = vector.shape_cast %246 : vector<1x8x128xf32> to vector<8x128xf32>
    %248 = vector.shape_cast %244 : vector<8x128xf32> to vector<1x8x128xf32>
    tpu.vector_store %arg15[%245, %c0_79, %c0_80], %248 {strides = array<i32>} : memref<8x8x128xf32, #tpu.memory_space<vmem>>, vector<1x8x128xf32>,
    %c1_i32_81 = arith.constant 1 : i32
    %249 = arith.index_cast %c1_i32_81 : i32 to index
    %c0_82 = arith.constant 0 : index
    %c0_83 = arith.constant 0 : index
    %250 = vector.load %arg16[%249, %c0_82, %c0_83] : memref<8x8x512xf32, #tpu.memory_space<vmem>>, vector<1x8x512xf32>
    %251 = vector.shape_cast %250 : vector<1x8x512xf32> to vector<8x512xf32>
    %cst_84 = arith.constant dense<0.000000e+00> : vector<8x512xf32>
    %252 = tpu.matmul %244, %222, %cst_84 {dimension_numbers = #tpu.dot_dimension_numbers<[1], [0], [0], [1], [0, 0, 1, 1], [], []>} : vector<8x128xf32>, vector<128x512xf32>, vector<8x512xf32> -> vector<8x512xf32>
    %253 = arith.addf %251, %252 : vector<8x512xf32>
    %254 = vector.extract_strided_slice %253 {offsets = [0, 0], sizes = [8, 384], strides = [1, 1]} : vector<8x512xf32> to vector<8x384xf32>
    %255 = arith.negf %254 : vector<8x384xf32>
    %256 = math.exp %255 : vector<8x384xf32>
    %cst_85 = arith.constant 1.000000e+00 : f32
    %257 = vector.broadcast %cst_85 : f32 to vector<8x384xf32>
    %258 = arith.addf %257, %256 : vector<8x384xf32>
    %259 = arith.divf %257, %258 : vector<8x384xf32>
    %260 = vector.extract_strided_slice %259 {offsets = [0, 0], sizes = [8, 128], strides = [1, 1]} : vector<8x384xf32> to vector<8x128xf32>
    %261 = vector.extract_strided_slice %259 {offsets = [0, 128], sizes = [8, 128], strides = [1, 1]} : vector<8x384xf32> to vector<8x128xf32>
    %262 = vector.extract_strided_slice %259 {offsets = [0, 256], sizes = [8, 128], strides = [1, 1]} : vector<8x384xf32> to vector<8x128xf32>
    %263 = vector.extract_strided_slice %253 {offsets = [0, 384], sizes = [8, 128], strides = [1, 1]} : vector<8x512xf32> to vector<8x128xf32>
    %264 = math.tanh %263 : vector<8x128xf32>
    %265 = arith.mulf %261, %242 : vector<8x128xf32>
    %266 = arith.mulf %260, %264 : vector<8x128xf32>
    %267 = arith.addf %265, %266 : vector<8x128xf32>
    %268 = math.tanh %267 : vector<8x128xf32>
    %269 = arith.mulf %262, %268 : vector<8x128xf32>
    %270 = arith.index_cast %c1_i32_81 : i32 to index
    %c0_86 = arith.constant 0 : index
    %c0_87 = arith.constant 0 : index
    %271 = vector.load %arg15[%270, %c0_86, %c0_87] : memref<8x8x128xf32, #tpu.memory_space<vmem>>, vector<1x8x128xf32>
    %272 = vector.shape_cast %271 : vector<1x8x128xf32> to vector<8x128xf32>
    %273 = vector.shape_cast %269 : vector<8x128xf32> to vector<1x8x128xf32>
    tpu.vector_store %arg15[%270, %c0_86, %c0_87], %273 {strides = array<i32>} : memref<8x8x128xf32, #tpu.memory_space<vmem>>, vector<1x8x128xf32>,
    %c2_i32_88 = arith.constant 2 : i32
    %274 = arith.index_cast %c2_i32_88 : i32 to index
    %c0_89 = arith.constant 0 : index
    %c0_90 = arith.constant 0 : index
    %275 = vector.load %arg16[%274, %c0_89, %c0_90] : memref<8x8x512xf32, #tpu.memory_space<vmem>>, vector<1x8x512xf32>
    %276 = vector.shape_cast %275 : vector<1x8x512xf32> to vector<8x512xf32>
    %cst_91 = arith.constant dense<0.000000e+00> : vector<8x512xf32>
    %277 = tpu.matmul %269, %222, %cst_91 {dimension_numbers = #tpu.dot_dimension_numbers<[1], [0], [0], [1], [0, 0, 1, 1], [], []>} : vector<8x128xf32>, vector<128x512xf32>, vector<8x512xf32> -> vector<8x512xf32>
    %278 = arith.addf %276, %277 : vector<8x512xf32>
    %279 = vector.extract_strided_slice %278 {offsets = [0, 0], sizes = [8, 384], strides = [1, 1]} : vector<8x512xf32> to vector<8x384xf32>
    %280 = arith.negf %279 : vector<8x384xf32>
    %281 = math.exp %280 : vector<8x384xf32>
    %cst_92 = arith.constant 1.000000e+00 : f32
    %282 = vector.broadcast %cst_92 : f32 to vector<8x384xf32>
    %283 = arith.addf %282, %281 : vector<8x384xf32>
    %284 = arith.divf %282, %283 : vector<8x384xf32>
    %285 = vector.extract_strided_slice %284 {offsets = [0, 0], sizes = [8, 128], strides = [1, 1]} : vector<8x384xf32> to vector<8x128xf32>
    %286 = vector.extract_strided_slice %284 {offsets = [0, 128], sizes = [8, 128], strides = [1, 1]} : vector<8x384xf32> to vector<8x128xf32>
    %287 = vector.extract_strided_slice %284 {offsets = [0, 256], sizes = [8, 128], strides = [1, 1]} : vector<8x384xf32> to vector<8x128xf32>
    %288 = vector.extract_strided_slice %278 {offsets = [0, 384], sizes = [8, 128], strides = [1, 1]} : vector<8x512xf32> to vector<8x128xf32>
    %289 = math.tanh %288 : vector<8x128xf32>
    %290 = arith.mulf %286, %267 : vector<8x128xf32>
    %291 = arith.mulf %285, %289 : vector<8x128xf32>
    %292 = arith.addf %290, %291 : vector<8x128xf32>
    %293 = math.tanh %292 : vector<8x128xf32>
    %294 = arith.mulf %287, %293 : vector<8x128xf32>
    %295 = arith.index_cast %c2_i32_88 : i32 to index
    %c0_93 = arith.constant 0 : index
    %c0_94 = arith.constant 0 : index
    %296 = vector.load %arg15[%295, %c0_93, %c0_94] : memref<8x8x128xf32, #tpu.memory_space<vmem>>, vector<1x8x128xf32>
    %297 = vector.shape_cast %296 : vector<1x8x128xf32> to vector<8x128xf32>
    %298 = vector.shape_cast %294 : vector<8x128xf32> to vector<1x8x128xf32>
    tpu.vector_store %arg15[%295, %c0_93, %c0_94], %298 {strides = array<i32>} : memref<8x8x128xf32, #tpu.memory_space<vmem>>, vector<1x8x128xf32>,
    %c3_i32_95 = arith.constant 3 : i32
    %299 = arith.index_cast %c3_i32_95 : i32 to index
    %c0_96 = arith.constant 0 : index
    %c0_97 = arith.constant 0 : index
    %300 = vector.load %arg16[%299, %c0_96, %c0_97] : memref<8x8x512xf32, #tpu.memory_space<vmem>>, vector<1x8x512xf32>
    %301 = vector.shape_cast %300 : vector<1x8x512xf32> to vector<8x512xf32>
    %cst_98 = arith.constant dense<0.000000e+00> : vector<8x512xf32>
    %302 = tpu.matmul %294, %222, %cst_98 {dimension_numbers = #tpu.dot_dimension_numbers<[1], [0], [0], [1], [0, 0, 1, 1], [], []>} : vector<8x128xf32>, vector<128x512xf32>, vector<8x512xf32> -> vector<8x512xf32>
    %303 = arith.addf %301, %302 : vector<8x512xf32>
    %304 = vector.extract_strided_slice %303 {offsets = [0, 0], sizes = [8, 384], strides = [1, 1]} : vector<8x512xf32> to vector<8x384xf32>
    %305 = arith.negf %304 : vector<8x384xf32>
    %306 = math.exp %305 : vector<8x384xf32>
    %cst_99 = arith.constant 1.000000e+00 : f32
    %307 = vector.broadcast %cst_99 : f32 to vector<8x384xf32>
    %308 = arith.addf %307, %306 : vector<8x384xf32>
    %309 = arith.divf %307, %308 : vector<8x384xf32>
    %310 = vector.extract_strided_slice %309 {offsets = [0, 0], sizes = [8, 128], strides = [1, 1]} : vector<8x384xf32> to vector<8x128xf32>
    %311 = vector.extract_strided_slice %309 {offsets = [0, 128], sizes = [8, 128], strides = [1, 1]} : vector<8x384xf32> to vector<8x128xf32>
    %312 = vector.extract_strided_slice %309 {offsets = [0, 256], sizes = [8, 128], strides = [1, 1]} : vector<8x384xf32> to vector<8x128xf32>
    %313 = vector.extract_strided_slice %303 {offsets = [0, 384], sizes = [8, 128], strides = [1, 1]} : vector<8x512xf32> to vector<8x128xf32>
    %314 = math.tanh %313 : vector<8x128xf32>
    %315 = arith.mulf %311, %292 : vector<8x128xf32>
    %316 = arith.mulf %310, %314 : vector<8x128xf32>
    %317 = arith.addf %315, %316 : vector<8x128xf32>
    %318 = math.tanh %317 : vector<8x128xf32>
    %319 = arith.mulf %312, %318 : vector<8x128xf32>
    %320 = arith.index_cast %c3_i32_95 : i32 to index
    %c0_100 = arith.constant 0 : index
    %c0_101 = arith.constant 0 : index
    %321 = vector.load %arg15[%320, %c0_100, %c0_101] : memref<8x8x128xf32, #tpu.memory_space<vmem>>, vector<1x8x128xf32>
    %322 = vector.shape_cast %321 : vector<1x8x128xf32> to vector<8x128xf32>
    %323 = vector.shape_cast %319 : vector<8x128xf32> to vector<1x8x128xf32>
    tpu.vector_store %arg15[%320, %c0_100, %c0_101], %323 {strides = array<i32>} : memref<8x8x128xf32, #tpu.memory_space<vmem>>, vector<1x8x128xf32>,
    %c4_i32_102 = arith.constant 4 : i32
    %324 = arith.index_cast %c4_i32_102 : i32 to index
    %c0_103 = arith.constant 0 : index
    %c0_104 = arith.constant 0 : index
    %325 = vector.load %arg16[%324, %c0_103, %c0_104] : memref<8x8x512xf32, #tpu.memory_space<vmem>>, vector<1x8x512xf32>
    %326 = vector.shape_cast %325 : vector<1x8x512xf32> to vector<8x512xf32>
    %cst_105 = arith.constant dense<0.000000e+00> : vector<8x512xf32>
    %327 = tpu.matmul %319, %222, %cst_105 {dimension_numbers = #tpu.dot_dimension_numbers<[1], [0], [0], [1], [0, 0, 1, 1], [], []>} : vector<8x128xf32>, vector<128x512xf32>, vector<8x512xf32> -> vector<8x512xf32>
    %328 = arith.addf %326, %327 : vector<8x512xf32>
    %329 = vector.extract_strided_slice %328 {offsets = [0, 0], sizes = [8, 384], strides = [1, 1]} : vector<8x512xf32> to vector<8x384xf32>
    %330 = arith.negf %329 : vector<8x384xf32>
    %331 = math.exp %330 : vector<8x384xf32>
    %cst_106 = arith.constant 1.000000e+00 : f32
    %332 = vector.broadcast %cst_106 : f32 to vector<8x384xf32>
    %333 = arith.addf %332, %331 : vector<8x384xf32>
    %334 = arith.divf %332, %333 : vector<8x384xf32>
    %335 = vector.extract_strided_slice %334 {offsets = [0, 0], sizes = [8, 128], strides = [1, 1]} : vector<8x384xf32> to vector<8x128xf32>
    %336 = vector.extract_strided_slice %334 {offsets = [0, 128], sizes = [8, 128], strides = [1, 1]} : vector<8x384xf32> to vector<8x128xf32>
    %337 = vector.extract_strided_slice %334 {offsets = [0, 256], sizes = [8, 128], strides = [1, 1]} : vector<8x384xf32> to vector<8x128xf32>
    %338 = vector.extract_strided_slice %328 {offsets = [0, 384], sizes = [8, 128], strides = [1, 1]} : vector<8x512xf32> to vector<8x128xf32>
    %339 = math.tanh %338 : vector<8x128xf32>
    %340 = arith.mulf %336, %317 : vector<8x128xf32>
    %341 = arith.mulf %335, %339 : vector<8x128xf32>
    %342 = arith.addf %340, %341 : vector<8x128xf32>
    %343 = math.tanh %342 : vector<8x128xf32>
    %344 = arith.mulf %337, %343 : vector<8x128xf32>
    %345 = arith.index_cast %c4_i32_102 : i32 to index
    %c0_107 = arith.constant 0 : index
    %c0_108 = arith.constant 0 : index
    %346 = vector.load %arg15[%345, %c0_107, %c0_108] : memref<8x8x128xf32, #tpu.memory_space<vmem>>, vector<1x8x128xf32>
    %347 = vector.shape_cast %346 : vector<1x8x128xf32> to vector<8x128xf32>
    %348 = vector.shape_cast %344 : vector<8x128xf32> to vector<1x8x128xf32>
    tpu.vector_store %arg15[%345, %c0_107, %c0_108], %348 {strides = array<i32>} : memref<8x8x128xf32, #tpu.memory_space<vmem>>, vector<1x8x128xf32>,
    %c5_i32_109 = arith.constant 5 : i32
    %349 = arith.index_cast %c5_i32_109 : i32 to index
    %c0_110 = arith.constant 0 : index
    %c0_111 = arith.constant 0 : index
    %350 = vector.load %arg16[%349, %c0_110, %c0_111] : memref<8x8x512xf32, #tpu.memory_space<vmem>>, vector<1x8x512xf32>
    %351 = vector.shape_cast %350 : vector<1x8x512xf32> to vector<8x512xf32>
    %cst_112 = arith.constant dense<0.000000e+00> : vector<8x512xf32>
    %352 = tpu.matmul %344, %222, %cst_112 {dimension_numbers = #tpu.dot_dimension_numbers<[1], [0], [0], [1], [0, 0, 1, 1], [], []>} : vector<8x128xf32>, vector<128x512xf32>, vector<8x512xf32> -> vector<8x512xf32>
    %353 = arith.addf %351, %352 : vector<8x512xf32>
    %354 = vector.extract_strided_slice %353 {offsets = [0, 0], sizes = [8, 384], strides = [1, 1]} : vector<8x512xf32> to vector<8x384xf32>
    %355 = arith.negf %354 : vector<8x384xf32>
    %356 = math.exp %355 : vector<8x384xf32>
    %cst_113 = arith.constant 1.000000e+00 : f32
    %357 = vector.broadcast %cst_113 : f32 to vector<8x384xf32>
    %358 = arith.addf %357, %356 : vector<8x384xf32>
    %359 = arith.divf %357, %358 : vector<8x384xf32>
    %360 = vector.extract_strided_slice %359 {offsets = [0, 0], sizes = [8, 128], strides = [1, 1]} : vector<8x384xf32> to vector<8x128xf32>
    %361 = vector.extract_strided_slice %359 {offsets = [0, 128], sizes = [8, 128], strides = [1, 1]} : vector<8x384xf32> to vector<8x128xf32>
    %362 = vector.extract_strided_slice %359 {offsets = [0, 256], sizes = [8, 128], strides = [1, 1]} : vector<8x384xf32> to vector<8x128xf32>
    %363 = vector.extract_strided_slice %353 {offsets = [0, 384], sizes = [8, 128], strides = [1, 1]} : vector<8x512xf32> to vector<8x128xf32>
    %364 = math.tanh %363 : vector<8x128xf32>
    %365 = arith.mulf %361, %342 : vector<8x128xf32>
    %366 = arith.mulf %360, %364 : vector<8x128xf32>
    %367 = arith.addf %365, %366 : vector<8x128xf32>
    %368 = math.tanh %367 : vector<8x128xf32>
    %369 = arith.mulf %362, %368 : vector<8x128xf32>
    %370 = arith.index_cast %c5_i32_109 : i32 to index
    %c0_114 = arith.constant 0 : index
    %c0_115 = arith.constant 0 : index
    %371 = vector.load %arg15[%370, %c0_114, %c0_115] : memref<8x8x128xf32, #tpu.memory_space<vmem>>, vector<1x8x128xf32>
    %372 = vector.shape_cast %371 : vector<1x8x128xf32> to vector<8x128xf32>
    %373 = vector.shape_cast %369 : vector<8x128xf32> to vector<1x8x128xf32>
    tpu.vector_store %arg15[%370, %c0_114, %c0_115], %373 {strides = array<i32>} : memref<8x8x128xf32, #tpu.memory_space<vmem>>, vector<1x8x128xf32>,
    %c6_i32_116 = arith.constant 6 : i32
    %374 = arith.index_cast %c6_i32_116 : i32 to index
    %c0_117 = arith.constant 0 : index
    %c0_118 = arith.constant 0 : index
    %375 = vector.load %arg16[%374, %c0_117, %c0_118] : memref<8x8x512xf32, #tpu.memory_space<vmem>>, vector<1x8x512xf32>
    %376 = vector.shape_cast %375 : vector<1x8x512xf32> to vector<8x512xf32>
    %cst_119 = arith.constant dense<0.000000e+00> : vector<8x512xf32>
    %377 = tpu.matmul %369, %222, %cst_119 {dimension_numbers = #tpu.dot_dimension_numbers<[1], [0], [0], [1], [0, 0, 1, 1], [], []>} : vector<8x128xf32>, vector<128x512xf32>, vector<8x512xf32> -> vector<8x512xf32>
    %378 = arith.addf %376, %377 : vector<8x512xf32>
    %379 = vector.extract_strided_slice %378 {offsets = [0, 0], sizes = [8, 384], strides = [1, 1]} : vector<8x512xf32> to vector<8x384xf32>
    %380 = arith.negf %379 : vector<8x384xf32>
    %381 = math.exp %380 : vector<8x384xf32>
    %cst_120 = arith.constant 1.000000e+00 : f32
    %382 = vector.broadcast %cst_120 : f32 to vector<8x384xf32>
    %383 = arith.addf %382, %381 : vector<8x384xf32>
    %384 = arith.divf %382, %383 : vector<8x384xf32>
    %385 = vector.extract_strided_slice %384 {offsets = [0, 0], sizes = [8, 128], strides = [1, 1]} : vector<8x384xf32> to vector<8x128xf32>
    %386 = vector.extract_strided_slice %384 {offsets = [0, 128], sizes = [8, 128], strides = [1, 1]} : vector<8x384xf32> to vector<8x128xf32>
    %387 = vector.extract_strided_slice %384 {offsets = [0, 256], sizes = [8, 128], strides = [1, 1]} : vector<8x384xf32> to vector<8x128xf32>
    %388 = vector.extract_strided_slice %378 {offsets = [0, 384], sizes = [8, 128], strides = [1, 1]} : vector<8x512xf32> to vector<8x128xf32>
    %389 = math.tanh %388 : vector<8x128xf32>
    %390 = arith.mulf %386, %367 : vector<8x128xf32>
    %391 = arith.mulf %385, %389 : vector<8x128xf32>
    %392 = arith.addf %390, %391 : vector<8x128xf32>
    %393 = math.tanh %392 : vector<8x128xf32>
    %394 = arith.mulf %387, %393 : vector<8x128xf32>
    %395 = arith.index_cast %c6_i32_116 : i32 to index
    %c0_121 = arith.constant 0 : index
    %c0_122 = arith.constant 0 : index
    %396 = vector.load %arg15[%395, %c0_121, %c0_122] : memref<8x8x128xf32, #tpu.memory_space<vmem>>, vector<1x8x128xf32>
    %397 = vector.shape_cast %396 : vector<1x8x128xf32> to vector<8x128xf32>
    %398 = vector.shape_cast %394 : vector<8x128xf32> to vector<1x8x128xf32>
    tpu.vector_store %arg15[%395, %c0_121, %c0_122], %398 {strides = array<i32>} : memref<8x8x128xf32, #tpu.memory_space<vmem>>, vector<1x8x128xf32>,
    %c7_i32_123 = arith.constant 7 : i32
    %399 = arith.index_cast %c7_i32_123 : i32 to index
    %c0_124 = arith.constant 0 : index
    %c0_125 = arith.constant 0 : index
    %400 = vector.load %arg16[%399, %c0_124, %c0_125] : memref<8x8x512xf32, #tpu.memory_space<vmem>>, vector<1x8x512xf32>
    %401 = vector.shape_cast %400 : vector<1x8x512xf32> to vector<8x512xf32>
    %cst_126 = arith.constant dense<0.000000e+00> : vector<8x512xf32>
    %402 = tpu.matmul %394, %222, %cst_126 {dimension_numbers = #tpu.dot_dimension_numbers<[1], [0], [0], [1], [0, 0, 1, 1], [], []>} : vector<8x128xf32>, vector<128x512xf32>, vector<8x512xf32> -> vector<8x512xf32>
    %403 = arith.addf %401, %402 : vector<8x512xf32>
    %404 = vector.extract_strided_slice %403 {offsets = [0, 0], sizes = [8, 384], strides = [1, 1]} : vector<8x512xf32> to vector<8x384xf32>
    %405 = arith.negf %404 : vector<8x384xf32>
    %406 = math.exp %405 : vector<8x384xf32>
    %cst_127 = arith.constant 1.000000e+00 : f32
    %407 = vector.broadcast %cst_127 : f32 to vector<8x384xf32>
    %408 = arith.addf %407, %406 : vector<8x384xf32>
    %409 = arith.divf %407, %408 : vector<8x384xf32>
    %410 = vector.extract_strided_slice %409 {offsets = [0, 0], sizes = [8, 128], strides = [1, 1]} : vector<8x384xf32> to vector<8x128xf32>
    %411 = vector.extract_strided_slice %409 {offsets = [0, 128], sizes = [8, 128], strides = [1, 1]} : vector<8x384xf32> to vector<8x128xf32>
    %412 = vector.extract_strided_slice %409 {offsets = [0, 256], sizes = [8, 128], strides = [1, 1]} : vector<8x384xf32> to vector<8x128xf32>
    %413 = vector.extract_strided_slice %403 {offsets = [0, 384], sizes = [8, 128], strides = [1, 1]} : vector<8x512xf32> to vector<8x128xf32>
    %414 = math.tanh %413 : vector<8x128xf32>
    %415 = arith.mulf %411, %392 : vector<8x128xf32>
    %416 = arith.mulf %410, %414 : vector<8x128xf32>
    %417 = arith.addf %415, %416 : vector<8x128xf32>
    %418 = math.tanh %417 : vector<8x128xf32>
    %419 = arith.mulf %412, %418 : vector<8x128xf32>
    %420 = arith.index_cast %c7_i32_123 : i32 to index
    %c0_128 = arith.constant 0 : index
    %c0_129 = arith.constant 0 : index
    %421 = vector.load %arg15[%420, %c0_128, %c0_129] : memref<8x8x128xf32, #tpu.memory_space<vmem>>, vector<1x8x128xf32>
    %422 = vector.shape_cast %421 : vector<1x8x128xf32> to vector<8x128xf32>
    %423 = vector.shape_cast %419 : vector<8x128xf32> to vector<1x8x128xf32>
    tpu.vector_store %arg15[%420, %c0_128, %c0_129], %423 {strides = array<i32>} : memref<8x8x128xf32, #tpu.memory_space<vmem>>, vector<1x8x128xf32>,
    %c8_i32_130 = arith.constant 8 : i32
    %c0_131 = arith.constant 0 : index
    %c0_132 = arith.constant 0 : index
    %c0_133 = arith.constant 0 : index
    %424 = vector.load %arg15[%c0_131, %c0_132, %c0_133] : memref<8x8x128xf32, #tpu.memory_space<vmem>>, vector<8x8x128xf32>
    %425 = vector.shape_cast %424 : vector<8x8x128xf32> to vector<64x128xf32>
    %c0_134 = arith.constant 0 : index
    %c0_135 = arith.constant 0 : index
    %426 = vector.load %arg7[%c0_134, %c0_135] : memref<128x512xf32, #tpu.memory_space<vmem>>, vector<128x512xf32>
    %cst_136 = arith.constant dense<0.000000e+00> : vector<64x512xf32>
    %427 = tpu.matmul %425, %426, %cst_136 {dimension_numbers = #tpu.dot_dimension_numbers<[1], [0], [0], [1], [0, 0, 1, 1], [], []>} : vector<64x128xf32>, vector<128x512xf32>, vector<64x512xf32> -> vector<64x512xf32>
    %428 = vector.shape_cast %427 : vector<64x512xf32> to vector<8x8x512xf32>
    %c0_137 = arith.constant 0 : index
    %c0_138 = arith.constant 0 : index
    %429 = vector.load %arg9[%c0_137, %c0_138] : memref<8x512xf32, #tpu.memory_space<vmem>>, vector<8x512xf32>
    %430 = vector.shape_cast %429 : vector<8x512xf32> to vector<1x8x512xf32>
    %431 = vector.broadcast %430 : vector<1x8x512xf32> to vector<8x8x512xf32>
    %432 = arith.addf %428, %431 : vector<8x8x512xf32>
    %c0_139 = arith.constant 0 : index
    %c0_140 = arith.constant 0 : index
    %c0_141 = arith.constant 0 : index
    %433 = vector.load %arg16[%c0_139, %c0_140, %c0_141] : memref<8x8x512xf32, #tpu.memory_space<vmem>>, vector<8x8x512xf32>
    tpu.vector_store %arg16[%c0_139, %c0_140, %c0_141], %432 {strides = array<i32>} : memref<8x8x512xf32, #tpu.memory_space<vmem>>, vector<8x8x512xf32>,
    %c0_142 = arith.constant 0 : index
    %c0_143 = arith.constant 0 : index
    %434 = vector.load %arg8[%c0_142, %c0_143] : memref<128x512xf32, #tpu.memory_space<vmem>>, vector<128x512xf32>
    %cst_144 = arith.constant 0.000000e+00 : f32
    %435 = vector.broadcast %cst_144 : f32 to vector<8x128xf32>
    %c0_i32_145 = arith.constant 0 : i32
    %436 = arith.index_cast %c0_i32_145 : i32 to index
    %c0_146 = arith.constant 0 : index
    %c0_147 = arith.constant 0 : index
    %437 = vector.load %arg16[%436, %c0_146, %c0_147] : memref<8x8x512xf32, #tpu.memory_space<vmem>>, vector<1x8x512xf32>
    %438 = vector.shape_cast %437 : vector<1x8x512xf32> to vector<8x512xf32>
    %cst_148 = arith.constant dense<0.000000e+00> : vector<8x512xf32>
    %439 = tpu.matmul %435, %434, %cst_148 {dimension_numbers = #tpu.dot_dimension_numbers<[1], [0], [0], [1], [0, 0, 1, 1], [], []>} : vector<8x128xf32>, vector<128x512xf32>, vector<8x512xf32> -> vector<8x512xf32>
    %440 = arith.addf %438, %439 : vector<8x512xf32>
    %441 = vector.extract_strided_slice %440 {offsets = [0, 0], sizes = [8, 384], strides = [1, 1]} : vector<8x512xf32> to vector<8x384xf32>
    %442 = arith.negf %441 : vector<8x384xf32>
    %443 = math.exp %442 : vector<8x384xf32>
    %cst_149 = arith.constant 1.000000e+00 : f32
    %444 = vector.broadcast %cst_149 : f32 to vector<8x384xf32>
    %445 = arith.addf %444, %443 : vector<8x384xf32>
    %446 = arith.divf %444, %445 : vector<8x384xf32>
    %447 = vector.extract_strided_slice %446 {offsets = [0, 0], sizes = [8, 128], strides = [1, 1]} : vector<8x384xf32> to vector<8x128xf32>
    %448 = vector.extract_strided_slice %446 {offsets = [0, 128], sizes = [8, 128], strides = [1, 1]} : vector<8x384xf32> to vector<8x128xf32>
    %449 = vector.extract_strided_slice %446 {offsets = [0, 256], sizes = [8, 128], strides = [1, 1]} : vector<8x384xf32> to vector<8x128xf32>
    %450 = vector.extract_strided_slice %440 {offsets = [0, 384], sizes = [8, 128], strides = [1, 1]} : vector<8x512xf32> to vector<8x128xf32>
    %451 = math.tanh %450 : vector<8x128xf32>
    %452 = arith.mulf %448, %435 : vector<8x128xf32>
    %453 = arith.mulf %447, %451 : vector<8x128xf32>
    %454 = arith.addf %452, %453 : vector<8x128xf32>
    %455 = math.tanh %454 : vector<8x128xf32>
    %456 = arith.mulf %449, %455 : vector<8x128xf32>
    %457 = arith.index_cast %c0_i32_145 : i32 to index
    %c0_150 = arith.constant 0 : index
    %c0_151 = arith.constant 0 : index
    %458 = vector.load %arg14[%457, %c0_150, %c0_151] : memref<8x8x128xf32, #tpu.memory_space<vmem>>, vector<1x8x128xf32>
    %459 = vector.shape_cast %458 : vector<1x8x128xf32> to vector<8x128xf32>
    %460 = vector.shape_cast %456 : vector<8x128xf32> to vector<1x8x128xf32>
    tpu.vector_store %arg14[%457, %c0_150, %c0_151], %460 {strides = array<i32>} : memref<8x8x128xf32, #tpu.memory_space<vmem>>, vector<1x8x128xf32>,
    %c1_i32_152 = arith.constant 1 : i32
    %461 = arith.index_cast %c1_i32_152 : i32 to index
    %c0_153 = arith.constant 0 : index
    %c0_154 = arith.constant 0 : index
    %462 = vector.load %arg16[%461, %c0_153, %c0_154] : memref<8x8x512xf32, #tpu.memory_space<vmem>>, vector<1x8x512xf32>
    %463 = vector.shape_cast %462 : vector<1x8x512xf32> to vector<8x512xf32>
    %cst_155 = arith.constant dense<0.000000e+00> : vector<8x512xf32>
    %464 = tpu.matmul %456, %434, %cst_155 {dimension_numbers = #tpu.dot_dimension_numbers<[1], [0], [0], [1], [0, 0, 1, 1], [], []>} : vector<8x128xf32>, vector<128x512xf32>, vector<8x512xf32> -> vector<8x512xf32>
    %465 = arith.addf %463, %464 : vector<8x512xf32>
    %466 = vector.extract_strided_slice %465 {offsets = [0, 0], sizes = [8, 384], strides = [1, 1]} : vector<8x512xf32> to vector<8x384xf32>
    %467 = arith.negf %466 : vector<8x384xf32>
    %468 = math.exp %467 : vector<8x384xf32>
    %cst_156 = arith.constant 1.000000e+00 : f32
    %469 = vector.broadcast %cst_156 : f32 to vector<8x384xf32>
    %470 = arith.addf %469, %468 : vector<8x384xf32>
    %471 = arith.divf %469, %470 : vector<8x384xf32>
    %472 = vector.extract_strided_slice %471 {offsets = [0, 0], sizes = [8, 128], strides = [1, 1]} : vector<8x384xf32> to vector<8x128xf32>
    %473 = vector.extract_strided_slice %471 {offsets = [0, 128], sizes = [8, 128], strides = [1, 1]} : vector<8x384xf32> to vector<8x128xf32>
    %474 = vector.extract_strided_slice %471 {offsets = [0, 256], sizes = [8, 128], strides = [1, 1]} : vector<8x384xf32> to vector<8x128xf32>
    %475 = vector.extract_strided_slice %465 {offsets = [0, 384], sizes = [8, 128], strides = [1, 1]} : vector<8x512xf32> to vector<8x128xf32>
    %476 = math.tanh %475 : vector<8x128xf32>
    %477 = arith.mulf %473, %454 : vector<8x128xf32>
    %478 = arith.mulf %472, %476 : vector<8x128xf32>
    %479 = arith.addf %477, %478 : vector<8x128xf32>
    %480 = math.tanh %479 : vector<8x128xf32>
    %481 = arith.mulf %474, %480 : vector<8x128xf32>
    %482 = arith.index_cast %c1_i32_152 : i32 to index
    %c0_157 = arith.constant 0 : index
    %c0_158 = arith.constant 0 : index
    %483 = vector.load %arg14[%482, %c0_157, %c0_158] : memref<8x8x128xf32, #tpu.memory_space<vmem>>, vector<1x8x128xf32>
    %484 = vector.shape_cast %483 : vector<1x8x128xf32> to vector<8x128xf32>
    %485 = vector.shape_cast %481 : vector<8x128xf32> to vector<1x8x128xf32>
    tpu.vector_store %arg14[%482, %c0_157, %c0_158], %485 {strides = array<i32>} : memref<8x8x128xf32, #tpu.memory_space<vmem>>, vector<1x8x128xf32>,
    %c2_i32_159 = arith.constant 2 : i32
    %486 = arith.index_cast %c2_i32_159 : i32 to index
    %c0_160 = arith.constant 0 : index
    %c0_161 = arith.constant 0 : index
    %487 = vector.load %arg16[%486, %c0_160, %c0_161] : memref<8x8x512xf32, #tpu.memory_space<vmem>>, vector<1x8x512xf32>
    %488 = vector.shape_cast %487 : vector<1x8x512xf32> to vector<8x512xf32>
    %cst_162 = arith.constant dense<0.000000e+00> : vector<8x512xf32>
    %489 = tpu.matmul %481, %434, %cst_162 {dimension_numbers = #tpu.dot_dimension_numbers<[1], [0], [0], [1], [0, 0, 1, 1], [], []>} : vector<8x128xf32>, vector<128x512xf32>, vector<8x512xf32> -> vector<8x512xf32>
    %490 = arith.addf %488, %489 : vector<8x512xf32>
    %491 = vector.extract_strided_slice %490 {offsets = [0, 0], sizes = [8, 384], strides = [1, 1]} : vector<8x512xf32> to vector<8x384xf32>
    %492 = arith.negf %491 : vector<8x384xf32>
    %493 = math.exp %492 : vector<8x384xf32>
    %cst_163 = arith.constant 1.000000e+00 : f32
    %494 = vector.broadcast %cst_163 : f32 to vector<8x384xf32>
    %495 = arith.addf %494, %493 : vector<8x384xf32>
    %496 = arith.divf %494, %495 : vector<8x384xf32>
    %497 = vector.extract_strided_slice %496 {offsets = [0, 0], sizes = [8, 128], strides = [1, 1]} : vector<8x384xf32> to vector<8x128xf32>
    %498 = vector.extract_strided_slice %496 {offsets = [0, 128], sizes = [8, 128], strides = [1, 1]} : vector<8x384xf32> to vector<8x128xf32>
    %499 = vector.extract_strided_slice %496 {offsets = [0, 256], sizes = [8, 128], strides = [1, 1]} : vector<8x384xf32> to vector<8x128xf32>
    %500 = vector.extract_strided_slice %490 {offsets = [0, 384], sizes = [8, 128], strides = [1, 1]} : vector<8x512xf32> to vector<8x128xf32>
    %501 = math.tanh %500 : vector<8x128xf32>
    %502 = arith.mulf %498, %479 : vector<8x128xf32>
    %503 = arith.mulf %497, %501 : vector<8x128xf32>
    %504 = arith.addf %502, %503 : vector<8x128xf32>
    %505 = math.tanh %504 : vector<8x128xf32>
    %506 = arith.mulf %499, %505 : vector<8x128xf32>
    %507 = arith.index_cast %c2_i32_159 : i32 to index
    %c0_164 = arith.constant 0 : index
    %c0_165 = arith.constant 0 : index
    %508 = vector.load %arg14[%507, %c0_164, %c0_165] : memref<8x8x128xf32, #tpu.memory_space<vmem>>, vector<1x8x128xf32>
    %509 = vector.shape_cast %508 : vector<1x8x128xf32> to vector<8x128xf32>
    %510 = vector.shape_cast %506 : vector<8x128xf32> to vector<1x8x128xf32>
    tpu.vector_store %arg14[%507, %c0_164, %c0_165], %510 {strides = array<i32>} : memref<8x8x128xf32, #tpu.memory_space<vmem>>, vector<1x8x128xf32>,
    %c3_i32_166 = arith.constant 3 : i32
    %511 = arith.index_cast %c3_i32_166 : i32 to index
    %c0_167 = arith.constant 0 : index
    %c0_168 = arith.constant 0 : index
    %512 = vector.load %arg16[%511, %c0_167, %c0_168] : memref<8x8x512xf32, #tpu.memory_space<vmem>>, vector<1x8x512xf32>
    %513 = vector.shape_cast %512 : vector<1x8x512xf32> to vector<8x512xf32>
    %cst_169 = arith.constant dense<0.000000e+00> : vector<8x512xf32>
    %514 = tpu.matmul %506, %434, %cst_169 {dimension_numbers = #tpu.dot_dimension_numbers<[1], [0], [0], [1], [0, 0, 1, 1], [], []>} : vector<8x128xf32>, vector<128x512xf32>, vector<8x512xf32> -> vector<8x512xf32>
    %515 = arith.addf %513, %514 : vector<8x512xf32>
    %516 = vector.extract_strided_slice %515 {offsets = [0, 0], sizes = [8, 384], strides = [1, 1]} : vector<8x512xf32> to vector<8x384xf32>
    %517 = arith.negf %516 : vector<8x384xf32>
    %518 = math.exp %517 : vector<8x384xf32>
    %cst_170 = arith.constant 1.000000e+00 : f32
    %519 = vector.broadcast %cst_170 : f32 to vector<8x384xf32>
    %520 = arith.addf %519, %518 : vector<8x384xf32>
    %521 = arith.divf %519, %520 : vector<8x384xf32>
    %522 = vector.extract_strided_slice %521 {offsets = [0, 0], sizes = [8, 128], strides = [1, 1]} : vector<8x384xf32> to vector<8x128xf32>
    %523 = vector.extract_strided_slice %521 {offsets = [0, 128], sizes = [8, 128], strides = [1, 1]} : vector<8x384xf32> to vector<8x128xf32>
    %524 = vector.extract_strided_slice %521 {offsets = [0, 256], sizes = [8, 128], strides = [1, 1]} : vector<8x384xf32> to vector<8x128xf32>
    %525 = vector.extract_strided_slice %515 {offsets = [0, 384], sizes = [8, 128], strides = [1, 1]} : vector<8x512xf32> to vector<8x128xf32>
    %526 = math.tanh %525 : vector<8x128xf32>
    %527 = arith.mulf %523, %504 : vector<8x128xf32>
    %528 = arith.mulf %522, %526 : vector<8x128xf32>
    %529 = arith.addf %527, %528 : vector<8x128xf32>
    %530 = math.tanh %529 : vector<8x128xf32>
    %531 = arith.mulf %524, %530 : vector<8x128xf32>
    %532 = arith.index_cast %c3_i32_166 : i32 to index
    %c0_171 = arith.constant 0 : index
    %c0_172 = arith.constant 0 : index
    %533 = vector.load %arg14[%532, %c0_171, %c0_172] : memref<8x8x128xf32, #tpu.memory_space<vmem>>, vector<1x8x128xf32>
    %534 = vector.shape_cast %533 : vector<1x8x128xf32> to vector<8x128xf32>
    %535 = vector.shape_cast %531 : vector<8x128xf32> to vector<1x8x128xf32>
    tpu.vector_store %arg14[%532, %c0_171, %c0_172], %535 {strides = array<i32>} : memref<8x8x128xf32, #tpu.memory_space<vmem>>, vector<1x8x128xf32>,
    %c4_i32_173 = arith.constant 4 : i32
    %536 = arith.index_cast %c4_i32_173 : i32 to index
    %c0_174 = arith.constant 0 : index
    %c0_175 = arith.constant 0 : index
    %537 = vector.load %arg16[%536, %c0_174, %c0_175] : memref<8x8x512xf32, #tpu.memory_space<vmem>>, vector<1x8x512xf32>
    %538 = vector.shape_cast %537 : vector<1x8x512xf32> to vector<8x512xf32>
    %cst_176 = arith.constant dense<0.000000e+00> : vector<8x512xf32>
    %539 = tpu.matmul %531, %434, %cst_176 {dimension_numbers = #tpu.dot_dimension_numbers<[1], [0], [0], [1], [0, 0, 1, 1], [], []>} : vector<8x128xf32>, vector<128x512xf32>, vector<8x512xf32> -> vector<8x512xf32>
    %540 = arith.addf %538, %539 : vector<8x512xf32>
    %541 = vector.extract_strided_slice %540 {offsets = [0, 0], sizes = [8, 384], strides = [1, 1]} : vector<8x512xf32> to vector<8x384xf32>
    %542 = arith.negf %541 : vector<8x384xf32>
    %543 = math.exp %542 : vector<8x384xf32>
    %cst_177 = arith.constant 1.000000e+00 : f32
    %544 = vector.broadcast %cst_177 : f32 to vector<8x384xf32>
    %545 = arith.addf %544, %543 : vector<8x384xf32>
    %546 = arith.divf %544, %545 : vector<8x384xf32>
    %547 = vector.extract_strided_slice %546 {offsets = [0, 0], sizes = [8, 128], strides = [1, 1]} : vector<8x384xf32> to vector<8x128xf32>
    %548 = vector.extract_strided_slice %546 {offsets = [0, 128], sizes = [8, 128], strides = [1, 1]} : vector<8x384xf32> to vector<8x128xf32>
    %549 = vector.extract_strided_slice %546 {offsets = [0, 256], sizes = [8, 128], strides = [1, 1]} : vector<8x384xf32> to vector<8x128xf32>
    %550 = vector.extract_strided_slice %540 {offsets = [0, 384], sizes = [8, 128], strides = [1, 1]} : vector<8x512xf32> to vector<8x128xf32>
    %551 = math.tanh %550 : vector<8x128xf32>
    %552 = arith.mulf %548, %529 : vector<8x128xf32>
    %553 = arith.mulf %547, %551 : vector<8x128xf32>
    %554 = arith.addf %552, %553 : vector<8x128xf32>
    %555 = math.tanh %554 : vector<8x128xf32>
    %556 = arith.mulf %549, %555 : vector<8x128xf32>
    %557 = arith.index_cast %c4_i32_173 : i32 to index
    %c0_178 = arith.constant 0 : index
    %c0_179 = arith.constant 0 : index
    %558 = vector.load %arg14[%557, %c0_178, %c0_179] : memref<8x8x128xf32, #tpu.memory_space<vmem>>, vector<1x8x128xf32>
    %559 = vector.shape_cast %558 : vector<1x8x128xf32> to vector<8x128xf32>
    %560 = vector.shape_cast %556 : vector<8x128xf32> to vector<1x8x128xf32>
    tpu.vector_store %arg14[%557, %c0_178, %c0_179], %560 {strides = array<i32>} : memref<8x8x128xf32, #tpu.memory_space<vmem>>, vector<1x8x128xf32>,
    %c5_i32_180 = arith.constant 5 : i32
    %561 = arith.index_cast %c5_i32_180 : i32 to index
    %c0_181 = arith.constant 0 : index
    %c0_182 = arith.constant 0 : index
    %562 = vector.load %arg16[%561, %c0_181, %c0_182] : memref<8x8x512xf32, #tpu.memory_space<vmem>>, vector<1x8x512xf32>
    %563 = vector.shape_cast %562 : vector<1x8x512xf32> to vector<8x512xf32>
    %cst_183 = arith.constant dense<0.000000e+00> : vector<8x512xf32>
    %564 = tpu.matmul %556, %434, %cst_183 {dimension_numbers = #tpu.dot_dimension_numbers<[1], [0], [0], [1], [0, 0, 1, 1], [], []>} : vector<8x128xf32>, vector<128x512xf32>, vector<8x512xf32> -> vector<8x512xf32>
    %565 = arith.addf %563, %564 : vector<8x512xf32>
    %566 = vector.extract_strided_slice %565 {offsets = [0, 0], sizes = [8, 384], strides = [1, 1]} : vector<8x512xf32> to vector<8x384xf32>
    %567 = arith.negf %566 : vector<8x384xf32>
    %568 = math.exp %567 : vector<8x384xf32>
    %cst_184 = arith.constant 1.000000e+00 : f32
    %569 = vector.broadcast %cst_184 : f32 to vector<8x384xf32>
    %570 = arith.addf %569, %568 : vector<8x384xf32>
    %571 = arith.divf %569, %570 : vector<8x384xf32>
    %572 = vector.extract_strided_slice %571 {offsets = [0, 0], sizes = [8, 128], strides = [1, 1]} : vector<8x384xf32> to vector<8x128xf32>
    %573 = vector.extract_strided_slice %571 {offsets = [0, 128], sizes = [8, 128], strides = [1, 1]} : vector<8x384xf32> to vector<8x128xf32>
    %574 = vector.extract_strided_slice %571 {offsets = [0, 256], sizes = [8, 128], strides = [1, 1]} : vector<8x384xf32> to vector<8x128xf32>
    %575 = vector.extract_strided_slice %565 {offsets = [0, 384], sizes = [8, 128], strides = [1, 1]} : vector<8x512xf32> to vector<8x128xf32>
    %576 = math.tanh %575 : vector<8x128xf32>
    %577 = arith.mulf %573, %554 : vector<8x128xf32>
    %578 = arith.mulf %572, %576 : vector<8x128xf32>
    %579 = arith.addf %577, %578 : vector<8x128xf32>
    %580 = math.tanh %579 : vector<8x128xf32>
    %581 = arith.mulf %574, %580 : vector<8x128xf32>
    %582 = arith.index_cast %c5_i32_180 : i32 to index
    %c0_185 = arith.constant 0 : index
    %c0_186 = arith.constant 0 : index
    %583 = vector.load %arg14[%582, %c0_185, %c0_186] : memref<8x8x128xf32, #tpu.memory_space<vmem>>, vector<1x8x128xf32>
    %584 = vector.shape_cast %583 : vector<1x8x128xf32> to vector<8x128xf32>
    %585 = vector.shape_cast %581 : vector<8x128xf32> to vector<1x8x128xf32>
    tpu.vector_store %arg14[%582, %c0_185, %c0_186], %585 {strides = array<i32>} : memref<8x8x128xf32, #tpu.memory_space<vmem>>, vector<1x8x128xf32>,
    %c6_i32_187 = arith.constant 6 : i32
    %586 = arith.index_cast %c6_i32_187 : i32 to index
    %c0_188 = arith.constant 0 : index
    %c0_189 = arith.constant 0 : index
    %587 = vector.load %arg16[%586, %c0_188, %c0_189] : memref<8x8x512xf32, #tpu.memory_space<vmem>>, vector<1x8x512xf32>
    %588 = vector.shape_cast %587 : vector<1x8x512xf32> to vector<8x512xf32>
    %cst_190 = arith.constant dense<0.000000e+00> : vector<8x512xf32>
    %589 = tpu.matmul %581, %434, %cst_190 {dimension_numbers = #tpu.dot_dimension_numbers<[1], [0], [0], [1], [0, 0, 1, 1], [], []>} : vector<8x128xf32>, vector<128x512xf32>, vector<8x512xf32> -> vector<8x512xf32>
    %590 = arith.addf %588, %589 : vector<8x512xf32>
    %591 = vector.extract_strided_slice %590 {offsets = [0, 0], sizes = [8, 384], strides = [1, 1]} : vector<8x512xf32> to vector<8x384xf32>
    %592 = arith.negf %591 : vector<8x384xf32>
    %593 = math.exp %592 : vector<8x384xf32>
    %cst_191 = arith.constant 1.000000e+00 : f32
    %594 = vector.broadcast %cst_191 : f32 to vector<8x384xf32>
    %595 = arith.addf %594, %593 : vector<8x384xf32>
    %596 = arith.divf %594, %595 : vector<8x384xf32>
    %597 = vector.extract_strided_slice %596 {offsets = [0, 0], sizes = [8, 128], strides = [1, 1]} : vector<8x384xf32> to vector<8x128xf32>
    %598 = vector.extract_strided_slice %596 {offsets = [0, 128], sizes = [8, 128], strides = [1, 1]} : vector<8x384xf32> to vector<8x128xf32>
    %599 = vector.extract_strided_slice %596 {offsets = [0, 256], sizes = [8, 128], strides = [1, 1]} : vector<8x384xf32> to vector<8x128xf32>
    %600 = vector.extract_strided_slice %590 {offsets = [0, 384], sizes = [8, 128], strides = [1, 1]} : vector<8x512xf32> to vector<8x128xf32>
    %601 = math.tanh %600 : vector<8x128xf32>
    %602 = arith.mulf %598, %579 : vector<8x128xf32>
    %603 = arith.mulf %597, %601 : vector<8x128xf32>
    %604 = arith.addf %602, %603 : vector<8x128xf32>
    %605 = math.tanh %604 : vector<8x128xf32>
    %606 = arith.mulf %599, %605 : vector<8x128xf32>
    %607 = arith.index_cast %c6_i32_187 : i32 to index
    %c0_192 = arith.constant 0 : index
    %c0_193 = arith.constant 0 : index
    %608 = vector.load %arg14[%607, %c0_192, %c0_193] : memref<8x8x128xf32, #tpu.memory_space<vmem>>, vector<1x8x128xf32>
    %609 = vector.shape_cast %608 : vector<1x8x128xf32> to vector<8x128xf32>
    %610 = vector.shape_cast %606 : vector<8x128xf32> to vector<1x8x128xf32>
    tpu.vector_store %arg14[%607, %c0_192, %c0_193], %610 {strides = array<i32>} : memref<8x8x128xf32, #tpu.memory_space<vmem>>, vector<1x8x128xf32>,
    %c7_i32_194 = arith.constant 7 : i32
    %611 = arith.index_cast %c7_i32_194 : i32 to index
    %c0_195 = arith.constant 0 : index
    %c0_196 = arith.constant 0 : index
    %612 = vector.load %arg16[%611, %c0_195, %c0_196] : memref<8x8x512xf32, #tpu.memory_space<vmem>>, vector<1x8x512xf32>
    %613 = vector.shape_cast %612 : vector<1x8x512xf32> to vector<8x512xf32>
    %cst_197 = arith.constant dense<0.000000e+00> : vector<8x512xf32>
    %614 = tpu.matmul %606, %434, %cst_197 {dimension_numbers = #tpu.dot_dimension_numbers<[1], [0], [0], [1], [0, 0, 1, 1], [], []>} : vector<8x128xf32>, vector<128x512xf32>, vector<8x512xf32> -> vector<8x512xf32>
    %615 = arith.addf %613, %614 : vector<8x512xf32>
    %616 = vector.extract_strided_slice %615 {offsets = [0, 0], sizes = [8, 384], strides = [1, 1]} : vector<8x512xf32> to vector<8x384xf32>
    %617 = arith.negf %616 : vector<8x384xf32>
    %618 = math.exp %617 : vector<8x384xf32>
    %cst_198 = arith.constant 1.000000e+00 : f32
    %619 = vector.broadcast %cst_198 : f32 to vector<8x384xf32>
    %620 = arith.addf %619, %618 : vector<8x384xf32>
    %621 = arith.divf %619, %620 : vector<8x384xf32>
    %622 = vector.extract_strided_slice %621 {offsets = [0, 0], sizes = [8, 128], strides = [1, 1]} : vector<8x384xf32> to vector<8x128xf32>
    %623 = vector.extract_strided_slice %621 {offsets = [0, 128], sizes = [8, 128], strides = [1, 1]} : vector<8x384xf32> to vector<8x128xf32>
    %624 = vector.extract_strided_slice %621 {offsets = [0, 256], sizes = [8, 128], strides = [1, 1]} : vector<8x384xf32> to vector<8x128xf32>
    %625 = vector.extract_strided_slice %615 {offsets = [0, 384], sizes = [8, 128], strides = [1, 1]} : vector<8x512xf32> to vector<8x128xf32>
    %626 = math.tanh %625 : vector<8x128xf32>
    %627 = arith.mulf %623, %604 : vector<8x128xf32>
    %628 = arith.mulf %622, %626 : vector<8x128xf32>
    %629 = arith.addf %627, %628 : vector<8x128xf32>
    %630 = math.tanh %629 : vector<8x128xf32>
    %631 = arith.mulf %624, %630 : vector<8x128xf32>
    %632 = arith.index_cast %c7_i32_194 : i32 to index
    %c0_199 = arith.constant 0 : index
    %c0_200 = arith.constant 0 : index
    %633 = vector.load %arg14[%632, %c0_199, %c0_200] : memref<8x8x128xf32, #tpu.memory_space<vmem>>, vector<1x8x128xf32>
    %634 = vector.shape_cast %633 : vector<1x8x128xf32> to vector<8x128xf32>
    %635 = vector.shape_cast %631 : vector<8x128xf32> to vector<1x8x128xf32>
    tpu.vector_store %arg14[%632, %c0_199, %c0_200], %635 {strides = array<i32>} : memref<8x8x128xf32, #tpu.memory_space<vmem>>, vector<1x8x128xf32>,
    %c8_i32_201 = arith.constant 8 : i32
    %c0_202 = arith.constant 0 : index
    %c0_203 = arith.constant 0 : index
    %c0_204 = arith.constant 0 : index
    %636 = vector.load %arg14[%c0_202, %c0_203, %c0_204] : memref<8x8x128xf32, #tpu.memory_space<vmem>>, vector<8x8x128xf32>
    %637 = vector.shape_cast %636 : vector<8x8x128xf32> to vector<64x128xf32>
    %c0_205 = arith.constant 0 : index
    %c0_206 = arith.constant 0 : index
    %638 = vector.load %arg10[%c0_205, %c0_206] : memref<128x512xf32, #tpu.memory_space<vmem>>, vector<128x512xf32>
    %cst_207 = arith.constant dense<0.000000e+00> : vector<64x512xf32>
    %639 = tpu.matmul %637, %638, %cst_207 {dimension_numbers = #tpu.dot_dimension_numbers<[1], [0], [0], [1], [0, 0, 1, 1], [], []>} : vector<64x128xf32>, vector<128x512xf32>, vector<64x512xf32> -> vector<64x512xf32>
    %640 = vector.shape_cast %639 : vector<64x512xf32> to vector<8x8x512xf32>
    %c0_208 = arith.constant 0 : index
    %c0_209 = arith.constant 0 : index
    %641 = vector.load %arg12[%c0_208, %c0_209] : memref<8x512xf32, #tpu.memory_space<vmem>>, vector<8x512xf32>
    %642 = vector.shape_cast %641 : vector<8x512xf32> to vector<1x8x512xf32>
    %643 = vector.broadcast %642 : vector<1x8x512xf32> to vector<8x8x512xf32>
    %644 = arith.addf %640, %643 : vector<8x8x512xf32>
    %c0_210 = arith.constant 0 : index
    %c0_211 = arith.constant 0 : index
    %c0_212 = arith.constant 0 : index
    %645 = vector.load %arg16[%c0_210, %c0_211, %c0_212] : memref<8x8x512xf32, #tpu.memory_space<vmem>>, vector<8x8x512xf32>
    tpu.vector_store %arg16[%c0_210, %c0_211, %c0_212], %644 {strides = array<i32>} : memref<8x8x512xf32, #tpu.memory_space<vmem>>, vector<8x8x512xf32>,
    %c0_213 = arith.constant 0 : index
    %c0_214 = arith.constant 0 : index
    %646 = vector.load %arg11[%c0_213, %c0_214] : memref<128x512xf32, #tpu.memory_space<vmem>>, vector<128x512xf32>
    %cst_215 = arith.constant 0.000000e+00 : f32
    %647 = vector.broadcast %cst_215 : f32 to vector<8x128xf32>
    %c0_i32_216 = arith.constant 0 : i32
    %648 = arith.index_cast %c0_i32_216 : i32 to index
    %c0_217 = arith.constant 0 : index
    %c0_218 = arith.constant 0 : index
    %649 = vector.load %arg16[%648, %c0_217, %c0_218] : memref<8x8x512xf32, #tpu.memory_space<vmem>>, vector<1x8x512xf32>
    %650 = vector.shape_cast %649 : vector<1x8x512xf32> to vector<8x512xf32>
    %cst_219 = arith.constant dense<0.000000e+00> : vector<8x512xf32>
    %651 = tpu.matmul %647, %646, %cst_219 {dimension_numbers = #tpu.dot_dimension_numbers<[1], [0], [0], [1], [0, 0, 1, 1], [], []>} : vector<8x128xf32>, vector<128x512xf32>, vector<8x512xf32> -> vector<8x512xf32>
    %652 = arith.addf %650, %651 : vector<8x512xf32>
    %653 = vector.extract_strided_slice %652 {offsets = [0, 0], sizes = [8, 384], strides = [1, 1]} : vector<8x512xf32> to vector<8x384xf32>
    %654 = arith.negf %653 : vector<8x384xf32>
    %655 = math.exp %654 : vector<8x384xf32>
    %cst_220 = arith.constant 1.000000e+00 : f32
    %656 = vector.broadcast %cst_220 : f32 to vector<8x384xf32>
    %657 = arith.addf %656, %655 : vector<8x384xf32>
    %658 = arith.divf %656, %657 : vector<8x384xf32>
    %659 = vector.extract_strided_slice %658 {offsets = [0, 0], sizes = [8, 128], strides = [1, 1]} : vector<8x384xf32> to vector<8x128xf32>
    %660 = vector.extract_strided_slice %658 {offsets = [0, 128], sizes = [8, 128], strides = [1, 1]} : vector<8x384xf32> to vector<8x128xf32>
    %661 = vector.extract_strided_slice %658 {offsets = [0, 256], sizes = [8, 128], strides = [1, 1]} : vector<8x384xf32> to vector<8x128xf32>
    %662 = vector.extract_strided_slice %652 {offsets = [0, 384], sizes = [8, 128], strides = [1, 1]} : vector<8x512xf32> to vector<8x128xf32>
    %663 = math.tanh %662 : vector<8x128xf32>
    %664 = arith.mulf %660, %647 : vector<8x128xf32>
    %665 = arith.mulf %659, %663 : vector<8x128xf32>
    %666 = arith.addf %664, %665 : vector<8x128xf32>
    %667 = math.tanh %666 : vector<8x128xf32>
    %668 = arith.mulf %661, %667 : vector<8x128xf32>
    %669 = arith.index_cast %c0_i32_216 : i32 to index
    %c0_221 = arith.constant 0 : index
    %c0_222 = arith.constant 0 : index
    %670 = vector.load %arg13[%669, %c0_221, %c0_222] : memref<8x8x128xf32, #tpu.memory_space<vmem>>, vector<1x8x128xf32>
    %671 = vector.shape_cast %670 : vector<1x8x128xf32> to vector<8x128xf32>
    %672 = vector.shape_cast %668 : vector<8x128xf32> to vector<1x8x128xf32>
    tpu.vector_store %arg13[%669, %c0_221, %c0_222], %672 {strides = array<i32>} : memref<8x8x128xf32, #tpu.memory_space<vmem>>, vector<1x8x128xf32>,
    %c1_i32_223 = arith.constant 1 : i32
    %673 = arith.index_cast %c1_i32_223 : i32 to index
    %c0_224 = arith.constant 0 : index
    %c0_225 = arith.constant 0 : index
    %674 = vector.load %arg16[%673, %c0_224, %c0_225] : memref<8x8x512xf32, #tpu.memory_space<vmem>>, vector<1x8x512xf32>
    %675 = vector.shape_cast %674 : vector<1x8x512xf32> to vector<8x512xf32>
    %cst_226 = arith.constant dense<0.000000e+00> : vector<8x512xf32>
    %676 = tpu.matmul %668, %646, %cst_226 {dimension_numbers = #tpu.dot_dimension_numbers<[1], [0], [0], [1], [0, 0, 1, 1], [], []>} : vector<8x128xf32>, vector<128x512xf32>, vector<8x512xf32> -> vector<8x512xf32>
    %677 = arith.addf %675, %676 : vector<8x512xf32>
    %678 = vector.extract_strided_slice %677 {offsets = [0, 0], sizes = [8, 384], strides = [1, 1]} : vector<8x512xf32> to vector<8x384xf32>
    %679 = arith.negf %678 : vector<8x384xf32>
    %680 = math.exp %679 : vector<8x384xf32>
    %cst_227 = arith.constant 1.000000e+00 : f32
    %681 = vector.broadcast %cst_227 : f32 to vector<8x384xf32>
    %682 = arith.addf %681, %680 : vector<8x384xf32>
    %683 = arith.divf %681, %682 : vector<8x384xf32>
    %684 = vector.extract_strided_slice %683 {offsets = [0, 0], sizes = [8, 128], strides = [1, 1]} : vector<8x384xf32> to vector<8x128xf32>
    %685 = vector.extract_strided_slice %683 {offsets = [0, 128], sizes = [8, 128], strides = [1, 1]} : vector<8x384xf32> to vector<8x128xf32>
    %686 = vector.extract_strided_slice %683 {offsets = [0, 256], sizes = [8, 128], strides = [1, 1]} : vector<8x384xf32> to vector<8x128xf32>
    %687 = vector.extract_strided_slice %677 {offsets = [0, 384], sizes = [8, 128], strides = [1, 1]} : vector<8x512xf32> to vector<8x128xf32>
    %688 = math.tanh %687 : vector<8x128xf32>
    %689 = arith.mulf %685, %666 : vector<8x128xf32>
    %690 = arith.mulf %684, %688 : vector<8x128xf32>
    %691 = arith.addf %689, %690 : vector<8x128xf32>
    %692 = math.tanh %691 : vector<8x128xf32>
    %693 = arith.mulf %686, %692 : vector<8x128xf32>
    %694 = arith.index_cast %c1_i32_223 : i32 to index
    %c0_228 = arith.constant 0 : index
    %c0_229 = arith.constant 0 : index
    %695 = vector.load %arg13[%694, %c0_228, %c0_229] : memref<8x8x128xf32, #tpu.memory_space<vmem>>, vector<1x8x128xf32>
    %696 = vector.shape_cast %695 : vector<1x8x128xf32> to vector<8x128xf32>
    %697 = vector.shape_cast %693 : vector<8x128xf32> to vector<1x8x128xf32>
    tpu.vector_store %arg13[%694, %c0_228, %c0_229], %697 {strides = array<i32>} : memref<8x8x128xf32, #tpu.memory_space<vmem>>, vector<1x8x128xf32>,
    %c2_i32_230 = arith.constant 2 : i32
    %698 = arith.index_cast %c2_i32_230 : i32 to index
    %c0_231 = arith.constant 0 : index
    %c0_232 = arith.constant 0 : index
    %699 = vector.load %arg16[%698, %c0_231, %c0_232] : memref<8x8x512xf32, #tpu.memory_space<vmem>>, vector<1x8x512xf32>
    %700 = vector.shape_cast %699 : vector<1x8x512xf32> to vector<8x512xf32>
    %cst_233 = arith.constant dense<0.000000e+00> : vector<8x512xf32>
    %701 = tpu.matmul %693, %646, %cst_233 {dimension_numbers = #tpu.dot_dimension_numbers<[1], [0], [0], [1], [0, 0, 1, 1], [], []>} : vector<8x128xf32>, vector<128x512xf32>, vector<8x512xf32> -> vector<8x512xf32>
    %702 = arith.addf %700, %701 : vector<8x512xf32>
    %703 = vector.extract_strided_slice %702 {offsets = [0, 0], sizes = [8, 384], strides = [1, 1]} : vector<8x512xf32> to vector<8x384xf32>
    %704 = arith.negf %703 : vector<8x384xf32>
    %705 = math.exp %704 : vector<8x384xf32>
    %cst_234 = arith.constant 1.000000e+00 : f32
    %706 = vector.broadcast %cst_234 : f32 to vector<8x384xf32>
    %707 = arith.addf %706, %705 : vector<8x384xf32>
    %708 = arith.divf %706, %707 : vector<8x384xf32>
    %709 = vector.extract_strided_slice %708 {offsets = [0, 0], sizes = [8, 128], strides = [1, 1]} : vector<8x384xf32> to vector<8x128xf32>
    %710 = vector.extract_strided_slice %708 {offsets = [0, 128], sizes = [8, 128], strides = [1, 1]} : vector<8x384xf32> to vector<8x128xf32>
    %711 = vector.extract_strided_slice %708 {offsets = [0, 256], sizes = [8, 128], strides = [1, 1]} : vector<8x384xf32> to vector<8x128xf32>
    %712 = vector.extract_strided_slice %702 {offsets = [0, 384], sizes = [8, 128], strides = [1, 1]} : vector<8x512xf32> to vector<8x128xf32>
    %713 = math.tanh %712 : vector<8x128xf32>
    %714 = arith.mulf %710, %691 : vector<8x128xf32>
    %715 = arith.mulf %709, %713 : vector<8x128xf32>
    %716 = arith.addf %714, %715 : vector<8x128xf32>
    %717 = math.tanh %716 : vector<8x128xf32>
    %718 = arith.mulf %711, %717 : vector<8x128xf32>
    %719 = arith.index_cast %c2_i32_230 : i32 to index
    %c0_235 = arith.constant 0 : index
    %c0_236 = arith.constant 0 : index
    %720 = vector.load %arg13[%719, %c0_235, %c0_236] : memref<8x8x128xf32, #tpu.memory_space<vmem>>, vector<1x8x128xf32>
    %721 = vector.shape_cast %720 : vector<1x8x128xf32> to vector<8x128xf32>
    %722 = vector.shape_cast %718 : vector<8x128xf32> to vector<1x8x128xf32>
    tpu.vector_store %arg13[%719, %c0_235, %c0_236], %722 {strides = array<i32>} : memref<8x8x128xf32, #tpu.memory_space<vmem>>, vector<1x8x128xf32>,
    %c3_i32_237 = arith.constant 3 : i32
    %723 = arith.index_cast %c3_i32_237 : i32 to index
    %c0_238 = arith.constant 0 : index
    %c0_239 = arith.constant 0 : index
    %724 = vector.load %arg16[%723, %c0_238, %c0_239] : memref<8x8x512xf32, #tpu.memory_space<vmem>>, vector<1x8x512xf32>
    %725 = vector.shape_cast %724 : vector<1x8x512xf32> to vector<8x512xf32>
    %cst_240 = arith.constant dense<0.000000e+00> : vector<8x512xf32>
    %726 = tpu.matmul %718, %646, %cst_240 {dimension_numbers = #tpu.dot_dimension_numbers<[1], [0], [0], [1], [0, 0, 1, 1], [], []>} : vector<8x128xf32>, vector<128x512xf32>, vector<8x512xf32> -> vector<8x512xf32>
    %727 = arith.addf %725, %726 : vector<8x512xf32>
    %728 = vector.extract_strided_slice %727 {offsets = [0, 0], sizes = [8, 384], strides = [1, 1]} : vector<8x512xf32> to vector<8x384xf32>
    %729 = arith.negf %728 : vector<8x384xf32>
    %730 = math.exp %729 : vector<8x384xf32>
    %cst_241 = arith.constant 1.000000e+00 : f32
    %731 = vector.broadcast %cst_241 : f32 to vector<8x384xf32>
    %732 = arith.addf %731, %730 : vector<8x384xf32>
    %733 = arith.divf %731, %732 : vector<8x384xf32>
    %734 = vector.extract_strided_slice %733 {offsets = [0, 0], sizes = [8, 128], strides = [1, 1]} : vector<8x384xf32> to vector<8x128xf32>
    %735 = vector.extract_strided_slice %733 {offsets = [0, 128], sizes = [8, 128], strides = [1, 1]} : vector<8x384xf32> to vector<8x128xf32>
    %736 = vector.extract_strided_slice %733 {offsets = [0, 256], sizes = [8, 128], strides = [1, 1]} : vector<8x384xf32> to vector<8x128xf32>
    %737 = vector.extract_strided_slice %727 {offsets = [0, 384], sizes = [8, 128], strides = [1, 1]} : vector<8x512xf32> to vector<8x128xf32>
    %738 = math.tanh %737 : vector<8x128xf32>
    %739 = arith.mulf %735, %716 : vector<8x128xf32>
    %740 = arith.mulf %734, %738 : vector<8x128xf32>
    %741 = arith.addf %739, %740 : vector<8x128xf32>
    %742 = math.tanh %741 : vector<8x128xf32>
    %743 = arith.mulf %736, %742 : vector<8x128xf32>
    %744 = arith.index_cast %c3_i32_237 : i32 to index
    %c0_242 = arith.constant 0 : index
    %c0_243 = arith.constant 0 : index
    %745 = vector.load %arg13[%744, %c0_242, %c0_243] : memref<8x8x128xf32, #tpu.memory_space<vmem>>, vector<1x8x128xf32>
    %746 = vector.shape_cast %745 : vector<1x8x128xf32> to vector<8x128xf32>
    %747 = vector.shape_cast %743 : vector<8x128xf32> to vector<1x8x128xf32>
    tpu.vector_store %arg13[%744, %c0_242, %c0_243], %747 {strides = array<i32>} : memref<8x8x128xf32, #tpu.memory_space<vmem>>, vector<1x8x128xf32>,
    %c4_i32_244 = arith.constant 4 : i32
    %748 = arith.index_cast %c4_i32_244 : i32 to index
    %c0_245 = arith.constant 0 : index
    %c0_246 = arith.constant 0 : index
    %749 = vector.load %arg16[%748, %c0_245, %c0_246] : memref<8x8x512xf32, #tpu.memory_space<vmem>>, vector<1x8x512xf32>
    %750 = vector.shape_cast %749 : vector<1x8x512xf32> to vector<8x512xf32>
    %cst_247 = arith.constant dense<0.000000e+00> : vector<8x512xf32>
    %751 = tpu.matmul %743, %646, %cst_247 {dimension_numbers = #tpu.dot_dimension_numbers<[1], [0], [0], [1], [0, 0, 1, 1], [], []>} : vector<8x128xf32>, vector<128x512xf32>, vector<8x512xf32> -> vector<8x512xf32>
    %752 = arith.addf %750, %751 : vector<8x512xf32>
    %753 = vector.extract_strided_slice %752 {offsets = [0, 0], sizes = [8, 384], strides = [1, 1]} : vector<8x512xf32> to vector<8x384xf32>
    %754 = arith.negf %753 : vector<8x384xf32>
    %755 = math.exp %754 : vector<8x384xf32>
    %cst_248 = arith.constant 1.000000e+00 : f32
    %756 = vector.broadcast %cst_248 : f32 to vector<8x384xf32>
    %757 = arith.addf %756, %755 : vector<8x384xf32>
    %758 = arith.divf %756, %757 : vector<8x384xf32>
    %759 = vector.extract_strided_slice %758 {offsets = [0, 0], sizes = [8, 128], strides = [1, 1]} : vector<8x384xf32> to vector<8x128xf32>
    %760 = vector.extract_strided_slice %758 {offsets = [0, 128], sizes = [8, 128], strides = [1, 1]} : vector<8x384xf32> to vector<8x128xf32>
    %761 = vector.extract_strided_slice %758 {offsets = [0, 256], sizes = [8, 128], strides = [1, 1]} : vector<8x384xf32> to vector<8x128xf32>
    %762 = vector.extract_strided_slice %752 {offsets = [0, 384], sizes = [8, 128], strides = [1, 1]} : vector<8x512xf32> to vector<8x128xf32>
    %763 = math.tanh %762 : vector<8x128xf32>
    %764 = arith.mulf %760, %741 : vector<8x128xf32>
    %765 = arith.mulf %759, %763 : vector<8x128xf32>
    %766 = arith.addf %764, %765 : vector<8x128xf32>
    %767 = math.tanh %766 : vector<8x128xf32>
    %768 = arith.mulf %761, %767 : vector<8x128xf32>
    %769 = arith.index_cast %c4_i32_244 : i32 to index
    %c0_249 = arith.constant 0 : index
    %c0_250 = arith.constant 0 : index
    %770 = vector.load %arg13[%769, %c0_249, %c0_250] : memref<8x8x128xf32, #tpu.memory_space<vmem>>, vector<1x8x128xf32>
    %771 = vector.shape_cast %770 : vector<1x8x128xf32> to vector<8x128xf32>
    %772 = vector.shape_cast %768 : vector<8x128xf32> to vector<1x8x128xf32>
    tpu.vector_store %arg13[%769, %c0_249, %c0_250], %772 {strides = array<i32>} : memref<8x8x128xf32, #tpu.memory_space<vmem>>, vector<1x8x128xf32>,
    %c5_i32_251 = arith.constant 5 : i32
    %773 = arith.index_cast %c5_i32_251 : i32 to index
    %c0_252 = arith.constant 0 : index
    %c0_253 = arith.constant 0 : index
    %774 = vector.load %arg16[%773, %c0_252, %c0_253] : memref<8x8x512xf32, #tpu.memory_space<vmem>>, vector<1x8x512xf32>
    %775 = vector.shape_cast %774 : vector<1x8x512xf32> to vector<8x512xf32>
    %cst_254 = arith.constant dense<0.000000e+00> : vector<8x512xf32>
    %776 = tpu.matmul %768, %646, %cst_254 {dimension_numbers = #tpu.dot_dimension_numbers<[1], [0], [0], [1], [0, 0, 1, 1], [], []>} : vector<8x128xf32>, vector<128x512xf32>, vector<8x512xf32> -> vector<8x512xf32>
    %777 = arith.addf %775, %776 : vector<8x512xf32>
    %778 = vector.extract_strided_slice %777 {offsets = [0, 0], sizes = [8, 384], strides = [1, 1]} : vector<8x512xf32> to vector<8x384xf32>
    %779 = arith.negf %778 : vector<8x384xf32>
    %780 = math.exp %779 : vector<8x384xf32>
    %cst_255 = arith.constant 1.000000e+00 : f32
    %781 = vector.broadcast %cst_255 : f32 to vector<8x384xf32>
    %782 = arith.addf %781, %780 : vector<8x384xf32>
    %783 = arith.divf %781, %782 : vector<8x384xf32>
    %784 = vector.extract_strided_slice %783 {offsets = [0, 0], sizes = [8, 128], strides = [1, 1]} : vector<8x384xf32> to vector<8x128xf32>
    %785 = vector.extract_strided_slice %783 {offsets = [0, 128], sizes = [8, 128], strides = [1, 1]} : vector<8x384xf32> to vector<8x128xf32>
    %786 = vector.extract_strided_slice %783 {offsets = [0, 256], sizes = [8, 128], strides = [1, 1]} : vector<8x384xf32> to vector<8x128xf32>
    %787 = vector.extract_strided_slice %777 {offsets = [0, 384], sizes = [8, 128], strides = [1, 1]} : vector<8x512xf32> to vector<8x128xf32>
    %788 = math.tanh %787 : vector<8x128xf32>
    %789 = arith.mulf %785, %766 : vector<8x128xf32>
    %790 = arith.mulf %784, %788 : vector<8x128xf32>
    %791 = arith.addf %789, %790 : vector<8x128xf32>
    %792 = math.tanh %791 : vector<8x128xf32>
    %793 = arith.mulf %786, %792 : vector<8x128xf32>
    %794 = arith.index_cast %c5_i32_251 : i32 to index
    %c0_256 = arith.constant 0 : index
    %c0_257 = arith.constant 0 : index
    %795 = vector.load %arg13[%794, %c0_256, %c0_257] : memref<8x8x128xf32, #tpu.memory_space<vmem>>, vector<1x8x128xf32>
    %796 = vector.shape_cast %795 : vector<1x8x128xf32> to vector<8x128xf32>
    %797 = vector.shape_cast %793 : vector<8x128xf32> to vector<1x8x128xf32>
    tpu.vector_store %arg13[%794, %c0_256, %c0_257], %797 {strides = array<i32>} : memref<8x8x128xf32, #tpu.memory_space<vmem>>, vector<1x8x128xf32>,
    %c6_i32_258 = arith.constant 6 : i32
    %798 = arith.index_cast %c6_i32_258 : i32 to index
    %c0_259 = arith.constant 0 : index
    %c0_260 = arith.constant 0 : index
    %799 = vector.load %arg16[%798, %c0_259, %c0_260] : memref<8x8x512xf32, #tpu.memory_space<vmem>>, vector<1x8x512xf32>
    %800 = vector.shape_cast %799 : vector<1x8x512xf32> to vector<8x512xf32>
    %cst_261 = arith.constant dense<0.000000e+00> : vector<8x512xf32>
    %801 = tpu.matmul %793, %646, %cst_261 {dimension_numbers = #tpu.dot_dimension_numbers<[1], [0], [0], [1], [0, 0, 1, 1], [], []>} : vector<8x128xf32>, vector<128x512xf32>, vector<8x512xf32> -> vector<8x512xf32>
    %802 = arith.addf %800, %801 : vector<8x512xf32>
    %803 = vector.extract_strided_slice %802 {offsets = [0, 0], sizes = [8, 384], strides = [1, 1]} : vector<8x512xf32> to vector<8x384xf32>
    %804 = arith.negf %803 : vector<8x384xf32>
    %805 = math.exp %804 : vector<8x384xf32>
    %cst_262 = arith.constant 1.000000e+00 : f32
    %806 = vector.broadcast %cst_262 : f32 to vector<8x384xf32>
    %807 = arith.addf %806, %805 : vector<8x384xf32>
    %808 = arith.divf %806, %807 : vector<8x384xf32>
    %809 = vector.extract_strided_slice %808 {offsets = [0, 0], sizes = [8, 128], strides = [1, 1]} : vector<8x384xf32> to vector<8x128xf32>
    %810 = vector.extract_strided_slice %808 {offsets = [0, 128], sizes = [8, 128], strides = [1, 1]} : vector<8x384xf32> to vector<8x128xf32>
    %811 = vector.extract_strided_slice %808 {offsets = [0, 256], sizes = [8, 128], strides = [1, 1]} : vector<8x384xf32> to vector<8x128xf32>
    %812 = vector.extract_strided_slice %802 {offsets = [0, 384], sizes = [8, 128], strides = [1, 1]} : vector<8x512xf32> to vector<8x128xf32>
    %813 = math.tanh %812 : vector<8x128xf32>
    %814 = arith.mulf %810, %791 : vector<8x128xf32>
    %815 = arith.mulf %809, %813 : vector<8x128xf32>
    %816 = arith.addf %814, %815 : vector<8x128xf32>
    %817 = math.tanh %816 : vector<8x128xf32>
    %818 = arith.mulf %811, %817 : vector<8x128xf32>
    %819 = arith.index_cast %c6_i32_258 : i32 to index
    %c0_263 = arith.constant 0 : index
    %c0_264 = arith.constant 0 : index
    %820 = vector.load %arg13[%819, %c0_263, %c0_264] : memref<8x8x128xf32, #tpu.memory_space<vmem>>, vector<1x8x128xf32>
    %821 = vector.shape_cast %820 : vector<1x8x128xf32> to vector<8x128xf32>
    %822 = vector.shape_cast %818 : vector<8x128xf32> to vector<1x8x128xf32>
    tpu.vector_store %arg13[%819, %c0_263, %c0_264], %822 {strides = array<i32>} : memref<8x8x128xf32, #tpu.memory_space<vmem>>, vector<1x8x128xf32>,
    %c7_i32_265 = arith.constant 7 : i32
    %823 = arith.index_cast %c7_i32_265 : i32 to index
    %c0_266 = arith.constant 0 : index
    %c0_267 = arith.constant 0 : index
    %824 = vector.load %arg16[%823, %c0_266, %c0_267] : memref<8x8x512xf32, #tpu.memory_space<vmem>>, vector<1x8x512xf32>
    %825 = vector.shape_cast %824 : vector<1x8x512xf32> to vector<8x512xf32>
    %cst_268 = arith.constant dense<0.000000e+00> : vector<8x512xf32>
    %826 = tpu.matmul %818, %646, %cst_268 {dimension_numbers = #tpu.dot_dimension_numbers<[1], [0], [0], [1], [0, 0, 1, 1], [], []>} : vector<8x128xf32>, vector<128x512xf32>, vector<8x512xf32> -> vector<8x512xf32>
    %827 = arith.addf %825, %826 : vector<8x512xf32>
    %828 = vector.extract_strided_slice %827 {offsets = [0, 0], sizes = [8, 384], strides = [1, 1]} : vector<8x512xf32> to vector<8x384xf32>
    %829 = arith.negf %828 : vector<8x384xf32>
    %830 = math.exp %829 : vector<8x384xf32>
    %cst_269 = arith.constant 1.000000e+00 : f32
    %831 = vector.broadcast %cst_269 : f32 to vector<8x384xf32>
    %832 = arith.addf %831, %830 : vector<8x384xf32>
    %833 = arith.divf %831, %832 : vector<8x384xf32>
    %834 = vector.extract_strided_slice %833 {offsets = [0, 0], sizes = [8, 128], strides = [1, 1]} : vector<8x384xf32> to vector<8x128xf32>
    %835 = vector.extract_strided_slice %833 {offsets = [0, 128], sizes = [8, 128], strides = [1, 1]} : vector<8x384xf32> to vector<8x128xf32>
    %836 = vector.extract_strided_slice %833 {offsets = [0, 256], sizes = [8, 128], strides = [1, 1]} : vector<8x384xf32> to vector<8x128xf32>
    %837 = vector.extract_strided_slice %827 {offsets = [0, 384], sizes = [8, 128], strides = [1, 1]} : vector<8x512xf32> to vector<8x128xf32>
    %838 = math.tanh %837 : vector<8x128xf32>
    %839 = arith.mulf %835, %816 : vector<8x128xf32>
    %840 = arith.mulf %834, %838 : vector<8x128xf32>
    %841 = arith.addf %839, %840 : vector<8x128xf32>
    %842 = math.tanh %841 : vector<8x128xf32>
    %843 = arith.mulf %836, %842 : vector<8x128xf32>
    %844 = arith.index_cast %c7_i32_265 : i32 to index
    %c0_270 = arith.constant 0 : index
    %c0_271 = arith.constant 0 : index
    %845 = vector.load %arg13[%844, %c0_270, %c0_271] : memref<8x8x128xf32, #tpu.memory_space<vmem>>, vector<1x8x128xf32>
    %846 = vector.shape_cast %845 : vector<1x8x128xf32> to vector<8x128xf32>
    %847 = vector.shape_cast %843 : vector<8x128xf32> to vector<1x8x128xf32>
    tpu.vector_store %arg13[%844, %c0_270, %c0_271], %847 {strides = array<i32>} : memref<8x8x128xf32, #tpu.memory_space<vmem>>, vector<1x8x128xf32>,
    %c8_i32_272 = arith.constant 8 : i32
    return
  }
}

</mosaic_0001>

<bundles_post_ra>
// kernel: lstm_autoencoder_forward.1
= control target key start
LH: loop header
LB: loop body
LE: loop exit
PB: predicated region body
PF: predicated region fallthrough
CT: control target
= control target key end

     0   :  { %18 = vsyncpa [#allocation6], 0  ;;  %s13053_s0 = inlined_call_operand.vmem [shape: f32[8,8,128], index: 0, kind: input, shape index: {}]   ;;  %s13054_s1 = inlined_call_operand.hbm [shape: f32[128,512], index: 1, kind: input, shape index: {}]   ;;  %s13055_s2 = inlined_call_operand.hbm [shape: f32[128,512], index: 2, kind: input, shape index: {}]   ;;  %s13056_s3 = inlined_call_operand.vmem [shape: f32[8,512], index: 3, kind: input, shape index: {}]   ;;  %s13057_s4 = inlined_call_operand.hbm [shape: f32[128,512], index: 4, kind: input, shape index: {}]   ;;  %s13058_s5 = inlined_call_operand.hbm [shape: f32[128,512], index: 5, kind: input, shape index: {}]   ;;  %s13059_s6 = inlined_call_operand.vmem [shape: f32[8,512], index: 6, kind: input, shape index: {}]   ;;  %s13060_s7 = inlined_call_operand.hbm [shape: f32[128,512], index: 7, kind: input, shape index: {}]   ;;  %s13061_s8 = inlined_call_operand.hbm [shape: f32[128,512], index: 8, kind: input, shape index: {}]   ;;  %s13062_s9 = inlined_call_operand.vmem [shape: f32[8,512], index: 9, kind: input, shape index: {}]   ;;  %s13063_s10 = inlined_call_operand.hbm [shape: f32[128,512], index: 10, kind: input, shape index: {}]   ;;  %s13064_s11 = inlined_call_operand.hbm [shape: f32[128,512], index: 11, kind: input, shape index: {}]   ;;  %s13065_s12 = inlined_call_operand.vmem [shape: f32[8,512], index: 12, kind: input, shape index: {}]   ;;  %s13066_s13 = inlined_call_operand.vmem [shape: f32[8,8,128], index: 13, kind: output, shape index: {}]  }
   0x1   :  { %19 = vsyncpa [#allocation8], 0 }
   0x2   :  { %20 = vsyncpa [#allocation11], 0 }
   0x3   :  { %21 = vsyncpa [#allocation14], 0 }
   0x4   :  { %22 = vsyncpa [#allocation17], 0  ;;  %s10894_s25 = smov [#allocation7]   ;;  %s10895_s27 = smov [#allocation10]  }
   0x5   :  { %s42_s26 = sshll.u32 %s10894_s25, 4  ;;  %s68_s28 = sshll.u32 %s10895_s27, 4  ;;  %s43_s26 = int_to_ptr.vmem [resolvable:$true] %s42_s26  ;;  %s10975_s28 = int_to_ptr.vmem [resolvable:$true] %s68_s28 }
   0x6   :  { %s10708_s14 = scalar_lea.hbm %s13055_s2, 8192 }
   0x7   :  { %p10709_p0 = scmp.ne.s32.totalorder %s13055_s2, %s10708_s14  ;;  %p10712_p1 = scmp.lt.u32.totalorder %s10708_s14, %s13055_s2 }
   0x9   :  { %p10714_p2 = pnand %p10712_p1, %p10709_p0 }
   0xb   :  { %10717 = shalt.err (!%p10714_p2)
}
   0xc   :  { %s10718_s19 = scalar_lea.vmem %s43_s26, 8192  ;;  %p10723_p4 = scmp.lt.s32.totalorder %s43_s26, %s43_s26 }
   0xd   :  { %p10719_p3 = scmp.ne.s32.totalorder %s43_s26, %s10718_s19  ;;  %p10724_p5 = scmp.lt.s32.totalorder %s10718_s19, %s10718_s19 }
   0xf   :  { %p10725_p6 = por %p10724_p5, %p10723_p4 }
  0x11   :  { %p10726_p7 = pnand %p10725_p6, %p10719_p3 }
  0x13   :  { %10729 = shalt.err (!%p10726_p7)
}
  0x14   :  { %s10896_s20 = smov 512   ;;  %s10897_s21 = smov 32  }
  0x15   :  { %48 = dma.hbm_to_vmem [thread:$0]  %s13055_s2, 8192, %s43_s26, [#allocation8], %s10896_s20, %s10896_s20, %s10897_s21  }
  0x16   :  { %s10730_s27 = scalar_lea.hbm %s13058_s5, 8192 }
  0x17   :  { %p10731_p8 = scmp.ne.s32.totalorder %s13058_s5, %s10730_s27  ;;  %p10734_p9 = scmp.lt.u32.totalorder %s10730_s27, %s13058_s5 }
  0x19   :  { %p10736_p10 = pnand %p10734_p9, %p10731_p8 }
  0x1b   :  { %10739 = shalt.err (!%p10736_p10)
}
  0x1c   :  { %s10740_s16 = scalar_lea.vmem %s10975_s28, 8192  ;;  %p10745_p12 = scmp.lt.s32.totalorder %s10975_s28, %s10975_s28 }
  0x1d   :  { %p10741_p11 = scmp.ne.s32.totalorder %s10975_s28, %s10740_s16  ;;  %p10746_p13 = scmp.lt.s32.totalorder %s10740_s16, %s10740_s16 }
  0x1f   :  { %p10747_p0 = por %p10746_p13, %p10745_p12 }
  0x21   :  { %p10748_p1 = pnand %p10747_p0, %p10741_p11 }
  0x23   :  { %10751 = shalt.err (!%p10748_p1)
}
  0x24   :  { %74 = dma.hbm_to_vmem [thread:$0]  %s13058_s5, 8192, %s10975_s28, [#allocation11], %s10896_s20, %s10896_s20, %s10897_s21  }
  0x25   :  { %s10898_s17 = smov [#allocation13]   ;;  %s10899_s19 = smov [#allocation5]  }
  0x26   :  { %s94_s18 = sshll.u32 %s10898_s17, 4  ;;  %s30_s22 = sshll.u32 %s10899_s19, 4  ;;  %s95_s18 = int_to_ptr.vmem [resolvable:$true] %s94_s18  ;;  %s11012_s22 = int_to_ptr.vmem [resolvable:$true] %s30_s22 }
  0x27   :  { %s10752_s25 = scalar_lea.hbm %s13061_s8, 8192 }
  0x28   :  { %p10753_p2 = scmp.ne.s32.totalorder %s13061_s8, %s10752_s25  ;;  %p10756_p3 = scmp.lt.u32.totalorder %s10752_s25, %s13061_s8 }
  0x2a   :  { %p10758_p4 = pnand %p10756_p3, %p10753_p2 }
  0x2c   :  { %10761 = shalt.err (!%p10758_p4)
}
  0x2d   :  { %s10762_s5 = scalar_lea.vmem %s95_s18, 8192  ;;  %p10767_p6 = scmp.lt.s32.totalorder %s95_s18, %s95_s18 }
  0x2e   :  { %p10763_p5 = scmp.ne.s32.totalorder %s95_s18, %s10762_s5  ;;  %p10768_p7 = scmp.lt.s32.totalorder %s10762_s5, %s10762_s5 }
  0x30   :  { %p10769_p8 = por %p10768_p7, %p10767_p6 }
  0x32   :  { %p10770_p9 = pnand %p10769_p8, %p10763_p5 }
  0x34   :  { %10773 = shalt.err (!%p10770_p9)
}
  0x35   :  { %100 = dma.hbm_to_vmem [thread:$0]  %s13061_s8, 8192, %s95_s18, [#allocation14], %s10896_s20, %s10896_s20, %s10897_s21  }
  0x36   :  { %s10774_s26 = scalar_lea.hbm %s13054_s1, 8192 }
  0x37   :  { %p10775_p10 = scmp.ne.s32.totalorder %s13054_s1, %s10774_s26  ;;  %p10778_p11 = scmp.lt.u32.totalorder %s10774_s26, %s13054_s1 }
  0x39   :  { %p10780_p12 = pnand %p10778_p11, %p10775_p10 }
  0x3b   :  { %10783 = shalt.err (!%p10780_p12)
}
  0x3c   :  { %s10784_s25 = scalar_lea.vmem %s11012_s22, 8192  ;;  %p10789_p0 = scmp.lt.s32.totalorder %s11012_s22, %s11012_s22 }
  0x3d   :  { %p10785_p13 = scmp.ne.s32.totalorder %s11012_s22, %s10784_s25  ;;  %p10790_p1 = scmp.lt.s32.totalorder %s10784_s25, %s10784_s25 }
  0x3f   :  { %p10791_p2 = por %p10790_p1, %p10789_p0 }
  0x41   :  { %p10792_p3 = pnand %p10791_p2, %p10785_p13 }
  0x43   :  { %10795 = shalt.err (!%p10792_p3)
}
  0x44   :  { %36 = dma.hbm_to_vmem [thread:$0]  %s13054_s1, 8192, %s11012_s22, [#allocation6], %s10896_s20, %s10896_s20, %s10897_s21  }
  0x45   :  { %s10900_s27 = smov [#allocation9]   ;;  %s10901_s30 = smov [#allocation12]  }
  0x46   :  { %s56_s29 = sshll.u32 %s10900_s27, 4  ;;  %s82_s14 = sshll.u32 %s10901_s30, 4  ;;  %s57_s29 = int_to_ptr.vmem [resolvable:$true] %s56_s29  ;;  %s11049_s14 = int_to_ptr.vmem [resolvable:$true] %s82_s14 }
  0x47   :  { %s10796_s15 = scalar_lea.hbm %s13057_s4, 8192 }
  0x48   :  { %p10797_p4 = scmp.ne.s32.totalorder %s13057_s4, %s10796_s15  ;;  %p10800_p5 = scmp.lt.u32.totalorder %s10796_s15, %s13057_s4 }
  0x4a   :  { %p10802_p6 = pnand %p10800_p5, %p10797_p4 }
  0x4c   :  { %10805 = shalt.err (!%p10802_p6)
}
  0x4d   :  { %s10806_s1 = scalar_lea.vmem %s57_s29, 8192  ;;  %p10811_p8 = scmp.lt.s32.totalorder %s57_s29, %s57_s29 }
  0x4e   :  { %p10807_p7 = scmp.ne.s32.totalorder %s57_s29, %s10806_s1  ;;  %p10812_p9 = scmp.lt.s32.totalorder %s10806_s1, %s10806_s1 }
  0x50   :  { %p10813_p10 = por %p10812_p9, %p10811_p8 }
  0x52   :  { %p10814_p11 = pnand %p10813_p10, %p10807_p7 }
  0x54   :  { %10817 = shalt.err (!%p10814_p11)
}
  0x55   :  { %62 = dma.hbm_to_vmem [thread:$0]  %s13057_s4, 8192, %s57_s29, [#allocation8], %s10896_s20, %s10896_s20, %s10897_s21  }
  0x56   :  { %s10818_s25 = scalar_lea.hbm %s13060_s7, 8192 }
  0x57   :  { %p10819_p12 = scmp.ne.s32.totalorder %s13060_s7, %s10818_s25  ;;  %p10822_p13 = scmp.lt.u32.totalorder %s10818_s25, %s13060_s7 }
  0x59   :  { %p10824_p0 = pnand %p10822_p13, %p10819_p12 }
  0x5b   :  { %10827 = shalt.err (!%p10824_p0)
}
  0x5c   :  { %s10828_s5 = scalar_lea.vmem %s11049_s14, 8192  ;;  %p10833_p2 = scmp.lt.s32.totalorder %s11049_s14, %s11049_s14 }
  0x5d   :  { %p10829_p1 = scmp.ne.s32.totalorder %s11049_s14, %s10828_s5  ;;  %p10834_p3 = scmp.lt.s32.totalorder %s10828_s5, %s10828_s5 }
  0x5f   :  { %p10835_p4 = por %p10834_p3, %p10833_p2 }
  0x61   :  { %p10836_p5 = pnand %p10835_p4, %p10829_p1 }
  0x63   :  { %10839 = shalt.err (!%p10836_p5)
}
  0x64   :  { %88 = dma.hbm_to_vmem [thread:$0]  %s13060_s7, 8192, %s11049_s14, [#allocation11], %s10896_s20, %s10896_s20, %s10897_s21  }
  0x65   :  { %s10902_s28 = smov [#allocation15]   ;;  %s10903_s16 = smov [#allocation16]  }
  0x66   :  { %s108_s15 = sshll.u32 %s10902_s28, 4  ;;  %s120_s2 = sshll.u32 %s10903_s16, 4  ;;  %s109_s15 = int_to_ptr.vmem [resolvable:$true] %s108_s15  ;;  %s11086_s2 = int_to_ptr.vmem [resolvable:$true] %s120_s2 }
  0x67   :  { %s10840_s1 = scalar_lea.hbm %s13063_s10, 8192 }
  0x68   :  { %p10841_p6 = scmp.ne.s32.totalorder %s13063_s10, %s10840_s1  ;;  %p10844_p7 = scmp.lt.u32.totalorder %s10840_s1, %s13063_s10 }
  0x6a   :  { %p10846_p8 = pnand %p10844_p7, %p10841_p6 }
  0x6c   :  { %10849 = shalt.err (!%p10846_p8)
}
  0x6d   :  { %s10850_s7 = scalar_lea.vmem %s109_s15, 8192  ;;  %p10855_p10 = scmp.lt.s32.totalorder %s109_s15, %s109_s15 }
  0x6e   :  { %p10851_p9 = scmp.ne.s32.totalorder %s109_s15, %s10850_s7  ;;  %p10856_p11 = scmp.lt.s32.totalorder %s10850_s7, %s10850_s7 }
  0x70   :  { %p10857_p12 = por %p10856_p11, %p10855_p10 }
  0x72   :  { %p10858_p13 = pnand %p10857_p12, %p10851_p9 }
  0x74   :  { %10861 = shalt.err (!%p10858_p13)
}
  0x75   :  { %114 = dma.hbm_to_vmem [thread:$0]  %s13063_s10, 8192, %s109_s15, [#allocation14], %s10896_s20, %s10896_s20, %s10897_s21  }
  0x76   :  { %s10862_s27 = scalar_lea.hbm %s13064_s11, 8192 }
  0x77   :  { %p10863_p0 = scmp.ne.s32.totalorder %s13064_s11, %s10862_s27  ;;  %p10866_p1 = scmp.lt.u32.totalorder %s10862_s27, %s13064_s11 }
  0x79   :  { %p10868_p2 = pnand %p10866_p1, %p10863_p0 }
  0x7b   :  { %10871 = shalt.err (!%p10868_p2)
}
  0x7c   :  { %s10872_s28 = scalar_lea.vmem %s11086_s2, 8192  ;;  %p10877_p4 = scmp.lt.s32.totalorder %s11086_s2, %s11086_s2 }
  0x7d   :  { %p10873_p3 = scmp.ne.s32.totalorder %s11086_s2, %s10872_s28  ;;  %p10878_p5 = scmp.lt.s32.totalorder %s10872_s28, %s10872_s28 }
  0x7f   :  { %p10879_p6 = por %p10878_p5, %p10877_p4 }
  0x81   :  { %p10880_p7 = pnand %p10879_p6, %p10873_p3 }
  0x83   :  { %10883 = shalt.err (!%p10880_p7)
}
  0x84   :  { %126 = dma.hbm_to_vmem [thread:$0]  %s13064_s11, 8192, %s11086_s2, [#allocation17], %s10896_s20, %s10896_s20, %s10897_s21  }
  0x85   :  { %10884 = dma.done.wait [#allocation6], 8192  }
  0x86   :  { %10885 = vsyncadd [#allocation6], 4294959104 }
  0x87   :  { %10886 = dma.done.wait [#allocation8], 16384  }
  0x88   :  { %10887 = vsyncadd [#allocation8], 4294950912 }
  0x89   :  { %10888 = dma.done.wait [#allocation11], 16384  }
  0x8a   :  { %10889 = vsyncadd [#allocation11], 4294950912 }
  0x8b   :  { %10890 = dma.done.wait [#allocation14], 16384  }
  0x8c   :  { %10891 = vsyncadd [#allocation14], 4294950912 }
  0x8d   :  { %10892 = dma.done.wait [#allocation17], 8192  }
  0x8e   :  { %10893 = vsyncadd [#allocation17], 4294959104  ;;  %v10904_v0 = vmov 0.0   ;;  %v162_v1 = vld [vmem:[#allocation5 + $0x8] sm:$0xff]  ;;  %v164_v3 = vld [vmem:[#allocation5 + $0x18] sm:$0xff] }
  0x8f   :  { %289 = vmatprep.mubr.f32.mxu0 %v10904_v0  ;;  %402 = vmatprep.mubr.f32.mxu1 %v10904_v0  ;;  %v166_v2 = vld [vmem:[#allocation5 + $0x28] sm:$0xff]  ;;  %v168_v5 = vld [vmem:[#allocation5 + $0x38] sm:$0xff]  ;;  %v161_v6 = vld [vmem:[#allocation5] sm:$0xff] }
  0x90   :  { %v7613_v4 = vpack.c.bf16 %v166_v2, %v162_v1  ;;  %v165_v7 = vld [vmem:[#allocation5 + $0x20] sm:$0xff]  ;;  %v7645_v8 = vpack.c.bf16 %v168_v5, %v164_v3  ;;  %v163_v10 = vld [vmem:[#allocation5 + $0x10] sm:$0xff]  ;;  %v170_v12 = vld [vmem:[#allocation5 + $0x48] sm:$0xff] }
  0x91   :  { %v7615_v9 = vpack.c.bf16 %v165_v7, %v161_v6  ;;  %v167_v11 = vld [vmem:[#allocation5 + $0x30] sm:$0xff]  ;;  %v174_v14 = vld [vmem:[#allocation5 + $0x68] sm:$0xff]  ;;  %v172_v15 = vld [vmem:[#allocation5 + $0x58] sm:$0xff] }
  0x92   :  { %7614 = vmatprep.subr.bf16.mxu0 %v7613_v4  ;;  %v7647_v13 = vpack.c.bf16 %v167_v11, %v163_v10  ;;  %v176_v16 = vld [vmem:[#allocation5 + $0x78] sm:$0xff]  ;;  %7646 = vmatprep.subr.bf16.mxu1 %v7645_v8  ;;  %v7617_v17 = vpack.c.bf16 %v174_v14, %v170_v12  ;;  %v169_v19 = vld [vmem:[#allocation5 + $0x40] sm:$0xff]  ;;  %v171_v21 = vld [vmem:[#allocation5 + $0x50] sm:$0xff] }
  0x93   :  { %7616 = vmatpush1.bf16.msra.mxu0 %v7615_v9  ;;  %v7649_v18 = vpack.c.bf16 %v176_v16, %v172_v15  ;;  %v173_v20 = vld [vmem:[#allocation5 + $0x60] sm:$0xff]  ;;  %v175_v23 = vld [vmem:[#allocation5 + $0x70] sm:$0xff]  ;;  %v178_v24 = vld [vmem:[#allocation5 + $0x88] sm:$0xff] }
  0x94   :  { %7648 = vmatpush1.bf16.msra.mxu1 %v7647_v13  ;;  %v7619_v22 = vpack.c.bf16 %v173_v20, %v169_v19  ;;  %v182_v25 = vld [vmem:[#allocation5 + $0xa8] sm:$0xff]  ;;  %7618 = vmatprep.subr.bf16.mxu0 %v7617_v17  ;;  %v7651_v26 = vpack.c.bf16 %v175_v23, %v171_v21  ;;  %v180_v28 = vld [vmem:[#allocation5 + $0x98] sm:$0xff]  ;;  %v177_v30 = vld [vmem:[#allocation5 + $0x80] sm:$0xff] }
  0x95   :  { %7650 = vmatprep.subr.bf16.mxu1 %v7649_v18  ;;  %v7621_v27 = vpack.c.bf16 %v182_v25, %v178_v24  ;;  %v184_v29 = vld [vmem:[#allocation5 + $0xb8] sm:$0xff]  ;;  %v181_v32 = vld [vmem:[#allocation5 + $0xa0] sm:$0xff]  ;;  %v179_v33 = vld [vmem:[#allocation5 + $0x90] sm:$0xff] }
  0x96   :  { %v7653_v31 = vpack.c.bf16 %v184_v29, %v180_v28  ;;  %v183_v34 = vld [vmem:[#allocation5 + $0xb0] sm:$0xff]  ;;  %v7623_v35 = vpack.c.bf16 %v181_v32, %v177_v30  ;;  %v186_v36 = vld [vmem:[#allocation5 + $0xc8] sm:$0xff]  ;;  %v188_v38 = vld [vmem:[#allocation5 + $0xd8] sm:$0xff] }
  0x97   :  { %7620 = vmatpush1.bf16.msra.mxu0 %v7619_v22  ;;  %v190_v37 = vld [vmem:[#allocation5 + $0xe8] sm:$0xff]  ;;  %v7655_v39 = vpack.c.bf16 %v183_v34, %v179_v33  ;;  %v192_v41 = vld [vmem:[#allocation5 + $0xf8] sm:$0xff]  ;;  %v185_v42 = vld [vmem:[#allocation5 + $0xc0] sm:$0xff] }
  0x98   :  { %7652 = vmatpush1.bf16.msra.mxu1 %v7651_v26  ;;  %7622 = vmatprep.subr.bf16.mxu0 %v7621_v27  ;;  %v7625_v40 = vpack.c.bf16 %v190_v37, %v186_v36  ;;  %v189_v43 = vld [vmem:[#allocation5 + $0xe0] sm:$0xff]  ;;  %v7657_v44 = vpack.c.bf16 %v192_v41, %v188_v38  ;;  %v187_v45 = vld [vmem:[#allocation5 + $0xd0] sm:$0xff]  ;;  %v194_v47 = vld [vmem:[#allocation5 + $0x108] sm:$0xff] }
  0x99   :  { %7654 = vmatprep.subr.bf16.mxu1 %v7653_v31  ;;  %v191_v46 = vld [vmem:[#allocation5 + $0xf0] sm:$0xff]  ;;  %v198_v48 = vld [vmem:[#allocation5 + $0x128] sm:$0xff]  ;;  %v196_v49 = vld [vmem:[#allocation5 + $0x118] sm:$0xff]  ;;  %v7627_v51 = vpack.c.bf16 %v189_v43, %v185_v42 }
  0x9a   :  { %v200_v50 = vld [vmem:[#allocation5 + $0x138] sm:$0xff]  ;;  %v7659_v52 = vpack.c.bf16 %v191_v46, %v187_v45  ;;  %v7629_v53 = vpack.c.bf16 %v198_v48, %v194_v47  ;;  %v193_v54 = vld [vmem:[#allocation5 + $0x100] sm:$0xff]  ;;  %v195_v56 = vld [vmem:[#allocation5 + $0x110] sm:$0xff] }
  0x9b   :  { %7624 = vmatpush1.bf16.msra.mxu0 %v7623_v35  ;;  %v197_v55 = vld [vmem:[#allocation5 + $0x120] sm:$0xff]  ;;  %v7661_v57 = vpack.c.bf16 %v200_v50, %v196_v49  ;;  %v199_v58 = vld [vmem:[#allocation5 + $0x130] sm:$0xff]  ;;  %v202_v59 = vld [vmem:[#allocation5 + $0x148] sm:$0xff] }
  0x9c   :  { %7656 = vmatpush1.bf16.msra.mxu1 %v7655_v39  ;;  %7626 = vmatprep.subr.bf16.mxu0 %v7625_v40  ;;  %v206_v60 = vld [vmem:[#allocation5 + $0x168] sm:$0xff]  ;;  %v204_v61 = vld [vmem:[#allocation5 + $0x158] sm:$0xff]  ;;  %v7631_v63 = vpack.c.bf16 %v197_v55, %v193_v54  ;;  %v7663_v1 = vpack.c.bf16 %v199_v58, %v195_v56  ;;  %v201_v3 = vld [vmem:[#allocation5 + $0x140] sm:$0xff] }
  0x9d   :  { %7658 = vmatprep.subr.bf16.mxu1 %v7657_v44  ;;  %v208_v62 = vld [vmem:[#allocation5 + $0x178] sm:$0xff]  ;;  %v7633_v2 = vpack.c.bf16 %v206_v60, %v202_v59  ;;  %v205_v4 = vld [vmem:[#allocation5 + $0x160] sm:$0xff]  ;;  %v203_v5 = vld [vmem:[#allocation5 + $0x150] sm:$0xff] }
  0x9e   :  { %v7665_v6 = vpack.c.bf16 %v208_v62, %v204_v61  ;;  %v207_v7 = vld [vmem:[#allocation5 + $0x170] sm:$0xff]  ;;  %v210_v8 = vld [vmem:[#allocation5 + $0x188] sm:$0xff]  ;;  %v212_v10 = vld [vmem:[#allocation5 + $0x198] sm:$0xff]  ;;  %v7635_v12 = vpack.c.bf16 %v205_v4, %v201_v3 }
  0x9f   :  { %7628 = vmatpush1.bf16.msra.mxu0 %v7627_v51  ;;  %v214_v9 = vld [vmem:[#allocation5 + $0x1a8] sm:$0xff]  ;;  %v216_v11 = vld [vmem:[#allocation5 + $0x1b8] sm:$0xff]  ;;  %v7667_v13 = vpack.c.bf16 %v207_v7, %v203_v5  ;;  %v209_v15 = vld [vmem:[#allocation5 + $0x180] sm:$0xff] }
  0xa0   :  { %7660 = vmatpush1.bf16.msra.mxu1 %v7659_v52  ;;  %7630 = vmatprep.subr.bf16.mxu0 %v7629_v53  ;;  %v7637_v14 = vpack.c.bf16 %v214_v9, %v210_v8  ;;  %v213_v16 = vld [vmem:[#allocation5 + $0x1a0] sm:$0xff]  ;;  %v211_v17 = vld [vmem:[#allocation5 + $0x190] sm:$0xff]  ;;  %v7669_v18 = vpack.c.bf16 %v216_v11, %v212_v10  ;;  %v218_v20 = vld [vmem:[#allocation5 + $0x1c8] sm:$0xff] }
  0xa1   :  { %7662 = vmatprep.subr.bf16.mxu1 %v7661_v57  ;;  %v215_v19 = vld [vmem:[#allocation5 + $0x1b0] sm:$0xff]  ;;  %v222_v21 = vld [vmem:[#allocation5 + $0x1e8] sm:$0xff]  ;;  %v220_v22 = vld [vmem:[#allocation5 + $0x1d8] sm:$0xff]  ;;  %v7639_v24 = vpack.c.bf16 %v213_v16, %v209_v15 }
  0xa2   :  { %v224_v23 = vld [vmem:[#allocation5 + $0x1f8] sm:$0xff]  ;;  %v7671_v25 = vpack.c.bf16 %v215_v19, %v211_v17  ;;  %v7641_v26 = vpack.c.bf16 %v222_v21, %v218_v20  ;;  %v217_v27 = vld [vmem:[#allocation5 + $0x1c0] sm:$0xff]  ;;  %v219_v29 = vld [vmem:[#allocation5 + $0x1d0] sm:$0xff] }
  0xa3   :  { %7632 = vmatpush1.bf16.msra.mxu0 %v7631_v63  ;;  %v221_v28 = vld [vmem:[#allocation5 + $0x1e0] sm:$0xff]  ;;  %v7673_v30 = vpack.c.bf16 %v224_v23, %v220_v22  ;;  %v223_v31 = vld [vmem:[#allocation5 + $0x1f0] sm:$0xff]  ;;  %v520_v32 = vld [vmem:[#allocation7 + $0x8] sm:$0xff] }
  0xa4   :  { %7664 = vmatpush1.bf16.msra.mxu1 %v7663_v1  ;;  %7634 = vmatprep.subr.bf16.mxu0 %v7633_v2  ;;  %v524_v33 = vld [vmem:[#allocation7 + $0x28] sm:$0xff]  ;;  %v522_v34 = vld [vmem:[#allocation7 + $0x18] sm:$0xff]  ;;  %v7643_v36 = vpack.c.bf16 %v221_v28, %v217_v27  ;;  %v7675_v37 = vpack.c.bf16 %v223_v31, %v219_v29  ;;  %v519_v39 = vld [vmem:[#allocation7] sm:$0xff] }
  0xa5   :  { %7666 = vmatprep.subr.bf16.mxu1 %v7665_v6  ;;  %v526_v35 = vld [vmem:[#allocation7 + $0x38] sm:$0xff]  ;;  %v11125_v38 = vpack.c.bf16 %v524_v33, %v520_v32  ;;  %v523_v40 = vld [vmem:[#allocation7 + $0x20] sm:$0xff]  ;;  %v521_v42 = vld [vmem:[#allocation7 + $0x10] sm:$0xff] }
  0xa6   :  { %v11127_v41 = vpack.c.bf16 %v526_v35, %v522_v34  ;;  %v525_v43 = vld [vmem:[#allocation7 + $0x30] sm:$0xff]  ;;  %v528_v44 = vld [vmem:[#allocation7 + $0x48] sm:$0xff]  ;;  %v153_v46 = vld [vmem:[%s13053_s0] sm:$0xff]  ;;  %v11132_v47 = vpack.c.bf16 %v523_v40, %v519_v39 }
  0xa7   :  { %7636 = vmatpush1.bf16.msra.mxu0 %v7635_v12  ;;  %v532_v45 = vld [vmem:[#allocation7 + $0x68] sm:$0xff]  ;;  %v530_v48 = vld [vmem:[#allocation7 + $0x58] sm:$0xff]  ;;  %v11135_v50 = vpack.c.bf16 %v525_v43, %v521_v42  ;;  %v527_v51 = vld [vmem:[#allocation7 + $0x40] sm:$0xff] }
  0xa8   :  { %7668 = vmatpush1.bf16.msra.mxu1 %v7667_v13  ;;  %7638 = vmatprep.subr.bf16.mxu0 %v7637_v14  ;;  %v534_v49 = vld [vmem:[#allocation7 + $0x78] sm:$0xff]  ;;  %v531_v52 = vld [vmem:[#allocation7 + $0x60] sm:$0xff]  ;;  %v11138_v53 = vpack.c.bf16 %v532_v45, %v528_v44  ;;  %v529_v54 = vld [vmem:[#allocation7 + $0x50] sm:$0xff] }
  0xa9   :  { %7670 = vmatprep.subr.bf16.mxu1 %v7669_v18  ;;  %v533_v55 = vld [vmem:[#allocation7 + $0x70] sm:$0xff]  ;;  %v11140_v56 = vpack.c.bf16 %v534_v49, %v530_v48  ;;  %v536_v57 = vld [vmem:[#allocation7 + $0x88] sm:$0xff]  ;;  %v11146_v60 = vpack.c.bf16 %v531_v52, %v527_v51  ;;  %v538_v61 = vld [vmem:[#allocation7 + $0x98] sm:$0xff] }
  0xaa   :  { %v540_v58 = vld [vmem:[#allocation7 + $0xa8] sm:$0xff]  ;;  %v542_v62 = vld [vmem:[#allocation7 + $0xb8] sm:$0xff]  ;;  %v11150_v63 = vpack.c.bf16 %v533_v55, %v529_v54  ;;  %v535_v1 = vld [vmem:[#allocation7 + $0x80] sm:$0xff] }
  0xab   :  { %7640 = vmatpush1.bf16.msra.mxu0 %v7639_v24  ;;  %v154_v59 = vld [vmem:[%s13053_s0 + $0x8] sm:$0xff]  ;;  %v539_v2 = vld [vmem:[#allocation7 + $0xa0] sm:$0xff]  ;;  %v11154_v3 = vpack.c.bf16 %v540_v58, %v536_v57  ;;  %v537_v4 = vld [vmem:[#allocation7 + $0x90] sm:$0xff]  ;;  %v11157_v6 = vpack.c.bf16 %v542_v62, %v538_v61 }
  0xac   :  { %7672 = vmatpush1.bf16.msra.mxu1 %v7671_v25  ;;  %7642 = vmatprep.subr.bf16.mxu0 %v7641_v26  ;;  %v541_v5 = vld [vmem:[#allocation7 + $0xb0] sm:$0xff]  ;;  %v544_v7 = vld [vmem:[#allocation7 + $0xc8] sm:$0xff]  ;;  %v11163_v10 = vpack.c.bf16 %v539_v2, %v535_v1  ;;  %v546_v11 = vld [vmem:[#allocation7 + $0xd8] sm:$0xff] }
  0xad   :  { %7674 = vmatprep.subr.bf16.mxu1 %v7673_v30  ;;  %v548_v8 = vld [vmem:[#allocation7 + $0xe8] sm:$0xff]  ;;  %v155_v9 = vld [vmem:[%s13053_s0 + $0x10] sm:$0xff]  ;;  %v550_v12 = vld [vmem:[#allocation7 + $0xf8] sm:$0xff]  ;;  %v11167_v13 = vpack.c.bf16 %v541_v5, %v537_v4 }
  0xae   :  { %v543_v14 = vld [vmem:[#allocation7 + $0xc0] sm:$0xff]  ;;  %v11171_v16 = vpack.c.bf16 %v548_v8, %v544_v7  ;;  %v545_v17 = vld [vmem:[#allocation7 + $0xd0] sm:$0xff]  ;;  %v11174_v19 = vpack.c.bf16 %v550_v12, %v546_v11  ;;  %v552_v20 = vld [vmem:[#allocation7 + $0x108] sm:$0xff] }
  0xaf   :  { %7644 = vmatpush1.bf16.msra.mxu0 %v7643_v36  ;;  %v547_v15 = vld [vmem:[#allocation7 + $0xe0] sm:$0xff]  ;;  %v549_v18 = vld [vmem:[#allocation7 + $0xf0] sm:$0xff]  ;;  %v556_v21 = vld [vmem:[#allocation7 + $0x128] sm:$0xff] }
  0xb0   :  { %7676 = vmatpush1.bf16.msra.mxu1 %v7675_v37  ;;  %7678 = vmatprep.subr.bf16.mxu0 %v11125_v38  ;;  %v156_v22 = vld [vmem:[%s13053_s0 + $0x18] sm:$0xff]  ;;  %v11180_v23 = vpack.c.bf16 %v547_v15, %v543_v14  ;;  %v11184_v26 = vpack.c.bf16 %v549_v18, %v545_v17  ;;  %v551_v27 = vld [vmem:[#allocation7 + $0x100] sm:$0xff]  ;;  %v11188_v29 = vpack.c.bf16 %v556_v21, %v552_v20  ;;  %v553_v30 = vld [vmem:[#allocation7 + $0x110] sm:$0xff] }
  0xb1   :  { %7710 = vmatprep.subr.bf16.mxu1 %v11127_v41  ;;  %v554_v24 = vld [vmem:[#allocation7 + $0x118] sm:$0xff]  ;;  %v555_v28 = vld [vmem:[#allocation7 + $0x120] sm:$0xff]  ;;  %v557_v31 = vld [vmem:[#allocation7 + $0x130] sm:$0xff] }
  0xb2   :  { %290 = vmatmul.mubr.f32.vlgmr.msra.gmra.mrb[0].mxu0 %v153_v46  ;;  %v558_v25 = vld [vmem:[#allocation7 + $0x138] sm:$0xff]  ;;  %v560_v33 = vld [vmem:[#allocation7 + $0x148] sm:$0xff]  ;;  %v157_v35 = vld [vmem:[%s13053_s0 + $0x20] sm:$0xff]  ;;  %v11197_v36 = vpack.c.bf16 %v555_v28, %v551_v27  ;;  %v11201_v40 = vpack.c.bf16 %v557_v31, %v553_v30 }
  0xb3   :  { %403 = vmatmul.mubr.f32.vlgmr.msra.gmra.mrb[0].mxu1 %v153_v46  ;;  %7680 = vmatpush1.bf16.msra.mxu0 %v11132_v47  ;;  %v11191_v32 = vpack.c.bf16 %v558_v25, %v554_v24  ;;  %v564_v34 = vld [vmem:[#allocation7 + $0x168] sm:$0xff]  ;;  %v562_v37 = vld [vmem:[#allocation7 + $0x158] sm:$0xff]  ;;  %v559_v42 = vld [vmem:[#allocation7 + $0x140] sm:$0xff] }
  0xb4   :  { %7712 = vmatpush1.bf16.msra.mxu1 %v11135_v50  ;;  %295 = vmatprep.mubr.f32.mxu0 %v10904_v0  ;;  %v566_v39 = vld [vmem:[#allocation7 + $0x178] sm:$0xff]  ;;  %v563_v43 = vld [vmem:[#allocation7 + $0x160] sm:$0xff]  ;;  %v11205_v44 = vpack.c.bf16 %v564_v34, %v560_v33  ;;  %v561_v45 = vld [vmem:[#allocation7 + $0x150] sm:$0xff] }
  0xb5   :  { %408 = vmatprep.mubr.f32.mxu1 %v10904_v0  ;;  %7682 = vmatprep.subr.bf16.mxu0 %v11138_v53  ;;  %v565_v46 = vld [vmem:[#allocation7 + $0x170] sm:$0xff]  ;;  %v11208_v48 = vpack.c.bf16 %v566_v39, %v562_v37  ;;  %v568_v49 = vld [vmem:[#allocation7 + $0x188] sm:$0xff]  ;;  %v11214_v54 = vpack.c.bf16 %v563_v43, %v559_v42  ;;  %v570_v55 = vld [vmem:[#allocation7 + $0x198] sm:$0xff] }
  0xb6   :  { %296 = vmatmul.mubr.f32.gmra.mrb[2].mxu0 %v154_v59  ;;  %7714 = vmatprep.subr.bf16.mxu1 %v11140_v56  ;;  %v572_v51 = vld [vmem:[#allocation7 + $0x1a8] sm:$0xff]  ;;  %v574_v57 = vld [vmem:[#allocation7 + $0x1b8] sm:$0xff]  ;;  %v11218_v58 = vpack.c.bf16 %v565_v46, %v561_v45  ;;  %v571_v61 = vld [vmem:[#allocation7 + $0x1a0] sm:$0xff] }
  0xb7   :  { %409 = vmatmul.mubr.f32.gmra.mrb[2].mxu1 %v154_v59  ;;  %7684 = vmatpush1.bf16.msra.mxu0 %v11146_v60  ;;  %v158_v52 = vld [vmem:[%s13053_s0 + $0x28] sm:$0xff]  ;;  %v567_v59 = vld [vmem:[#allocation7 + $0x180] sm:$0xff]  ;;  %v11222_v62 = vpack.c.bf16 %v572_v51, %v568_v49  ;;  %v569_v1 = vld [vmem:[#allocation7 + $0x190] sm:$0xff]  ;;  %v11225_v4 = vpack.c.bf16 %v574_v57, %v570_v55 }
  0xb8   :  { %7716 = vmatpush1.bf16.msra.mxu1 %v11150_v63  ;;  %301 = vmatprep.mubr.f32.mxu0 %v10904_v0  ;;  %v573_v2 = vld [vmem:[#allocation7 + $0x1b0] sm:$0xff]  ;;  %v576_v5 = vld [vmem:[#allocation7 + $0x1c8] sm:$0xff]  ;;  %v578_v11 = vld [vmem:[#allocation7 + $0x1d8] sm:$0xff] }
  0xb9   :  { %414 = vmatprep.mubr.f32.mxu1 %v10904_v0  ;;  %7686 = vmatprep.subr.bf16.mxu0 %v11154_v3  ;;  %v580_v7 = vld [vmem:[#allocation7 + $0x1e8] sm:$0xff]  ;;  %v159_v8 = vld [vmem:[%s13053_s0 + $0x30] sm:$0xff]  ;;  %v582_v12 = vld [vmem:[#allocation7 + $0x1f8] sm:$0xff]  ;;  %v11235_v14 = vpack.c.bf16 %v573_v2, %v569_v1 }
  0xba   :  { %302 = vmatmul.mubr.f32.gmra.mrb[4].mxu0 %v155_v9  ;;  %7718 = vmatprep.subr.bf16.mxu1 %v11157_v6  ;;  %v575_v15 = vld [vmem:[#allocation7 + $0x1c0] sm:$0xff]  ;;  %v11239_v18 = vpack.c.bf16 %v580_v7, %v576_v5  ;;  %v577_v20 = vld [vmem:[#allocation7 + $0x1d0] sm:$0xff]  ;;  %v160_v24 = vld [vmem:[%s13053_s0 + $0x38] sm:$0xff] }
  0xbb   :  { %415 = vmatmul.mubr.f32.gmra.mrb[4].mxu1 %v155_v9  ;;  %7688 = vmatpush1.bf16.msra.mxu0 %v11163_v10  ;;  %v11231_v9 = vpack.c.bf16 %v571_v61, %v567_v59  ;;  %v579_v17 = vld [vmem:[#allocation7 + $0x1e0] sm:$0xff]  ;;  %v581_v21 = vld [vmem:[#allocation7 + $0x1f0] sm:$0xff]  ;;  %v11307_v30 = vld [vmem:[%s13056_s3 + $0x8] sm:$0xff] }
  0xbc   :  { %7720 = vmatpush1.bf16.msra.mxu1 %v11167_v13  ;;  %307 = vmatprep.mubr.f32.mxu0 %v10904_v0  ;;  %v11248_v25 = vpack.c.bf16 %v579_v17, %v575_v15  ;;  %v11252_v27 = vpack.c.bf16 %v581_v21, %v577_v20  ;;  %v11302_v28 = vld [vmem:[%s13056_s3] sm:$0xff]  ;;  %v11314_v45 = vld [vmem:[%s13056_s3 + $0x10] sm:$0xff]  ;;  %v11320_v49 = vld [vmem:[%s13056_s3 + $0x18] sm:$0xff] }
  0xbd   :  { %420 = vmatprep.mubr.f32.mxu1 %v10904_v0  ;;  %7690 = vmatprep.subr.bf16.mxu0 %v11171_v16 }
  0xbe   :  { %308 = vmatmul.mubr.f32.gmra.mrb[6].mxu0 %v156_v22  ;;  %7722 = vmatprep.subr.bf16.mxu1 %v11174_v19 }
  0xbf   :  { %421 = vmatmul.mubr.f32.gmra.mrb[6].mxu1 %v156_v22  ;;  %7692 = vmatpush1.bf16.msra.mxu0 %v11180_v23  ;;  %v11242_v22 = vpack.c.bf16 %v582_v12, %v578_v11 }
  0xc0   :  { %7724 = vmatpush1.bf16.msra.mxu1 %v11184_v26  ;;  %313 = vmatprep.mubr.f32.mxu0 %v10904_v0 }
  0xc1   :  { %426 = vmatprep.mubr.f32.mxu1 %v10904_v0  ;;  %7694 = vmatprep.subr.bf16.mxu0 %v11188_v29 }
  0xc2   :  { %314 = vmatmul.mubr.f32.gmra.mrb[8].mxu0 %v157_v35  ;;  %7726 = vmatprep.subr.bf16.mxu1 %v11191_v32 }
  0xc3   :  { %427 = vmatmul.mubr.f32.gmra.mrb[8].mxu1 %v157_v35  ;;  %7696 = vmatpush1.bf16.msra.mxu0 %v11197_v36 }
  0xc4   :  { %7728 = vmatpush1.bf16.msra.mxu1 %v11201_v40  ;;  %319 = vmatprep.mubr.f32.mxu0 %v10904_v0 }
  0xc5   :  { %432 = vmatprep.mubr.f32.mxu1 %v10904_v0  ;;  %7698 = vmatprep.subr.bf16.mxu0 %v11205_v44 }
  0xc6   :  { %320 = vmatmul.mubr.f32.gmra.mrb[10].mxu0 %v158_v52  ;;  %7730 = vmatprep.subr.bf16.mxu1 %v11208_v48 }
  0xc7   :  { %433 = vmatmul.mubr.f32.gmra.mrb[10].mxu1 %v158_v52  ;;  %7700 = vmatpush1.bf16.msra.mxu0 %v11214_v54 }
  0xc8   :  { %7732 = vmatpush1.bf16.msra.mxu1 %v11218_v58  ;;  %325 = vmatprep.mubr.f32.mxu0 %v10904_v0 }
  0xc9   :  { %438 = vmatprep.mubr.f32.mxu1 %v10904_v0  ;;  %7702 = vmatprep.subr.bf16.mxu0 %v11222_v62 }
  0xca   :  { %326 = vmatmul.mubr.f32.gmra.mrb[12].mxu0 %v159_v8  ;;  %7734 = vmatprep.subr.bf16.mxu1 %v11225_v4 }
  0xcb   :  { %439 = vmatmul.mubr.f32.gmra.mrb[12].mxu1 %v159_v8  ;;  %7704 = vmatpush1.bf16.msra.mxu0 %v11231_v9 }
  0xcc   :  { %7736 = vmatpush1.bf16.msra.mxu1 %v11235_v14  ;;  %331 = vmatprep.mubr.f32.mxu0 %v10904_v0 }
  0xcd   :  { %444 = vmatprep.mubr.f32.mxu1 %v10904_v0  ;;  %7706 = vmatprep.subr.bf16.mxu0 %v11239_v18 }
  0xce   :  { %332 = vmatmul.mubr.f32.gmra.mrb[14].mxu0 %v160_v24  ;;  %7738 = vmatprep.subr.bf16.mxu1 %v11242_v22 }
  0xcf   :  { %445 = vmatmul.mubr.f32.gmra.mrb[14].mxu1 %v160_v24  ;;  %7708 = vmatpush1.bf16.msra.mxu0 %v11248_v25 }
  0xd0   :  { %7740 = vmatpush1.bf16.msra.mxu1 %v11252_v27  ;;  %651 = vmatprep.mubr.f32.mxu0 %v10904_v0 }
  0xd1   :  { %722 = vmatprep.mubr.f32.mxu1 %v10904_v0  ;;  %7742 = vmatprep.subr.bf16.mxu0 %v11125_v38 }
  0xd2   :  { %652 = vmatmul.mubr.f32.vlgmr.msra.gmra.mrb[0].mxu0 %v10904_v0  ;;  %7774 = vmatprep.subr.bf16.mxu1 %v11127_v41 }
  0xd3   :  { %723 = vmatmul.mubr.f32.vlgmr.msra.gmra.mrb[0].mxu1 %v10904_v0  ;;  %7744 = vmatpush1.bf16.msra.mxu0 %v11132_v47 }
  0xd4   :  { %7776 = vmatpush1.bf16.msra.mxu1 %v11135_v50  ;;  %7746 = vmatprep.subr.bf16.mxu0 %v11138_v53 }
  0xd5   :  { %7778 = vmatprep.subr.bf16.mxu1 %v11140_v56  ;;  %827 = vmatprep.mubr.f32.mxu0 %v10904_v0 }
  0xd6   :  { %898 = vmatprep.mubr.f32.mxu1 %v10904_v0 }
  0xd7   :  { %7748 = vmatpush1.bf16.msra.mxu0 %v11146_v60 }
  0xd8   :  { %7780 = vmatpush1.bf16.msra.mxu1 %v11150_v63  ;;  %7750 = vmatprep.subr.bf16.mxu0 %v11154_v3 }
  0xd9   :  { %7782 = vmatprep.subr.bf16.mxu1 %v11157_v6 }
  0xdb   :  { %7752 = vmatpush1.bf16.msra.mxu0 %v11163_v10 }
  0xdc   :  { %7784 = vmatpush1.bf16.msra.mxu1 %v11167_v13  ;;  %7754 = vmatprep.subr.bf16.mxu0 %v11171_v16 }
  0xdd   :  { %7786 = vmatprep.subr.bf16.mxu1 %v11174_v19 }
  0xdf   :  { %7756 = vmatpush1.bf16.msra.mxu0 %v11180_v23 }
  0xe0   :  { %7788 = vmatpush1.bf16.msra.mxu1 %v11184_v26  ;;  %7758 = vmatprep.subr.bf16.mxu0 %v11188_v29 }
  0xe1   :  { %7790 = vmatprep.subr.bf16.mxu1 %v11191_v32 }
  0xe3   :  { %7760 = vmatpush1.bf16.msra.mxu0 %v11197_v36 }
  0xe4   :  { %7792 = vmatpush1.bf16.msra.mxu1 %v11201_v40  ;;  %7762 = vmatprep.subr.bf16.mxu0 %v11205_v44 }
  0xe5   :  { %7794 = vmatprep.subr.bf16.mxu1 %v11208_v48 }
  0xe7   :  { %7764 = vmatpush1.bf16.msra.mxu0 %v11214_v54 }
  0xe8   :  { %7796 = vmatpush1.bf16.msra.mxu1 %v11218_v58  ;;  %7766 = vmatprep.subr.bf16.mxu0 %v11222_v62 }
  0xe9   :  { %7798 = vmatprep.subr.bf16.mxu1 %v11225_v4 }
  0xeb   :  { %7768 = vmatpush1.bf16.msra.mxu0 %v11231_v9 }
  0xec   :  { %7800 = vmatpush1.bf16.msra.mxu1 %v11235_v14  ;;  %7770 = vmatprep.subr.bf16.mxu0 %v11239_v18 }
  0xed   :  { %7802 = vmatprep.subr.bf16.mxu1 %v11242_v22 }
  0xef   :  { %7772 = vmatpush1.bf16.msra.mxu0 %v11248_v25 }
  0xf0   :  { %7804 = vmatpush1.bf16.msra.mxu1 %v11252_v27  ;;  %7806 = vmatprep.subr.bf16.mxu0 %v11125_v38 }
  0xf1   :  { %7838 = vmatprep.subr.bf16.mxu1 %v11127_v41 }
 0x1a5   :  { %v653_v31 = vpop.f32.mrb[0].mxu0 }
 0x1a6   :  { %v9917_v33 = vadd.f32 %v653_v31, %v11302_v28  ;;  %v724_v34 = vpop.f32.mrb[0].mxu1  ;;  %v655_v35 = vpop.f32.mrb[1].mxu0 }
 0x1a7   :  { %v9918_v37 = vadd.f32 %v655_v35, %v11307_v30  ;;  %v726_v39 = vpop.f32.mrb[1].mxu1  ;;  %v9933_v46 = vadd.f32 %v724_v34, %v11314_v45 }
 0x1a8   :  { %v7510_v42 = vmul.f32 -1.442695, %v9917_v33  ;;  %v9934_v52 = vadd.f32 %v726_v39, %v11320_v49 }
 0x1a9   :  { %v7511_v43 = vmul.f32 -1.442695, %v9918_v37  ;;  %v7512_v51 = vmul.f32 -1.442695, %v9933_v46 }
 0x1aa   :  { %10184 = vpow2.f32 %v7510_v42 }
 0x1ab   :  { %10186 = vpow2.f32 %v7511_v43 }
 0x1ac   :  { %10188 = vpow2.f32 %v7512_v51 }
 0x1ad   :  { %10190 = vtanh.f32 %v9934_v52 }
 0x1b4   :  { %v10185_v55 = vpop.eup %10184 }
 0x1b5   :  { %v742_v57 = vadd.f32 1.0, %v10185_v55  ;;  %v10187_v59 = vpop.eup %10186 }
 0x1b6   :  { %v743_v61 = vadd.f32 1.0, %v10187_v59  ;;  %v10189_v1 = vpop.eup %10188 }
 0x1b7   :  { %10192 = vrcp.f32 %v742_v57  ;;  %v10191_v2 = vpop.eup %10190  ;;  %v744_v11 = vadd.f32 1.0, %v10189_v1 }
 0x1b8   :  { %10194 = vrcp.f32 %v743_v61 }
 0x1b9   :  { %10196 = vrcp.f32 %v744_v11 }
 0x1c1   :  { %v10193_v5 = vpop.eup %10192 }
 0x1c2   :  { %v753_v7 = vmul.f32 %v10193_v5, %v10191_v2  ;;  %v10195_v8 = vpop.eup %10194 }
 0x1c3   :  { %v752_v12 = vmul.f32 0.0, %v10195_v8  ;;  %v10197_v17 = vpop.eup %10196 }
 0x1c5   :  { %v11323_v15 = vadd.f32 %v753_v7, %v752_v12 }
 0x1c7   :  { %10198 = vtanh.f32 %v11323_v15 }
 0x1d1   :  { %v10199_v20 = vpop.eup %10198 }
 0x1d2   :  { %v11326_v21 = vmul.f32 %v10199_v20, %v10197_v17 }
 0x1d4   :  { %828 = vmatmul.mubr.f32.vlgmr.msra.gmra.mrb[2].mxu0 %v11326_v21  ;;  %899 = vmatmul.mubr.f32.vlgmr.msra.gmra.mrb[2].mxu1 %v11326_v21 }
 0x1d5   :  { %7808 = vmatpush1.bf16.msra.mxu0 %v11132_v47  ;;  %7840 = vmatpush1.bf16.msra.mxu1 %v11135_v50 }
 0x1d6   :  { %7810 = vmatprep.subr.bf16.mxu0 %v11138_v53  ;;  %7842 = vmatprep.subr.bf16.mxu1 %v11140_v56 }
 0x1d7   :  { %1004 = vmatprep.mubr.f32.mxu0 %v10904_v0  ;;  %1075 = vmatprep.mubr.f32.mxu1 %v10904_v0 }
 0x1d9   :  { %7812 = vmatpush1.bf16.msra.mxu0 %v11146_v60  ;;  %7844 = vmatpush1.bf16.msra.mxu1 %v11150_v63 }
 0x1da   :  { %7814 = vmatprep.subr.bf16.mxu0 %v11154_v3  ;;  %7846 = vmatprep.subr.bf16.mxu1 %v11157_v6 }
 0x1dd   :  { %7816 = vmatpush1.bf16.msra.mxu0 %v11163_v10  ;;  %7848 = vmatpush1.bf16.msra.mxu1 %v11167_v13 }
 0x1de   :  { %7818 = vmatprep.subr.bf16.mxu0 %v11171_v16  ;;  %7850 = vmatprep.subr.bf16.mxu1 %v11174_v19 }
 0x1e1   :  { %7820 = vmatpush1.bf16.msra.mxu0 %v11180_v23  ;;  %7852 = vmatpush1.bf16.msra.mxu1 %v11184_v26 }
 0x1e2   :  { %7822 = vmatprep.subr.bf16.mxu0 %v11188_v29  ;;  %7854 = vmatprep.subr.bf16.mxu1 %v11191_v32 }
 0x1e5   :  { %7824 = vmatpush1.bf16.msra.mxu0 %v11197_v36  ;;  %7856 = vmatpush1.bf16.msra.mxu1 %v11201_v40 }
 0x1e6   :  { %7826 = vmatprep.subr.bf16.mxu0 %v11205_v44  ;;  %7858 = vmatprep.subr.bf16.mxu1 %v11208_v48 }
 0x1e9   :  { %7828 = vmatpush1.bf16.msra.mxu0 %v11214_v54  ;;  %7860 = vmatpush1.bf16.msra.mxu1 %v11218_v58 }
 0x1ea   :  { %7830 = vmatprep.subr.bf16.mxu0 %v11222_v62  ;;  %7862 = vmatprep.subr.bf16.mxu1 %v11225_v4 }
 0x1ed   :  { %7832 = vmatpush1.bf16.msra.mxu0 %v11231_v9  ;;  %7864 = vmatpush1.bf16.msra.mxu1 %v11235_v14 }
 0x1ee   :  { %7834 = vmatprep.subr.bf16.mxu0 %v11239_v18  ;;  %7866 = vmatprep.subr.bf16.mxu1 %v11242_v22 }
 0x1f1   :  { %7836 = vmatpush1.bf16.msra.mxu0 %v11248_v25  ;;  %7868 = vmatpush1.bf16.msra.mxu1 %v11252_v27 }
 0x1f2   :  { %7870 = vmatprep.subr.bf16.mxu0 %v11125_v38  ;;  %7902 = vmatprep.subr.bf16.mxu1 %v11127_v41 }
 0x2a7   :  { %v829_v24 = vpop.f32.mrb[2].mxu0  ;;  %v900_v31 = vpop.f32.mrb[2].mxu1 }
 0x2a8   :  { %v9919_v33 = vadd.f32 %v829_v24, %v11302_v28  ;;  %v831_v34 = vpop.f32.mrb[3].mxu0  ;;  %v902_v35 = vpop.f32.mrb[3].mxu1  ;;  %v9935_v43 = vadd.f32 %v900_v31, %v11314_v45 }
 0x2a9   :  { %v9920_v37 = vadd.f32 %v831_v34, %v11307_v30  ;;  %v9936_v46 = vadd.f32 %v902_v35, %v11320_v49 }
 0x2aa   :  { %v7513_v39 = vmul.f32 -1.442695, %v9919_v33  ;;  %v7515_v51 = vmul.f32 -1.442695, %v9935_v43 }
 0x2ab   :  { %v7514_v42 = vmul.f32 -1.442695, %v9920_v37 }
 0x2ac   :  { %10200 = vpow2.f32 %v7513_v39 }
 0x2ad   :  { %10202 = vpow2.f32 %v7514_v42 }
 0x2ae   :  { %10204 = vtanh.f32 %v9936_v46 }
 0x2af   :  { %10206 = vpow2.f32 %v7515_v51 }
 0x2b6   :  { %v10201_v52 = vpop.eup %10200 }
 0x2b7   :  { %v918_v55 = vadd.f32 1.0, %v10201_v52  ;;  %v10203_v57 = vpop.eup %10202 }
 0x2b8   :  { %v919_v59 = vadd.f32 1.0, %v10203_v57  ;;  %v10205_v61 = vpop.eup %10204 }
 0x2b9   :  { %10208 = vrcp.f32 %v918_v55  ;;  %v10207_v1 = vpop.eup %10206 }
 0x2ba   :  { %10210 = vrcp.f32 %v919_v59  ;;  %v920_v8 = vadd.f32 1.0, %v10207_v1 }
 0x2bc   :  { %10212 = vrcp.f32 %v920_v8 }
 0x2c3   :  { %v10209_v2 = vpop.eup %10208 }
 0x2c4   :  { %v929_v5 = vmul.f32 %v10209_v2, %v10205_v61  ;;  %v10211_v7 = vpop.eup %10210 }
 0x2c5   :  { %v928_v11 = vmul.f32 %v10211_v7, %v11323_v15 }
 0x2c6   :  { %v10213_v17 = vpop.eup %10212 }
 0x2c7   :  { %v11369_v12 = vadd.f32 %v929_v5, %v928_v11 }
 0x2c9   :  { %10214 = vtanh.f32 %v11369_v12 }
 0x2d3   :  { %v10215_v20 = vpop.eup %10214 }
 0x2d4   :  { %v11372_v24 = vmul.f32 %v10215_v20, %v10213_v17 }
 0x2d6   :  { %1005 = vmatmul.mubr.f32.vlgmr.msra.gmra.mrb[4].mxu0 %v11372_v24  ;;  %1076 = vmatmul.mubr.f32.vlgmr.msra.gmra.mrb[4].mxu1 %v11372_v24 }
 0x2d7   :  { %7872 = vmatpush1.bf16.msra.mxu0 %v11132_v47  ;;  %7904 = vmatpush1.bf16.msra.mxu1 %v11135_v50 }
 0x2d8   :  { %7874 = vmatprep.subr.bf16.mxu0 %v11138_v53  ;;  %7906 = vmatprep.subr.bf16.mxu1 %v11140_v56 }
 0x2d9   :  { %1181 = vmatprep.mubr.f32.mxu0 %v10904_v0  ;;  %1252 = vmatprep.mubr.f32.mxu1 %v10904_v0 }
 0x2db   :  { %7876 = vmatpush1.bf16.msra.mxu0 %v11146_v60  ;;  %7908 = vmatpush1.bf16.msra.mxu1 %v11150_v63 }
 0x2dc   :  { %7878 = vmatprep.subr.bf16.mxu0 %v11154_v3  ;;  %7910 = vmatprep.subr.bf16.mxu1 %v11157_v6 }
 0x2df   :  { %7880 = vmatpush1.bf16.msra.mxu0 %v11163_v10  ;;  %7912 = vmatpush1.bf16.msra.mxu1 %v11167_v13 }
 0x2e0   :  { %7882 = vmatprep.subr.bf16.mxu0 %v11171_v16  ;;  %7914 = vmatprep.subr.bf16.mxu1 %v11174_v19 }
 0x2e3   :  { %7884 = vmatpush1.bf16.msra.mxu0 %v11180_v23  ;;  %7916 = vmatpush1.bf16.msra.mxu1 %v11184_v26 }
 0x2e4   :  { %7886 = vmatprep.subr.bf16.mxu0 %v11188_v29  ;;  %7918 = vmatprep.subr.bf16.mxu1 %v11191_v32 }
 0x2e7   :  { %7888 = vmatpush1.bf16.msra.mxu0 %v11197_v36  ;;  %7920 = vmatpush1.bf16.msra.mxu1 %v11201_v40 }
 0x2e8   :  { %7890 = vmatprep.subr.bf16.mxu0 %v11205_v44  ;;  %7922 = vmatprep.subr.bf16.mxu1 %v11208_v48 }
 0x2eb   :  { %7892 = vmatpush1.bf16.msra.mxu0 %v11214_v54  ;;  %7924 = vmatpush1.bf16.msra.mxu1 %v11218_v58 }
 0x2ec   :  { %7894 = vmatprep.subr.bf16.mxu0 %v11222_v62  ;;  %7926 = vmatprep.subr.bf16.mxu1 %v11225_v4 }
 0x2ef   :  { %7896 = vmatpush1.bf16.msra.mxu0 %v11231_v9  ;;  %7928 = vmatpush1.bf16.msra.mxu1 %v11235_v14 }
 0x2f0   :  { %7898 = vmatprep.subr.bf16.mxu0 %v11239_v18  ;;  %7930 = vmatprep.subr.bf16.mxu1 %v11242_v22 }
 0x2f3   :  { %7900 = vmatpush1.bf16.msra.mxu0 %v11248_v25  ;;  %7932 = vmatpush1.bf16.msra.mxu1 %v11252_v27 }
 0x2f4   :  { %7934 = vmatprep.subr.bf16.mxu0 %v11125_v38  ;;  %7966 = vmatprep.subr.bf16.mxu1 %v11127_v41 }
 0x3a9   :  { %v1006_v15 = vpop.f32.mrb[4].mxu0  ;;  %v1077_v31 = vpop.f32.mrb[4].mxu1 }
 0x3aa   :  { %v9921_v33 = vadd.f32 %v1006_v15, %v11302_v28  ;;  %v1008_v34 = vpop.f32.mrb[5].mxu0  ;;  %v1079_v35 = vpop.f32.mrb[5].mxu1  ;;  %v9937_v43 = vadd.f32 %v1077_v31, %v11314_v45 }
 0x3ab   :  { %v9922_v37 = vadd.f32 %v1008_v34, %v11307_v30  ;;  %v9938_v46 = vadd.f32 %v1079_v35, %v11320_v49 }
 0x3ac   :  { %v7516_v39 = vmul.f32 -1.442695, %v9921_v33  ;;  %v7518_v51 = vmul.f32 -1.442695, %v9937_v43 }
 0x3ad   :  { %v7517_v42 = vmul.f32 -1.442695, %v9922_v37 }
 0x3ae   :  { %10216 = vpow2.f32 %v7516_v39 }
 0x3af   :  { %10218 = vpow2.f32 %v7517_v42 }
 0x3b0   :  { %10220 = vtanh.f32 %v9938_v46 }
 0x3b1   :  { %10222 = vpow2.f32 %v7518_v51 }
 0x3b8   :  { %v10217_v52 = vpop.eup %10216 }
 0x3b9   :  { %v1095_v55 = vadd.f32 1.0, %v10217_v52  ;;  %v10219_v57 = vpop.eup %10218 }
 0x3ba   :  { %v1096_v59 = vadd.f32 1.0, %v10219_v57  ;;  %v10221_v61 = vpop.eup %10220 }
 0x3bb   :  { %10224 = vrcp.f32 %v1095_v55  ;;  %v10223_v1 = vpop.eup %10222 }
 0x3bc   :  { %10226 = vrcp.f32 %v1096_v59  ;;  %v1097_v8 = vadd.f32 1.0, %v10223_v1 }
 0x3be   :  { %10228 = vrcp.f32 %v1097_v8 }
 0x3c5   :  { %v10225_v2 = vpop.eup %10224 }
 0x3c6   :  { %v1106_v5 = vmul.f32 %v10225_v2, %v10221_v61  ;;  %v10227_v7 = vpop.eup %10226 }
 0x3c7   :  { %v1105_v11 = vmul.f32 %v10227_v7, %v11369_v12 }
 0x3c8   :  { %v10229_v20 = vpop.eup %10228 }
 0x3c9   :  { %v11415_v17 = vadd.f32 %v1106_v5, %v1105_v11 }
 0x3cb   :  { %10230 = vtanh.f32 %v11415_v17 }
 0x3d5   :  { %v10231_v15 = vpop.eup %10230 }
 0x3d6   :  { %v11418_v31 = vmul.f32 %v10231_v15, %v10229_v20 }
 0x3d8   :  { %1182 = vmatmul.mubr.f32.vlgmr.msra.gmra.mrb[6].mxu0 %v11418_v31  ;;  %1253 = vmatmul.mubr.f32.vlgmr.msra.gmra.mrb[6].mxu1 %v11418_v31 }
 0x3d9   :  { %7936 = vmatpush1.bf16.msra.mxu0 %v11132_v47  ;;  %7968 = vmatpush1.bf16.msra.mxu1 %v11135_v50 }
 0x3da   :  { %7938 = vmatprep.subr.bf16.mxu0 %v11138_v53  ;;  %7970 = vmatprep.subr.bf16.mxu1 %v11140_v56 }
 0x3db   :  { %1358 = vmatprep.mubr.f32.mxu0 %v10904_v0  ;;  %1429 = vmatprep.mubr.f32.mxu1 %v10904_v0 }
 0x3dd   :  { %7940 = vmatpush1.bf16.msra.mxu0 %v11146_v60  ;;  %7972 = vmatpush1.bf16.msra.mxu1 %v11150_v63 }
 0x3de   :  { %7942 = vmatprep.subr.bf16.mxu0 %v11154_v3  ;;  %7974 = vmatprep.subr.bf16.mxu1 %v11157_v6 }
 0x3e1   :  { %7944 = vmatpush1.bf16.msra.mxu0 %v11163_v10  ;;  %7976 = vmatpush1.bf16.msra.mxu1 %v11167_v13 }
 0x3e2   :  { %7946 = vmatprep.subr.bf16.mxu0 %v11171_v16  ;;  %7978 = vmatprep.subr.bf16.mxu1 %v11174_v19 }
 0x3e5   :  { %7948 = vmatpush1.bf16.msra.mxu0 %v11180_v23  ;;  %7980 = vmatpush1.bf16.msra.mxu1 %v11184_v26 }
 0x3e6   :  { %7950 = vmatprep.subr.bf16.mxu0 %v11188_v29  ;;  %7982 = vmatprep.subr.bf16.mxu1 %v11191_v32 }
 0x3e9   :  { %7952 = vmatpush1.bf16.msra.mxu0 %v11197_v36  ;;  %7984 = vmatpush1.bf16.msra.mxu1 %v11201_v40 }
 0x3ea   :  { %7954 = vmatprep.subr.bf16.mxu0 %v11205_v44  ;;  %7986 = vmatprep.subr.bf16.mxu1 %v11208_v48 }
 0x3ed   :  { %7956 = vmatpush1.bf16.msra.mxu0 %v11214_v54  ;;  %7988 = vmatpush1.bf16.msra.mxu1 %v11218_v58 }
 0x3ee   :  { %7958 = vmatprep.subr.bf16.mxu0 %v11222_v62  ;;  %7990 = vmatprep.subr.bf16.mxu1 %v11225_v4 }
 0x3f1   :  { %7960 = vmatpush1.bf16.msra.mxu0 %v11231_v9  ;;  %7992 = vmatpush1.bf16.msra.mxu1 %v11235_v14 }
 0x3f2   :  { %7962 = vmatprep.subr.bf16.mxu0 %v11239_v18  ;;  %7994 = vmatprep.subr.bf16.mxu1 %v11242_v22 }
 0x3f5   :  { %7964 = vmatpush1.bf16.msra.mxu0 %v11248_v25  ;;  %7996 = vmatpush1.bf16.msra.mxu1 %v11252_v27 }
 0x3f6   :  { %7998 = vmatprep.subr.bf16.mxu0 %v11125_v38  ;;  %8030 = vmatprep.subr.bf16.mxu1 %v11127_v41 }
 0x4ab   :  { %v1183_v12 = vpop.f32.mrb[6].mxu0  ;;  %v1254_v33 = vpop.f32.mrb[6].mxu1 }
 0x4ac   :  { %v9923_v34 = vadd.f32 %v1183_v12, %v11302_v28  ;;  %v1185_v35 = vpop.f32.mrb[7].mxu0  ;;  %v1256_v37 = vpop.f32.mrb[7].mxu1  ;;  %v9939_v46 = vadd.f32 %v1254_v33, %v11314_v45 }
 0x4ad   :  { %v9924_v39 = vadd.f32 %v1185_v35, %v11307_v30  ;;  %v9940_v51 = vadd.f32 %v1256_v37, %v11320_v49 }
 0x4ae   :  { %v7519_v42 = vmul.f32 -1.442695, %v9923_v34  ;;  %v7521_v52 = vmul.f32 -1.442695, %v9939_v46 }
 0x4af   :  { %v7520_v43 = vmul.f32 -1.442695, %v9924_v39 }
 0x4b0   :  { %10232 = vpow2.f32 %v7519_v42 }
 0x4b1   :  { %10234 = vpow2.f32 %v7520_v43 }
 0x4b2   :  { %10236 = vtanh.f32 %v9940_v51 }
 0x4b3   :  { %10238 = vpow2.f32 %v7521_v52 }
 0x4ba   :  { %v10233_v55 = vpop.eup %10232 }
 0x4bb   :  { %v1272_v57 = vadd.f32 1.0, %v10233_v55  ;;  %v10235_v59 = vpop.eup %10234 }
 0x4bc   :  { %v1273_v61 = vadd.f32 1.0, %v10235_v59  ;;  %v10237_v1 = vpop.eup %10236 }
 0x4bd   :  { %10240 = vrcp.f32 %v1272_v57  ;;  %v10239_v2 = vpop.eup %10238 }
 0x4be   :  { %10242 = vrcp.f32 %v1273_v61  ;;  %v1274_v11 = vadd.f32 1.0, %v10239_v2 }
 0x4c0   :  { %10244 = vrcp.f32 %v1274_v11 }
 0x4c7   :  { %v10241_v5 = vpop.eup %10240 }
 0x4c8   :  { %v1283_v7 = vmul.f32 %v10241_v5, %v10237_v1  ;;  %v10243_v8 = vpop.eup %10242 }
 0x4c9   :  { %v1282_v20 = vmul.f32 %v10243_v8, %v11415_v17 }
 0x4ca   :  { %v10245_v12 = vpop.eup %10244 }
 0x4cb   :  { %v11461_v15 = vadd.f32 %v1283_v7, %v1282_v20 }
 0x4cd   :  { %10246 = vtanh.f32 %v11461_v15 }
 0x4d7   :  { %v10247_v33 = vpop.eup %10246 }
 0x4d8   :  { %v11464_v34 = vmul.f32 %v10247_v33, %v10245_v12 }
 0x4da   :  { %1359 = vmatmul.mubr.f32.vlgmr.msra.gmra.mrb[8].mxu0 %v11464_v34  ;;  %1430 = vmatmul.mubr.f32.vlgmr.msra.gmra.mrb[8].mxu1 %v11464_v34 }
 0x4db   :  { %8000 = vmatpush1.bf16.msra.mxu0 %v11132_v47  ;;  %8032 = vmatpush1.bf16.msra.mxu1 %v11135_v50 }
 0x4dc   :  { %8002 = vmatprep.subr.bf16.mxu0 %v11138_v53  ;;  %8034 = vmatprep.subr.bf16.mxu1 %v11140_v56 }
 0x4dd   :  { %1535 = vmatprep.mubr.f32.mxu0 %v10904_v0  ;;  %1606 = vmatprep.mubr.f32.mxu1 %v10904_v0 }
 0x4df   :  { %8004 = vmatpush1.bf16.msra.mxu0 %v11146_v60  ;;  %8036 = vmatpush1.bf16.msra.mxu1 %v11150_v63 }
 0x4e0   :  { %8006 = vmatprep.subr.bf16.mxu0 %v11154_v3  ;;  %8038 = vmatprep.subr.bf16.mxu1 %v11157_v6 }
 0x4e3   :  { %8008 = vmatpush1.bf16.msra.mxu0 %v11163_v10  ;;  %8040 = vmatpush1.bf16.msra.mxu1 %v11167_v13 }
 0x4e4   :  { %8010 = vmatprep.subr.bf16.mxu0 %v11171_v16  ;;  %8042 = vmatprep.subr.bf16.mxu1 %v11174_v19 }
 0x4e7   :  { %8012 = vmatpush1.bf16.msra.mxu0 %v11180_v23  ;;  %8044 = vmatpush1.bf16.msra.mxu1 %v11184_v26 }
 0x4e8   :  { %8014 = vmatprep.subr.bf16.mxu0 %v11188_v29  ;;  %8046 = vmatprep.subr.bf16.mxu1 %v11191_v32 }
 0x4eb   :  { %8016 = vmatpush1.bf16.msra.mxu0 %v11197_v36  ;;  %8048 = vmatpush1.bf16.msra.mxu1 %v11201_v40 }
 0x4ec   :  { %8018 = vmatprep.subr.bf16.mxu0 %v11205_v44  ;;  %8050 = vmatprep.subr.bf16.mxu1 %v11208_v48 }
 0x4ef   :  { %8020 = vmatpush1.bf16.msra.mxu0 %v11214_v54  ;;  %8052 = vmatpush1.bf16.msra.mxu1 %v11218_v58 }
 0x4f0   :  { %8022 = vmatprep.subr.bf16.mxu0 %v11222_v62  ;;  %8054 = vmatprep.subr.bf16.mxu1 %v11225_v4 }
 0x4f3   :  { %8024 = vmatpush1.bf16.msra.mxu0 %v11231_v9  ;;  %8056 = vmatpush1.bf16.msra.mxu1 %v11235_v14 }
 0x4f4   :  { %8026 = vmatprep.subr.bf16.mxu0 %v11239_v18  ;;  %8058 = vmatprep.subr.bf16.mxu1 %v11242_v22 }
 0x4f7   :  { %8028 = vmatpush1.bf16.msra.mxu0 %v11248_v25  ;;  %8060 = vmatpush1.bf16.msra.mxu1 %v11252_v27 }
 0x4f8   :  { %8062 = vmatprep.subr.bf16.mxu0 %v11125_v38  ;;  %8094 = vmatprep.subr.bf16.mxu1 %v11127_v41 }
 0x5ad   :  { %v1360_v17 = vpop.f32.mrb[8].mxu0  ;;  %v1431_v35 = vpop.f32.mrb[8].mxu1 }
 0x5ae   :  { %v9925_v37 = vadd.f32 %v1360_v17, %v11302_v28  ;;  %v1362_v39 = vpop.f32.mrb[9].mxu0  ;;  %v1433_v42 = vpop.f32.mrb[9].mxu1  ;;  %v9941_v52 = vadd.f32 %v1431_v35, %v11314_v45 }
 0x5af   :  { %v9926_v43 = vadd.f32 %v1362_v39, %v11307_v30  ;;  %v9942_v55 = vadd.f32 %v1433_v42, %v11320_v49 }
 0x5b0   :  { %v7522_v46 = vmul.f32 -1.442695, %v9925_v37  ;;  %v7524_v57 = vmul.f32 -1.442695, %v9941_v52 }
 0x5b1   :  { %v7523_v51 = vmul.f32 -1.442695, %v9926_v43 }
 0x5b2   :  { %10248 = vpow2.f32 %v7522_v46 }
 0x5b3   :  { %10250 = vpow2.f32 %v7523_v51 }
 0x5b4   :  { %10252 = vtanh.f32 %v9942_v55 }
 0x5b5   :  { %10254 = vpow2.f32 %v7524_v57 }
 0x5bc   :  { %v10249_v59 = vpop.eup %10248 }
 0x5bd   :  { %v1449_v61 = vadd.f32 1.0, %v10249_v59  ;;  %v10251_v1 = vpop.eup %10250 }
 0x5be   :  { %v1450_v2 = vadd.f32 1.0, %v10251_v1  ;;  %v10253_v5 = vpop.eup %10252 }
 0x5bf   :  { %10256 = vrcp.f32 %v1449_v61  ;;  %v10255_v7 = vpop.eup %10254 }
 0x5c0   :  { %10258 = vrcp.f32 %v1450_v2  ;;  %v1451_v12 = vadd.f32 1.0, %v10255_v7 }
 0x5c2   :  { %10260 = vrcp.f32 %v1451_v12 }
 0x5c9   :  { %v10257_v8 = vpop.eup %10256 }
 0x5ca   :  { %v1460_v11 = vmul.f32 %v10257_v8, %v10253_v5  ;;  %v10259_v20 = vpop.eup %10258 }
 0x5cb   :  { %v1459_v33 = vmul.f32 %v10259_v20, %v11461_v15 }
 0x5cc   :  { %v10261_v35 = vpop.eup %10260 }
 0x5cd   :  { %v11507_v17 = vadd.f32 %v1460_v11, %v1459_v33 }
 0x5cf   :  { %10262 = vtanh.f32 %v11507_v17 }
 0x5d9   :  { %v10263_v37 = vpop.eup %10262 }
 0x5da   :  { %v11510_v39 = vmul.f32 %v10263_v37, %v10261_v35 }
 0x5dc   :  { %1536 = vmatmul.mubr.f32.vlgmr.msra.gmra.mrb[10].mxu0 %v11510_v39  ;;  %1607 = vmatmul.mubr.f32.vlgmr.msra.gmra.mrb[10].mxu1 %v11510_v39 }
 0x5dd   :  { %8064 = vmatpush1.bf16.msra.mxu0 %v11132_v47  ;;  %8096 = vmatpush1.bf16.msra.mxu1 %v11135_v50 }
 0x5de   :  { %8066 = vmatprep.subr.bf16.mxu0 %v11138_v53  ;;  %8098 = vmatprep.subr.bf16.mxu1 %v11140_v56 }
 0x5df   :  { %1712 = vmatprep.mubr.f32.mxu0 %v10904_v0  ;;  %1783 = vmatprep.mubr.f32.mxu1 %v10904_v0 }
 0x5e1   :  { %8068 = vmatpush1.bf16.msra.mxu0 %v11146_v60  ;;  %8100 = vmatpush1.bf16.msra.mxu1 %v11150_v63 }
 0x5e2   :  { %8070 = vmatprep.subr.bf16.mxu0 %v11154_v3  ;;  %8102 = vmatprep.subr.bf16.mxu1 %v11157_v6 }
 0x5e5   :  { %8072 = vmatpush1.bf16.msra.mxu0 %v11163_v10  ;;  %8104 = vmatpush1.bf16.msra.mxu1 %v11167_v13 }
 0x5e6   :  { %8074 = vmatprep.subr.bf16.mxu0 %v11171_v16  ;;  %8106 = vmatprep.subr.bf16.mxu1 %v11174_v19 }
 0x5e9   :  { %8076 = vmatpush1.bf16.msra.mxu0 %v11180_v23  ;;  %8108 = vmatpush1.bf16.msra.mxu1 %v11184_v26 }
 0x5ea   :  { %8078 = vmatprep.subr.bf16.mxu0 %v11188_v29  ;;  %8110 = vmatprep.subr.bf16.mxu1 %v11191_v32 }
 0x5ed   :  { %8080 = vmatpush1.bf16.msra.mxu0 %v11197_v36  ;;  %8112 = vmatpush1.bf16.msra.mxu1 %v11201_v40 }
 0x5ee   :  { %8082 = vmatprep.subr.bf16.mxu0 %v11205_v44  ;;  %8114 = vmatprep.subr.bf16.mxu1 %v11208_v48 }
 0x5f1   :  { %8084 = vmatpush1.bf16.msra.mxu0 %v11214_v54  ;;  %8116 = vmatpush1.bf16.msra.mxu1 %v11218_v58 }
 0x5f2   :  { %8086 = vmatprep.subr.bf16.mxu0 %v11222_v62  ;;  %8118 = vmatprep.subr.bf16.mxu1 %v11225_v4 }
 0x5f5   :  { %8088 = vmatpush1.bf16.msra.mxu0 %v11231_v9  ;;  %8120 = vmatpush1.bf16.msra.mxu1 %v11235_v14 }
 0x5f6   :  { %8090 = vmatprep.subr.bf16.mxu0 %v11239_v18  ;;  %8122 = vmatprep.subr.bf16.mxu1 %v11242_v22 }
 0x5f9   :  { %8092 = vmatpush1.bf16.msra.mxu0 %v11248_v25  ;;  %8124 = vmatpush1.bf16.msra.mxu1 %v11252_v27 }
 0x5fa   :  { %8126 = vmatprep.subr.bf16.mxu0 %v11125_v38  ;;  %8158 = vmatprep.subr.bf16.mxu1 %v11127_v41 }
 0x6af   :  { %v1537_v15 = vpop.f32.mrb[10].mxu0  ;;  %v1608_v42 = vpop.f32.mrb[10].mxu1 }
 0x6b0   :  { %v9927_v43 = vadd.f32 %v1537_v15, %v11302_v28  ;;  %v1539_v46 = vpop.f32.mrb[11].mxu0  ;;  %v1610_v51 = vpop.f32.mrb[11].mxu1  ;;  %v9943_v59 = vadd.f32 %v1608_v42, %v11314_v45 }
 0x6b1   :  { %v9928_v52 = vadd.f32 %v1539_v46, %v11307_v30  ;;  %v9944_v61 = vadd.f32 %v1610_v51, %v11320_v49  ;;  %v2016_v46 = vld [vmem:[#allocation9 + $0x58] sm:$0xff] }
 0x6b2   :  { %v7525_v55 = vmul.f32 -1.442695, %v9927_v43  ;;  %v7527_v1 = vmul.f32 -1.442695, %v9943_v59  ;;  %v2020_v51 = vld [vmem:[#allocation9 + $0x78] sm:$0xff] }
 0x6b3   :  { %v7526_v57 = vmul.f32 -1.442695, %v9928_v52 }
 0x6b4   :  { %10264 = vpow2.f32 %v7525_v55 }
 0x6b5   :  { %10266 = vpow2.f32 %v7526_v57 }
 0x6b6   :  { %10268 = vtanh.f32 %v9944_v61  ;;  %v2013_v61 = vld [vmem:[#allocation9 + $0x40] sm:$0xff] }
 0x6b7   :  { %10270 = vpow2.f32 %v7527_v1  ;;  %v2017_v1 = vld [vmem:[#allocation9 + $0x60] sm:$0xff] }
 0x6be   :  { %v10265_v38 = vpop.eup %10264 }
 0x6bf   :  { %v1626_v2 = vadd.f32 1.0, %v10265_v38  ;;  %v10267_v41 = vpop.eup %10266 }
 0x6c0   :  { %v1627_v5 = vadd.f32 1.0, %v10267_v41  ;;  %v10269_v7 = vpop.eup %10268  ;;  %v8225_v41 = vpack.c.bf16 %v2020_v51, %v2016_v46  ;;  %v2049_v46 = vld [vmem:[#allocation9 + $0x160] sm:$0xff] }
 0x6c1   :  { %10272 = vrcp.f32 %v1626_v2  ;;  %v10271_v8 = vpop.eup %10270 }
 0x6c2   :  { %10274 = vrcp.f32 %v1627_v5  ;;  %v1628_v33 = vadd.f32 1.0, %v10271_v8  ;;  %v2015_v5 = vld [vmem:[#allocation9 + $0x50] sm:$0xff]  ;;  %v2022_v8 = vld [vmem:[#allocation9 + $0x88] sm:$0xff] }
 0x6c4   :  { %10276 = vrcp.f32 %v1628_v33  ;;  %v8195_v33 = vpack.c.bf16 %v2017_v1, %v2013_v61  ;;  %v2058_v61 = vld [vmem:[#allocation9 + $0x1a8] sm:$0xff]  ;;  %v2056_v1 = vld [vmem:[#allocation9 + $0x198] sm:$0xff] }
 0x6cb   :  { %v10273_v11 = vpop.eup %10272 }
 0x6cc   :  { %v1637_v20 = vmul.f32 %v10273_v11, %v10269_v7  ;;  %v10275_v12 = vpop.eup %10274  ;;  %v2019_v7 = vld [vmem:[#allocation9 + $0x70] sm:$0xff]  ;;  %v2026_v11 = vld [vmem:[#allocation9 + $0xa8] sm:$0xff] }
 0x6cd   :  { %v1636_v35 = vmul.f32 %v10275_v12, %v11507_v17  ;;  %v2018_v17 = vld [vmem:[#allocation9 + $0x68] sm:$0xff]  ;;  %v2028_v12 = vld [vmem:[#allocation9 + $0xb8] sm:$0xff] }
 0x6ce   :  { %v10277_v15 = vpop.eup %10276 }
 0x6cf   :  { %v11553_v37 = vadd.f32 %v1637_v20, %v1636_v35  ;;  %v2024_v20 = vld [vmem:[#allocation9 + $0x98] sm:$0xff]  ;;  %v8227_v35 = vpack.c.bf16 %v2019_v7, %v2015_v5  ;;  %v2053_v7 = vld [vmem:[#allocation9 + $0x180] sm:$0xff] }
 0x6d1   :  { %10278 = vtanh.f32 %v11553_v37 }
 0x6db   :  { %v10279_v42 = vpop.eup %10278 }
 0x6dc   :  { %v11556_v43 = vmul.f32 %v10279_v42, %v10277_v15  ;;  %v2025_v15 = vld [vmem:[#allocation9 + $0xa0] sm:$0xff]  ;;  %v8197_v42 = vpack.c.bf16 %v2026_v11, %v2022_v8 }
 0x6dd   :  { %v2057_v8 = vld [vmem:[#allocation9 + $0x1a0] sm:$0xff] }
 0x6de   :  { %1713 = vmatmul.mubr.f32.vlgmr.msra.gmra.mrb[12].mxu0 %v11556_v43  ;;  %1784 = vmatmul.mubr.f32.vlgmr.msra.gmra.mrb[12].mxu1 %v11556_v43 }
 0x6df   :  { %8128 = vmatpush1.bf16.msra.mxu0 %v11132_v47  ;;  %8160 = vmatpush1.bf16.msra.mxu1 %v11135_v50  ;;  %v2006_v47 = vld [vmem:[#allocation9 + $0x8] sm:$0xff] }
 0x6e0   :  { %8130 = vmatprep.subr.bf16.mxu0 %v11138_v53  ;;  %8162 = vmatprep.subr.bf16.mxu1 %v11140_v56  ;;  %v2010_v50 = vld [vmem:[#allocation9 + $0x28] sm:$0xff]  ;;  %v2008_v53 = vld [vmem:[#allocation9 + $0x18] sm:$0xff] }
 0x6e1   :  { %1889 = vmatprep.mubr.f32.mxu0 %v10904_v0  ;;  %1960 = vmatprep.mubr.f32.mxu1 %v10904_v0  ;;  %v8189_v56 = vpack.c.bf16 %v2010_v50, %v2006_v47  ;;  %v8229_v47 = vpack.c.bf16 %v2028_v12, %v2024_v20  ;;  %v2023_v50 = vld [vmem:[#allocation9 + $0x90] sm:$0xff] }
 0x6e2   :  { %v2055_v12 = vld [vmem:[#allocation9 + $0x190] sm:$0xff] }
 0x6e3   :  { %8132 = vmatpush1.bf16.msra.mxu0 %v11146_v60  ;;  %8164 = vmatpush1.bf16.msra.mxu1 %v11150_v63  ;;  %v2012_v60 = vld [vmem:[#allocation9 + $0x38] sm:$0xff] }
 0x6e4   :  { %8134 = vmatprep.subr.bf16.mxu0 %v11154_v3  ;;  %8166 = vmatprep.subr.bf16.mxu1 %v11157_v6  ;;  %v8221_v63 = vpack.c.bf16 %v2012_v60, %v2008_v53  ;;  %v2027_v53 = vld [vmem:[#allocation9 + $0xb0] sm:$0xff]  ;;  %v2034_v60 = vld [vmem:[#allocation9 + $0xe8] sm:$0xff] }
 0x6e7   :  { %8136 = vmatpush1.bf16.msra.mxu0 %v11163_v10  ;;  %8168 = vmatpush1.bf16.msra.mxu1 %v11167_v13 }
 0x6e8   :  { %8138 = vmatprep.subr.bf16.mxu0 %v11171_v16  ;;  %8170 = vmatprep.subr.bf16.mxu1 %v11174_v19 }
 0x6eb   :  { %8140 = vmatpush1.bf16.msra.mxu0 %v11180_v23  ;;  %8172 = vmatpush1.bf16.msra.mxu1 %v11184_v26 }
 0x6ec   :  { %8142 = vmatprep.subr.bf16.mxu0 %v11188_v29  ;;  %8174 = vmatprep.subr.bf16.mxu1 %v11191_v32 }
 0x6ef   :  { %8144 = vmatpush1.bf16.msra.mxu0 %v11197_v36  ;;  %8176 = vmatpush1.bf16.msra.mxu1 %v11201_v40 }
 0x6f0   :  { %8146 = vmatprep.subr.bf16.mxu0 %v11205_v44  ;;  %8178 = vmatprep.subr.bf16.mxu1 %v11208_v48 }
 0x6f3   :  { %8148 = vmatpush1.bf16.msra.mxu0 %v11214_v54  ;;  %8180 = vmatpush1.bf16.msra.mxu1 %v11218_v58 }
 0x6f4   :  { %8150 = vmatprep.subr.bf16.mxu0 %v11222_v62  ;;  %8182 = vmatprep.subr.bf16.mxu1 %v11225_v4 }
 0x6f7   :  { %8152 = vmatpush1.bf16.msra.mxu0 %v11231_v9  ;;  %8184 = vmatpush1.bf16.msra.mxu1 %v11235_v14 }
 0x6f8   :  { %8154 = vmatprep.subr.bf16.mxu0 %v11239_v18  ;;  %8186 = vmatprep.subr.bf16.mxu1 %v11242_v22 }
 0x6fb   :  { %8156 = vmatpush1.bf16.msra.mxu0 %v11248_v25  ;;  %8188 = vmatpush1.bf16.msra.mxu1 %v11252_v27  ;;  %v2005_v27 = vld [vmem:[#allocation9] sm:$0xff] }
 0x6fc   :  { %8190 = vmatprep.subr.bf16.mxu0 %v8189_v56  ;;  %8222 = vmatprep.subr.bf16.mxu1 %v8221_v63  ;;  %v2030_v56 = vld [vmem:[#allocation9 + $0xc8] sm:$0xff]  ;;  %v2032_v63 = vld [vmem:[#allocation9 + $0xd8] sm:$0xff] }
 0x7b1   :  { %v1714_v3 = vpop.f32.mrb[12].mxu0  ;;  %v1785_v6 = vpop.f32.mrb[12].mxu1 }
 0x7b2   :  { %v9929_v10 = vadd.f32 %v1714_v3, %v11302_v28  ;;  %v1716_v13 = vpop.f32.mrb[13].mxu0  ;;  %v1787_v16 = vpop.f32.mrb[13].mxu1  ;;  %v9945_v29 = vadd.f32 %v1785_v6, %v11314_v45  ;;  %v2009_v28 = vld [vmem:[#allocation9 + $0x20] sm:$0xff]  ;;  %v2011_v45 = vld [vmem:[#allocation9 + $0x30] sm:$0xff]  ;;  %v2036_v3 = vld [vmem:[#allocation9 + $0xf8] sm:$0xff] }
 0x7b3   :  { %v9930_v19 = vadd.f32 %v1716_v13, %v11307_v30  ;;  %v9946_v32 = vadd.f32 %v1787_v16, %v11320_v49  ;;  %v2007_v30 = vld [vmem:[#allocation9 + $0x10] sm:$0xff]  ;;  %v2014_v49 = vld [vmem:[#allocation9 + $0x48] sm:$0xff]  ;;  %v8191_v57 = vpack.c.bf16 %v2009_v28, %v2005_v27  ;;  %v2029_v13 = vld [vmem:[#allocation9 + $0xc0] sm:$0xff] }
 0x7b4   :  { %v7528_v23 = vmul.f32 -1.442695, %v9929_v10  ;;  %v7530_v36 = vmul.f32 -1.442695, %v9945_v29  ;;  %v8223_v59 = vpack.c.bf16 %v2011_v45, %v2007_v30  ;;  %v8193_v2 = vpack.c.bf16 %v2018_v17, %v2014_v49  ;;  %v2033_v16 = vld [vmem:[#allocation9 + $0xe0] sm:$0xff]  ;;  %v2035_v29 = vld [vmem:[#allocation9 + $0xf0] sm:$0xff] }
 0x7b5   :  { %v7529_v26 = vmul.f32 -1.442695, %v9930_v19  ;;  %v8231_v10 = vpack.c.bf16 %v2027_v53, %v2023_v50  ;;  %v8201_v19 = vpack.c.bf16 %v2034_v60, %v2030_v56  ;;  %v2050_v27 = vld [vmem:[#allocation9 + $0x168] sm:$0xff]  ;;  %v2048_v28 = vld [vmem:[#allocation9 + $0x158] sm:$0xff]  ;;  %v2045_v17 = vld [vmem:[#allocation9 + $0x140] sm:$0xff] }
 0x7b6   :  { %10280 = vpow2.f32 %v7528_v23  ;;  %v8233_v23 = vpack.c.bf16 %v2036_v3, %v2032_v63  ;;  %v2052_v30 = vld [vmem:[#allocation9 + $0x178] sm:$0xff]  ;;  %v2061_v53 = vld [vmem:[#allocation9 + $0x1c0] sm:$0xff]  ;;  %v2063_v3 = vld [vmem:[#allocation9 + $0x1d0] sm:$0xff] }
 0x7b7   :  { %10282 = vpow2.f32 %v7529_v26  ;;  %v2031_v26 = vld [vmem:[#allocation9 + $0xd0] sm:$0xff]  ;;  %v2065_v63 = vld [vmem:[#allocation9 + $0x1e0] sm:$0xff] }
 0x7b8   :  { %10284 = vtanh.f32 %v9946_v32  ;;  %v2038_v32 = vld [vmem:[#allocation9 + $0x108] sm:$0xff] }
 0x7b9   :  { %10286 = vpow2.f32 %v7530_v36  ;;  %v2042_v36 = vld [vmem:[#allocation9 + $0x128] sm:$0xff] }
 0x7c0   :  { %v10281_v40 = vpop.eup %10280 }
 0x7c1   :  { %v1803_v44 = vadd.f32 1.0, %v10281_v40  ;;  %v10283_v48 = vpop.eup %10282  ;;  %v2040_v40 = vld [vmem:[#allocation9 + $0x118] sm:$0xff] }
 0x7c2   :  { %v1804_v54 = vadd.f32 1.0, %v10283_v48  ;;  %v10285_v58 = vpop.eup %10284  ;;  %v8203_v48 = vpack.c.bf16 %v2033_v16, %v2029_v13  ;;  %v2363_v16 = vld [vmem:[#allocation10] sm:$0xff] }
 0x7c3   :  { %10288 = vrcp.f32 %v1803_v44  ;;  %v10287_v62 = vpop.eup %10286  ;;  %v2044_v44 = vld [vmem:[#allocation9 + $0x138] sm:$0xff] }
 0x7c4   :  { %10290 = vrcp.f32 %v1804_v54  ;;  %v1805_v18 = vadd.f32 1.0, %v10287_v62  ;;  %v8235_v54 = vpack.c.bf16 %v2035_v29, %v2031_v26  ;;  %v2041_v62 = vld [vmem:[#allocation9 + $0x120] sm:$0xff]  ;;  %v2365_v26 = vld [vmem:[#allocation10 + $0x10] sm:$0xff] }
 0x7c5   :  { %v2369_v29 = vld [vmem:[#allocation10 + $0x30] sm:$0xff] }
 0x7c6   :  { %10292 = vrcp.f32 %v1805_v18  ;;  %v2043_v18 = vld [vmem:[#allocation9 + $0x130] sm:$0xff] }
 0x7cd   :  { %v10289_v4 = vpop.eup %10288 }
 0x7ce   :  { %v1814_v9 = vmul.f32 %v10289_v4, %v10285_v58  ;;  %v10291_v14 = vpop.eup %10290  ;;  %v2037_v58 = vld [vmem:[#allocation9 + $0x100] sm:$0xff]  ;;  %v8205_v4 = vpack.c.bf16 %v2042_v36, %v2038_v32  ;;  %v2372_v32 = vld [vmem:[#allocation10 + $0x48] sm:$0xff] }
 0x7cf   :  { %v1813_v22 = vmul.f32 %v10291_v14, %v11553_v37  ;;  %v2021_v37 = vld [vmem:[#allocation9 + $0x80] sm:$0xff]  ;;  %v2039_v14 = vld [vmem:[#allocation9 + $0x110] sm:$0xff]  ;;  %v8207_v45 = vpack.c.bf16 %v2041_v62, %v2037_v58  ;;  %v2376_v36 = vld [vmem:[#allocation10 + $0x68] sm:$0xff] }
 0x7d0   :  { %v10293_v52 = vpop.eup %10292  ;;  %v8199_v6 = vpack.c.bf16 %v2025_v15, %v2021_v37  ;;  %v8239_v49 = vpack.c.bf16 %v2043_v18, %v2039_v14  ;;  %v2066_v37 = vld [vmem:[#allocation9 + $0x1e8] sm:$0xff]  ;;  %v2064_v15 = vld [vmem:[#allocation9 + $0x1d8] sm:$0xff]  ;;  %v2375_v58 = vld [vmem:[#allocation10 + $0x60] sm:$0xff] }
 0x7d1   :  { %v11597_v25 = vadd.f32 %v1814_v9, %v1813_v22  ;;  %v8237_v9 = vpack.c.bf16 %v2044_v44, %v2040_v40  ;;  %v2046_v22 = vld [vmem:[#allocation9 + $0x148] sm:$0xff]  ;;  %v2374_v40 = vld [vmem:[#allocation10 + $0x58] sm:$0xff]  ;;  %v11646_v44 = vpack.c.bf16 %v2376_v36, %v2372_v32  ;;  %v2377_v14 = vld [vmem:[#allocation10 + $0x70] sm:$0xff] }
 0x7d2   :  { %v8209_v51 = vpack.c.bf16 %v2050_v27, %v2046_v22  ;;  %v2380_v22 = vld [vmem:[#allocation10 + $0x88] sm:$0xff]  ;;  %v2409_v32 = vld [vmem:[#allocation10 + $0x170] sm:$0xff] }
 0x7d3   :  { %10294 = vtanh.f32 %v11597_v25  ;;  %v2384_v27 = vld [vmem:[#allocation10 + $0xa8] sm:$0xff] }
 0x7d4   :  { %v2412_v36 = vld [vmem:[#allocation10 + $0x188] sm:$0xff] }
 0x7dd   :  { %v10295_v55 = vpop.eup %10294 }
 0x7de   :  { %v11600_v38 = vmul.f32 %v10295_v55, %v10293_v52  ;;  %v8241_v52 = vpack.c.bf16 %v2052_v30, %v2048_v28  ;;  %v2047_v55 = vld [vmem:[#allocation9 + $0x150] sm:$0xff]  ;;  %v2382_v28 = vld [vmem:[#allocation10 + $0x98] sm:$0xff]  ;;  %v11658_v30 = vpack.c.bf16 %v2384_v27, %v2380_v22  ;;  %v2415_v27 = vld [vmem:[#allocation10 + $0x1a0] sm:$0xff] }
 0x7e0   :  { %1890 = vmatmul.mubr.f32.vlgmr.msra.gmra.mrb[14].mxu0 %v11600_v38  ;;  %1961 = vmatmul.mubr.f32.vlgmr.msra.gmra.mrb[14].mxu1 %v11600_v38 }
 0x7e1   :  { %8192 = vmatpush1.bf16.msra.mxu0 %v8191_v57  ;;  %8224 = vmatpush1.bf16.msra.mxu1 %v8223_v59  ;;  %v2051_v57 = vld [vmem:[#allocation9 + $0x170] sm:$0xff]  ;;  %v2054_v59 = vld [vmem:[#allocation9 + $0x188] sm:$0xff] }
 0x7e2   :  { %8194 = vmatprep.subr.bf16.mxu0 %v8193_v2  ;;  %8226 = vmatprep.subr.bf16.mxu1 %v8225_v41  ;;  %v2060_v2 = vld [vmem:[#allocation9 + $0x1b8] sm:$0xff]  ;;  %v8211_v41 = vpack.c.bf16 %v2049_v46, %v2045_v17  ;;  %v8243_v5 = vpack.c.bf16 %v2051_v57, %v2047_v55  ;;  %v8213_v11 = vpack.c.bf16 %v2058_v61, %v2054_v59  ;;  %v2383_v17 = vld [vmem:[#allocation10 + $0xa0] sm:$0xff]  ;;  %v2385_v55 = vld [vmem:[#allocation10 + $0xb0] sm:$0xff] }
 0x7e3   :  { %2133 = vmatprep.mubr.f32.mxu0 %v10904_v0  ;;  %2246 = vmatprep.mubr.f32.mxu1 %v10904_v0  ;;  %v8245_v20 = vpack.c.bf16 %v2060_v2, %v2056_v1  ;;  %v2388_v59 = vld [vmem:[#allocation10 + $0xc8] sm:$0xff]  ;;  %v2390_v1 = vld [vmem:[#allocation10 + $0xd8] sm:$0xff] }
 0x7e4   :  { %v2392_v61 = vld [vmem:[#allocation10 + $0xe8] sm:$0xff] }
 0x7e5   :  { %8196 = vmatpush1.bf16.msra.mxu0 %v8195_v33  ;;  %8228 = vmatpush1.bf16.msra.mxu1 %v8227_v35  ;;  %v2059_v33 = vld [vmem:[#allocation9 + $0x1b0] sm:$0xff]  ;;  %v2062_v35 = vld [vmem:[#allocation9 + $0x1c8] sm:$0xff]  ;;  %v11670_v2 = vpack.c.bf16 %v2392_v61, %v2388_v59  ;;  %v2422_v59 = vld [vmem:[#allocation10 + $0x1d8] sm:$0xff] }
 0x7e6   :  { %8198 = vmatprep.subr.bf16.mxu0 %v8197_v42  ;;  %8230 = vmatprep.subr.bf16.mxu1 %v8229_v47  ;;  %v2068_v42 = vld [vmem:[#allocation9 + $0x1f8] sm:$0xff]  ;;  %v8215_v47 = vpack.c.bf16 %v2057_v8, %v2053_v7  ;;  %v8247_v50 = vpack.c.bf16 %v2059_v33, %v2055_v12  ;;  %v8217_v56 = vpack.c.bf16 %v2066_v37, %v2062_v35  ;;  %v2391_v7 = vld [vmem:[#allocation10 + $0xe0] sm:$0xff]  ;;  %v2393_v12 = vld [vmem:[#allocation10 + $0xf0] sm:$0xff] }
 0x7e7   :  { %v8249_v60 = vpack.c.bf16 %v2068_v42, %v2064_v15  ;;  %v2396_v35 = vld [vmem:[#allocation10 + $0x108] sm:$0xff]  ;;  %v2398_v15 = vld [vmem:[#allocation10 + $0x118] sm:$0xff] }
 0x7e8   :  { %v2400_v37 = vld [vmem:[#allocation10 + $0x128] sm:$0xff] }
 0x7e9   :  { %8200 = vmatpush1.bf16.msra.mxu0 %v8199_v6  ;;  %8232 = vmatpush1.bf16.msra.mxu1 %v8231_v10  ;;  %v2067_v6 = vld [vmem:[#allocation9 + $0x1f0] sm:$0xff]  ;;  %v8219_v10 = vpack.c.bf16 %v2065_v63, %v2061_v53  ;;  %v11682_v42 = vpack.c.bf16 %v2400_v37, %v2396_v35  ;;  %v2399_v53 = vld [vmem:[#allocation10 + $0x120] sm:$0xff] }
 0x7ea   :  { %8202 = vmatprep.subr.bf16.mxu0 %v8201_v19  ;;  %8234 = vmatprep.subr.bf16.mxu1 %v8233_v23  ;;  %v8251_v13 = vpack.c.bf16 %v2067_v6, %v2063_v3  ;;  %v2397_v63 = vld [vmem:[#allocation10 + $0x110] sm:$0xff]  ;;  %v2404_v6 = vld [vmem:[#allocation10 + $0x148] sm:$0xff] }
 0x7eb   :  { %v2401_v3 = vld [vmem:[#allocation10 + $0x130] sm:$0xff] }
 0x7ec   :  { %v2425_v35 = vld [vmem:[#allocation10 + $0x1f0] sm:$0xff] }
 0x7ed   :  { %8204 = vmatpush1.bf16.msra.mxu0 %v8203_v48  ;;  %8236 = vmatpush1.bf16.msra.mxu1 %v8235_v54  ;;  %v2378_v48 = vld [vmem:[#allocation10 + $0x78] sm:$0xff]  ;;  %v2371_v54 = vld [vmem:[#allocation10 + $0x40] sm:$0xff] }
 0x7ee   :  { %8206 = vmatprep.subr.bf16.mxu0 %v8205_v4  ;;  %8238 = vmatprep.subr.bf16.mxu1 %v8237_v9  ;;  %v11648_v62 = vpack.c.bf16 %v2378_v48, %v2374_v40  ;;  %v11650_v4 = vpack.c.bf16 %v2375_v58, %v2371_v54  ;;  %v2373_v9 = vld [vmem:[#allocation10 + $0x50] sm:$0xff]  ;;  %v2416_v40 = vld [vmem:[#allocation10 + $0x1a8] sm:$0xff]  ;;  %v2414_v58 = vld [vmem:[#allocation10 + $0x198] sm:$0xff] }
 0x7ef   :  { %v11653_v18 = vpack.c.bf16 %v2377_v14, %v2373_v9  ;;  %v11704_v54 = vpack.c.bf16 %v2416_v40, %v2412_v36  ;;  %v2418_v9 = vld [vmem:[#allocation10 + $0x1b8] sm:$0xff]  ;;  %v2411_v14 = vld [vmem:[#allocation10 + $0x180] sm:$0xff] }
 0x7f0   :  { %v11706_v22 = vpack.c.bf16 %v2418_v9, %v2414_v58 }
 0x7f1   :  { %8208 = vmatpush1.bf16.msra.mxu0 %v8207_v45  ;;  %8240 = vmatpush1.bf16.msra.mxu1 %v8239_v49  ;;  %v2386_v45 = vld [vmem:[#allocation10 + $0xb8] sm:$0xff]  ;;  %v2379_v49 = vld [vmem:[#allocation10 + $0x80] sm:$0xff] }
 0x7f2   :  { %8210 = vmatprep.subr.bf16.mxu0 %v8209_v51  ;;  %8242 = vmatprep.subr.bf16.mxu1 %v8241_v52  ;;  %v11660_v46 = vpack.c.bf16 %v2386_v45, %v2382_v28  ;;  %v11662_v51 = vpack.c.bf16 %v2383_v17, %v2379_v49  ;;  %v2381_v52 = vld [vmem:[#allocation10 + $0x90] sm:$0xff]  ;;  %v11709_v49 = vpack.c.bf16 %v2415_v27, %v2411_v14 }
 0x7f3   :  { %v11665_v57 = vpack.c.bf16 %v2385_v55, %v2381_v52  ;;  %v2413_v28 = vld [vmem:[#allocation10 + $0x190] sm:$0xff]  ;;  %v2420_v52 = vld [vmem:[#allocation10 + $0x1c8] sm:$0xff] }
 0x7f4   :  { %v2417_v45 = vld [vmem:[#allocation10 + $0x1b0] sm:$0xff]  ;;  %v2424_v55 = vld [vmem:[#allocation10 + $0x1e8] sm:$0xff] }
 0x7f5   :  { %8212 = vmatpush1.bf16.msra.mxu0 %v8211_v41  ;;  %8244 = vmatpush1.bf16.msra.mxu1 %v8243_v5  ;;  %v2394_v41 = vld [vmem:[#allocation10 + $0xf8] sm:$0xff]  ;;  %v2387_v5 = vld [vmem:[#allocation10 + $0xc0] sm:$0xff]  ;;  %v11713_v17 = vpack.c.bf16 %v2417_v45, %v2413_v28  ;;  %v11718_v61 = vpack.c.bf16 %v2424_v55, %v2420_v52 }
 0x7f6   :  { %8214 = vmatprep.subr.bf16.mxu0 %v8213_v11  ;;  %8246 = vmatprep.subr.bf16.mxu1 %v8245_v20  ;;  %v11672_v8 = vpack.c.bf16 %v2394_v41, %v2390_v1  ;;  %v11674_v11 = vpack.c.bf16 %v2391_v7, %v2387_v5  ;;  %v2389_v20 = vld [vmem:[#allocation10 + $0xd0] sm:$0xff]  ;;  %v2426_v1 = vld [vmem:[#allocation10 + $0x1f8] sm:$0xff]  ;;  %v2419_v41 = vld [vmem:[#allocation10 + $0x1c0] sm:$0xff] }
 0x7f7   :  { %v11677_v33 = vpack.c.bf16 %v2393_v12, %v2389_v20  ;;  %v2423_v5 = vld [vmem:[#allocation10 + $0x1e0] sm:$0xff]  ;;  %v11720_v7 = vpack.c.bf16 %v2426_v1, %v2422_v59  ;;  %v2421_v12 = vld [vmem:[#allocation10 + $0x1d0] sm:$0xff] }
 0x7f8   :  { %v11722_v20 = vpack.c.bf16 %v2423_v5, %v2419_v41  ;;  %v11725_v37 = vpack.c.bf16 %v2425_v35, %v2421_v12 }
 0x7f9   :  { %8216 = vmatpush1.bf16.msra.mxu0 %v8215_v47  ;;  %8248 = vmatpush1.bf16.msra.mxu1 %v8247_v50  ;;  %v2402_v47 = vld [vmem:[#allocation10 + $0x138] sm:$0xff]  ;;  %v2395_v50 = vld [vmem:[#allocation10 + $0x100] sm:$0xff] }
 0x7fa   :  { %8218 = vmatprep.subr.bf16.mxu0 %v8217_v56  ;;  %8250 = vmatprep.subr.bf16.mxu1 %v8249_v60  ;;  %v11684_v56 = vpack.c.bf16 %v2402_v47, %v2398_v15  ;;  %v11686_v60 = vpack.c.bf16 %v2399_v53, %v2395_v50  ;;  %v10696_v50 = vld [vmem:[%s13056_s3] sm:$0xff] }
 0x7fd   :  { %8220 = vmatpush1.bf16.msra.mxu0 %v8219_v10  ;;  %8252 = vmatpush1.bf16.msra.mxu1 %v8251_v13  ;;  %v11689_v10 = vpack.c.bf16 %v2401_v3, %v2397_v63  ;;  %v2408_v13 = vld [vmem:[#allocation10 + $0x168] sm:$0xff] }
 0x800   :  { %2134 = vmatmul.mubr.f32.vlgmr.msra.gmra.mrb[16].mxu0 %v11326_v21  ;;  %2247 = vmatmul.mubr.f32.vlgmr.msra.gmra.mrb[16].mxu1 %v11326_v21  ;;  %v2364_v21 = vld [vmem:[#allocation10 + $0x8] sm:$0xff] }
 0x801   :  { %2139 = vmatprep.mubr.f32.mxu0 %v10904_v0  ;;  %2252 = vmatprep.mubr.f32.mxu1 %v10904_v0 }
 0x804   :  { %2140 = vmatmul.mubr.f32.gmra.mrb[18].mxu0 %v11372_v24  ;;  %2253 = vmatmul.mubr.f32.gmra.mrb[18].mxu1 %v11372_v24  ;;  %v2368_v24 = vld [vmem:[#allocation10 + $0x28] sm:$0xff] }
 0x805   :  { %2145 = vmatprep.mubr.f32.mxu0 %v10904_v0  ;;  %2258 = vmatprep.mubr.f32.mxu1 %v10904_v0 }
 0x808   :  { %2146 = vmatmul.mubr.f32.gmra.mrb[20].mxu0 %v11418_v31  ;;  %2259 = vmatmul.mubr.f32.gmra.mrb[20].mxu1 %v11418_v31  ;;  %v2366_v31 = vld [vmem:[#allocation10 + $0x18] sm:$0xff] }
 0x809   :  { %2151 = vmatprep.mubr.f32.mxu0 %v10904_v0  ;;  %2264 = vmatprep.mubr.f32.mxu1 %v10904_v0 }
 0x80c   :  { %2152 = vmatmul.mubr.f32.gmra.mrb[22].mxu0 %v11464_v34  ;;  %2265 = vmatmul.mubr.f32.gmra.mrb[22].mxu1 %v11464_v34  ;;  %v11634_v34 = vpack.c.bf16 %v2368_v24, %v2364_v21  ;;  %v2406_v21 = vld [vmem:[#allocation10 + $0x158] sm:$0xff] }
 0x80d   :  { %2157 = vmatprep.mubr.f32.mxu0 %v10904_v0  ;;  %2270 = vmatprep.mubr.f32.mxu1 %v10904_v0  ;;  %v2410_v24 = vld [vmem:[#allocation10 + $0x178] sm:$0xff] }
 0x80e   :  { %8254 = vmatprep.subr.bf16.mxu0 %v11634_v34 }
 0x810   :  { %2158 = vmatmul.mubr.f32.gmra.mrb[24].mxu0 %v11510_v39  ;;  %2271 = vmatmul.mubr.f32.gmra.mrb[24].mxu1 %v11510_v39  ;;  %v2370_v39 = vld [vmem:[#allocation10 + $0x38] sm:$0xff] }
 0x811   :  { %2163 = vmatprep.mubr.f32.mxu0 %v10904_v0  ;;  %2276 = vmatprep.mubr.f32.mxu1 %v10904_v0  ;;  %v11636_v19 = vpack.c.bf16 %v2370_v39, %v2366_v31  ;;  %v11693_v31 = vpack.c.bf16 %v2408_v13, %v2404_v6  ;;  %v11695_v39 = vpack.c.bf16 %v2410_v24, %v2406_v21  ;;  %v10697_v6 = vld [vmem:[%s13056_s3 + $0x8] sm:$0xff] }
 0x813   :  { %8286 = vmatprep.subr.bf16.mxu1 %v11636_v19 }
 0x814   :  { %2164 = vmatmul.mubr.f32.gmra.mrb[26].mxu0 %v11556_v43  ;;  %2277 = vmatmul.mubr.f32.gmra.mrb[26].mxu1 %v11556_v43  ;;  %v2367_v43 = vld [vmem:[#allocation10 + $0x20] sm:$0xff] }
 0x815   :  { %2169 = vmatprep.mubr.f32.mxu0 %v10904_v0  ;;  %2282 = vmatprep.mubr.f32.mxu1 %v10904_v0  ;;  %v11638_v23 = vpack.c.bf16 %v2367_v43, %v2363_v16  ;;  %v2403_v16 = vld [vmem:[#allocation10 + $0x140] sm:$0xff] }
 0x816   :  { %v2407_v43 = vld [vmem:[#allocation10 + $0x160] sm:$0xff] }
 0x817   :  { %8256 = vmatpush1.bf16.msra.mxu0 %v11638_v23 }
 0x818   :  { %2170 = vmatmul.mubr.f32.gmra.mrb[28].mxu0 %v11600_v38  ;;  %2283 = vmatmul.mubr.f32.gmra.mrb[28].mxu1 %v11600_v38  ;;  %v11641_v38 = vpack.c.bf16 %v2369_v29, %v2365_v26  ;;  %v2405_v26 = vld [vmem:[#allocation10 + $0x150] sm:$0xff]  ;;  %v11698_v29 = vpack.c.bf16 %v2407_v43, %v2403_v16 }
 0x819   :  { %2175 = vmatprep.mubr.f32.mxu0 %v10904_v0  ;;  %2288 = vmatprep.mubr.f32.mxu1 %v10904_v0  ;;  %v11702_v48 = vpack.c.bf16 %v2409_v32, %v2405_v26  ;;  %v10698_v16 = vld [vmem:[%s13056_s3 + $0x10] sm:$0xff]  ;;  %v10699_v26 = vld [vmem:[%s13056_s3 + $0x18] sm:$0xff] }
 0x81a   :  { %8288 = vmatpush1.bf16.msra.mxu1 %v11641_v38  ;;  %8258 = vmatprep.subr.bf16.mxu0 %v11646_v44 }
 0x81b   :  { %8290 = vmatprep.subr.bf16.mxu1 %v11648_v62  ;;  %8260 = vmatpush1.bf16.msra.mxu0 %v11650_v4 }
 0x81c   :  { %8262 = vmatprep.subr.bf16.mxu0 %v11658_v30 }
 0x81e   :  { %8292 = vmatpush1.bf16.msra.mxu1 %v11653_v18 }
 0x81f   :  { %8294 = vmatprep.subr.bf16.mxu1 %v11660_v46  ;;  %8264 = vmatpush1.bf16.msra.mxu0 %v11662_v51 }
 0x820   :  { %8266 = vmatprep.subr.bf16.mxu0 %v11670_v2 }
 0x822   :  { %8296 = vmatpush1.bf16.msra.mxu1 %v11665_v57 }
 0x823   :  { %8298 = vmatprep.subr.bf16.mxu1 %v11672_v8  ;;  %8268 = vmatpush1.bf16.msra.mxu0 %v11674_v11 }
 0x824   :  { %8270 = vmatprep.subr.bf16.mxu0 %v11682_v42 }
 0x826   :  { %8300 = vmatpush1.bf16.msra.mxu1 %v11677_v33 }
 0x827   :  { %8302 = vmatprep.subr.bf16.mxu1 %v11684_v56  ;;  %8272 = vmatpush1.bf16.msra.mxu0 %v11686_v60 }
 0x828   :  { %8274 = vmatprep.subr.bf16.mxu0 %v11693_v31 }
 0x82a   :  { %8304 = vmatpush1.bf16.msra.mxu1 %v11689_v10 }
 0x82b   :  { %8306 = vmatprep.subr.bf16.mxu1 %v11695_v39  ;;  %8276 = vmatpush1.bf16.msra.mxu0 %v11698_v29 }
 0x82c   :  { %8278 = vmatprep.subr.bf16.mxu0 %v11704_v54 }
 0x82e   :  { %8308 = vmatpush1.bf16.msra.mxu1 %v11702_v48 }
 0x82f   :  { %8310 = vmatprep.subr.bf16.mxu1 %v11706_v22  ;;  %8280 = vmatpush1.bf16.msra.mxu0 %v11709_v49 }
 0x830   :  { %8282 = vmatprep.subr.bf16.mxu0 %v11718_v61 }
 0x832   :  { %8312 = vmatpush1.bf16.msra.mxu1 %v11713_v17 }
 0x833   :  { %8314 = vmatprep.subr.bf16.mxu1 %v11720_v7  ;;  %8284 = vmatpush1.bf16.msra.mxu0 %v11722_v20 }
 0x834   :  { %8318 = vmatprep.subr.bf16.mxu0 %v11634_v34 }
 0x836   :  { %8316 = vmatpush1.bf16.msra.mxu1 %v11725_v37 }
 0x837   :  { %8350 = vmatprep.subr.bf16.mxu1 %v11636_v19 }
 0x8b3   :  { %v1891_v15 = vpop.f32.mrb[14].mxu0  ;;  %v1962_v47 = vpop.f32.mrb[14].mxu1 }
 0x8b4   :  { %v9931_v53 = vadd.f32 %v10696_v50, %v1891_v15  ;;  %v1893_v63 = vpop.f32.mrb[15].mxu0  ;;  %v1964_v3 = vpop.f32.mrb[15].mxu1  ;;  %v9947_v43 = vadd.f32 %v10698_v16, %v1962_v47  ;;  %v11791_v15 = vld [vmem:[%s13059_s6 + $0x8] sm:$0xff] }
 0x8b5   :  { %v9932_v13 = vadd.f32 %v10697_v6, %v1893_v63  ;;  %v9948_v32 = vadd.f32 %v10699_v26, %v1964_v3 }
 0x8b6   :  { %v7531_v21 = vmul.f32 -1.442695, %v9931_v53  ;;  %v7533_v36 = vmul.f32 -1.442695, %v9947_v43  ;;  %v11804_v43 = vld [vmem:[%s13059_s6 + $0x18] sm:$0xff] }
 0x8b7   :  { %v7532_v24 = vmul.f32 -1.442695, %v9932_v13 }
 0x8b8   :  { %10296 = vpow2.f32 %v7531_v21 }
 0x8b9   :  { %10298 = vpow2.f32 %v7532_v24  ;;  %v11798_v24 = vld [vmem:[%s13059_s6 + $0x10] sm:$0xff] }
 0x8ba   :  { %10300 = vtanh.f32 %v9948_v32 }
 0x8bb   :  { %10302 = vpow2.f32 %v7533_v36 }
 0x8c2   :  { %v10297_v40 = vpop.eup %10296 }
 0x8c3   :  { %v1980_v58 = vadd.f32 1.0, %v10297_v40  ;;  %v10299_v9 = vpop.eup %10298 }
 0x8c4   :  { %v1981_v14 = vadd.f32 1.0, %v10299_v9  ;;  %v10301_v27 = vpop.eup %10300 }
 0x8c5   :  { %10304 = vrcp.f32 %v1980_v58  ;;  %v10303_v28 = vpop.eup %10302 }
 0x8c6   :  { %10306 = vrcp.f32 %v1981_v14  ;;  %v1982_v59 = vadd.f32 1.0, %v10303_v28 }
 0x8c8   :  { %10308 = vrcp.f32 %v1982_v59 }
 0x8cf   :  { %v10305_v45 = vpop.eup %10304 }
 0x8d0   :  { %v1991_v52 = vmul.f32 %v10305_v45, %v10301_v27  ;;  %v10307_v55 = vpop.eup %10306 }
 0x8d1   :  { %v1990_v1 = vmul.f32 %v10307_v55, %v11597_v25  ;;  %v11786_v25 = vld [vmem:[%s13059_s6] sm:$0xff] }
 0x8d2   :  { %v10309_v5 = vpop.eup %10308 }
 0x8d3   :  { %v1992_v41 = vadd.f32 %v1991_v52, %v1990_v1 }
 0x8d5   :  { %10310 = vtanh.f32 %v1992_v41 }
 0x8df   :  { %v10311_v12 = vpop.eup %10310 }
 0x8e0   :  { %v1994_v35 = vmul.f32 %v10311_v12, %v10309_v5 }
 0x8e2   :  { %2176 = vmatmul.mubr.f32.gmra.mrb[30].mxu0 %v1994_v35  ;;  %2289 = vmatmul.mubr.f32.gmra.mrb[30].mxu1 %v1994_v35 }
 0x8e3   :  { %2495 = vmatprep.mubr.f32.mxu0 %v10904_v0  ;;  %2566 = vmatprep.mubr.f32.mxu1 %v10904_v0 }
 0x8e6   :  { %2496 = vmatmul.mubr.f32.vlgmr.msra.gmra.mrb[16].mxu0 %v10904_v0  ;;  %2567 = vmatmul.mubr.f32.vlgmr.msra.gmra.mrb[16].mxu1 %v10904_v0 }
 0x8e7   :  { %8320 = vmatpush1.bf16.msra.mxu0 %v11638_v23  ;;  %8352 = vmatpush1.bf16.msra.mxu1 %v11641_v38 }
 0x8e8   :  { %8322 = vmatprep.subr.bf16.mxu0 %v11646_v44  ;;  %8354 = vmatprep.subr.bf16.mxu1 %v11648_v62 }
 0x8e9   :  { %2670 = vmatprep.mubr.f32.mxu0 %v10904_v0  ;;  %2741 = vmatprep.mubr.f32.mxu1 %v10904_v0 }
 0x8eb   :  { %8324 = vmatpush1.bf16.msra.mxu0 %v11650_v4  ;;  %8356 = vmatpush1.bf16.msra.mxu1 %v11653_v18 }
 0x8ec   :  { %8326 = vmatprep.subr.bf16.mxu0 %v11658_v30  ;;  %8358 = vmatprep.subr.bf16.mxu1 %v11660_v46 }
 0x8ef   :  { %8328 = vmatpush1.bf16.msra.mxu0 %v11662_v51  ;;  %8360 = vmatpush1.bf16.msra.mxu1 %v11665_v57 }
 0x8f0   :  { %8330 = vmatprep.subr.bf16.mxu0 %v11670_v2  ;;  %8362 = vmatprep.subr.bf16.mxu1 %v11672_v8 }
 0x8f3   :  { %8332 = vmatpush1.bf16.msra.mxu0 %v11674_v11  ;;  %8364 = vmatpush1.bf16.msra.mxu1 %v11677_v33 }
 0x8f4   :  { %8334 = vmatprep.subr.bf16.mxu0 %v11682_v42  ;;  %8366 = vmatprep.subr.bf16.mxu1 %v11684_v56 }
 0x8f7   :  { %8336 = vmatpush1.bf16.msra.mxu0 %v11686_v60  ;;  %8368 = vmatpush1.bf16.msra.mxu1 %v11689_v10 }
 0x8f8   :  { %8338 = vmatprep.subr.bf16.mxu0 %v11693_v31  ;;  %8370 = vmatprep.subr.bf16.mxu1 %v11695_v39 }
 0x8fb   :  { %8340 = vmatpush1.bf16.msra.mxu0 %v11698_v29  ;;  %8372 = vmatpush1.bf16.msra.mxu1 %v11702_v48 }
 0x8fc   :  { %8342 = vmatprep.subr.bf16.mxu0 %v11704_v54  ;;  %8374 = vmatprep.subr.bf16.mxu1 %v11706_v22 }
 0x8ff   :  { %8344 = vmatpush1.bf16.msra.mxu0 %v11709_v49  ;;  %8376 = vmatpush1.bf16.msra.mxu1 %v11713_v17 }
 0x900   :  { %8346 = vmatprep.subr.bf16.mxu0 %v11718_v61  ;;  %8378 = vmatprep.subr.bf16.mxu1 %v11720_v7 }
 0x903   :  { %8348 = vmatpush1.bf16.msra.mxu0 %v11722_v20  ;;  %8380 = vmatpush1.bf16.msra.mxu1 %v11725_v37 }
 0x904   :  { %8382 = vmatprep.subr.bf16.mxu0 %v11634_v34  ;;  %8414 = vmatprep.subr.bf16.mxu1 %v11636_v19 }
 0x9b9   :  { %v2497_v47 = vpop.f32.mrb[16].mxu0  ;;  %v2568_v50 = vpop.f32.mrb[16].mxu1 }
 0x9ba   :  { %v9949_v53 = vadd.f32 %v2497_v47, %v11786_v25  ;;  %v2499_v63 = vpop.f32.mrb[17].mxu0  ;;  %v2570_v3 = vpop.f32.mrb[17].mxu1  ;;  %v9965_v16 = vadd.f32 %v2568_v50, %v11798_v24 }
 0x9bb   :  { %v9950_v6 = vadd.f32 %v2499_v63, %v11791_v15  ;;  %v9966_v26 = vadd.f32 %v2570_v3, %v11804_v43 }
 0x9bc   :  { %v7534_v13 = vmul.f32 -1.442695, %v9949_v53  ;;  %v7536_v32 = vmul.f32 -1.442695, %v9965_v16 }
 0x9bd   :  { %v7535_v21 = vmul.f32 -1.442695, %v9950_v6 }
 0x9be   :  { %10312 = vpow2.f32 %v7534_v13 }
 0x9bf   :  { %10314 = vpow2.f32 %v7535_v21 }
 0x9c0   :  { %10316 = vtanh.f32 %v9966_v26 }
 0x9c1   :  { %10318 = vpow2.f32 %v7536_v32 }
 0x9c8   :  { %v10313_v36 = vpop.eup %10312 }
 0x9c9   :  { %v2586_v40 = vadd.f32 1.0, %v10313_v36  ;;  %v10315_v58 = vpop.eup %10314 }
 0x9ca   :  { %v2587_v9 = vadd.f32 1.0, %v10315_v58  ;;  %v10317_v14 = vpop.eup %10316 }
 0x9cb   :  { %10320 = vrcp.f32 %v2586_v40  ;;  %v10319_v27 = vpop.eup %10318 }
 0x9cc   :  { %10322 = vrcp.f32 %v2587_v9  ;;  %v2588_v55 = vadd.f32 1.0, %v10319_v27 }
 0x9ce   :  { %10324 = vrcp.f32 %v2588_v55 }
 0x9d5   :  { %v10321_v28 = vpop.eup %10320 }
 0x9d6   :  { %v2597_v45 = vmul.f32 %v10321_v28, %v10317_v14  ;;  %v10323_v52 = vpop.eup %10322 }
 0x9d7   :  { %v2596_v59 = vmul.f32 0.0, %v10323_v52 }
 0x9d8   :  { %v10325_v41 = vpop.eup %10324 }
 0x9d9   :  { %v11807_v1 = vadd.f32 %v2597_v45, %v2596_v59 }
 0x9db   :  { %10326 = vtanh.f32 %v11807_v1 }
 0x9e5   :  { %v10327_v5 = vpop.eup %10326 }
 0x9e6   :  { %v11810_v12 = vmul.f32 %v10327_v5, %v10325_v41 }
 0x9e8   :  { %2671 = vmatmul.mubr.f32.vlgmr.msra.gmra.mrb[18].mxu0 %v11810_v12  ;;  %2742 = vmatmul.mubr.f32.vlgmr.msra.gmra.mrb[18].mxu1 %v11810_v12 }
 0x9e9   :  { %8384 = vmatpush1.bf16.msra.mxu0 %v11638_v23  ;;  %8416 = vmatpush1.bf16.msra.mxu1 %v11641_v38 }
 0x9ea   :  { %8386 = vmatprep.subr.bf16.mxu0 %v11646_v44  ;;  %8418 = vmatprep.subr.bf16.mxu1 %v11648_v62 }
 0x9eb   :  { %2846 = vmatprep.mubr.f32.mxu0 %v10904_v0  ;;  %2917 = vmatprep.mubr.f32.mxu1 %v10904_v0 }
 0x9ed   :  { %8388 = vmatpush1.bf16.msra.mxu0 %v11650_v4  ;;  %8420 = vmatpush1.bf16.msra.mxu1 %v11653_v18 }
 0x9ee   :  { %8390 = vmatprep.subr.bf16.mxu0 %v11658_v30  ;;  %8422 = vmatprep.subr.bf16.mxu1 %v11660_v46 }
 0x9f1   :  { %8392 = vmatpush1.bf16.msra.mxu0 %v11662_v51  ;;  %8424 = vmatpush1.bf16.msra.mxu1 %v11665_v57 }
 0x9f2   :  { %8394 = vmatprep.subr.bf16.mxu0 %v11670_v2  ;;  %8426 = vmatprep.subr.bf16.mxu1 %v11672_v8 }
 0x9f5   :  { %8396 = vmatpush1.bf16.msra.mxu0 %v11674_v11  ;;  %8428 = vmatpush1.bf16.msra.mxu1 %v11677_v33 }
 0x9f6   :  { %8398 = vmatprep.subr.bf16.mxu0 %v11682_v42  ;;  %8430 = vmatprep.subr.bf16.mxu1 %v11684_v56 }
 0x9f9   :  { %8400 = vmatpush1.bf16.msra.mxu0 %v11686_v60  ;;  %8432 = vmatpush1.bf16.msra.mxu1 %v11689_v10 }
 0x9fa   :  { %8402 = vmatprep.subr.bf16.mxu0 %v11693_v31  ;;  %8434 = vmatprep.subr.bf16.mxu1 %v11695_v39 }
 0x9fd   :  { %8404 = vmatpush1.bf16.msra.mxu0 %v11698_v29  ;;  %8436 = vmatpush1.bf16.msra.mxu1 %v11702_v48 }
 0x9fe   :  { %8406 = vmatprep.subr.bf16.mxu0 %v11704_v54  ;;  %8438 = vmatprep.subr.bf16.mxu1 %v11706_v22 }
 0xa01   :  { %8408 = vmatpush1.bf16.msra.mxu0 %v11709_v49  ;;  %8440 = vmatpush1.bf16.msra.mxu1 %v11713_v17 }
 0xa02   :  { %8410 = vmatprep.subr.bf16.mxu0 %v11718_v61  ;;  %8442 = vmatprep.subr.bf16.mxu1 %v11720_v7 }
 0xa05   :  { %8412 = vmatpush1.bf16.msra.mxu0 %v11722_v20  ;;  %8444 = vmatpush1.bf16.msra.mxu1 %v11725_v37 }
 0xa06   :  { %8446 = vmatprep.subr.bf16.mxu0 %v11634_v34  ;;  %8478 = vmatprep.subr.bf16.mxu1 %v11636_v19 }
 0xabb   :  { %v2672_v35 = vpop.f32.mrb[18].mxu0  ;;  %v2743_v47 = vpop.f32.mrb[18].mxu1 }
 0xabc   :  { %v9951_v50 = vadd.f32 %v2672_v35, %v11786_v25  ;;  %v2674_v53 = vpop.f32.mrb[19].mxu0  ;;  %v2745_v63 = vpop.f32.mrb[19].mxu1  ;;  %v9967_v21 = vadd.f32 %v2743_v47, %v11798_v24 }
 0xabd   :  { %v9952_v3 = vadd.f32 %v2674_v53, %v11791_v15  ;;  %v9968_v16 = vadd.f32 %v2745_v63, %v11804_v43 }
 0xabe   :  { %v7537_v6 = vmul.f32 -1.442695, %v9951_v50  ;;  %v7539_v26 = vmul.f32 -1.442695, %v9967_v21 }
 0xabf   :  { %v7538_v13 = vmul.f32 -1.442695, %v9952_v3 }
 0xac0   :  { %10328 = vpow2.f32 %v7537_v6 }
 0xac1   :  { %10330 = vpow2.f32 %v7538_v13 }
 0xac2   :  { %10332 = vtanh.f32 %v9968_v16 }
 0xac3   :  { %10334 = vpow2.f32 %v7539_v26 }
 0xaca   :  { %v10329_v32 = vpop.eup %10328 }
 0xacb   :  { %v2761_v36 = vadd.f32 1.0, %v10329_v32  ;;  %v10331_v40 = vpop.eup %10330 }
 0xacc   :  { %v2762_v58 = vadd.f32 1.0, %v10331_v40  ;;  %v10333_v9 = vpop.eup %10332 }
 0xacd   :  { %10336 = vrcp.f32 %v2761_v36  ;;  %v10335_v14 = vpop.eup %10334 }
 0xace   :  { %10338 = vrcp.f32 %v2762_v58  ;;  %v2763_v52 = vadd.f32 1.0, %v10335_v14 }
 0xad0   :  { %10340 = vrcp.f32 %v2763_v52 }
 0xad7   :  { %v10337_v27 = vpop.eup %10336 }
 0xad8   :  { %v2772_v28 = vmul.f32 %v10337_v27, %v10333_v9  ;;  %v10339_v45 = vpop.eup %10338 }
 0xad9   :  { %v2771_v55 = vmul.f32 %v10339_v45, %v11807_v1 }
 0xada   :  { %v10341_v41 = vpop.eup %10340 }
 0xadb   :  { %v11853_v59 = vadd.f32 %v2772_v28, %v2771_v55 }
 0xadd   :  { %10342 = vtanh.f32 %v11853_v59 }
 0xae7   :  { %v10343_v5 = vpop.eup %10342 }
 0xae8   :  { %v11856_v35 = vmul.f32 %v10343_v5, %v10341_v41 }
 0xaea   :  { %2847 = vmatmul.mubr.f32.vlgmr.msra.gmra.mrb[20].mxu0 %v11856_v35  ;;  %2918 = vmatmul.mubr.f32.vlgmr.msra.gmra.mrb[20].mxu1 %v11856_v35 }
 0xaeb   :  { %8448 = vmatpush1.bf16.msra.mxu0 %v11638_v23  ;;  %8480 = vmatpush1.bf16.msra.mxu1 %v11641_v38 }
 0xaec   :  { %8450 = vmatprep.subr.bf16.mxu0 %v11646_v44  ;;  %8482 = vmatprep.subr.bf16.mxu1 %v11648_v62 }
 0xaed   :  { %3022 = vmatprep.mubr.f32.mxu0 %v10904_v0  ;;  %3093 = vmatprep.mubr.f32.mxu1 %v10904_v0 }
 0xaef   :  { %8452 = vmatpush1.bf16.msra.mxu0 %v11650_v4  ;;  %8484 = vmatpush1.bf16.msra.mxu1 %v11653_v18 }
 0xaf0   :  { %8454 = vmatprep.subr.bf16.mxu0 %v11658_v30  ;;  %8486 = vmatprep.subr.bf16.mxu1 %v11660_v46 }
 0xaf3   :  { %8456 = vmatpush1.bf16.msra.mxu0 %v11662_v51  ;;  %8488 = vmatpush1.bf16.msra.mxu1 %v11665_v57 }
 0xaf4   :  { %8458 = vmatprep.subr.bf16.mxu0 %v11670_v2  ;;  %8490 = vmatprep.subr.bf16.mxu1 %v11672_v8 }
 0xaf7   :  { %8460 = vmatpush1.bf16.msra.mxu0 %v11674_v11  ;;  %8492 = vmatpush1.bf16.msra.mxu1 %v11677_v33 }
 0xaf8   :  { %8462 = vmatprep.subr.bf16.mxu0 %v11682_v42  ;;  %8494 = vmatprep.subr.bf16.mxu1 %v11684_v56 }
 0xafb   :  { %8464 = vmatpush1.bf16.msra.mxu0 %v11686_v60  ;;  %8496 = vmatpush1.bf16.msra.mxu1 %v11689_v10 }
 0xafc   :  { %8466 = vmatprep.subr.bf16.mxu0 %v11693_v31  ;;  %8498 = vmatprep.subr.bf16.mxu1 %v11695_v39 }
 0xaff   :  { %8468 = vmatpush1.bf16.msra.mxu0 %v11698_v29  ;;  %8500 = vmatpush1.bf16.msra.mxu1 %v11702_v48 }
 0xb00   :  { %8470 = vmatprep.subr.bf16.mxu0 %v11704_v54  ;;  %8502 = vmatprep.subr.bf16.mxu1 %v11706_v22 }
 0xb03   :  { %8472 = vmatpush1.bf16.msra.mxu0 %v11709_v49  ;;  %8504 = vmatpush1.bf16.msra.mxu1 %v11713_v17 }
 0xb04   :  { %8474 = vmatprep.subr.bf16.mxu0 %v11718_v61  ;;  %8506 = vmatprep.subr.bf16.mxu1 %v11720_v7 }
 0xb07   :  { %8476 = vmatpush1.bf16.msra.mxu0 %v11722_v20  ;;  %8508 = vmatpush1.bf16.msra.mxu1 %v11725_v37 }
 0xb08   :  { %8510 = vmatprep.subr.bf16.mxu0 %v11634_v34  ;;  %8542 = vmatprep.subr.bf16.mxu1 %v11636_v19 }
 0xbbd   :  { %v2848_v1 = vpop.f32.mrb[20].mxu0  ;;  %v2919_v47 = vpop.f32.mrb[20].mxu1 }
 0xbbe   :  { %v9953_v50 = vadd.f32 %v2848_v1, %v11786_v25  ;;  %v2850_v53 = vpop.f32.mrb[21].mxu0  ;;  %v2921_v63 = vpop.f32.mrb[21].mxu1  ;;  %v9969_v21 = vadd.f32 %v2919_v47, %v11798_v24 }
 0xbbf   :  { %v9954_v3 = vadd.f32 %v2850_v53, %v11791_v15  ;;  %v9970_v16 = vadd.f32 %v2921_v63, %v11804_v43 }
 0xbc0   :  { %v7540_v6 = vmul.f32 -1.442695, %v9953_v50  ;;  %v7542_v26 = vmul.f32 -1.442695, %v9969_v21 }
 0xbc1   :  { %v7541_v13 = vmul.f32 -1.442695, %v9954_v3 }
 0xbc2   :  { %10344 = vpow2.f32 %v7540_v6 }
 0xbc3   :  { %10346 = vpow2.f32 %v7541_v13 }
 0xbc4   :  { %10348 = vtanh.f32 %v9970_v16 }
 0xbc5   :  { %10350 = vpow2.f32 %v7542_v26 }
 0xbcc   :  { %v10345_v32 = vpop.eup %10344 }
 0xbcd   :  { %v2937_v36 = vadd.f32 1.0, %v10345_v32  ;;  %v10347_v40 = vpop.eup %10346 }
 0xbce   :  { %v2938_v58 = vadd.f32 1.0, %v10347_v40  ;;  %v10349_v9 = vpop.eup %10348 }
 0xbcf   :  { %10352 = vrcp.f32 %v2937_v36  ;;  %v10351_v14 = vpop.eup %10350 }
 0xbd0   :  { %10354 = vrcp.f32 %v2938_v58  ;;  %v2939_v52 = vadd.f32 1.0, %v10351_v14 }
 0xbd2   :  { %10356 = vrcp.f32 %v2939_v52 }
 0xbd9   :  { %v10353_v27 = vpop.eup %10352 }
 0xbda   :  { %v2948_v28 = vmul.f32 %v10353_v27, %v10349_v9  ;;  %v10355_v45 = vpop.eup %10354 }
 0xbdb   :  { %v2947_v55 = vmul.f32 %v10355_v45, %v11853_v59 }
 0xbdc   :  { %v10357_v5 = vpop.eup %10356 }
 0xbdd   :  { %v11899_v41 = vadd.f32 %v2948_v28, %v2947_v55 }
 0xbdf   :  { %10358 = vtanh.f32 %v11899_v41 }
 0xbe9   :  { %v10359_v1 = vpop.eup %10358 }
 0xbea   :  { %v11902_v47 = vmul.f32 %v10359_v1, %v10357_v5 }
 0xbec   :  { %3023 = vmatmul.mubr.f32.vlgmr.msra.gmra.mrb[22].mxu0 %v11902_v47  ;;  %3094 = vmatmul.mubr.f32.vlgmr.msra.gmra.mrb[22].mxu1 %v11902_v47 }
 0xbed   :  { %8512 = vmatpush1.bf16.msra.mxu0 %v11638_v23  ;;  %8544 = vmatpush1.bf16.msra.mxu1 %v11641_v38 }
 0xbee   :  { %8514 = vmatprep.subr.bf16.mxu0 %v11646_v44  ;;  %8546 = vmatprep.subr.bf16.mxu1 %v11648_v62 }
 0xbef   :  { %3198 = vmatprep.mubr.f32.mxu0 %v10904_v0  ;;  %3269 = vmatprep.mubr.f32.mxu1 %v10904_v0 }
 0xbf1   :  { %8516 = vmatpush1.bf16.msra.mxu0 %v11650_v4  ;;  %8548 = vmatpush1.bf16.msra.mxu1 %v11653_v18 }
 0xbf2   :  { %8518 = vmatprep.subr.bf16.mxu0 %v11658_v30  ;;  %8550 = vmatprep.subr.bf16.mxu1 %v11660_v46 }
 0xbf5   :  { %8520 = vmatpush1.bf16.msra.mxu0 %v11662_v51  ;;  %8552 = vmatpush1.bf16.msra.mxu1 %v11665_v57 }
 0xbf6   :  { %8522 = vmatprep.subr.bf16.mxu0 %v11670_v2  ;;  %8554 = vmatprep.subr.bf16.mxu1 %v11672_v8 }
 0xbf9   :  { %8524 = vmatpush1.bf16.msra.mxu0 %v11674_v11  ;;  %8556 = vmatpush1.bf16.msra.mxu1 %v11677_v33 }
 0xbfa   :  { %8526 = vmatprep.subr.bf16.mxu0 %v11682_v42  ;;  %8558 = vmatprep.subr.bf16.mxu1 %v11684_v56 }
 0xbfd   :  { %8528 = vmatpush1.bf16.msra.mxu0 %v11686_v60  ;;  %8560 = vmatpush1.bf16.msra.mxu1 %v11689_v10 }
 0xbfe   :  { %8530 = vmatprep.subr.bf16.mxu0 %v11693_v31  ;;  %8562 = vmatprep.subr.bf16.mxu1 %v11695_v39 }
 0xc01   :  { %8532 = vmatpush1.bf16.msra.mxu0 %v11698_v29  ;;  %8564 = vmatpush1.bf16.msra.mxu1 %v11702_v48 }
 0xc02   :  { %8534 = vmatprep.subr.bf16.mxu0 %v11704_v54  ;;  %8566 = vmatprep.subr.bf16.mxu1 %v11706_v22 }
 0xc05   :  { %8536 = vmatpush1.bf16.msra.mxu0 %v11709_v49  ;;  %8568 = vmatpush1.bf16.msra.mxu1 %v11713_v17 }
 0xc06   :  { %8538 = vmatprep.subr.bf16.mxu0 %v11718_v61  ;;  %8570 = vmatprep.subr.bf16.mxu1 %v11720_v7 }
 0xc09   :  { %8540 = vmatpush1.bf16.msra.mxu0 %v11722_v20  ;;  %8572 = vmatpush1.bf16.msra.mxu1 %v11725_v37 }
 0xc0a   :  { %8574 = vmatprep.subr.bf16.mxu0 %v11634_v34  ;;  %8606 = vmatprep.subr.bf16.mxu1 %v11636_v19 }
 0xcbf   :  { %v3024_v59 = vpop.f32.mrb[22].mxu0  ;;  %v3095_v50 = vpop.f32.mrb[22].mxu1 }
 0xcc0   :  { %v9955_v53 = vadd.f32 %v3024_v59, %v11786_v25  ;;  %v3026_v63 = vpop.f32.mrb[23].mxu0  ;;  %v3097_v3 = vpop.f32.mrb[23].mxu1  ;;  %v9971_v16 = vadd.f32 %v3095_v50, %v11798_v24 }
 0xcc1   :  { %v9956_v6 = vadd.f32 %v3026_v63, %v11791_v15  ;;  %v9972_v26 = vadd.f32 %v3097_v3, %v11804_v43 }
 0xcc2   :  { %v7543_v13 = vmul.f32 -1.442695, %v9955_v53  ;;  %v7545_v32 = vmul.f32 -1.442695, %v9971_v16 }
 0xcc3   :  { %v7544_v21 = vmul.f32 -1.442695, %v9956_v6 }
 0xcc4   :  { %10360 = vpow2.f32 %v7543_v13 }
 0xcc5   :  { %10362 = vpow2.f32 %v7544_v21 }
 0xcc6   :  { %10364 = vtanh.f32 %v9972_v26 }
 0xcc7   :  { %10366 = vpow2.f32 %v7545_v32 }
 0xcce   :  { %v10361_v36 = vpop.eup %10360 }
 0xccf   :  { %v3113_v40 = vadd.f32 1.0, %v10361_v36  ;;  %v10363_v58 = vpop.eup %10362 }
 0xcd0   :  { %v3114_v9 = vadd.f32 1.0, %v10363_v58  ;;  %v10365_v14 = vpop.eup %10364 }
 0xcd1   :  { %10368 = vrcp.f32 %v3113_v40  ;;  %v10367_v27 = vpop.eup %10366 }
 0xcd2   :  { %10370 = vrcp.f32 %v3114_v9  ;;  %v3115_v55 = vadd.f32 1.0, %v10367_v27 }
 0xcd4   :  { %10372 = vrcp.f32 %v3115_v55 }
 0xcdb   :  { %v10369_v28 = vpop.eup %10368 }
 0xcdc   :  { %v3124_v45 = vmul.f32 %v10369_v28, %v10365_v14  ;;  %v10371_v52 = vpop.eup %10370 }
 0xcdd   :  { %v3123_v5 = vmul.f32 %v10371_v52, %v11899_v41 }
 0xcde   :  { %v10373_v59 = vpop.eup %10372 }
 0xcdf   :  { %v11945_v1 = vadd.f32 %v3124_v45, %v3123_v5 }
 0xce1   :  { %10374 = vtanh.f32 %v11945_v1 }
 0xceb   :  { %v10375_v50 = vpop.eup %10374 }
 0xcec   :  { %v11948_v53 = vmul.f32 %v10375_v50, %v10373_v59 }
 0xcee   :  { %3199 = vmatmul.mubr.f32.vlgmr.msra.gmra.mrb[24].mxu0 %v11948_v53  ;;  %3270 = vmatmul.mubr.f32.vlgmr.msra.gmra.mrb[24].mxu1 %v11948_v53 }
 0xcef   :  { %8576 = vmatpush1.bf16.msra.mxu0 %v11638_v23  ;;  %8608 = vmatpush1.bf16.msra.mxu1 %v11641_v38 }
 0xcf0   :  { %8578 = vmatprep.subr.bf16.mxu0 %v11646_v44  ;;  %8610 = vmatprep.subr.bf16.mxu1 %v11648_v62 }
 0xcf1   :  { %3374 = vmatprep.mubr.f32.mxu0 %v10904_v0  ;;  %3445 = vmatprep.mubr.f32.mxu1 %v10904_v0 }
 0xcf3   :  { %8580 = vmatpush1.bf16.msra.mxu0 %v11650_v4  ;;  %8612 = vmatpush1.bf16.msra.mxu1 %v11653_v18 }
 0xcf4   :  { %8582 = vmatprep.subr.bf16.mxu0 %v11658_v30  ;;  %8614 = vmatprep.subr.bf16.mxu1 %v11660_v46 }
 0xcf7   :  { %8584 = vmatpush1.bf16.msra.mxu0 %v11662_v51  ;;  %8616 = vmatpush1.bf16.msra.mxu1 %v11665_v57 }
 0xcf8   :  { %8586 = vmatprep.subr.bf16.mxu0 %v11670_v2  ;;  %8618 = vmatprep.subr.bf16.mxu1 %v11672_v8 }
 0xcfb   :  { %8588 = vmatpush1.bf16.msra.mxu0 %v11674_v11  ;;  %8620 = vmatpush1.bf16.msra.mxu1 %v11677_v33 }
 0xcfc   :  { %8590 = vmatprep.subr.bf16.mxu0 %v11682_v42  ;;  %8622 = vmatprep.subr.bf16.mxu1 %v11684_v56 }
 0xcff   :  { %8592 = vmatpush1.bf16.msra.mxu0 %v11686_v60  ;;  %8624 = vmatpush1.bf16.msra.mxu1 %v11689_v10 }
 0xd00   :  { %8594 = vmatprep.subr.bf16.mxu0 %v11693_v31  ;;  %8626 = vmatprep.subr.bf16.mxu1 %v11695_v39 }
 0xd03   :  { %8596 = vmatpush1.bf16.msra.mxu0 %v11698_v29  ;;  %8628 = vmatpush1.bf16.msra.mxu1 %v11702_v48 }
 0xd04   :  { %8598 = vmatprep.subr.bf16.mxu0 %v11704_v54  ;;  %8630 = vmatprep.subr.bf16.mxu1 %v11706_v22 }
 0xd07   :  { %8600 = vmatpush1.bf16.msra.mxu0 %v11709_v49  ;;  %8632 = vmatpush1.bf16.msra.mxu1 %v11713_v17 }
 0xd08   :  { %8602 = vmatprep.subr.bf16.mxu0 %v11718_v61  ;;  %8634 = vmatprep.subr.bf16.mxu1 %v11720_v7 }
 0xd0b   :  { %8604 = vmatpush1.bf16.msra.mxu0 %v11722_v20  ;;  %8636 = vmatpush1.bf16.msra.mxu1 %v11725_v37 }
 0xd0c   :  { %8638 = vmatprep.subr.bf16.mxu0 %v11634_v34  ;;  %8670 = vmatprep.subr.bf16.mxu1 %v11636_v19 }
 0xdc1   :  { %v3200_v41 = vpop.f32.mrb[24].mxu0  ;;  %v3271_v63 = vpop.f32.mrb[24].mxu1 }
 0xdc2   :  { %v9957_v3 = vadd.f32 %v3200_v41, %v11786_v25  ;;  %v3202_v6 = vpop.f32.mrb[25].mxu0  ;;  %v3273_v13 = vpop.f32.mrb[25].mxu1  ;;  %v9973_v32 = vadd.f32 %v3271_v63, %v11798_v24 }
 0xdc3   :  { %v9958_v21 = vadd.f32 %v3202_v6, %v11791_v15  ;;  %v9974_v36 = vadd.f32 %v3273_v13, %v11804_v43 }
 0xdc4   :  { %v7546_v16 = vmul.f32 -1.442695, %v9957_v3  ;;  %v7548_v40 = vmul.f32 -1.442695, %v9973_v32 }
 0xdc5   :  { %v7547_v26 = vmul.f32 -1.442695, %v9958_v21 }
 0xdc6   :  { %10376 = vpow2.f32 %v7546_v16 }
 0xdc7   :  { %10378 = vpow2.f32 %v7547_v26 }
 0xdc8   :  { %10380 = vtanh.f32 %v9974_v36 }
 0xdc9   :  { %10382 = vpow2.f32 %v7548_v40 }
 0xdd0   :  { %v10377_v58 = vpop.eup %10376 }
 0xdd1   :  { %v3289_v9 = vadd.f32 1.0, %v10377_v58  ;;  %v10379_v14 = vpop.eup %10378 }
 0xdd2   :  { %v3290_v27 = vadd.f32 1.0, %v10379_v14  ;;  %v10381_v28 = vpop.eup %10380 }
 0xdd3   :  { %10384 = vrcp.f32 %v3289_v9  ;;  %v10383_v45 = vpop.eup %10382 }
 0xdd4   :  { %10386 = vrcp.f32 %v3290_v27  ;;  %v3291_v59 = vadd.f32 1.0, %v10383_v45 }
 0xdd6   :  { %10388 = vrcp.f32 %v3291_v59 }
 0xddd   :  { %v10385_v52 = vpop.eup %10384 }
 0xdde   :  { %v3300_v55 = vmul.f32 %v10385_v52, %v10381_v28  ;;  %v10387_v5 = vpop.eup %10386 }
 0xddf   :  { %v3299_v50 = vmul.f32 %v10387_v5, %v11945_v1 }
 0xde0   :  { %v10389_v63 = vpop.eup %10388 }
 0xde1   :  { %v11991_v41 = vadd.f32 %v3300_v55, %v3299_v50 }
 0xde3   :  { %10390 = vtanh.f32 %v11991_v41 }
 0xded   :  { %v10391_v3 = vpop.eup %10390 }
 0xdee   :  { %v11994_v6 = vmul.f32 %v10391_v3, %v10389_v63 }
 0xdf0   :  { %3375 = vmatmul.mubr.f32.vlgmr.msra.gmra.mrb[26].mxu0 %v11994_v6  ;;  %3446 = vmatmul.mubr.f32.vlgmr.msra.gmra.mrb[26].mxu1 %v11994_v6 }
 0xdf1   :  { %8640 = vmatpush1.bf16.msra.mxu0 %v11638_v23  ;;  %8672 = vmatpush1.bf16.msra.mxu1 %v11641_v38 }
 0xdf2   :  { %8642 = vmatprep.subr.bf16.mxu0 %v11646_v44  ;;  %8674 = vmatprep.subr.bf16.mxu1 %v11648_v62 }
 0xdf3   :  { %3550 = vmatprep.mubr.f32.mxu0 %v10904_v0  ;;  %3621 = vmatprep.mubr.f32.mxu1 %v10904_v0 }
 0xdf5   :  { %8644 = vmatpush1.bf16.msra.mxu0 %v11650_v4  ;;  %8676 = vmatpush1.bf16.msra.mxu1 %v11653_v18 }
 0xdf6   :  { %8646 = vmatprep.subr.bf16.mxu0 %v11658_v30  ;;  %8678 = vmatprep.subr.bf16.mxu1 %v11660_v46 }
 0xdf9   :  { %8648 = vmatpush1.bf16.msra.mxu0 %v11662_v51  ;;  %8680 = vmatpush1.bf16.msra.mxu1 %v11665_v57 }
 0xdfa   :  { %8650 = vmatprep.subr.bf16.mxu0 %v11670_v2  ;;  %8682 = vmatprep.subr.bf16.mxu1 %v11672_v8 }
 0xdfd   :  { %8652 = vmatpush1.bf16.msra.mxu0 %v11674_v11  ;;  %8684 = vmatpush1.bf16.msra.mxu1 %v11677_v33 }
 0xdfe   :  { %8654 = vmatprep.subr.bf16.mxu0 %v11682_v42  ;;  %8686 = vmatprep.subr.bf16.mxu1 %v11684_v56 }
 0xe01   :  { %8656 = vmatpush1.bf16.msra.mxu0 %v11686_v60  ;;  %8688 = vmatpush1.bf16.msra.mxu1 %v11689_v10 }
 0xe02   :  { %8658 = vmatprep.subr.bf16.mxu0 %v11693_v31  ;;  %8690 = vmatprep.subr.bf16.mxu1 %v11695_v39 }
 0xe05   :  { %8660 = vmatpush1.bf16.msra.mxu0 %v11698_v29  ;;  %8692 = vmatpush1.bf16.msra.mxu1 %v11702_v48 }
 0xe06   :  { %8662 = vmatprep.subr.bf16.mxu0 %v11704_v54  ;;  %8694 = vmatprep.subr.bf16.mxu1 %v11706_v22 }
 0xe09   :  { %8664 = vmatpush1.bf16.msra.mxu0 %v11709_v49  ;;  %8696 = vmatpush1.bf16.msra.mxu1 %v11713_v17 }
 0xe0a   :  { %8666 = vmatprep.subr.bf16.mxu0 %v11718_v61  ;;  %8698 = vmatprep.subr.bf16.mxu1 %v11720_v7 }
 0xe0d   :  { %8668 = vmatpush1.bf16.msra.mxu0 %v11722_v20  ;;  %8700 = vmatpush1.bf16.msra.mxu1 %v11725_v37 }
 0xe0e   :  { %8702 = vmatprep.subr.bf16.mxu0 %v11634_v34  ;;  %8734 = vmatprep.subr.bf16.mxu1 %v11636_v19 }
 0xec3   :  { %v3376_v1 = vpop.f32.mrb[26].mxu0  ;;  %v3447_v13 = vpop.f32.mrb[26].mxu1 }
 0xec4   :  { %v9959_v21 = vadd.f32 %v3376_v1, %v11786_v25  ;;  %v3378_v16 = vpop.f32.mrb[27].mxu0  ;;  %v3449_v26 = vpop.f32.mrb[27].mxu1  ;;  %v9975_v58 = vadd.f32 %v3447_v13, %v11798_v24 }
 0xec5   :  { %v9960_v32 = vadd.f32 %v3378_v16, %v11791_v15  ;;  %v9976_v9 = vadd.f32 %v3449_v26, %v11804_v43  ;;  %v3853_v16 = vld [vmem:[#allocation12 + $0x58] sm:$0xff] }
 0xec6   :  { %v7549_v36 = vmul.f32 -1.442695, %v9959_v21  ;;  %v7551_v14 = vmul.f32 -1.442695, %v9975_v58  ;;  %v3857_v26 = vld [vmem:[#allocation12 + $0x78] sm:$0xff] }
 0xec7   :  { %v7550_v40 = vmul.f32 -1.442695, %v9960_v32 }
 0xec8   :  { %10392 = vpow2.f32 %v7549_v36 }
 0xec9   :  { %10394 = vpow2.f32 %v7550_v40 }
 0xeca   :  { %10396 = vtanh.f32 %v9976_v9  ;;  %v3850_v9 = vld [vmem:[#allocation12 + $0x40] sm:$0xff] }
 0xecb   :  { %10398 = vpow2.f32 %v7551_v14  ;;  %v3854_v14 = vld [vmem:[#allocation12 + $0x60] sm:$0xff] }
 0xed2   :  { %v10393_v34 = vpop.eup %10392 }
 0xed3   :  { %v3465_v27 = vadd.f32 1.0, %v10393_v34  ;;  %v10395_v19 = vpop.eup %10394 }
 0xed4   :  { %v3466_v28 = vadd.f32 1.0, %v10395_v19  ;;  %v10397_v45 = vpop.eup %10396  ;;  %v8801_v19 = vpack.c.bf16 %v3857_v26, %v3853_v16  ;;  %v3886_v16 = vld [vmem:[#allocation12 + $0x160] sm:$0xff] }
 0xed5   :  { %10400 = vrcp.f32 %v3465_v27  ;;  %v10399_v52 = vpop.eup %10398 }
 0xed6   :  { %10402 = vrcp.f32 %v3466_v28  ;;  %v3467_v50 = vadd.f32 1.0, %v10399_v52  ;;  %v3852_v28 = vld [vmem:[#allocation12 + $0x50] sm:$0xff]  ;;  %v3859_v52 = vld [vmem:[#allocation12 + $0x88] sm:$0xff] }
 0xed8   :  { %10404 = vrcp.f32 %v3467_v50  ;;  %v8771_v50 = vpack.c.bf16 %v3854_v14, %v3850_v9  ;;  %v3895_v9 = vld [vmem:[#allocation12 + $0x1a8] sm:$0xff]  ;;  %v3893_v14 = vld [vmem:[#allocation12 + $0x198] sm:$0xff] }
 0xedf   :  { %v10401_v55 = vpop.eup %10400 }
 0xee0   :  { %v3476_v5 = vmul.f32 %v10401_v55, %v10397_v45  ;;  %v10403_v59 = vpop.eup %10402  ;;  %v3856_v45 = vld [vmem:[#allocation12 + $0x70] sm:$0xff]  ;;  %v3863_v55 = vld [vmem:[#allocation12 + $0xa8] sm:$0xff] }
 0xee1   :  { %v3475_v63 = vmul.f32 %v10403_v59, %v11991_v41  ;;  %v3855_v41 = vld [vmem:[#allocation12 + $0x68] sm:$0xff]  ;;  %v3865_v59 = vld [vmem:[#allocation12 + $0xb8] sm:$0xff] }
 0xee2   :  { %v10405_v1 = vpop.eup %10404 }
 0xee3   :  { %v12037_v3 = vadd.f32 %v3476_v5, %v3475_v63  ;;  %v3861_v5 = vld [vmem:[#allocation12 + $0x98] sm:$0xff]  ;;  %v8803_v63 = vpack.c.bf16 %v3856_v45, %v3852_v28  ;;  %v3890_v45 = vld [vmem:[#allocation12 + $0x180] sm:$0xff] }
 0xee5   :  { %10406 = vtanh.f32 %v12037_v3 }
 0xeef   :  { %v10407_v13 = vpop.eup %10406 }
 0xef0   :  { %v12040_v21 = vmul.f32 %v10407_v13, %v10405_v1  ;;  %v3862_v1 = vld [vmem:[#allocation12 + $0xa0] sm:$0xff]  ;;  %v8773_v13 = vpack.c.bf16 %v3863_v55, %v3859_v52 }
 0xef1   :  { %v3894_v52 = vld [vmem:[#allocation12 + $0x1a0] sm:$0xff] }
 0xef2   :  { %3551 = vmatmul.mubr.f32.vlgmr.msra.gmra.mrb[28].mxu0 %v12040_v21  ;;  %3622 = vmatmul.mubr.f32.vlgmr.msra.gmra.mrb[28].mxu1 %v12040_v21 }
 0xef3   :  { %8704 = vmatpush1.bf16.msra.mxu0 %v11638_v23  ;;  %8736 = vmatpush1.bf16.msra.mxu1 %v11641_v38  ;;  %v3843_v23 = vld [vmem:[#allocation12 + $0x8] sm:$0xff] }
 0xef4   :  { %8706 = vmatprep.subr.bf16.mxu0 %v11646_v44  ;;  %8738 = vmatprep.subr.bf16.mxu1 %v11648_v62  ;;  %v3847_v38 = vld [vmem:[#allocation12 + $0x28] sm:$0xff]  ;;  %v3845_v44 = vld [vmem:[#allocation12 + $0x18] sm:$0xff] }
 0xef5   :  { %3726 = vmatprep.mubr.f32.mxu0 %v10904_v0  ;;  %3797 = vmatprep.mubr.f32.mxu1 %v10904_v0  ;;  %v8765_v62 = vpack.c.bf16 %v3847_v38, %v3843_v23  ;;  %v8805_v23 = vpack.c.bf16 %v3865_v59, %v3861_v5  ;;  %v3860_v38 = vld [vmem:[#allocation12 + $0x90] sm:$0xff] }
 0xef6   :  { %v3892_v59 = vld [vmem:[#allocation12 + $0x190] sm:$0xff] }
 0xef7   :  { %8708 = vmatpush1.bf16.msra.mxu0 %v11650_v4  ;;  %8740 = vmatpush1.bf16.msra.mxu1 %v11653_v18  ;;  %v3849_v4 = vld [vmem:[#allocation12 + $0x38] sm:$0xff] }
 0xef8   :  { %8710 = vmatprep.subr.bf16.mxu0 %v11658_v30  ;;  %8742 = vmatprep.subr.bf16.mxu1 %v11660_v46  ;;  %v8797_v18 = vpack.c.bf16 %v3849_v4, %v3845_v44  ;;  %v3864_v44 = vld [vmem:[#allocation12 + $0xb0] sm:$0xff]  ;;  %v3871_v4 = vld [vmem:[#allocation12 + $0xe8] sm:$0xff] }
 0xefb   :  { %8712 = vmatpush1.bf16.msra.mxu0 %v11662_v51  ;;  %8744 = vmatpush1.bf16.msra.mxu1 %v11665_v57 }
 0xefc   :  { %8714 = vmatprep.subr.bf16.mxu0 %v11670_v2  ;;  %8746 = vmatprep.subr.bf16.mxu1 %v11672_v8 }
 0xeff   :  { %8716 = vmatpush1.bf16.msra.mxu0 %v11674_v11  ;;  %8748 = vmatpush1.bf16.msra.mxu1 %v11677_v33 }
 0xf00   :  { %8718 = vmatprep.subr.bf16.mxu0 %v11682_v42  ;;  %8750 = vmatprep.subr.bf16.mxu1 %v11684_v56 }
 0xf03   :  { %8720 = vmatpush1.bf16.msra.mxu0 %v11686_v60  ;;  %8752 = vmatpush1.bf16.msra.mxu1 %v11689_v10 }
 0xf04   :  { %8722 = vmatprep.subr.bf16.mxu0 %v11693_v31  ;;  %8754 = vmatprep.subr.bf16.mxu1 %v11695_v39 }
 0xf07   :  { %8724 = vmatpush1.bf16.msra.mxu0 %v11698_v29  ;;  %8756 = vmatpush1.bf16.msra.mxu1 %v11702_v48 }
 0xf08   :  { %8726 = vmatprep.subr.bf16.mxu0 %v11704_v54  ;;  %8758 = vmatprep.subr.bf16.mxu1 %v11706_v22 }
 0xf0b   :  { %8728 = vmatpush1.bf16.msra.mxu0 %v11709_v49  ;;  %8760 = vmatpush1.bf16.msra.mxu1 %v11713_v17 }
 0xf0c   :  { %8730 = vmatprep.subr.bf16.mxu0 %v11718_v61  ;;  %8762 = vmatprep.subr.bf16.mxu1 %v11720_v7 }
 0xf0f   :  { %8732 = vmatpush1.bf16.msra.mxu0 %v11722_v20  ;;  %8764 = vmatpush1.bf16.msra.mxu1 %v11725_v37  ;;  %v3842_v37 = vld [vmem:[#allocation12] sm:$0xff] }
 0xf10   :  { %8766 = vmatprep.subr.bf16.mxu0 %v8765_v62  ;;  %8798 = vmatprep.subr.bf16.mxu1 %v8797_v18  ;;  %v3867_v62 = vld [vmem:[#allocation12 + $0xc8] sm:$0xff]  ;;  %v3869_v18 = vld [vmem:[#allocation12 + $0xd8] sm:$0xff] }
 0xfc5   :  { %v3552_v30 = vpop.f32.mrb[28].mxu0  ;;  %v3623_v46 = vpop.f32.mrb[28].mxu1 }
 0xfc6   :  { %v9961_v51 = vadd.f32 %v3552_v30, %v11786_v25  ;;  %v3554_v57 = vpop.f32.mrb[29].mxu0  ;;  %v3625_v2 = vpop.f32.mrb[29].mxu1  ;;  %v9977_v42 = vadd.f32 %v3623_v46, %v11798_v24  ;;  %v3846_v25 = vld [vmem:[#allocation12 + $0x20] sm:$0xff]  ;;  %v3848_v24 = vld [vmem:[#allocation12 + $0x30] sm:$0xff]  ;;  %v3873_v30 = vld [vmem:[#allocation12 + $0xf8] sm:$0xff] }
 0xfc7   :  { %v9962_v8 = vadd.f32 %v3554_v57, %v11791_v15  ;;  %v9978_v56 = vadd.f32 %v3625_v2, %v11804_v43  ;;  %v3844_v15 = vld [vmem:[#allocation12 + $0x10] sm:$0xff]  ;;  %v3851_v43 = vld [vmem:[#allocation12 + $0x48] sm:$0xff]  ;;  %v8767_v40 = vpack.c.bf16 %v3846_v25, %v3842_v37  ;;  %v3866_v57 = vld [vmem:[#allocation12 + $0xc0] sm:$0xff] }
 0xfc8   :  { %v7552_v11 = vmul.f32 -1.442695, %v9961_v51  ;;  %v7554_v60 = vmul.f32 -1.442695, %v9977_v42  ;;  %v8799_v58 = vpack.c.bf16 %v3848_v24, %v3844_v15  ;;  %v8769_v27 = vpack.c.bf16 %v3855_v41, %v3851_v43  ;;  %v3870_v2 = vld [vmem:[#allocation12 + $0xe0] sm:$0xff]  ;;  %v3872_v42 = vld [vmem:[#allocation12 + $0xf0] sm:$0xff] }
 0xfc9   :  { %v7553_v33 = vmul.f32 -1.442695, %v9962_v8  ;;  %v8807_v51 = vpack.c.bf16 %v3864_v44, %v3860_v38  ;;  %v8777_v8 = vpack.c.bf16 %v3871_v4, %v3867_v62  ;;  %v3887_v37 = vld [vmem:[#allocation12 + $0x168] sm:$0xff]  ;;  %v3885_v25 = vld [vmem:[#allocation12 + $0x158] sm:$0xff]  ;;  %v3882_v41 = vld [vmem:[#allocation12 + $0x140] sm:$0xff] }
 0xfca   :  { %10408 = vpow2.f32 %v7552_v11  ;;  %v8809_v11 = vpack.c.bf16 %v3873_v30, %v3869_v18  ;;  %v3889_v15 = vld [vmem:[#allocation12 + $0x178] sm:$0xff]  ;;  %v3898_v44 = vld [vmem:[#allocation12 + $0x1c0] sm:$0xff]  ;;  %v3900_v30 = vld [vmem:[#allocation12 + $0x1d0] sm:$0xff] }
 0xfcb   :  { %10410 = vpow2.f32 %v7553_v33  ;;  %v3868_v33 = vld [vmem:[#allocation12 + $0xd0] sm:$0xff]  ;;  %v3902_v18 = vld [vmem:[#allocation12 + $0x1e0] sm:$0xff] }
 0xfcc   :  { %10412 = vtanh.f32 %v9978_v56  ;;  %v3875_v56 = vld [vmem:[#allocation12 + $0x108] sm:$0xff] }
 0xfcd   :  { %10414 = vpow2.f32 %v7554_v60  ;;  %v3879_v60 = vld [vmem:[#allocation12 + $0x128] sm:$0xff] }
 0xfd4   :  { %v10409_v10 = vpop.eup %10408 }
 0xfd5   :  { %v3641_v31 = vadd.f32 1.0, %v10409_v10  ;;  %v10411_v39 = vpop.eup %10410  ;;  %v3877_v10 = vld [vmem:[#allocation12 + $0x118] sm:$0xff] }
 0xfd6   :  { %v3642_v29 = vadd.f32 1.0, %v10411_v39  ;;  %v10413_v48 = vpop.eup %10412  ;;  %v8779_v39 = vpack.c.bf16 %v3870_v2, %v3866_v57  ;;  %v4200_v2 = vld [vmem:[#allocation13] sm:$0xff] }
 0xfd7   :  { %10416 = vrcp.f32 %v3641_v31  ;;  %v10415_v54 = vpop.eup %10414  ;;  %v3881_v31 = vld [vmem:[#allocation12 + $0x138] sm:$0xff] }
 0xfd8   :  { %10418 = vrcp.f32 %v3642_v29  ;;  %v3643_v61 = vadd.f32 1.0, %v10415_v54  ;;  %v8811_v29 = vpack.c.bf16 %v3872_v42, %v3868_v33  ;;  %v3878_v54 = vld [vmem:[#allocation12 + $0x120] sm:$0xff]  ;;  %v4202_v33 = vld [vmem:[#allocation13 + $0x10] sm:$0xff] }
 0xfd9   :  { %v4206_v42 = vld [vmem:[#allocation13 + $0x30] sm:$0xff] }
 0xfda   :  { %10420 = vrcp.f32 %v3643_v61  ;;  %v3880_v61 = vld [vmem:[#allocation12 + $0x130] sm:$0xff] }
 0xfe1   :  { %v10417_v22 = vpop.eup %10416 }
 0xfe2   :  { %v3652_v49 = vmul.f32 %v10417_v22, %v10413_v48  ;;  %v10419_v17 = vpop.eup %10418  ;;  %v3874_v48 = vld [vmem:[#allocation12 + $0x100] sm:$0xff]  ;;  %v8781_v22 = vpack.c.bf16 %v3879_v60, %v3875_v56  ;;  %v4209_v56 = vld [vmem:[#allocation13 + $0x48] sm:$0xff] }
 0xfe3   :  { %v3651_v7 = vmul.f32 %v10419_v17, %v12037_v3  ;;  %v3858_v3 = vld [vmem:[#allocation12 + $0x80] sm:$0xff]  ;;  %v3876_v17 = vld [vmem:[#allocation12 + $0x110] sm:$0xff]  ;;  %v8783_v24 = vpack.c.bf16 %v3878_v54, %v3874_v48  ;;  %v4213_v60 = vld [vmem:[#allocation13 + $0x68] sm:$0xff] }
 0xfe4   :  { %v10421_v32 = vpop.eup %10420  ;;  %v8775_v46 = vpack.c.bf16 %v3862_v1, %v3858_v3  ;;  %v8815_v43 = vpack.c.bf16 %v3880_v61, %v3876_v17  ;;  %v3903_v3 = vld [vmem:[#allocation12 + $0x1e8] sm:$0xff]  ;;  %v3901_v1 = vld [vmem:[#allocation12 + $0x1d8] sm:$0xff]  ;;  %v4212_v48 = vld [vmem:[#allocation13 + $0x60] sm:$0xff] }
 0xfe5   :  { %v12081_v20 = vadd.f32 %v3652_v49, %v3651_v7  ;;  %v8813_v49 = vpack.c.bf16 %v3881_v31, %v3877_v10  ;;  %v3883_v7 = vld [vmem:[#allocation12 + $0x148] sm:$0xff]  ;;  %v4211_v10 = vld [vmem:[#allocation13 + $0x58] sm:$0xff]  ;;  %v12130_v31 = vpack.c.bf16 %v4213_v60, %v4209_v56  ;;  %v4214_v17 = vld [vmem:[#allocation13 + $0x70] sm:$0xff] }
 0xfe6   :  { %v8785_v26 = vpack.c.bf16 %v3887_v37, %v3883_v7  ;;  %v4217_v7 = vld [vmem:[#allocation13 + $0x88] sm:$0xff]  ;;  %v4246_v56 = vld [vmem:[#allocation13 + $0x170] sm:$0xff] }
 0xfe7   :  { %10422 = vtanh.f32 %v12081_v20  ;;  %v4221_v37 = vld [vmem:[#allocation13 + $0xa8] sm:$0xff] }
 0xfe8   :  { %v4249_v60 = vld [vmem:[#allocation13 + $0x188] sm:$0xff] }
 0xff1   :  { %v10423_v36 = vpop.eup %10422 }
 0xff2   :  { %v12084_v34 = vmul.f32 %v10423_v36, %v10421_v32  ;;  %v8817_v32 = vpack.c.bf16 %v3889_v15, %v3885_v25  ;;  %v3884_v36 = vld [vmem:[#allocation12 + $0x150] sm:$0xff]  ;;  %v4219_v25 = vld [vmem:[#allocation13 + $0x98] sm:$0xff]  ;;  %v12142_v15 = vpack.c.bf16 %v4221_v37, %v4217_v7  ;;  %v4252_v37 = vld [vmem:[#allocation13 + $0x1a0] sm:$0xff] }
 0xff4   :  { %3727 = vmatmul.mubr.f32.vlgmr.msra.gmra.mrb[30].mxu0 %v12084_v34  ;;  %3798 = vmatmul.mubr.f32.vlgmr.msra.gmra.mrb[30].mxu1 %v12084_v34 }
 0xff5   :  { %8768 = vmatpush1.bf16.msra.mxu0 %v8767_v40  ;;  %8800 = vmatpush1.bf16.msra.mxu1 %v8799_v58  ;;  %v3888_v40 = vld [vmem:[#allocation12 + $0x170] sm:$0xff]  ;;  %v3891_v58 = vld [vmem:[#allocation12 + $0x188] sm:$0xff] }
 0xff6   :  { %8770 = vmatprep.subr.bf16.mxu0 %v8769_v27  ;;  %8802 = vmatprep.subr.bf16.mxu1 %v8801_v19  ;;  %v3897_v27 = vld [vmem:[#allocation12 + $0x1b8] sm:$0xff]  ;;  %v8787_v19 = vpack.c.bf16 %v3886_v16, %v3882_v41  ;;  %v8819_v28 = vpack.c.bf16 %v3888_v40, %v3884_v36  ;;  %v8789_v55 = vpack.c.bf16 %v3895_v9, %v3891_v58  ;;  %v4220_v41 = vld [vmem:[#allocation13 + $0xa0] sm:$0xff]  ;;  %v4222_v36 = vld [vmem:[#allocation13 + $0xb0] sm:$0xff] }
 0xff7   :  { %3970 = vmatprep.mubr.f32.mxu0 %v10904_v0  ;;  %4083 = vmatprep.mubr.f32.mxu1 %v10904_v0  ;;  %v8821_v5 = vpack.c.bf16 %v3897_v27, %v3893_v14  ;;  %v4225_v58 = vld [vmem:[#allocation13 + $0xc8] sm:$0xff]  ;;  %v4227_v14 = vld [vmem:[#allocation13 + $0xd8] sm:$0xff] }
 0xff8   :  { %v4229_v9 = vld [vmem:[#allocation13 + $0xe8] sm:$0xff] }
 0xff9   :  { %8772 = vmatpush1.bf16.msra.mxu0 %v8771_v50  ;;  %8804 = vmatpush1.bf16.msra.mxu1 %v8803_v63  ;;  %v3896_v50 = vld [vmem:[#allocation12 + $0x1b0] sm:$0xff]  ;;  %v3899_v63 = vld [vmem:[#allocation12 + $0x1c8] sm:$0xff]  ;;  %v12154_v27 = vpack.c.bf16 %v4229_v9, %v4225_v58  ;;  %v4259_v58 = vld [vmem:[#allocation13 + $0x1d8] sm:$0xff] }
 0xffa   :  { %8774 = vmatprep.subr.bf16.mxu0 %v8773_v13  ;;  %8806 = vmatprep.subr.bf16.mxu1 %v8805_v23  ;;  %v3905_v13 = vld [vmem:[#allocation12 + $0x1f8] sm:$0xff]  ;;  %v8791_v23 = vpack.c.bf16 %v3894_v52, %v3890_v45  ;;  %v8823_v38 = vpack.c.bf16 %v3896_v50, %v3892_v59  ;;  %v8793_v62 = vpack.c.bf16 %v3903_v3, %v3899_v63  ;;  %v4228_v45 = vld [vmem:[#allocation13 + $0xe0] sm:$0xff]  ;;  %v4230_v59 = vld [vmem:[#allocation13 + $0xf0] sm:$0xff] }
 0xffb   :  { %v8825_v4 = vpack.c.bf16 %v3905_v13, %v3901_v1  ;;  %v4233_v63 = vld [vmem:[#allocation13 + $0x108] sm:$0xff]  ;;  %v4235_v1 = vld [vmem:[#allocation13 + $0x118] sm:$0xff] }
 0xffc   :  { %v4237_v3 = vld [vmem:[#allocation13 + $0x128] sm:$0xff] }
 0xffd   :  { %8776 = vmatpush1.bf16.msra.mxu0 %v8775_v46  ;;  %8808 = vmatpush1.bf16.msra.mxu1 %v8807_v51  ;;  %v3904_v46 = vld [vmem:[#allocation12 + $0x1f0] sm:$0xff]  ;;  %v8795_v51 = vpack.c.bf16 %v3902_v18, %v3898_v44  ;;  %v12166_v13 = vpack.c.bf16 %v4237_v3, %v4233_v63  ;;  %v4236_v44 = vld [vmem:[#allocation13 + $0x120] sm:$0xff] }
 0xffe   :  { %8778 = vmatprep.subr.bf16.mxu0 %v8777_v8  ;;  %8810 = vmatprep.subr.bf16.mxu1 %v8809_v11  ;;  %v8827_v57 = vpack.c.bf16 %v3904_v46, %v3900_v30  ;;  %v4234_v18 = vld [vmem:[#allocation13 + $0x110] sm:$0xff]  ;;  %v4241_v46 = vld [vmem:[#allocation13 + $0x148] sm:$0xff] }
 0xfff   :  { %v4238_v30 = vld [vmem:[#allocation13 + $0x130] sm:$0xff] }
0x1000   :  { %v4262_v63 = vld [vmem:[#allocation13 + $0x1f0] sm:$0xff] }
0x1001   :  { %8780 = vmatpush1.bf16.msra.mxu0 %v8779_v39  ;;  %8812 = vmatpush1.bf16.msra.mxu1 %v8811_v29  ;;  %v4215_v39 = vld [vmem:[#allocation13 + $0x78] sm:$0xff]  ;;  %v4208_v29 = vld [vmem:[#allocation13 + $0x40] sm:$0xff] }
0x1002   :  { %8782 = vmatprep.subr.bf16.mxu0 %v8781_v22  ;;  %8814 = vmatprep.subr.bf16.mxu1 %v8813_v49  ;;  %v12132_v54 = vpack.c.bf16 %v4215_v39, %v4211_v10  ;;  %v12134_v22 = vpack.c.bf16 %v4212_v48, %v4208_v29  ;;  %v4210_v49 = vld [vmem:[#allocation13 + $0x50] sm:$0xff]  ;;  %v4253_v10 = vld [vmem:[#allocation13 + $0x1a8] sm:$0xff]  ;;  %v4251_v48 = vld [vmem:[#allocation13 + $0x198] sm:$0xff] }
0x1003   :  { %v12137_v61 = vpack.c.bf16 %v4214_v17, %v4210_v49  ;;  %v12188_v29 = vpack.c.bf16 %v4253_v10, %v4249_v60  ;;  %v4255_v49 = vld [vmem:[#allocation13 + $0x1b8] sm:$0xff]  ;;  %v4248_v17 = vld [vmem:[#allocation13 + $0x180] sm:$0xff] }
0x1004   :  { %v12190_v7 = vpack.c.bf16 %v4255_v49, %v4251_v48 }
0x1005   :  { %8784 = vmatpush1.bf16.msra.mxu0 %v8783_v24  ;;  %8816 = vmatpush1.bf16.msra.mxu1 %v8815_v43  ;;  %v4223_v24 = vld [vmem:[#allocation13 + $0xb8] sm:$0xff]  ;;  %v4216_v43 = vld [vmem:[#allocation13 + $0x80] sm:$0xff] }
0x1006   :  { %8786 = vmatprep.subr.bf16.mxu0 %v8785_v26  ;;  %8818 = vmatprep.subr.bf16.mxu1 %v8817_v32  ;;  %v12144_v16 = vpack.c.bf16 %v4223_v24, %v4219_v25  ;;  %v12146_v26 = vpack.c.bf16 %v4220_v41, %v4216_v43  ;;  %v4218_v32 = vld [vmem:[#allocation13 + $0x90] sm:$0xff]  ;;  %v12193_v43 = vpack.c.bf16 %v4252_v37, %v4248_v17 }
0x1007   :  { %v12149_v40 = vpack.c.bf16 %v4222_v36, %v4218_v32  ;;  %v4250_v25 = vld [vmem:[#allocation13 + $0x190] sm:$0xff]  ;;  %v4257_v32 = vld [vmem:[#allocation13 + $0x1c8] sm:$0xff] }
0x1008   :  { %v4254_v24 = vld [vmem:[#allocation13 + $0x1b0] sm:$0xff]  ;;  %v4261_v36 = vld [vmem:[#allocation13 + $0x1e8] sm:$0xff] }
0x1009   :  { %8788 = vmatpush1.bf16.msra.mxu0 %v8787_v19  ;;  %8820 = vmatpush1.bf16.msra.mxu1 %v8819_v28  ;;  %v4231_v19 = vld [vmem:[#allocation13 + $0xf8] sm:$0xff]  ;;  %v4224_v28 = vld [vmem:[#allocation13 + $0xc0] sm:$0xff]  ;;  %v12197_v41 = vpack.c.bf16 %v4254_v24, %v4250_v25  ;;  %v12202_v9 = vpack.c.bf16 %v4261_v36, %v4257_v32 }
0x100a   :  { %8790 = vmatprep.subr.bf16.mxu0 %v8789_v55  ;;  %8822 = vmatprep.subr.bf16.mxu1 %v8821_v5  ;;  %v12156_v52 = vpack.c.bf16 %v4231_v19, %v4227_v14  ;;  %v12158_v55 = vpack.c.bf16 %v4228_v45, %v4224_v28  ;;  %v4226_v5 = vld [vmem:[#allocation13 + $0xd0] sm:$0xff]  ;;  %v4263_v14 = vld [vmem:[#allocation13 + $0x1f8] sm:$0xff]  ;;  %v4256_v19 = vld [vmem:[#allocation13 + $0x1c0] sm:$0xff] }
0x100b   :  { %v12161_v50 = vpack.c.bf16 %v4230_v59, %v4226_v5  ;;  %v4260_v28 = vld [vmem:[#allocation13 + $0x1e0] sm:$0xff]  ;;  %v12204_v45 = vpack.c.bf16 %v4263_v14, %v4259_v58  ;;  %v4258_v59 = vld [vmem:[#allocation13 + $0x1d0] sm:$0xff] }
0x100c   :  { %v12206_v5 = vpack.c.bf16 %v4260_v28, %v4256_v19  ;;  %v12209_v3 = vpack.c.bf16 %v4262_v63, %v4258_v59 }
0x100d   :  { %8792 = vmatpush1.bf16.msra.mxu0 %v8791_v23  ;;  %8824 = vmatpush1.bf16.msra.mxu1 %v8823_v38  ;;  %v4239_v23 = vld [vmem:[#allocation13 + $0x138] sm:$0xff]  ;;  %v4232_v38 = vld [vmem:[#allocation13 + $0x100] sm:$0xff] }
0x100e   :  { %8794 = vmatprep.subr.bf16.mxu0 %v8793_v62  ;;  %8826 = vmatprep.subr.bf16.mxu1 %v8825_v4  ;;  %v12168_v62 = vpack.c.bf16 %v4239_v23, %v4235_v1  ;;  %v12170_v4 = vpack.c.bf16 %v4236_v44, %v4232_v38  ;;  %v10700_v38 = vld [vmem:[%s13059_s6] sm:$0xff] }
0x1011   :  { %8796 = vmatpush1.bf16.msra.mxu0 %v8795_v51  ;;  %8828 = vmatpush1.bf16.msra.mxu1 %v8827_v57  ;;  %v12173_v51 = vpack.c.bf16 %v4238_v30, %v4234_v18  ;;  %v4245_v57 = vld [vmem:[#allocation13 + $0x168] sm:$0xff] }
0x1014   :  { %3971 = vmatmul.mubr.f32.vlgmr.msra.gmra.mrb[32].mxu0 %v11810_v12  ;;  %4084 = vmatmul.mubr.f32.vlgmr.msra.gmra.mrb[32].mxu1 %v11810_v12  ;;  %v4201_v12 = vld [vmem:[#allocation13 + $0x8] sm:$0xff] }
0x1015   :  { %3976 = vmatprep.mubr.f32.mxu0 %v10904_v0  ;;  %4089 = vmatprep.mubr.f32.mxu1 %v10904_v0 }
0x1018   :  { %3977 = vmatmul.mubr.f32.gmra.mrb[34].mxu0 %v11856_v35  ;;  %4090 = vmatmul.mubr.f32.gmra.mrb[34].mxu1 %v11856_v35  ;;  %v4205_v35 = vld [vmem:[#allocation13 + $0x28] sm:$0xff] }
0x1019   :  { %3982 = vmatprep.mubr.f32.mxu0 %v10904_v0  ;;  %4095 = vmatprep.mubr.f32.mxu1 %v10904_v0 }
0x101c   :  { %3983 = vmatmul.mubr.f32.gmra.mrb[36].mxu0 %v11902_v47  ;;  %4096 = vmatmul.mubr.f32.gmra.mrb[36].mxu1 %v11902_v47  ;;  %v4203_v47 = vld [vmem:[#allocation13 + $0x18] sm:$0xff] }
0x101d   :  { %3988 = vmatprep.mubr.f32.mxu0 %v10904_v0  ;;  %4101 = vmatprep.mubr.f32.mxu1 %v10904_v0 }
0x1020   :  { %3989 = vmatmul.mubr.f32.gmra.mrb[38].mxu0 %v11948_v53  ;;  %4102 = vmatmul.mubr.f32.gmra.mrb[38].mxu1 %v11948_v53  ;;  %v12118_v53 = vpack.c.bf16 %v4205_v35, %v4201_v12  ;;  %v4243_v12 = vld [vmem:[#allocation13 + $0x158] sm:$0xff] }
0x1021   :  { %3994 = vmatprep.mubr.f32.mxu0 %v10904_v0  ;;  %4107 = vmatprep.mubr.f32.mxu1 %v10904_v0  ;;  %v4247_v35 = vld [vmem:[#allocation13 + $0x178] sm:$0xff] }
0x1022   :  { %8830 = vmatprep.subr.bf16.mxu0 %v12118_v53 }
0x1024   :  { %3995 = vmatmul.mubr.f32.gmra.mrb[40].mxu0 %v11994_v6  ;;  %4108 = vmatmul.mubr.f32.gmra.mrb[40].mxu1 %v11994_v6  ;;  %v4207_v6 = vld [vmem:[#allocation13 + $0x38] sm:$0xff] }
0x1025   :  { %4000 = vmatprep.mubr.f32.mxu0 %v10904_v0  ;;  %4113 = vmatprep.mubr.f32.mxu1 %v10904_v0  ;;  %v12120_v8 = vpack.c.bf16 %v4207_v6, %v4203_v47  ;;  %v12177_v47 = vpack.c.bf16 %v4245_v57, %v4241_v46  ;;  %v12179_v6 = vpack.c.bf16 %v4247_v35, %v4243_v12  ;;  %v10701_v46 = vld [vmem:[%s13059_s6 + $0x8] sm:$0xff] }
0x1027   :  { %8862 = vmatprep.subr.bf16.mxu1 %v12120_v8 }
0x1028   :  { %4001 = vmatmul.mubr.f32.gmra.mrb[42].mxu0 %v12040_v21  ;;  %4114 = vmatmul.mubr.f32.gmra.mrb[42].mxu1 %v12040_v21  ;;  %v4204_v21 = vld [vmem:[#allocation13 + $0x20] sm:$0xff] }
0x1029   :  { %4006 = vmatprep.mubr.f32.mxu0 %v10904_v0  ;;  %4119 = vmatprep.mubr.f32.mxu1 %v10904_v0  ;;  %v12122_v11 = vpack.c.bf16 %v4204_v21, %v4200_v2  ;;  %v4240_v2 = vld [vmem:[#allocation13 + $0x140] sm:$0xff] }
0x102a   :  { %v4244_v21 = vld [vmem:[#allocation13 + $0x160] sm:$0xff] }
0x102b   :  { %8832 = vmatpush1.bf16.msra.mxu0 %v12122_v11 }
0x102c   :  { %4007 = vmatmul.mubr.f32.gmra.mrb[44].mxu0 %v12084_v34  ;;  %4120 = vmatmul.mubr.f32.gmra.mrb[44].mxu1 %v12084_v34  ;;  %v12125_v34 = vpack.c.bf16 %v4206_v42, %v4202_v33  ;;  %v4242_v33 = vld [vmem:[#allocation13 + $0x150] sm:$0xff]  ;;  %v12182_v42 = vpack.c.bf16 %v4244_v21, %v4240_v2 }
0x102d   :  { %4012 = vmatprep.mubr.f32.mxu0 %v10904_v0  ;;  %4125 = vmatprep.mubr.f32.mxu1 %v10904_v0  ;;  %v12186_v39 = vpack.c.bf16 %v4246_v56, %v4242_v33  ;;  %v10702_v2 = vld [vmem:[%s13059_s6 + $0x10] sm:$0xff]  ;;  %v10703_v33 = vld [vmem:[%s13059_s6 + $0x18] sm:$0xff] }
0x102e   :  { %8864 = vmatpush1.bf16.msra.mxu1 %v12125_v34  ;;  %8834 = vmatprep.subr.bf16.mxu0 %v12130_v31 }
0x102f   :  { %8866 = vmatprep.subr.bf16.mxu1 %v12132_v54  ;;  %8836 = vmatpush1.bf16.msra.mxu0 %v12134_v22 }
0x1030   :  { %8838 = vmatprep.subr.bf16.mxu0 %v12142_v15 }
0x1032   :  { %8868 = vmatpush1.bf16.msra.mxu1 %v12137_v61 }
0x1033   :  { %8870 = vmatprep.subr.bf16.mxu1 %v12144_v16  ;;  %8840 = vmatpush1.bf16.msra.mxu0 %v12146_v26 }
0x1034   :  { %8842 = vmatprep.subr.bf16.mxu0 %v12154_v27 }
0x1036   :  { %8872 = vmatpush1.bf16.msra.mxu1 %v12149_v40 }
0x1037   :  { %8874 = vmatprep.subr.bf16.mxu1 %v12156_v52  ;;  %8844 = vmatpush1.bf16.msra.mxu0 %v12158_v55 }
0x1038   :  { %8846 = vmatprep.subr.bf16.mxu0 %v12166_v13 }
0x103a   :  { %8876 = vmatpush1.bf16.msra.mxu1 %v12161_v50 }
0x103b   :  { %8878 = vmatprep.subr.bf16.mxu1 %v12168_v62  ;;  %8848 = vmatpush1.bf16.msra.mxu0 %v12170_v4 }
0x103c   :  { %8850 = vmatprep.subr.bf16.mxu0 %v12177_v47 }
0x103e   :  { %8880 = vmatpush1.bf16.msra.mxu1 %v12173_v51 }
0x103f   :  { %8882 = vmatprep.subr.bf16.mxu1 %v12179_v6  ;;  %8852 = vmatpush1.bf16.msra.mxu0 %v12182_v42 }
0x1040   :  { %8854 = vmatprep.subr.bf16.mxu0 %v12188_v29 }
0x1042   :  { %8884 = vmatpush1.bf16.msra.mxu1 %v12186_v39 }
0x1043   :  { %8886 = vmatprep.subr.bf16.mxu1 %v12190_v7  ;;  %8856 = vmatpush1.bf16.msra.mxu0 %v12193_v43 }
0x1044   :  { %8858 = vmatprep.subr.bf16.mxu0 %v12202_v9 }
0x1046   :  { %8888 = vmatpush1.bf16.msra.mxu1 %v12197_v41 }
0x1047   :  { %8890 = vmatprep.subr.bf16.mxu1 %v12204_v45  ;;  %8860 = vmatpush1.bf16.msra.mxu0 %v12206_v5 }
0x1048   :  { %8894 = vmatprep.subr.bf16.mxu0 %v12118_v53 }
0x104a   :  { %8892 = vmatpush1.bf16.msra.mxu1 %v12209_v3 }
0x104b   :  { %8926 = vmatprep.subr.bf16.mxu1 %v12120_v8 }
0x10c7   :  { %v3728_v1 = vpop.f32.mrb[30].mxu0  ;;  %v3799_v23 = vpop.f32.mrb[30].mxu1 }
0x10c8   :  { %v9963_v44 = vadd.f32 %v10700_v38, %v3728_v1  ;;  %v3730_v18 = vpop.f32.mrb[31].mxu0  ;;  %v3801_v30 = vpop.f32.mrb[31].mxu1  ;;  %v9979_v21 = vadd.f32 %v10702_v2, %v3799_v23  ;;  %v12275_v1 = vld [vmem:[%s13062_s9 + $0x8] sm:$0xff] }
0x10c9   :  { %v9964_v57 = vadd.f32 %v10701_v46, %v3730_v18  ;;  %v9980_v56 = vadd.f32 %v10703_v33, %v3801_v30 }
0x10ca   :  { %v7555_v12 = vmul.f32 -1.442695, %v9963_v44  ;;  %v7557_v60 = vmul.f32 -1.442695, %v9979_v21  ;;  %v12288_v21 = vld [vmem:[%s13062_s9 + $0x18] sm:$0xff] }
0x10cb   :  { %v7556_v35 = vmul.f32 -1.442695, %v9964_v57 }
0x10cc   :  { %10424 = vpow2.f32 %v7555_v12 }
0x10cd   :  { %10426 = vpow2.f32 %v7556_v35  ;;  %v12282_v35 = vld [vmem:[%s13062_s9 + $0x10] sm:$0xff] }
0x10ce   :  { %10428 = vtanh.f32 %v9980_v56 }
0x10cf   :  { %10430 = vpow2.f32 %v7557_v60 }
0x10d6   :  { %v10425_v10 = vpop.eup %10424 }
0x10d7   :  { %v3817_v48 = vadd.f32 1.0, %v10425_v10  ;;  %v10427_v49 = vpop.eup %10426 }
0x10d8   :  { %v3818_v17 = vadd.f32 1.0, %v10427_v49  ;;  %v10429_v37 = vpop.eup %10428 }
0x10d9   :  { %10432 = vrcp.f32 %v3817_v48  ;;  %v10431_v25 = vpop.eup %10430 }
0x10da   :  { %10434 = vrcp.f32 %v3818_v17  ;;  %v3819_v58 = vadd.f32 1.0, %v10431_v25 }
0x10dc   :  { %10436 = vrcp.f32 %v3819_v58 }
0x10e3   :  { %v10433_v24 = vpop.eup %10432 }
0x10e4   :  { %v3828_v32 = vmul.f32 %v10433_v24, %v10429_v37  ;;  %v10435_v36 = vpop.eup %10434 }
0x10e5   :  { %v3827_v14 = vmul.f32 %v10435_v36, %v12081_v20  ;;  %v12270_v20 = vld [vmem:[%s13062_s9] sm:$0xff] }
0x10e6   :  { %v10437_v28 = vpop.eup %10436 }
0x10e7   :  { %v3829_v19 = vadd.f32 %v3828_v32, %v3827_v14 }
0x10e9   :  { %10438 = vtanh.f32 %v3829_v19 }
0x10f3   :  { %v10439_v59 = vpop.eup %10438 }
0x10f4   :  { %v3831_v63 = vmul.f32 %v10439_v59, %v10437_v28 }
0x10f6   :  { %4013 = vmatmul.mubr.f32.gmra.mrb[46].mxu0 %v3831_v63  ;;  %4126 = vmatmul.mubr.f32.gmra.mrb[46].mxu1 %v3831_v63 }
0x10f7   :  { %4332 = vmatprep.mubr.f32.mxu0 %v10904_v0  ;;  %4403 = vmatprep.mubr.f32.mxu1 %v10904_v0 }
0x10fa   :  { %4333 = vmatmul.mubr.f32.vlgmr.msra.gmra.mrb[32].mxu0 %v10904_v0  ;;  %4404 = vmatmul.mubr.f32.vlgmr.msra.gmra.mrb[32].mxu1 %v10904_v0 }
0x10fb   :  { %8896 = vmatpush1.bf16.msra.mxu0 %v12122_v11  ;;  %8928 = vmatpush1.bf16.msra.mxu1 %v12125_v34 }
0x10fc   :  { %8898 = vmatprep.subr.bf16.mxu0 %v12130_v31  ;;  %8930 = vmatprep.subr.bf16.mxu1 %v12132_v54 }
0x10fd   :  { %4507 = vmatprep.mubr.f32.mxu0 %v10904_v0  ;;  %4578 = vmatprep.mubr.f32.mxu1 %v10904_v0 }
0x10ff   :  { %8900 = vmatpush1.bf16.msra.mxu0 %v12134_v22  ;;  %8932 = vmatpush1.bf16.msra.mxu1 %v12137_v61 }
0x1100   :  { %8902 = vmatprep.subr.bf16.mxu0 %v12142_v15  ;;  %8934 = vmatprep.subr.bf16.mxu1 %v12144_v16 }
0x1103   :  { %8904 = vmatpush1.bf16.msra.mxu0 %v12146_v26  ;;  %8936 = vmatpush1.bf16.msra.mxu1 %v12149_v40 }
0x1104   :  { %8906 = vmatprep.subr.bf16.mxu0 %v12154_v27  ;;  %8938 = vmatprep.subr.bf16.mxu1 %v12156_v52 }
0x1107   :  { %8908 = vmatpush1.bf16.msra.mxu0 %v12158_v55  ;;  %8940 = vmatpush1.bf16.msra.mxu1 %v12161_v50 }
0x1108   :  { %8910 = vmatprep.subr.bf16.mxu0 %v12166_v13  ;;  %8942 = vmatprep.subr.bf16.mxu1 %v12168_v62 }
0x110b   :  { %8912 = vmatpush1.bf16.msra.mxu0 %v12170_v4  ;;  %8944 = vmatpush1.bf16.msra.mxu1 %v12173_v51 }
0x110c   :  { %8914 = vmatprep.subr.bf16.mxu0 %v12177_v47  ;;  %8946 = vmatprep.subr.bf16.mxu1 %v12179_v6 }
0x110f   :  { %8916 = vmatpush1.bf16.msra.mxu0 %v12182_v42  ;;  %8948 = vmatpush1.bf16.msra.mxu1 %v12186_v39 }
0x1110   :  { %8918 = vmatprep.subr.bf16.mxu0 %v12188_v29  ;;  %8950 = vmatprep.subr.bf16.mxu1 %v12190_v7 }
0x1113   :  { %8920 = vmatpush1.bf16.msra.mxu0 %v12193_v43  ;;  %8952 = vmatpush1.bf16.msra.mxu1 %v12197_v41 }
0x1114   :  { %8922 = vmatprep.subr.bf16.mxu0 %v12202_v9  ;;  %8954 = vmatprep.subr.bf16.mxu1 %v12204_v45 }
0x1117   :  { %8924 = vmatpush1.bf16.msra.mxu0 %v12206_v5  ;;  %8956 = vmatpush1.bf16.msra.mxu1 %v12209_v3 }
0x1118   :  { %8958 = vmatprep.subr.bf16.mxu0 %v12118_v53  ;;  %8990 = vmatprep.subr.bf16.mxu1 %v12120_v8 }
0x11cd   :  { %v4334_v23 = vpop.f32.mrb[32].mxu0  ;;  %v4405_v38 = vpop.f32.mrb[32].mxu1 }
0x11ce   :  { %v9981_v44 = vadd.f32 %v4334_v23, %v12270_v20  ;;  %v4336_v18 = vpop.f32.mrb[33].mxu0  ;;  %v4407_v30 = vpop.f32.mrb[33].mxu1  ;;  %v9997_v2 = vadd.f32 %v4405_v38, %v12282_v35 }
0x11cf   :  { %v9982_v46 = vadd.f32 %v4336_v18, %v12275_v1  ;;  %v9998_v33 = vadd.f32 %v4407_v30, %v12288_v21 }
0x11d0   :  { %v7558_v57 = vmul.f32 -1.442695, %v9981_v44  ;;  %v7560_v56 = vmul.f32 -1.442695, %v9997_v2 }
0x11d1   :  { %v7559_v12 = vmul.f32 -1.442695, %v9982_v46 }
0x11d2   :  { %10440 = vpow2.f32 %v7558_v57 }
0x11d3   :  { %10442 = vpow2.f32 %v7559_v12 }
0x11d4   :  { %10444 = vtanh.f32 %v9998_v33 }
0x11d5   :  { %10446 = vpow2.f32 %v7560_v56 }
0x11dc   :  { %v10441_v60 = vpop.eup %10440 }
0x11dd   :  { %v4423_v10 = vadd.f32 1.0, %v10441_v60  ;;  %v10443_v48 = vpop.eup %10442 }
0x11de   :  { %v4424_v49 = vadd.f32 1.0, %v10443_v48  ;;  %v10445_v17 = vpop.eup %10444 }
0x11df   :  { %10448 = vrcp.f32 %v4423_v10  ;;  %v10447_v37 = vpop.eup %10446 }
0x11e0   :  { %10450 = vrcp.f32 %v4424_v49  ;;  %v4425_v36 = vadd.f32 1.0, %v10447_v37 }
0x11e2   :  { %10452 = vrcp.f32 %v4425_v36 }
0x11e9   :  { %v10449_v25 = vpop.eup %10448 }
0x11ea   :  { %v4434_v24 = vmul.f32 %v10449_v25, %v10445_v17  ;;  %v10451_v32 = vpop.eup %10450 }
0x11eb   :  { %v4433_v58 = vmul.f32 0.0, %v10451_v32 }
0x11ec   :  { %v10453_v19 = vpop.eup %10452 }
0x11ed   :  { %v12291_v14 = vadd.f32 %v4434_v24, %v4433_v58 }
0x11ef   :  { %10454 = vtanh.f32 %v12291_v14 }
0x11f9   :  { %v10455_v28 = vpop.eup %10454 }
0x11fa   :  { %v12294_v59 = vmul.f32 %v10455_v28, %v10453_v19 }
0x11fc   :  { %4508 = vmatmul.mubr.f32.vlgmr.msra.gmra.mrb[34].mxu0 %v12294_v59  ;;  %4579 = vmatmul.mubr.f32.vlgmr.msra.gmra.mrb[34].mxu1 %v12294_v59 }
0x11fd   :  { %8960 = vmatpush1.bf16.msra.mxu0 %v12122_v11  ;;  %8992 = vmatpush1.bf16.msra.mxu1 %v12125_v34 }
0x11fe   :  { %8962 = vmatprep.subr.bf16.mxu0 %v12130_v31  ;;  %8994 = vmatprep.subr.bf16.mxu1 %v12132_v54 }
0x11ff   :  { %4682 = vmatprep.mubr.f32.mxu0 %v10904_v0  ;;  %4753 = vmatprep.mubr.f32.mxu1 %v10904_v0 }
0x1201   :  { %8964 = vmatpush1.bf16.msra.mxu0 %v12134_v22  ;;  %8996 = vmatpush1.bf16.msra.mxu1 %v12137_v61 }
0x1202   :  { %8966 = vmatprep.subr.bf16.mxu0 %v12142_v15  ;;  %8998 = vmatprep.subr.bf16.mxu1 %v12144_v16 }
0x1205   :  { %8968 = vmatpush1.bf16.msra.mxu0 %v12146_v26  ;;  %9000 = vmatpush1.bf16.msra.mxu1 %v12149_v40 }
0x1206   :  { %8970 = vmatprep.subr.bf16.mxu0 %v12154_v27  ;;  %9002 = vmatprep.subr.bf16.mxu1 %v12156_v52 }
0x1209   :  { %8972 = vmatpush1.bf16.msra.mxu0 %v12158_v55  ;;  %9004 = vmatpush1.bf16.msra.mxu1 %v12161_v50 }
0x120a   :  { %8974 = vmatprep.subr.bf16.mxu0 %v12166_v13  ;;  %9006 = vmatprep.subr.bf16.mxu1 %v12168_v62 }
0x120d   :  { %8976 = vmatpush1.bf16.msra.mxu0 %v12170_v4  ;;  %9008 = vmatpush1.bf16.msra.mxu1 %v12173_v51 }
0x120e   :  { %8978 = vmatprep.subr.bf16.mxu0 %v12177_v47  ;;  %9010 = vmatprep.subr.bf16.mxu1 %v12179_v6 }
0x1211   :  { %8980 = vmatpush1.bf16.msra.mxu0 %v12182_v42  ;;  %9012 = vmatpush1.bf16.msra.mxu1 %v12186_v39 }
0x1212   :  { %8982 = vmatprep.subr.bf16.mxu0 %v12188_v29  ;;  %9014 = vmatprep.subr.bf16.mxu1 %v12190_v7 }
0x1215   :  { %8984 = vmatpush1.bf16.msra.mxu0 %v12193_v43  ;;  %9016 = vmatpush1.bf16.msra.mxu1 %v12197_v41 }
0x1216   :  { %8986 = vmatprep.subr.bf16.mxu0 %v12202_v9  ;;  %9018 = vmatprep.subr.bf16.mxu1 %v12204_v45 }
0x1219   :  { %8988 = vmatpush1.bf16.msra.mxu0 %v12206_v5  ;;  %9020 = vmatpush1.bf16.msra.mxu1 %v12209_v3 }
0x121a   :  { %9022 = vmatprep.subr.bf16.mxu0 %v12118_v53  ;;  %9054 = vmatprep.subr.bf16.mxu1 %v12120_v8 }
0x12cf   :  { %v4509_v63 = vpop.f32.mrb[34].mxu0  ;;  %v4580_v23 = vpop.f32.mrb[34].mxu1 }
0x12d0   :  { %v9983_v38 = vadd.f32 %v4509_v63, %v12270_v20  ;;  %v4511_v44 = vpop.f32.mrb[35].mxu0  ;;  %v4582_v18 = vpop.f32.mrb[35].mxu1  ;;  %v9999_v12 = vadd.f32 %v4580_v23, %v12282_v35 }
0x12d1   :  { %v9984_v30 = vadd.f32 %v4511_v44, %v12275_v1  ;;  %v10000_v2 = vadd.f32 %v4582_v18, %v12288_v21 }
0x12d2   :  { %v7561_v46 = vmul.f32 -1.442695, %v9983_v38  ;;  %v7563_v33 = vmul.f32 -1.442695, %v9999_v12 }
0x12d3   :  { %v7562_v57 = vmul.f32 -1.442695, %v9984_v30 }
0x12d4   :  { %10456 = vpow2.f32 %v7561_v46 }
0x12d5   :  { %10458 = vpow2.f32 %v7562_v57 }
0x12d6   :  { %10460 = vtanh.f32 %v10000_v2 }
0x12d7   :  { %10462 = vpow2.f32 %v7563_v33 }
0x12de   :  { %v10457_v56 = vpop.eup %10456 }
0x12df   :  { %v4598_v60 = vadd.f32 1.0, %v10457_v56  ;;  %v10459_v10 = vpop.eup %10458 }
0x12e0   :  { %v4599_v48 = vadd.f32 1.0, %v10459_v10  ;;  %v10461_v49 = vpop.eup %10460 }
0x12e1   :  { %10464 = vrcp.f32 %v4598_v60  ;;  %v10463_v17 = vpop.eup %10462 }
0x12e2   :  { %10466 = vrcp.f32 %v4599_v48  ;;  %v4600_v32 = vadd.f32 1.0, %v10463_v17 }
0x12e4   :  { %10468 = vrcp.f32 %v4600_v32 }
0x12eb   :  { %v10465_v37 = vpop.eup %10464 }
0x12ec   :  { %v4609_v25 = vmul.f32 %v10465_v37, %v10461_v49  ;;  %v10467_v24 = vpop.eup %10466 }
0x12ed   :  { %v4608_v36 = vmul.f32 %v10467_v24, %v12291_v14 }
0x12ee   :  { %v10469_v19 = vpop.eup %10468 }
0x12ef   :  { %v12337_v58 = vadd.f32 %v4609_v25, %v4608_v36 }
0x12f1   :  { %10470 = vtanh.f32 %v12337_v58 }
0x12fb   :  { %v10471_v28 = vpop.eup %10470 }
0x12fc   :  { %v12340_v63 = vmul.f32 %v10471_v28, %v10469_v19 }
0x12fe   :  { %4683 = vmatmul.mubr.f32.vlgmr.msra.gmra.mrb[36].mxu0 %v12340_v63  ;;  %4754 = vmatmul.mubr.f32.vlgmr.msra.gmra.mrb[36].mxu1 %v12340_v63 }
0x12ff   :  { %9024 = vmatpush1.bf16.msra.mxu0 %v12122_v11  ;;  %9056 = vmatpush1.bf16.msra.mxu1 %v12125_v34 }
0x1300   :  { %9026 = vmatprep.subr.bf16.mxu0 %v12130_v31  ;;  %9058 = vmatprep.subr.bf16.mxu1 %v12132_v54 }
0x1301   :  { %4857 = vmatprep.mubr.f32.mxu0 %v10904_v0  ;;  %4928 = vmatprep.mubr.f32.mxu1 %v10904_v0 }
0x1303   :  { %9028 = vmatpush1.bf16.msra.mxu0 %v12134_v22  ;;  %9060 = vmatpush1.bf16.msra.mxu1 %v12137_v61 }
0x1304   :  { %9030 = vmatprep.subr.bf16.mxu0 %v12142_v15  ;;  %9062 = vmatprep.subr.bf16.mxu1 %v12144_v16 }
0x1307   :  { %9032 = vmatpush1.bf16.msra.mxu0 %v12146_v26  ;;  %9064 = vmatpush1.bf16.msra.mxu1 %v12149_v40 }
0x1308   :  { %9034 = vmatprep.subr.bf16.mxu0 %v12154_v27  ;;  %9066 = vmatprep.subr.bf16.mxu1 %v12156_v52 }
0x130b   :  { %9036 = vmatpush1.bf16.msra.mxu0 %v12158_v55  ;;  %9068 = vmatpush1.bf16.msra.mxu1 %v12161_v50 }
0x130c   :  { %9038 = vmatprep.subr.bf16.mxu0 %v12166_v13  ;;  %9070 = vmatprep.subr.bf16.mxu1 %v12168_v62 }
0x130f   :  { %9040 = vmatpush1.bf16.msra.mxu0 %v12170_v4  ;;  %9072 = vmatpush1.bf16.msra.mxu1 %v12173_v51 }
0x1310   :  { %9042 = vmatprep.subr.bf16.mxu0 %v12177_v47  ;;  %9074 = vmatprep.subr.bf16.mxu1 %v12179_v6 }
0x1313   :  { %9044 = vmatpush1.bf16.msra.mxu0 %v12182_v42  ;;  %9076 = vmatpush1.bf16.msra.mxu1 %v12186_v39 }
0x1314   :  { %9046 = vmatprep.subr.bf16.mxu0 %v12188_v29  ;;  %9078 = vmatprep.subr.bf16.mxu1 %v12190_v7 }
0x1317   :  { %9048 = vmatpush1.bf16.msra.mxu0 %v12193_v43  ;;  %9080 = vmatpush1.bf16.msra.mxu1 %v12197_v41 }
0x1318   :  { %9050 = vmatprep.subr.bf16.mxu0 %v12202_v9  ;;  %9082 = vmatprep.subr.bf16.mxu1 %v12204_v45 }
0x131b   :  { %9052 = vmatpush1.bf16.msra.mxu0 %v12206_v5  ;;  %9084 = vmatpush1.bf16.msra.mxu1 %v12209_v3 }
0x131c   :  { %9086 = vmatprep.subr.bf16.mxu0 %v12118_v53  ;;  %9118 = vmatprep.subr.bf16.mxu1 %v12120_v8 }
0x13d1   :  { %v4684_v14 = vpop.f32.mrb[36].mxu0  ;;  %v4755_v23 = vpop.f32.mrb[36].mxu1 }
0x13d2   :  { %v9985_v38 = vadd.f32 %v4684_v14, %v12270_v20  ;;  %v4686_v44 = vpop.f32.mrb[37].mxu0  ;;  %v4757_v18 = vpop.f32.mrb[37].mxu1  ;;  %v10001_v12 = vadd.f32 %v4755_v23, %v12282_v35 }
0x13d3   :  { %v9986_v30 = vadd.f32 %v4686_v44, %v12275_v1  ;;  %v10002_v2 = vadd.f32 %v4757_v18, %v12288_v21 }
0x13d4   :  { %v7564_v46 = vmul.f32 -1.442695, %v9985_v38  ;;  %v7566_v33 = vmul.f32 -1.442695, %v10001_v12 }
0x13d5   :  { %v7565_v57 = vmul.f32 -1.442695, %v9986_v30 }
0x13d6   :  { %10472 = vpow2.f32 %v7564_v46 }
0x13d7   :  { %10474 = vpow2.f32 %v7565_v57 }
0x13d8   :  { %10476 = vtanh.f32 %v10002_v2 }
0x13d9   :  { %10478 = vpow2.f32 %v7566_v33 }
0x13e0   :  { %v10473_v56 = vpop.eup %10472 }
0x13e1   :  { %v4773_v60 = vadd.f32 1.0, %v10473_v56  ;;  %v10475_v10 = vpop.eup %10474 }
0x13e2   :  { %v4774_v48 = vadd.f32 1.0, %v10475_v10  ;;  %v10477_v49 = vpop.eup %10476 }
0x13e3   :  { %10480 = vrcp.f32 %v4773_v60  ;;  %v10479_v17 = vpop.eup %10478 }
0x13e4   :  { %10482 = vrcp.f32 %v4774_v48  ;;  %v4775_v32 = vadd.f32 1.0, %v10479_v17 }
0x13e6   :  { %10484 = vrcp.f32 %v4775_v32 }
0x13ed   :  { %v10481_v37 = vpop.eup %10480 }
0x13ee   :  { %v4784_v25 = vmul.f32 %v10481_v37, %v10477_v49  ;;  %v10483_v24 = vpop.eup %10482 }
0x13ef   :  { %v4783_v36 = vmul.f32 %v10483_v24, %v12337_v58 }
0x13f0   :  { %v10485_v28 = vpop.eup %10484 }
0x13f1   :  { %v12383_v19 = vadd.f32 %v4784_v25, %v4783_v36 }
0x13f3   :  { %10486 = vtanh.f32 %v12383_v19 }
0x13fd   :  { %v10487_v14 = vpop.eup %10486 }
0x13fe   :  { %v12386_v23 = vmul.f32 %v10487_v14, %v10485_v28 }
0x1400   :  { %4858 = vmatmul.mubr.f32.vlgmr.msra.gmra.mrb[38].mxu0 %v12386_v23  ;;  %4929 = vmatmul.mubr.f32.vlgmr.msra.gmra.mrb[38].mxu1 %v12386_v23 }
0x1401   :  { %9088 = vmatpush1.bf16.msra.mxu0 %v12122_v11  ;;  %9120 = vmatpush1.bf16.msra.mxu1 %v12125_v34 }
0x1402   :  { %9090 = vmatprep.subr.bf16.mxu0 %v12130_v31  ;;  %9122 = vmatprep.subr.bf16.mxu1 %v12132_v54 }
0x1403   :  { %5032 = vmatprep.mubr.f32.mxu0 %v10904_v0  ;;  %5103 = vmatprep.mubr.f32.mxu1 %v10904_v0 }
0x1405   :  { %9092 = vmatpush1.bf16.msra.mxu0 %v12134_v22  ;;  %9124 = vmatpush1.bf16.msra.mxu1 %v12137_v61 }
0x1406   :  { %9094 = vmatprep.subr.bf16.mxu0 %v12142_v15  ;;  %9126 = vmatprep.subr.bf16.mxu1 %v12144_v16 }
0x1409   :  { %9096 = vmatpush1.bf16.msra.mxu0 %v12146_v26  ;;  %9128 = vmatpush1.bf16.msra.mxu1 %v12149_v40 }
0x140a   :  { %9098 = vmatprep.subr.bf16.mxu0 %v12154_v27  ;;  %9130 = vmatprep.subr.bf16.mxu1 %v12156_v52 }
0x140d   :  { %9100 = vmatpush1.bf16.msra.mxu0 %v12158_v55  ;;  %9132 = vmatpush1.bf16.msra.mxu1 %v12161_v50 }
0x140e   :  { %9102 = vmatprep.subr.bf16.mxu0 %v12166_v13  ;;  %9134 = vmatprep.subr.bf16.mxu1 %v12168_v62 }
0x1411   :  { %9104 = vmatpush1.bf16.msra.mxu0 %v12170_v4  ;;  %9136 = vmatpush1.bf16.msra.mxu1 %v12173_v51 }
0x1412   :  { %9106 = vmatprep.subr.bf16.mxu0 %v12177_v47  ;;  %9138 = vmatprep.subr.bf16.mxu1 %v12179_v6 }
0x1415   :  { %9108 = vmatpush1.bf16.msra.mxu0 %v12182_v42  ;;  %9140 = vmatpush1.bf16.msra.mxu1 %v12186_v39 }
0x1416   :  { %9110 = vmatprep.subr.bf16.mxu0 %v12188_v29  ;;  %9142 = vmatprep.subr.bf16.mxu1 %v12190_v7 }
0x1419   :  { %9112 = vmatpush1.bf16.msra.mxu0 %v12193_v43  ;;  %9144 = vmatpush1.bf16.msra.mxu1 %v12197_v41 }
0x141a   :  { %9114 = vmatprep.subr.bf16.mxu0 %v12202_v9  ;;  %9146 = vmatprep.subr.bf16.mxu1 %v12204_v45 }
0x141d   :  { %9116 = vmatpush1.bf16.msra.mxu0 %v12206_v5  ;;  %9148 = vmatpush1.bf16.msra.mxu1 %v12209_v3 }
0x141e   :  { %9150 = vmatprep.subr.bf16.mxu0 %v12118_v53  ;;  %9182 = vmatprep.subr.bf16.mxu1 %v12120_v8 }
0x14d3   :  { %v4859_v58 = vpop.f32.mrb[38].mxu0  ;;  %v4930_v38 = vpop.f32.mrb[38].mxu1 }
0x14d4   :  { %v9987_v44 = vadd.f32 %v4859_v58, %v12270_v20  ;;  %v4861_v18 = vpop.f32.mrb[39].mxu0  ;;  %v4932_v30 = vpop.f32.mrb[39].mxu1  ;;  %v10003_v2 = vadd.f32 %v4930_v38, %v12282_v35 }
0x14d5   :  { %v9988_v46 = vadd.f32 %v4861_v18, %v12275_v1  ;;  %v10004_v33 = vadd.f32 %v4932_v30, %v12288_v21 }
0x14d6   :  { %v7567_v57 = vmul.f32 -1.442695, %v9987_v44  ;;  %v7569_v56 = vmul.f32 -1.442695, %v10003_v2 }
0x14d7   :  { %v7568_v12 = vmul.f32 -1.442695, %v9988_v46 }
0x14d8   :  { %10488 = vpow2.f32 %v7567_v57 }
0x14d9   :  { %10490 = vpow2.f32 %v7568_v12 }
0x14da   :  { %10492 = vtanh.f32 %v10004_v33 }
0x14db   :  { %10494 = vpow2.f32 %v7569_v56 }
0x14e2   :  { %v10489_v60 = vpop.eup %10488 }
0x14e3   :  { %v4948_v10 = vadd.f32 1.0, %v10489_v60  ;;  %v10491_v48 = vpop.eup %10490 }
0x14e4   :  { %v4949_v49 = vadd.f32 1.0, %v10491_v48  ;;  %v10493_v17 = vpop.eup %10492 }
0x14e5   :  { %10496 = vrcp.f32 %v4948_v10  ;;  %v10495_v37 = vpop.eup %10494 }
0x14e6   :  { %10498 = vrcp.f32 %v4949_v49  ;;  %v4950_v36 = vadd.f32 1.0, %v10495_v37 }
0x14e8   :  { %10500 = vrcp.f32 %v4950_v36 }
0x14ef   :  { %v10497_v25 = vpop.eup %10496 }
0x14f0   :  { %v4959_v24 = vmul.f32 %v10497_v25, %v10493_v17  ;;  %v10499_v32 = vpop.eup %10498 }
0x14f1   :  { %v4958_v28 = vmul.f32 %v10499_v32, %v12383_v19 }
0x14f2   :  { %v10501_v58 = vpop.eup %10500 }
0x14f3   :  { %v12429_v14 = vadd.f32 %v4959_v24, %v4958_v28 }
0x14f5   :  { %10502 = vtanh.f32 %v12429_v14 }
0x14ff   :  { %v10503_v38 = vpop.eup %10502 }
0x1500   :  { %v12432_v44 = vmul.f32 %v10503_v38, %v10501_v58 }
0x1502   :  { %5033 = vmatmul.mubr.f32.vlgmr.msra.gmra.mrb[40].mxu0 %v12432_v44  ;;  %5104 = vmatmul.mubr.f32.vlgmr.msra.gmra.mrb[40].mxu1 %v12432_v44 }
0x1503   :  { %9152 = vmatpush1.bf16.msra.mxu0 %v12122_v11  ;;  %9184 = vmatpush1.bf16.msra.mxu1 %v12125_v34 }
0x1504   :  { %9154 = vmatprep.subr.bf16.mxu0 %v12130_v31  ;;  %9186 = vmatprep.subr.bf16.mxu1 %v12132_v54 }
0x1505   :  { %5207 = vmatprep.mubr.f32.mxu0 %v10904_v0  ;;  %5278 = vmatprep.mubr.f32.mxu1 %v10904_v0 }
0x1507   :  { %9156 = vmatpush1.bf16.msra.mxu0 %v12134_v22  ;;  %9188 = vmatpush1.bf16.msra.mxu1 %v12137_v61 }
0x1508   :  { %9158 = vmatprep.subr.bf16.mxu0 %v12142_v15  ;;  %9190 = vmatprep.subr.bf16.mxu1 %v12144_v16 }
0x150b   :  { %9160 = vmatpush1.bf16.msra.mxu0 %v12146_v26  ;;  %9192 = vmatpush1.bf16.msra.mxu1 %v12149_v40 }
0x150c   :  { %9162 = vmatprep.subr.bf16.mxu0 %v12154_v27  ;;  %9194 = vmatprep.subr.bf16.mxu1 %v12156_v52 }
0x150f   :  { %9164 = vmatpush1.bf16.msra.mxu0 %v12158_v55  ;;  %9196 = vmatpush1.bf16.msra.mxu1 %v12161_v50 }
0x1510   :  { %9166 = vmatprep.subr.bf16.mxu0 %v12166_v13  ;;  %9198 = vmatprep.subr.bf16.mxu1 %v12168_v62 }
0x1513   :  { %9168 = vmatpush1.bf16.msra.mxu0 %v12170_v4  ;;  %9200 = vmatpush1.bf16.msra.mxu1 %v12173_v51 }
0x1514   :  { %9170 = vmatprep.subr.bf16.mxu0 %v12177_v47  ;;  %9202 = vmatprep.subr.bf16.mxu1 %v12179_v6 }
0x1517   :  { %9172 = vmatpush1.bf16.msra.mxu0 %v12182_v42  ;;  %9204 = vmatpush1.bf16.msra.mxu1 %v12186_v39 }
0x1518   :  { %9174 = vmatprep.subr.bf16.mxu0 %v12188_v29  ;;  %9206 = vmatprep.subr.bf16.mxu1 %v12190_v7 }
0x151b   :  { %9176 = vmatpush1.bf16.msra.mxu0 %v12193_v43  ;;  %9208 = vmatpush1.bf16.msra.mxu1 %v12197_v41 }
0x151c   :  { %9178 = vmatprep.subr.bf16.mxu0 %v12202_v9  ;;  %9210 = vmatprep.subr.bf16.mxu1 %v12204_v45 }
0x151f   :  { %9180 = vmatpush1.bf16.msra.mxu0 %v12206_v5  ;;  %9212 = vmatpush1.bf16.msra.mxu1 %v12209_v3 }
0x1520   :  { %9214 = vmatprep.subr.bf16.mxu0 %v12118_v53  ;;  %9246 = vmatprep.subr.bf16.mxu1 %v12120_v8 }
0x15d5   :  { %v5034_v19 = vpop.f32.mrb[40].mxu0  ;;  %v5105_v18 = vpop.f32.mrb[40].mxu1 }
0x15d6   :  { %v9989_v30 = vadd.f32 %v5034_v19, %v12270_v20  ;;  %v5036_v46 = vpop.f32.mrb[41].mxu0  ;;  %v5107_v57 = vpop.f32.mrb[41].mxu1  ;;  %v10005_v56 = vadd.f32 %v5105_v18, %v12282_v35 }
0x15d7   :  { %v9990_v12 = vadd.f32 %v5036_v46, %v12275_v1  ;;  %v10006_v60 = vadd.f32 %v5107_v57, %v12288_v21 }
0x15d8   :  { %v7570_v2 = vmul.f32 -1.442695, %v9989_v30  ;;  %v7572_v10 = vmul.f32 -1.442695, %v10005_v56 }
0x15d9   :  { %v7571_v33 = vmul.f32 -1.442695, %v9990_v12 }
0x15da   :  { %10504 = vpow2.f32 %v7570_v2 }
0x15db   :  { %10506 = vpow2.f32 %v7571_v33 }
0x15dc   :  { %10508 = vtanh.f32 %v10006_v60 }
0x15dd   :  { %10510 = vpow2.f32 %v7572_v10 }
0x15e4   :  { %v10505_v48 = vpop.eup %10504 }
0x15e5   :  { %v5123_v49 = vadd.f32 1.0, %v10505_v48  ;;  %v10507_v17 = vpop.eup %10506 }
0x15e6   :  { %v5124_v37 = vadd.f32 1.0, %v10507_v17  ;;  %v10509_v25 = vpop.eup %10508 }
0x15e7   :  { %10512 = vrcp.f32 %v5123_v49  ;;  %v10511_v24 = vpop.eup %10510 }
0x15e8   :  { %10514 = vrcp.f32 %v5124_v37  ;;  %v5125_v58 = vadd.f32 1.0, %v10511_v24 }
0x15ea   :  { %10516 = vrcp.f32 %v5125_v58 }
0x15f1   :  { %v10513_v32 = vpop.eup %10512 }
0x15f2   :  { %v5134_v36 = vmul.f32 %v10513_v32, %v10509_v25  ;;  %v10515_v28 = vpop.eup %10514 }
0x15f3   :  { %v5133_v38 = vmul.f32 %v10515_v28, %v12429_v14 }
0x15f4   :  { %v10517_v18 = vpop.eup %10516 }
0x15f5   :  { %v12475_v19 = vadd.f32 %v5134_v36, %v5133_v38 }
0x15f7   :  { %10518 = vtanh.f32 %v12475_v19 }
0x1601   :  { %v10519_v30 = vpop.eup %10518 }
0x1602   :  { %v12478_v46 = vmul.f32 %v10519_v30, %v10517_v18 }
0x1604   :  { %5208 = vmatmul.mubr.f32.vlgmr.msra.gmra.mrb[42].mxu0 %v12478_v46  ;;  %5279 = vmatmul.mubr.f32.vlgmr.msra.gmra.mrb[42].mxu1 %v12478_v46 }
0x1605   :  { %9216 = vmatpush1.bf16.msra.mxu0 %v12122_v11  ;;  %9248 = vmatpush1.bf16.msra.mxu1 %v12125_v34 }
0x1606   :  { %9218 = vmatprep.subr.bf16.mxu0 %v12130_v31  ;;  %9250 = vmatprep.subr.bf16.mxu1 %v12132_v54 }
0x1607   :  { %5382 = vmatprep.mubr.f32.mxu0 %v10904_v0  ;;  %5453 = vmatprep.mubr.f32.mxu1 %v10904_v0 }
0x1609   :  { %9220 = vmatpush1.bf16.msra.mxu0 %v12134_v22  ;;  %9252 = vmatpush1.bf16.msra.mxu1 %v12137_v61 }
0x160a   :  { %9222 = vmatprep.subr.bf16.mxu0 %v12142_v15  ;;  %9254 = vmatprep.subr.bf16.mxu1 %v12144_v16 }
0x160d   :  { %9224 = vmatpush1.bf16.msra.mxu0 %v12146_v26  ;;  %9256 = vmatpush1.bf16.msra.mxu1 %v12149_v40 }
0x160e   :  { %9226 = vmatprep.subr.bf16.mxu0 %v12154_v27  ;;  %9258 = vmatprep.subr.bf16.mxu1 %v12156_v52 }
0x1611   :  { %9228 = vmatpush1.bf16.msra.mxu0 %v12158_v55  ;;  %9260 = vmatpush1.bf16.msra.mxu1 %v12161_v50 }
0x1612   :  { %9230 = vmatprep.subr.bf16.mxu0 %v12166_v13  ;;  %9262 = vmatprep.subr.bf16.mxu1 %v12168_v62 }
0x1615   :  { %9232 = vmatpush1.bf16.msra.mxu0 %v12170_v4  ;;  %9264 = vmatpush1.bf16.msra.mxu1 %v12173_v51 }
0x1616   :  { %9234 = vmatprep.subr.bf16.mxu0 %v12177_v47  ;;  %9266 = vmatprep.subr.bf16.mxu1 %v12179_v6 }
0x1619   :  { %9236 = vmatpush1.bf16.msra.mxu0 %v12182_v42  ;;  %9268 = vmatpush1.bf16.msra.mxu1 %v12186_v39 }
0x161a   :  { %9238 = vmatprep.subr.bf16.mxu0 %v12188_v29  ;;  %9270 = vmatprep.subr.bf16.mxu1 %v12190_v7 }
0x161d   :  { %9240 = vmatpush1.bf16.msra.mxu0 %v12193_v43  ;;  %9272 = vmatpush1.bf16.msra.mxu1 %v12197_v41 }
0x161e   :  { %9242 = vmatprep.subr.bf16.mxu0 %v12202_v9  ;;  %9274 = vmatprep.subr.bf16.mxu1 %v12204_v45 }
0x1621   :  { %9244 = vmatpush1.bf16.msra.mxu0 %v12206_v5  ;;  %9276 = vmatpush1.bf16.msra.mxu1 %v12209_v3 }
0x1622   :  { %9278 = vmatprep.subr.bf16.mxu0 %v12118_v53  ;;  %9310 = vmatprep.subr.bf16.mxu1 %v12120_v8 }
0x16d7   :  { %v5209_v14 = vpop.f32.mrb[42].mxu0  ;;  %v5280_v57 = vpop.f32.mrb[42].mxu1 }
0x16d8   :  { %v9991_v12 = vadd.f32 %v5209_v14, %v12270_v20  ;;  %v5211_v2 = vpop.f32.mrb[43].mxu0  ;;  %v5282_v33 = vpop.f32.mrb[43].mxu1  ;;  %v10007_v48 = vadd.f32 %v5280_v57, %v12282_v35 }
0x16d9   :  { %v9992_v56 = vadd.f32 %v5211_v2, %v12275_v1  ;;  %v10008_v49 = vadd.f32 %v5282_v33, %v12288_v21  ;;  %v5683_v2 = vld [vmem:[#allocation15 + $0x58] sm:$0xff] }
0x16da   :  { %v7573_v60 = vmul.f32 -1.442695, %v9991_v12  ;;  %v7575_v17 = vmul.f32 -1.442695, %v10007_v48  ;;  %v5687_v33 = vld [vmem:[#allocation15 + $0x78] sm:$0xff] }
0x16db   :  { %v7574_v10 = vmul.f32 -1.442695, %v9992_v56 }
0x16dc   :  { %10520 = vpow2.f32 %v7573_v60 }
0x16dd   :  { %10522 = vpow2.f32 %v7574_v10 }
0x16de   :  { %10524 = vtanh.f32 %v10008_v49  ;;  %v5680_v49 = vld [vmem:[#allocation15 + $0x40] sm:$0xff] }
0x16df   :  { %10526 = vpow2.f32 %v7575_v17  ;;  %v5684_v17 = vld [vmem:[#allocation15 + $0x60] sm:$0xff] }
0x16e6   :  { %v10521_v53 = vpop.eup %10520 }
0x16e7   :  { %v5298_v37 = vadd.f32 1.0, %v10521_v53  ;;  %v10523_v8 = vpop.eup %10522 }
0x16e8   :  { %v5299_v25 = vadd.f32 1.0, %v10523_v8  ;;  %v10525_v24 = vpop.eup %10524  ;;  %v9377_v8 = vpack.c.bf16 %v5687_v33, %v5683_v2  ;;  %v5716_v2 = vld [vmem:[#allocation15 + $0x160] sm:$0xff] }
0x16e9   :  { %10528 = vrcp.f32 %v5298_v37  ;;  %v10527_v32 = vpop.eup %10526 }
0x16ea   :  { %10530 = vrcp.f32 %v5299_v25  ;;  %v5300_v38 = vadd.f32 1.0, %v10527_v32  ;;  %v5682_v25 = vld [vmem:[#allocation15 + $0x50] sm:$0xff]  ;;  %v5689_v32 = vld [vmem:[#allocation15 + $0x88] sm:$0xff] }
0x16ec   :  { %10532 = vrcp.f32 %v5300_v38  ;;  %v9347_v38 = vpack.c.bf16 %v5684_v17, %v5680_v49  ;;  %v5725_v49 = vld [vmem:[#allocation15 + $0x1a8] sm:$0xff]  ;;  %v5723_v17 = vld [vmem:[#allocation15 + $0x198] sm:$0xff] }
0x16f3   :  { %v10529_v36 = vpop.eup %10528 }
0x16f4   :  { %v5309_v28 = vmul.f32 %v10529_v36, %v10525_v24  ;;  %v10531_v58 = vpop.eup %10530  ;;  %v5686_v24 = vld [vmem:[#allocation15 + $0x70] sm:$0xff]  ;;  %v5693_v36 = vld [vmem:[#allocation15 + $0xa8] sm:$0xff] }
0x16f5   :  { %v5308_v18 = vmul.f32 %v10531_v58, %v12475_v19  ;;  %v5685_v19 = vld [vmem:[#allocation15 + $0x68] sm:$0xff]  ;;  %v5695_v58 = vld [vmem:[#allocation15 + $0xb8] sm:$0xff] }
0x16f6   :  { %v10533_v14 = vpop.eup %10532 }
0x16f7   :  { %v12521_v30 = vadd.f32 %v5309_v28, %v5308_v18  ;;  %v5691_v28 = vld [vmem:[#allocation15 + $0x98] sm:$0xff]  ;;  %v9379_v18 = vpack.c.bf16 %v5686_v24, %v5682_v25  ;;  %v5720_v24 = vld [vmem:[#allocation15 + $0x180] sm:$0xff] }
0x16f9   :  { %10534 = vtanh.f32 %v12521_v30 }
0x1703   :  { %v10535_v57 = vpop.eup %10534 }
0x1704   :  { %v12524_v12 = vmul.f32 %v10535_v57, %v10533_v14  ;;  %v5692_v14 = vld [vmem:[#allocation15 + $0xa0] sm:$0xff]  ;;  %v9349_v57 = vpack.c.bf16 %v5693_v36, %v5689_v32 }
0x1705   :  { %v5724_v32 = vld [vmem:[#allocation15 + $0x1a0] sm:$0xff] }
0x1706   :  { %5383 = vmatmul.mubr.f32.vlgmr.msra.gmra.mrb[44].mxu0 %v12524_v12  ;;  %5454 = vmatmul.mubr.f32.vlgmr.msra.gmra.mrb[44].mxu1 %v12524_v12 }
0x1707   :  { %9280 = vmatpush1.bf16.msra.mxu0 %v12122_v11  ;;  %9312 = vmatpush1.bf16.msra.mxu1 %v12125_v34  ;;  %v5673_v11 = vld [vmem:[#allocation15 + $0x8] sm:$0xff] }
0x1708   :  { %9282 = vmatprep.subr.bf16.mxu0 %v12130_v31  ;;  %9314 = vmatprep.subr.bf16.mxu1 %v12132_v54  ;;  %v5677_v34 = vld [vmem:[#allocation15 + $0x28] sm:$0xff]  ;;  %v5675_v31 = vld [vmem:[#allocation15 + $0x18] sm:$0xff] }
0x1709   :  { %5557 = vmatprep.mubr.f32.mxu0 %v10904_v0  ;;  %5628 = vmatprep.mubr.f32.mxu1 %v10904_v0  ;;  %v9341_v54 = vpack.c.bf16 %v5677_v34, %v5673_v11  ;;  %v9381_v11 = vpack.c.bf16 %v5695_v58, %v5691_v28  ;;  %v5690_v34 = vld [vmem:[#allocation15 + $0x90] sm:$0xff] }
0x170a   :  { %v5722_v58 = vld [vmem:[#allocation15 + $0x190] sm:$0xff] }
0x170b   :  { %9284 = vmatpush1.bf16.msra.mxu0 %v12134_v22  ;;  %9316 = vmatpush1.bf16.msra.mxu1 %v12137_v61  ;;  %v5679_v22 = vld [vmem:[#allocation15 + $0x38] sm:$0xff] }
0x170c   :  { %9286 = vmatprep.subr.bf16.mxu0 %v12142_v15  ;;  %9318 = vmatprep.subr.bf16.mxu1 %v12144_v16  ;;  %v9373_v61 = vpack.c.bf16 %v5679_v22, %v5675_v31  ;;  %v5694_v31 = vld [vmem:[#allocation15 + $0xb0] sm:$0xff]  ;;  %v5701_v22 = vld [vmem:[#allocation15 + $0xe8] sm:$0xff] }
0x170f   :  { %9288 = vmatpush1.bf16.msra.mxu0 %v12146_v26  ;;  %9320 = vmatpush1.bf16.msra.mxu1 %v12149_v40 }
0x1710   :  { %9290 = vmatprep.subr.bf16.mxu0 %v12154_v27  ;;  %9322 = vmatprep.subr.bf16.mxu1 %v12156_v52 }
0x1713   :  { %9292 = vmatpush1.bf16.msra.mxu0 %v12158_v55  ;;  %9324 = vmatpush1.bf16.msra.mxu1 %v12161_v50 }
0x1714   :  { %9294 = vmatprep.subr.bf16.mxu0 %v12166_v13  ;;  %9326 = vmatprep.subr.bf16.mxu1 %v12168_v62 }
0x1717   :  { %9296 = vmatpush1.bf16.msra.mxu0 %v12170_v4  ;;  %9328 = vmatpush1.bf16.msra.mxu1 %v12173_v51 }
0x1718   :  { %9298 = vmatprep.subr.bf16.mxu0 %v12177_v47  ;;  %9330 = vmatprep.subr.bf16.mxu1 %v12179_v6 }
0x171b   :  { %9300 = vmatpush1.bf16.msra.mxu0 %v12182_v42  ;;  %9332 = vmatpush1.bf16.msra.mxu1 %v12186_v39 }
0x171c   :  { %9302 = vmatprep.subr.bf16.mxu0 %v12188_v29  ;;  %9334 = vmatprep.subr.bf16.mxu1 %v12190_v7 }
0x171f   :  { %9304 = vmatpush1.bf16.msra.mxu0 %v12193_v43  ;;  %9336 = vmatpush1.bf16.msra.mxu1 %v12197_v41 }
0x1720   :  { %9306 = vmatprep.subr.bf16.mxu0 %v12202_v9  ;;  %9338 = vmatprep.subr.bf16.mxu1 %v12204_v45 }
0x1723   :  { %9308 = vmatpush1.bf16.msra.mxu0 %v12206_v5  ;;  %9340 = vmatpush1.bf16.msra.mxu1 %v12209_v3  ;;  %v5672_v3 = vld [vmem:[#allocation15] sm:$0xff] }
0x1724   :  { %9342 = vmatprep.subr.bf16.mxu0 %v9341_v54  ;;  %9374 = vmatprep.subr.bf16.mxu1 %v9373_v61  ;;  %v5697_v54 = vld [vmem:[#allocation15 + $0xc8] sm:$0xff]  ;;  %v5699_v61 = vld [vmem:[#allocation15 + $0xd8] sm:$0xff] }
0x17d9   :  { %v5384_v15 = vpop.f32.mrb[44].mxu0  ;;  %v5455_v16 = vpop.f32.mrb[44].mxu1 }
0x17da   :  { %v9993_v26 = vadd.f32 %v5384_v15, %v12270_v20  ;;  %v5386_v40 = vpop.f32.mrb[45].mxu0  ;;  %v5457_v27 = vpop.f32.mrb[45].mxu1  ;;  %v10009_v13 = vadd.f32 %v5455_v16, %v12282_v35  ;;  %v5676_v20 = vld [vmem:[#allocation15 + $0x20] sm:$0xff]  ;;  %v5678_v35 = vld [vmem:[#allocation15 + $0x30] sm:$0xff]  ;;  %v5703_v15 = vld [vmem:[#allocation15 + $0xf8] sm:$0xff] }
0x17db   :  { %v9994_v52 = vadd.f32 %v5386_v40, %v12275_v1  ;;  %v10010_v62 = vadd.f32 %v5457_v27, %v12288_v21  ;;  %v5674_v1 = vld [vmem:[#allocation15 + $0x10] sm:$0xff]  ;;  %v5681_v21 = vld [vmem:[#allocation15 + $0x48] sm:$0xff]  ;;  %v9343_v10 = vpack.c.bf16 %v5676_v20, %v5672_v3  ;;  %v5696_v40 = vld [vmem:[#allocation15 + $0xc0] sm:$0xff] }
0x17dc   :  { %v7576_v55 = vmul.f32 -1.442695, %v9993_v26  ;;  %v7578_v4 = vmul.f32 -1.442695, %v10009_v13  ;;  %v9375_v48 = vpack.c.bf16 %v5678_v35, %v5674_v1  ;;  %v9345_v37 = vpack.c.bf16 %v5685_v19, %v5681_v21  ;;  %v5700_v27 = vld [vmem:[#allocation15 + $0xe0] sm:$0xff]  ;;  %v5702_v13 = vld [vmem:[#allocation15 + $0xf0] sm:$0xff] }
0x17dd   :  { %v7577_v50 = vmul.f32 -1.442695, %v9994_v52  ;;  %v9383_v26 = vpack.c.bf16 %v5694_v31, %v5690_v34  ;;  %v9353_v52 = vpack.c.bf16 %v5701_v22, %v5697_v54  ;;  %v5717_v3 = vld [vmem:[#allocation15 + $0x168] sm:$0xff]  ;;  %v5715_v20 = vld [vmem:[#allocation15 + $0x158] sm:$0xff]  ;;  %v5712_v19 = vld [vmem:[#allocation15 + $0x140] sm:$0xff] }
0x17de   :  { %10536 = vpow2.f32 %v7576_v55  ;;  %v9385_v55 = vpack.c.bf16 %v5703_v15, %v5699_v61  ;;  %v5719_v1 = vld [vmem:[#allocation15 + $0x178] sm:$0xff]  ;;  %v5728_v31 = vld [vmem:[#allocation15 + $0x1c0] sm:$0xff]  ;;  %v5730_v15 = vld [vmem:[#allocation15 + $0x1d0] sm:$0xff] }
0x17df   :  { %10538 = vpow2.f32 %v7577_v50  ;;  %v5698_v50 = vld [vmem:[#allocation15 + $0xd0] sm:$0xff]  ;;  %v5732_v61 = vld [vmem:[#allocation15 + $0x1e0] sm:$0xff] }
0x17e0   :  { %10540 = vtanh.f32 %v10010_v62  ;;  %v5705_v62 = vld [vmem:[#allocation15 + $0x108] sm:$0xff] }
0x17e1   :  { %10542 = vpow2.f32 %v7578_v4  ;;  %v5709_v4 = vld [vmem:[#allocation15 + $0x128] sm:$0xff] }
0x17e8   :  { %v10537_v51 = vpop.eup %10536 }
0x17e9   :  { %v5473_v47 = vadd.f32 1.0, %v10537_v51  ;;  %v10539_v6 = vpop.eup %10538  ;;  %v5707_v51 = vld [vmem:[#allocation15 + $0x118] sm:$0xff] }
0x17ea   :  { %v5474_v42 = vadd.f32 1.0, %v10539_v6  ;;  %v10541_v39 = vpop.eup %10540  ;;  %v9355_v6 = vpack.c.bf16 %v5700_v27, %v5696_v40  ;;  %v6030_v27 = vld [vmem:[#allocation16] sm:$0xff] }
0x17eb   :  { %10544 = vrcp.f32 %v5473_v47  ;;  %v10543_v29 = vpop.eup %10542  ;;  %v5711_v47 = vld [vmem:[#allocation15 + $0x138] sm:$0xff] }
0x17ec   :  { %10546 = vrcp.f32 %v5474_v42  ;;  %v5475_v9 = vadd.f32 1.0, %v10543_v29  ;;  %v9387_v42 = vpack.c.bf16 %v5702_v13, %v5698_v50  ;;  %v5708_v29 = vld [vmem:[#allocation15 + $0x120] sm:$0xff]  ;;  %v6032_v50 = vld [vmem:[#allocation16 + $0x10] sm:$0xff] }
0x17ed   :  { %v6036_v13 = vld [vmem:[#allocation16 + $0x30] sm:$0xff] }
0x17ee   :  { %10548 = vrcp.f32 %v5475_v9  ;;  %v5710_v9 = vld [vmem:[#allocation15 + $0x130] sm:$0xff] }
0x17f5   :  { %v10545_v7 = vpop.eup %10544 }
0x17f6   :  { %v5484_v43 = vmul.f32 %v10545_v7, %v10541_v39  ;;  %v10547_v41 = vpop.eup %10546  ;;  %v5704_v39 = vld [vmem:[#allocation15 + $0x100] sm:$0xff]  ;;  %v9357_v7 = vpack.c.bf16 %v5709_v4, %v5705_v62  ;;  %v6039_v62 = vld [vmem:[#allocation16 + $0x48] sm:$0xff] }
0x17f7   :  { %v5483_v45 = vmul.f32 %v10547_v41, %v12521_v30  ;;  %v5688_v30 = vld [vmem:[#allocation15 + $0x80] sm:$0xff]  ;;  %v5706_v41 = vld [vmem:[#allocation15 + $0x110] sm:$0xff]  ;;  %v9359_v35 = vpack.c.bf16 %v5708_v29, %v5704_v39  ;;  %v6043_v4 = vld [vmem:[#allocation16 + $0x68] sm:$0xff] }
0x17f8   :  { %v10549_v56 = vpop.eup %10548  ;;  %v9351_v16 = vpack.c.bf16 %v5692_v14, %v5688_v30  ;;  %v9391_v21 = vpack.c.bf16 %v5710_v9, %v5706_v41  ;;  %v5733_v30 = vld [vmem:[#allocation15 + $0x1e8] sm:$0xff]  ;;  %v5731_v14 = vld [vmem:[#allocation15 + $0x1d8] sm:$0xff]  ;;  %v6042_v39 = vld [vmem:[#allocation16 + $0x60] sm:$0xff] }
0x17f9   :  { %v12565_v5 = vadd.f32 %v5484_v43, %v5483_v45  ;;  %v9389_v43 = vpack.c.bf16 %v5711_v47, %v5707_v51  ;;  %v5713_v45 = vld [vmem:[#allocation15 + $0x148] sm:$0xff]  ;;  %v6041_v51 = vld [vmem:[#allocation16 + $0x58] sm:$0xff]  ;;  %v12614_v47 = vpack.c.bf16 %v6043_v4, %v6039_v62  ;;  %v6044_v41 = vld [vmem:[#allocation16 + $0x70] sm:$0xff] }
0x17fa   :  { %v9361_v33 = vpack.c.bf16 %v5717_v3, %v5713_v45  ;;  %v6047_v45 = vld [vmem:[#allocation16 + $0x88] sm:$0xff]  ;;  %v6076_v62 = vld [vmem:[#allocation16 + $0x170] sm:$0xff] }
0x17fb   :  { %10550 = vtanh.f32 %v12565_v5  ;;  %v6051_v3 = vld [vmem:[#allocation16 + $0xa8] sm:$0xff] }
0x17fc   :  { %v6079_v4 = vld [vmem:[#allocation16 + $0x188] sm:$0xff] }
0x1805   :  { %v10551_v60 = vpop.eup %10550 }
0x1806   :  { %v12568_v53 = vmul.f32 %v10551_v60, %v10549_v56  ;;  %v9393_v56 = vpack.c.bf16 %v5719_v1, %v5715_v20  ;;  %v5714_v60 = vld [vmem:[#allocation15 + $0x150] sm:$0xff]  ;;  %v6049_v20 = vld [vmem:[#allocation16 + $0x98] sm:$0xff]  ;;  %v12626_v1 = vpack.c.bf16 %v6051_v3, %v6047_v45  ;;  %v6082_v3 = vld [vmem:[#allocation16 + $0x1a0] sm:$0xff] }
0x1808   :  { %5558 = vmatmul.mubr.f32.vlgmr.msra.gmra.mrb[46].mxu0 %v12568_v53  ;;  %5629 = vmatmul.mubr.f32.vlgmr.msra.gmra.mrb[46].mxu1 %v12568_v53 }
0x1809   :  { %9344 = vmatpush1.bf16.msra.mxu0 %v9343_v10  ;;  %9376 = vmatpush1.bf16.msra.mxu1 %v9375_v48  ;;  %v5718_v10 = vld [vmem:[#allocation15 + $0x170] sm:$0xff]  ;;  %v5721_v48 = vld [vmem:[#allocation15 + $0x188] sm:$0xff] }
0x180a   :  { %9346 = vmatprep.subr.bf16.mxu0 %v9345_v37  ;;  %9378 = vmatprep.subr.bf16.mxu1 %v9377_v8  ;;  %v5727_v37 = vld [vmem:[#allocation15 + $0x1b8] sm:$0xff]  ;;  %v9363_v8 = vpack.c.bf16 %v5716_v2, %v5712_v19  ;;  %v9395_v25 = vpack.c.bf16 %v5718_v10, %v5714_v60  ;;  %v9365_v36 = vpack.c.bf16 %v5725_v49, %v5721_v48  ;;  %v6050_v19 = vld [vmem:[#allocation16 + $0xa0] sm:$0xff]  ;;  %v6052_v60 = vld [vmem:[#allocation16 + $0xb0] sm:$0xff] }
0x180b   :  { %5800 = vmatprep.mubr.f32.mxu0 %v10904_v0  ;;  %5913 = vmatprep.mubr.f32.mxu1 %v10904_v0  ;;  %v9397_v28 = vpack.c.bf16 %v5727_v37, %v5723_v17  ;;  %v6055_v48 = vld [vmem:[#allocation16 + $0xc8] sm:$0xff]  ;;  %v6057_v17 = vld [vmem:[#allocation16 + $0xd8] sm:$0xff] }
0x180c   :  { %v6059_v49 = vld [vmem:[#allocation16 + $0xe8] sm:$0xff] }
0x180d   :  { %9348 = vmatpush1.bf16.msra.mxu0 %v9347_v38  ;;  %9380 = vmatpush1.bf16.msra.mxu1 %v9379_v18  ;;  %v5726_v38 = vld [vmem:[#allocation15 + $0x1b0] sm:$0xff]  ;;  %v5729_v18 = vld [vmem:[#allocation15 + $0x1c8] sm:$0xff]  ;;  %v12638_v37 = vpack.c.bf16 %v6059_v49, %v6055_v48  ;;  %v6089_v48 = vld [vmem:[#allocation16 + $0x1d8] sm:$0xff] }
0x180e   :  { %9350 = vmatprep.subr.bf16.mxu0 %v9349_v57  ;;  %9382 = vmatprep.subr.bf16.mxu1 %v9381_v11  ;;  %v5735_v57 = vld [vmem:[#allocation15 + $0x1f8] sm:$0xff]  ;;  %v9367_v11 = vpack.c.bf16 %v5724_v32, %v5720_v24  ;;  %v9399_v34 = vpack.c.bf16 %v5726_v38, %v5722_v58  ;;  %v9369_v54 = vpack.c.bf16 %v5733_v30, %v5729_v18  ;;  %v6058_v24 = vld [vmem:[#allocation16 + $0xe0] sm:$0xff]  ;;  %v6060_v58 = vld [vmem:[#allocation16 + $0xf0] sm:$0xff] }
0x180f   :  { %v9401_v22 = vpack.c.bf16 %v5735_v57, %v5731_v14  ;;  %v6063_v18 = vld [vmem:[#allocation16 + $0x108] sm:$0xff]  ;;  %v6065_v14 = vld [vmem:[#allocation16 + $0x118] sm:$0xff] }
0x1810   :  { %v6067_v30 = vld [vmem:[#allocation16 + $0x128] sm:$0xff] }
0x1811   :  { %9352 = vmatpush1.bf16.msra.mxu0 %v9351_v16  ;;  %9384 = vmatpush1.bf16.msra.mxu1 %v9383_v26  ;;  %v5734_v16 = vld [vmem:[#allocation15 + $0x1f0] sm:$0xff]  ;;  %v9371_v26 = vpack.c.bf16 %v5732_v61, %v5728_v31  ;;  %v12650_v57 = vpack.c.bf16 %v6067_v30, %v6063_v18  ;;  %v6066_v31 = vld [vmem:[#allocation16 + $0x120] sm:$0xff] }
0x1812   :  { %9354 = vmatprep.subr.bf16.mxu0 %v9353_v52  ;;  %9386 = vmatprep.subr.bf16.mxu1 %v9385_v55  ;;  %v9403_v40 = vpack.c.bf16 %v5734_v16, %v5730_v15  ;;  %v6064_v61 = vld [vmem:[#allocation16 + $0x110] sm:$0xff]  ;;  %v6071_v16 = vld [vmem:[#allocation16 + $0x148] sm:$0xff] }
0x1813   :  { %v6068_v15 = vld [vmem:[#allocation16 + $0x130] sm:$0xff] }
0x1814   :  { %v6092_v18 = vld [vmem:[#allocation16 + $0x1f0] sm:$0xff] }
0x1815   :  { %9356 = vmatpush1.bf16.msra.mxu0 %v9355_v6  ;;  %9388 = vmatpush1.bf16.msra.mxu1 %v9387_v42  ;;  %v6045_v6 = vld [vmem:[#allocation16 + $0x78] sm:$0xff]  ;;  %v6038_v42 = vld [vmem:[#allocation16 + $0x40] sm:$0xff] }
0x1816   :  { %9358 = vmatprep.subr.bf16.mxu0 %v9357_v7  ;;  %9390 = vmatprep.subr.bf16.mxu1 %v9389_v43  ;;  %v12616_v29 = vpack.c.bf16 %v6045_v6, %v6041_v51  ;;  %v12618_v7 = vpack.c.bf16 %v6042_v39, %v6038_v42  ;;  %v6040_v43 = vld [vmem:[#allocation16 + $0x50] sm:$0xff]  ;;  %v6083_v51 = vld [vmem:[#allocation16 + $0x1a8] sm:$0xff]  ;;  %v6081_v39 = vld [vmem:[#allocation16 + $0x198] sm:$0xff] }
0x1817   :  { %v12621_v9 = vpack.c.bf16 %v6044_v41, %v6040_v43  ;;  %v12672_v42 = vpack.c.bf16 %v6083_v51, %v6079_v4  ;;  %v6085_v43 = vld [vmem:[#allocation16 + $0x1b8] sm:$0xff]  ;;  %v6078_v41 = vld [vmem:[#allocation16 + $0x180] sm:$0xff] }
0x1818   :  { %v12674_v45 = vpack.c.bf16 %v6085_v43, %v6081_v39 }
0x1819   :  { %9360 = vmatpush1.bf16.msra.mxu0 %v9359_v35  ;;  %9392 = vmatpush1.bf16.msra.mxu1 %v9391_v21  ;;  %v6053_v35 = vld [vmem:[#allocation16 + $0xb8] sm:$0xff]  ;;  %v6046_v21 = vld [vmem:[#allocation16 + $0x80] sm:$0xff] }
0x181a   :  { %9362 = vmatprep.subr.bf16.mxu0 %v9361_v33  ;;  %9394 = vmatprep.subr.bf16.mxu1 %v9393_v56  ;;  %v12628_v2 = vpack.c.bf16 %v6053_v35, %v6049_v20  ;;  %v12630_v33 = vpack.c.bf16 %v6050_v19, %v6046_v21  ;;  %v6048_v56 = vld [vmem:[#allocation16 + $0x90] sm:$0xff]  ;;  %v12677_v21 = vpack.c.bf16 %v6082_v3, %v6078_v41 }
0x181b   :  { %v12633_v10 = vpack.c.bf16 %v6052_v60, %v6048_v56  ;;  %v6080_v20 = vld [vmem:[#allocation16 + $0x190] sm:$0xff]  ;;  %v6087_v56 = vld [vmem:[#allocation16 + $0x1c8] sm:$0xff] }
0x181c   :  { %v6084_v35 = vld [vmem:[#allocation16 + $0x1b0] sm:$0xff]  ;;  %v6091_v60 = vld [vmem:[#allocation16 + $0x1e8] sm:$0xff] }
0x181d   :  { %9364 = vmatpush1.bf16.msra.mxu0 %v9363_v8  ;;  %9396 = vmatpush1.bf16.msra.mxu1 %v9395_v25  ;;  %v6061_v8 = vld [vmem:[#allocation16 + $0xf8] sm:$0xff]  ;;  %v6054_v25 = vld [vmem:[#allocation16 + $0xc0] sm:$0xff]  ;;  %v12681_v19 = vpack.c.bf16 %v6084_v35, %v6080_v20  ;;  %v12686_v49 = vpack.c.bf16 %v6091_v60, %v6087_v56 }
0x181e   :  { %9366 = vmatprep.subr.bf16.mxu0 %v9365_v36  ;;  %9398 = vmatprep.subr.bf16.mxu1 %v9397_v28  ;;  %v12640_v32 = vpack.c.bf16 %v6061_v8, %v6057_v17  ;;  %v12642_v36 = vpack.c.bf16 %v6058_v24, %v6054_v25  ;;  %v6056_v28 = vld [vmem:[#allocation16 + $0xd0] sm:$0xff]  ;;  %v6093_v17 = vld [vmem:[#allocation16 + $0x1f8] sm:$0xff]  ;;  %v6086_v8 = vld [vmem:[#allocation16 + $0x1c0] sm:$0xff] }
0x181f   :  { %v12645_v38 = vpack.c.bf16 %v6060_v58, %v6056_v28  ;;  %v6090_v25 = vld [vmem:[#allocation16 + $0x1e0] sm:$0xff]  ;;  %v12688_v24 = vpack.c.bf16 %v6093_v17, %v6089_v48  ;;  %v6088_v58 = vld [vmem:[#allocation16 + $0x1d0] sm:$0xff] }
0x1820   :  { %v12690_v28 = vpack.c.bf16 %v6090_v25, %v6086_v8  ;;  %v12693_v30 = vpack.c.bf16 %v6092_v18, %v6088_v58 }
0x1821   :  { %9368 = vmatpush1.bf16.msra.mxu0 %v9367_v11  ;;  %9400 = vmatpush1.bf16.msra.mxu1 %v9399_v34  ;;  %v6069_v11 = vld [vmem:[#allocation16 + $0x138] sm:$0xff]  ;;  %v6062_v34 = vld [vmem:[#allocation16 + $0x100] sm:$0xff] }
0x1822   :  { %9370 = vmatprep.subr.bf16.mxu0 %v9369_v54  ;;  %9402 = vmatprep.subr.bf16.mxu1 %v9401_v22  ;;  %v12652_v54 = vpack.c.bf16 %v6069_v11, %v6065_v14  ;;  %v12654_v22 = vpack.c.bf16 %v6066_v31, %v6062_v34  ;;  %v10704_v34 = vld [vmem:[%s13062_s9] sm:$0xff] }
0x1825   :  { %9372 = vmatpush1.bf16.msra.mxu0 %v9371_v26  ;;  %9404 = vmatpush1.bf16.msra.mxu1 %v9403_v40  ;;  %v12657_v26 = vpack.c.bf16 %v6068_v15, %v6064_v61  ;;  %v6075_v40 = vld [vmem:[#allocation16 + $0x168] sm:$0xff] }
0x1828   :  { %5801 = vmatmul.mubr.f32.vlgmr.msra.gmra.mrb[48].mxu0 %v12294_v59  ;;  %5914 = vmatmul.mubr.f32.vlgmr.msra.gmra.mrb[48].mxu1 %v12294_v59  ;;  %v6031_v59 = vld [vmem:[#allocation16 + $0x8] sm:$0xff] }
0x1829   :  { %5806 = vmatprep.mubr.f32.mxu0 %v10904_v0  ;;  %5919 = vmatprep.mubr.f32.mxu1 %v10904_v0 }
0x182c   :  { %5807 = vmatmul.mubr.f32.gmra.mrb[50].mxu0 %v12340_v63  ;;  %5920 = vmatmul.mubr.f32.gmra.mrb[50].mxu1 %v12340_v63  ;;  %v6035_v63 = vld [vmem:[#allocation16 + $0x28] sm:$0xff] }
0x182d   :  { %5812 = vmatprep.mubr.f32.mxu0 %v10904_v0  ;;  %5925 = vmatprep.mubr.f32.mxu1 %v10904_v0 }
0x1830   :  { %5813 = vmatmul.mubr.f32.gmra.mrb[52].mxu0 %v12386_v23  ;;  %5926 = vmatmul.mubr.f32.gmra.mrb[52].mxu1 %v12386_v23  ;;  %v6033_v23 = vld [vmem:[#allocation16 + $0x18] sm:$0xff] }
0x1831   :  { %5818 = vmatprep.mubr.f32.mxu0 %v10904_v0  ;;  %5931 = vmatprep.mubr.f32.mxu1 %v10904_v0 }
0x1834   :  { %5819 = vmatmul.mubr.f32.gmra.mrb[54].mxu0 %v12432_v44  ;;  %5932 = vmatmul.mubr.f32.gmra.mrb[54].mxu1 %v12432_v44  ;;  %v12602_v44 = vpack.c.bf16 %v6035_v63, %v6031_v59  ;;  %v6073_v59 = vld [vmem:[#allocation16 + $0x158] sm:$0xff] }
0x1835   :  { %5824 = vmatprep.mubr.f32.mxu0 %v10904_v0  ;;  %5937 = vmatprep.mubr.f32.mxu1 %v10904_v0  ;;  %v6077_v63 = vld [vmem:[#allocation16 + $0x178] sm:$0xff] }
0x1836   :  { %9406 = vmatprep.subr.bf16.mxu0 %v12602_v44 }
0x1838   :  { %5825 = vmatmul.mubr.f32.gmra.mrb[56].mxu0 %v12478_v46  ;;  %5938 = vmatmul.mubr.f32.gmra.mrb[56].mxu1 %v12478_v46  ;;  %v6037_v46 = vld [vmem:[#allocation16 + $0x38] sm:$0xff] }
0x1839   :  { %5830 = vmatprep.mubr.f32.mxu0 %v10904_v0  ;;  %5943 = vmatprep.mubr.f32.mxu1 %v10904_v0  ;;  %v12604_v52 = vpack.c.bf16 %v6037_v46, %v6033_v23  ;;  %v12661_v23 = vpack.c.bf16 %v6075_v40, %v6071_v16  ;;  %v12663_v46 = vpack.c.bf16 %v6077_v63, %v6073_v59  ;;  %v10705_v16 = vld [vmem:[%s13062_s9 + $0x8] sm:$0xff] }
0x183b   :  { %9438 = vmatprep.subr.bf16.mxu1 %v12604_v52 }
0x183c   :  { %5831 = vmatmul.mubr.f32.gmra.mrb[58].mxu0 %v12524_v12  ;;  %5944 = vmatmul.mubr.f32.gmra.mrb[58].mxu1 %v12524_v12  ;;  %v6034_v12 = vld [vmem:[#allocation16 + $0x20] sm:$0xff] }
0x183d   :  { %5836 = vmatprep.mubr.f32.mxu0 %v10904_v0  ;;  %5949 = vmatprep.mubr.f32.mxu1 %v10904_v0  ;;  %v12606_v55 = vpack.c.bf16 %v6034_v12, %v6030_v27  ;;  %v6070_v27 = vld [vmem:[#allocation16 + $0x140] sm:$0xff] }
0x183e   :  { %v6074_v12 = vld [vmem:[#allocation16 + $0x160] sm:$0xff] }
0x183f   :  { %9408 = vmatpush1.bf16.msra.mxu0 %v12606_v55 }
0x1840   :  { %5837 = vmatmul.mubr.f32.gmra.mrb[60].mxu0 %v12568_v53  ;;  %5950 = vmatmul.mubr.f32.gmra.mrb[60].mxu1 %v12568_v53  ;;  %v12609_v53 = vpack.c.bf16 %v6036_v13, %v6032_v50  ;;  %v6072_v50 = vld [vmem:[#allocation16 + $0x150] sm:$0xff]  ;;  %v12666_v13 = vpack.c.bf16 %v6074_v12, %v6070_v27 }
0x1841   :  { %5842 = vmatprep.mubr.f32.mxu0 %v10904_v0  ;;  %5955 = vmatprep.mubr.f32.mxu1 %v10904_v0  ;;  %v12670_v6 = vpack.c.bf16 %v6076_v62, %v6072_v50  ;;  %v10706_v27 = vld [vmem:[%s13062_s9 + $0x10] sm:$0xff]  ;;  %v10707_v50 = vld [vmem:[%s13062_s9 + $0x18] sm:$0xff] }
0x1842   :  { %9440 = vmatpush1.bf16.msra.mxu1 %v12609_v53  ;;  %9410 = vmatprep.subr.bf16.mxu0 %v12614_v47 }
0x1843   :  { %9442 = vmatprep.subr.bf16.mxu1 %v12616_v29  ;;  %9412 = vmatpush1.bf16.msra.mxu0 %v12618_v7 }
0x1844   :  { %9414 = vmatprep.subr.bf16.mxu0 %v12626_v1 }
0x1846   :  { %9444 = vmatpush1.bf16.msra.mxu1 %v12621_v9 }
0x1847   :  { %9446 = vmatprep.subr.bf16.mxu1 %v12628_v2  ;;  %9416 = vmatpush1.bf16.msra.mxu0 %v12630_v33 }
0x1848   :  { %9418 = vmatprep.subr.bf16.mxu0 %v12638_v37 }
0x184a   :  { %9448 = vmatpush1.bf16.msra.mxu1 %v12633_v10 }
0x184b   :  { %9450 = vmatprep.subr.bf16.mxu1 %v12640_v32  ;;  %9420 = vmatpush1.bf16.msra.mxu0 %v12642_v36 }
0x184c   :  { %9422 = vmatprep.subr.bf16.mxu0 %v12650_v57 }
0x184e   :  { %9452 = vmatpush1.bf16.msra.mxu1 %v12645_v38 }
0x184f   :  { %9454 = vmatprep.subr.bf16.mxu1 %v12652_v54  ;;  %9424 = vmatpush1.bf16.msra.mxu0 %v12654_v22 }
0x1850   :  { %9426 = vmatprep.subr.bf16.mxu0 %v12661_v23 }
0x1852   :  { %9456 = vmatpush1.bf16.msra.mxu1 %v12657_v26 }
0x1853   :  { %9458 = vmatprep.subr.bf16.mxu1 %v12663_v46  ;;  %9428 = vmatpush1.bf16.msra.mxu0 %v12666_v13 }
0x1854   :  { %9430 = vmatprep.subr.bf16.mxu0 %v12672_v42 }
0x1856   :  { %9460 = vmatpush1.bf16.msra.mxu1 %v12670_v6 }
0x1857   :  { %9462 = vmatprep.subr.bf16.mxu1 %v12674_v45  ;;  %9432 = vmatpush1.bf16.msra.mxu0 %v12677_v21 }
0x1858   :  { %9434 = vmatprep.subr.bf16.mxu0 %v12686_v49 }
0x185a   :  { %9464 = vmatpush1.bf16.msra.mxu1 %v12681_v19 }
0x185b   :  { %9466 = vmatprep.subr.bf16.mxu1 %v12688_v24  ;;  %9436 = vmatpush1.bf16.msra.mxu0 %v12690_v28 }
0x185c   :  { %9470 = vmatprep.subr.bf16.mxu0 %v12602_v44 }
0x185e   :  { %9468 = vmatpush1.bf16.msra.mxu1 %v12693_v30 }
0x185f   :  { %9502 = vmatprep.subr.bf16.mxu1 %v12604_v52 }
0x18db   :  { %v5559_v14 = vpop.f32.mrb[46].mxu0  ;;  %v5630_v11 = vpop.f32.mrb[46].mxu1 }
0x18dc   :  { %v9995_v31 = vadd.f32 %v10704_v34, %v5559_v14  ;;  %v5561_v61 = vpop.f32.mrb[47].mxu0  ;;  %v5632_v15 = vpop.f32.mrb[47].mxu1  ;;  %v10011_v12 = vadd.f32 %v10706_v27, %v5630_v11  ;;  %v12759_v14 = vld [vmem:[%s13065_s12 + $0x8] sm:$0xff] }
0x18dd   :  { %v9996_v40 = vadd.f32 %v10705_v16, %v5561_v61  ;;  %v10012_v62 = vadd.f32 %v10707_v50, %v5632_v15 }
0x18de   :  { %v7579_v59 = vmul.f32 -1.442695, %v9995_v31  ;;  %v7581_v4 = vmul.f32 -1.442695, %v10011_v12  ;;  %v12772_v12 = vld [vmem:[%s13065_s12 + $0x18] sm:$0xff] }
0x18df   :  { %v7580_v63 = vmul.f32 -1.442695, %v9996_v40 }
0x18e0   :  { %10552 = vpow2.f32 %v7579_v59 }
0x18e1   :  { %10554 = vpow2.f32 %v7580_v63  ;;  %v12766_v63 = vld [vmem:[%s13065_s12 + $0x10] sm:$0xff] }
0x18e2   :  { %10556 = vtanh.f32 %v10012_v62 }
0x18e3   :  { %10558 = vpow2.f32 %v7581_v4 }
0x18ea   :  { %v10553_v51 = vpop.eup %10552 }
0x18eb   :  { %v5648_v39 = vadd.f32 1.0, %v10553_v51  ;;  %v10555_v43 = vpop.eup %10554 }
0x18ec   :  { %v5649_v41 = vadd.f32 1.0, %v10555_v43  ;;  %v10557_v3 = vpop.eup %10556 }
0x18ed   :  { %10560 = vrcp.f32 %v5648_v39  ;;  %v10559_v20 = vpop.eup %10558 }
0x18ee   :  { %10562 = vrcp.f32 %v5649_v41  ;;  %v5650_v48 = vadd.f32 1.0, %v10559_v20 }
0x18f0   :  { %10564 = vrcp.f32 %v5650_v48 }
0x18f7   :  { %v10561_v35 = vpop.eup %10560 }
0x18f8   :  { %v5659_v56 = vmul.f32 %v10561_v35, %v10557_v3  ;;  %v10563_v60 = vpop.eup %10562 }
0x18f9   :  { %v5658_v17 = vmul.f32 %v10563_v60, %v12565_v5  ;;  %v12754_v5 = vld [vmem:[%s13065_s12] sm:$0xff] }
0x18fa   :  { %v10565_v25 = vpop.eup %10564 }
0x18fb   :  { %v5660_v8 = vadd.f32 %v5659_v56, %v5658_v17 }
0x18fd   :  { %10566 = vtanh.f32 %v5660_v8 }
0x1907   :  { %v10567_v58 = vpop.eup %10566 }
0x1908   :  { %v5662_v18 = vmul.f32 %v10567_v58, %v10565_v25 }
0x190a   :  { %5843 = vmatmul.mubr.f32.gmra.mrb[62].mxu0 %v5662_v18  ;;  %5956 = vmatmul.mubr.f32.gmra.mrb[62].mxu1 %v5662_v18 }
0x190b   :  { %6162 = vmatprep.mubr.f32.mxu0 %v10904_v0  ;;  %6233 = vmatprep.mubr.f32.mxu1 %v10904_v0 }
0x190e   :  { %6163 = vmatmul.mubr.f32.vlgmr.msra.gmra.mrb[48].mxu0 %v10904_v0  ;;  %6234 = vmatmul.mubr.f32.vlgmr.msra.gmra.mrb[48].mxu1 %v10904_v0 }
0x190f   :  { %9472 = vmatpush1.bf16.msra.mxu0 %v12606_v55  ;;  %9504 = vmatpush1.bf16.msra.mxu1 %v12609_v53 }
0x1910   :  { %9474 = vmatprep.subr.bf16.mxu0 %v12614_v47  ;;  %9506 = vmatprep.subr.bf16.mxu1 %v12616_v29 }
0x1911   :  { %6337 = vmatprep.mubr.f32.mxu0 %v10904_v0  ;;  %6408 = vmatprep.mubr.f32.mxu1 %v10904_v0 }
0x1913   :  { %9476 = vmatpush1.bf16.msra.mxu0 %v12618_v7  ;;  %9508 = vmatpush1.bf16.msra.mxu1 %v12621_v9 }
0x1914   :  { %9478 = vmatprep.subr.bf16.mxu0 %v12626_v1  ;;  %9510 = vmatprep.subr.bf16.mxu1 %v12628_v2 }
0x1917   :  { %9480 = vmatpush1.bf16.msra.mxu0 %v12630_v33  ;;  %9512 = vmatpush1.bf16.msra.mxu1 %v12633_v10 }
0x1918   :  { %9482 = vmatprep.subr.bf16.mxu0 %v12638_v37  ;;  %9514 = vmatprep.subr.bf16.mxu1 %v12640_v32 }
0x191b   :  { %9484 = vmatpush1.bf16.msra.mxu0 %v12642_v36  ;;  %9516 = vmatpush1.bf16.msra.mxu1 %v12645_v38 }
0x191c   :  { %9486 = vmatprep.subr.bf16.mxu0 %v12650_v57  ;;  %9518 = vmatprep.subr.bf16.mxu1 %v12652_v54 }
0x191f   :  { %9488 = vmatpush1.bf16.msra.mxu0 %v12654_v22  ;;  %9520 = vmatpush1.bf16.msra.mxu1 %v12657_v26 }
0x1920   :  { %9490 = vmatprep.subr.bf16.mxu0 %v12661_v23  ;;  %9522 = vmatprep.subr.bf16.mxu1 %v12663_v46 }
0x1923   :  { %9492 = vmatpush1.bf16.msra.mxu0 %v12666_v13  ;;  %9524 = vmatpush1.bf16.msra.mxu1 %v12670_v6 }
0x1924   :  { %9494 = vmatprep.subr.bf16.mxu0 %v12672_v42  ;;  %9526 = vmatprep.subr.bf16.mxu1 %v12674_v45 }
0x1927   :  { %9496 = vmatpush1.bf16.msra.mxu0 %v12677_v21  ;;  %9528 = vmatpush1.bf16.msra.mxu1 %v12681_v19 }
0x1928   :  { %9498 = vmatprep.subr.bf16.mxu0 %v12686_v49  ;;  %9530 = vmatprep.subr.bf16.mxu1 %v12688_v24 }
0x192b   :  { %9500 = vmatpush1.bf16.msra.mxu0 %v12690_v28  ;;  %9532 = vmatpush1.bf16.msra.mxu1 %v12693_v30 }
0x192c   :  { %9534 = vmatprep.subr.bf16.mxu0 %v12602_v44  ;;  %9566 = vmatprep.subr.bf16.mxu1 %v12604_v52 }
0x19e1   :  { %v6164_v11 = vpop.f32.mrb[48].mxu0  ;;  %v6235_v34 = vpop.f32.mrb[48].mxu1 }
0x19e2   :  { %v10013_v31 = vadd.f32 %v6164_v11, %v12754_v5  ;;  %v6166_v61 = vpop.f32.mrb[49].mxu0  ;;  %v6237_v15 = vpop.f32.mrb[49].mxu1  ;;  %v10029_v27 = vadd.f32 %v6235_v34, %v12766_v63 }
0x19e3   :  { %v10014_v16 = vadd.f32 %v6166_v61, %v12759_v14  ;;  %v10030_v50 = vadd.f32 %v6237_v15, %v12772_v12 }
0x19e4   :  { %v7582_v40 = vmul.f32 -1.442695, %v10013_v31  ;;  %v7584_v62 = vmul.f32 -1.442695, %v10029_v27 }
0x19e5   :  { %v7583_v59 = vmul.f32 -1.442695, %v10014_v16 }
0x19e6   :  { %10568 = vpow2.f32 %v7582_v40 }
0x19e7   :  { %10570 = vpow2.f32 %v7583_v59 }
0x19e8   :  { %10572 = vtanh.f32 %v10030_v50 }
0x19e9   :  { %10574 = vpow2.f32 %v7584_v62 }
0x19f0   :  { %v10569_v4 = vpop.eup %10568 }
0x19f1   :  { %v6253_v51 = vadd.f32 1.0, %v10569_v4  ;;  %v10571_v39 = vpop.eup %10570 }
0x19f2   :  { %v6254_v43 = vadd.f32 1.0, %v10571_v39  ;;  %v10573_v41 = vpop.eup %10572 }
0x19f3   :  { %10576 = vrcp.f32 %v6253_v51  ;;  %v10575_v3 = vpop.eup %10574 }
0x19f4   :  { %10578 = vrcp.f32 %v6254_v43  ;;  %v6255_v60 = vadd.f32 1.0, %v10575_v3 }
0x19f6   :  { %10580 = vrcp.f32 %v6255_v60 }
0x19fd   :  { %v10577_v20 = vpop.eup %10576 }
0x19fe   :  { %v6264_v35 = vmul.f32 %v10577_v20, %v10573_v41  ;;  %v10579_v56 = vpop.eup %10578 }
0x19ff   :  { %v6263_v48 = vmul.f32 0.0, %v10579_v56 }
0x1a00   :  { %v10581_v8 = vpop.eup %10580 }
0x1a01   :  { %v12775_v17 = vadd.f32 %v6264_v35, %v6263_v48 }
0x1a03   :  { %10582 = vtanh.f32 %v12775_v17 }
0x1a0d   :  { %v10583_v25 = vpop.eup %10582 }
0x1a0e   :  { %v6267_v58 = vmul.f32 %v10583_v25, %v10581_v8 }
0x1a10   :  { %6268 = vst [vmem:[%s13066_s13] sm:$0xff] %v6267_v58  ;;  %6338 = vmatmul.mubr.f32.vlgmr.msra.gmra.mrb[50].mxu0 %v6267_v58  ;;  %6409 = vmatmul.mubr.f32.vlgmr.msra.gmra.mrb[50].mxu1 %v6267_v58 }
0x1a11   :  { %9536 = vmatpush1.bf16.msra.mxu0 %v12606_v55  ;;  %9568 = vmatpush1.bf16.msra.mxu1 %v12609_v53 }
0x1a12   :  { %9538 = vmatprep.subr.bf16.mxu0 %v12614_v47  ;;  %9570 = vmatprep.subr.bf16.mxu1 %v12616_v29 }
0x1a13   :  { %6513 = vmatprep.mubr.f32.mxu0 %v10904_v0  ;;  %6584 = vmatprep.mubr.f32.mxu1 %v10904_v0 }
0x1a15   :  { %9540 = vmatpush1.bf16.msra.mxu0 %v12618_v7  ;;  %9572 = vmatpush1.bf16.msra.mxu1 %v12621_v9 }
0x1a16   :  { %9542 = vmatprep.subr.bf16.mxu0 %v12626_v1  ;;  %9574 = vmatprep.subr.bf16.mxu1 %v12628_v2 }
0x1a19   :  { %9544 = vmatpush1.bf16.msra.mxu0 %v12630_v33  ;;  %9576 = vmatpush1.bf16.msra.mxu1 %v12633_v10 }
0x1a1a   :  { %9546 = vmatprep.subr.bf16.mxu0 %v12638_v37  ;;  %9578 = vmatprep.subr.bf16.mxu1 %v12640_v32 }
0x1a1d   :  { %9548 = vmatpush1.bf16.msra.mxu0 %v12642_v36  ;;  %9580 = vmatpush1.bf16.msra.mxu1 %v12645_v38 }
0x1a1e   :  { %9550 = vmatprep.subr.bf16.mxu0 %v12650_v57  ;;  %9582 = vmatprep.subr.bf16.mxu1 %v12652_v54 }
0x1a21   :  { %9552 = vmatpush1.bf16.msra.mxu0 %v12654_v22  ;;  %9584 = vmatpush1.bf16.msra.mxu1 %v12657_v26 }
0x1a22   :  { %9554 = vmatprep.subr.bf16.mxu0 %v12661_v23  ;;  %9586 = vmatprep.subr.bf16.mxu1 %v12663_v46 }
0x1a25   :  { %9556 = vmatpush1.bf16.msra.mxu0 %v12666_v13  ;;  %9588 = vmatpush1.bf16.msra.mxu1 %v12670_v6 }
0x1a26   :  { %9558 = vmatprep.subr.bf16.mxu0 %v12672_v42  ;;  %9590 = vmatprep.subr.bf16.mxu1 %v12674_v45 }
0x1a29   :  { %9560 = vmatpush1.bf16.msra.mxu0 %v12677_v21  ;;  %9592 = vmatpush1.bf16.msra.mxu1 %v12681_v19 }
0x1a2a   :  { %9562 = vmatprep.subr.bf16.mxu0 %v12686_v49  ;;  %9594 = vmatprep.subr.bf16.mxu1 %v12688_v24 }
0x1a2d   :  { %9564 = vmatpush1.bf16.msra.mxu0 %v12690_v28  ;;  %9596 = vmatpush1.bf16.msra.mxu1 %v12693_v30 }
0x1a2e   :  { %9598 = vmatprep.subr.bf16.mxu0 %v12602_v44  ;;  %9630 = vmatprep.subr.bf16.mxu1 %v12604_v52 }
0x1ae3   :  { %v6339_v18 = vpop.f32.mrb[50].mxu0  ;;  %v6410_v11 = vpop.f32.mrb[50].mxu1 }
0x1ae4   :  { %v10015_v34 = vadd.f32 %v6339_v18, %v12754_v5  ;;  %v6341_v31 = vpop.f32.mrb[51].mxu0  ;;  %v6412_v61 = vpop.f32.mrb[51].mxu1  ;;  %v10031_v59 = vadd.f32 %v6410_v11, %v12766_v63 }
0x1ae5   :  { %v10016_v15 = vadd.f32 %v6341_v31, %v12759_v14  ;;  %v10032_v27 = vadd.f32 %v6412_v61, %v12772_v12 }
0x1ae6   :  { %v7585_v16 = vmul.f32 -1.442695, %v10015_v34  ;;  %v7587_v50 = vmul.f32 -1.442695, %v10031_v59 }
0x1ae7   :  { %v7586_v40 = vmul.f32 -1.442695, %v10016_v15 }
0x1ae8   :  { %10584 = vpow2.f32 %v7585_v16 }
0x1ae9   :  { %10586 = vpow2.f32 %v7586_v40 }
0x1aea   :  { %10588 = vtanh.f32 %v10032_v27 }
0x1aeb   :  { %10590 = vpow2.f32 %v7587_v50 }
0x1af2   :  { %v10585_v62 = vpop.eup %10584 }
0x1af3   :  { %v6428_v4 = vadd.f32 1.0, %v10585_v62  ;;  %v10587_v51 = vpop.eup %10586 }
0x1af4   :  { %v6429_v39 = vadd.f32 1.0, %v10587_v51  ;;  %v10589_v43 = vpop.eup %10588 }
0x1af5   :  { %10592 = vrcp.f32 %v6428_v4  ;;  %v10591_v41 = vpop.eup %10590 }
0x1af6   :  { %10594 = vrcp.f32 %v6429_v39  ;;  %v6430_v56 = vadd.f32 1.0, %v10591_v41 }
0x1af8   :  { %10596 = vrcp.f32 %v6430_v56 }
0x1aff   :  { %v10593_v3 = vpop.eup %10592 }
0x1b00   :  { %v6439_v20 = vmul.f32 %v10593_v3, %v10589_v43  ;;  %v10595_v35 = vpop.eup %10594 }
0x1b01   :  { %v6438_v60 = vmul.f32 %v10595_v35, %v12775_v17 }
0x1b02   :  { %v10597_v8 = vpop.eup %10596 }
0x1b03   :  { %v12820_v48 = vadd.f32 %v6439_v20, %v6438_v60 }
0x1b05   :  { %10598 = vtanh.f32 %v12820_v48 }
0x1b0f   :  { %v10599_v25 = vpop.eup %10598 }
0x1b10   :  { %v6442_v58 = vmul.f32 %v10599_v25, %v10597_v8 }
0x1b12   :  { %7588 = vst [vmem:[%s13066_s13 + $0x8] sm:$0xff] %v6442_v58  ;;  %6514 = vmatmul.mubr.f32.vlgmr.msra.gmra.mrb[52].mxu0 %v6442_v58  ;;  %6585 = vmatmul.mubr.f32.vlgmr.msra.gmra.mrb[52].mxu1 %v6442_v58 }
0x1b13   :  { %9600 = vmatpush1.bf16.msra.mxu0 %v12606_v55  ;;  %9632 = vmatpush1.bf16.msra.mxu1 %v12609_v53 }
0x1b14   :  { %9602 = vmatprep.subr.bf16.mxu0 %v12614_v47  ;;  %9634 = vmatprep.subr.bf16.mxu1 %v12616_v29 }
0x1b15   :  { %6689 = vmatprep.mubr.f32.mxu0 %v10904_v0  ;;  %6760 = vmatprep.mubr.f32.mxu1 %v10904_v0 }
0x1b17   :  { %9604 = vmatpush1.bf16.msra.mxu0 %v12618_v7  ;;  %9636 = vmatpush1.bf16.msra.mxu1 %v12621_v9 }
0x1b18   :  { %9606 = vmatprep.subr.bf16.mxu0 %v12626_v1  ;;  %9638 = vmatprep.subr.bf16.mxu1 %v12628_v2 }
0x1b1b   :  { %9608 = vmatpush1.bf16.msra.mxu0 %v12630_v33  ;;  %9640 = vmatpush1.bf16.msra.mxu1 %v12633_v10 }
0x1b1c   :  { %9610 = vmatprep.subr.bf16.mxu0 %v12638_v37  ;;  %9642 = vmatprep.subr.bf16.mxu1 %v12640_v32 }
0x1b1f   :  { %9612 = vmatpush1.bf16.msra.mxu0 %v12642_v36  ;;  %9644 = vmatpush1.bf16.msra.mxu1 %v12645_v38 }
0x1b20   :  { %9614 = vmatprep.subr.bf16.mxu0 %v12650_v57  ;;  %9646 = vmatprep.subr.bf16.mxu1 %v12652_v54 }
0x1b23   :  { %9616 = vmatpush1.bf16.msra.mxu0 %v12654_v22  ;;  %9648 = vmatpush1.bf16.msra.mxu1 %v12657_v26 }
0x1b24   :  { %9618 = vmatprep.subr.bf16.mxu0 %v12661_v23  ;;  %9650 = vmatprep.subr.bf16.mxu1 %v12663_v46 }
0x1b27   :  { %9620 = vmatpush1.bf16.msra.mxu0 %v12666_v13  ;;  %9652 = vmatpush1.bf16.msra.mxu1 %v12670_v6 }
0x1b28   :  { %9622 = vmatprep.subr.bf16.mxu0 %v12672_v42  ;;  %9654 = vmatprep.subr.bf16.mxu1 %v12674_v45 }
0x1b2b   :  { %9624 = vmatpush1.bf16.msra.mxu0 %v12677_v21  ;;  %9656 = vmatpush1.bf16.msra.mxu1 %v12681_v19 }
0x1b2c   :  { %9626 = vmatprep.subr.bf16.mxu0 %v12686_v49  ;;  %9658 = vmatprep.subr.bf16.mxu1 %v12688_v24 }
0x1b2f   :  { %9628 = vmatpush1.bf16.msra.mxu0 %v12690_v28  ;;  %9660 = vmatpush1.bf16.msra.mxu1 %v12693_v30 }
0x1b30   :  { %9662 = vmatprep.subr.bf16.mxu0 %v12602_v44  ;;  %9694 = vmatprep.subr.bf16.mxu1 %v12604_v52 }
0x1be5   :  { %v6515_v17 = vpop.f32.mrb[52].mxu0  ;;  %v6586_v18 = vpop.f32.mrb[52].mxu1 }
0x1be6   :  { %v10017_v11 = vadd.f32 %v6515_v17, %v12754_v5  ;;  %v6517_v34 = vpop.f32.mrb[53].mxu0  ;;  %v6588_v31 = vpop.f32.mrb[53].mxu1  ;;  %v10033_v40 = vadd.f32 %v6586_v18, %v12766_v63 }
0x1be7   :  { %v10018_v61 = vadd.f32 %v6517_v34, %v12759_v14  ;;  %v10034_v59 = vadd.f32 %v6588_v31, %v12772_v12 }
0x1be8   :  { %v7589_v15 = vmul.f32 -1.442695, %v10017_v11  ;;  %v7591_v27 = vmul.f32 -1.442695, %v10033_v40 }
0x1be9   :  { %v7590_v16 = vmul.f32 -1.442695, %v10018_v61 }
0x1bea   :  { %10600 = vpow2.f32 %v7589_v15 }
0x1beb   :  { %10602 = vpow2.f32 %v7590_v16 }
0x1bec   :  { %10604 = vtanh.f32 %v10034_v59 }
0x1bed   :  { %10606 = vpow2.f32 %v7591_v27 }
0x1bf4   :  { %v10601_v50 = vpop.eup %10600 }
0x1bf5   :  { %v6604_v62 = vadd.f32 1.0, %v10601_v50  ;;  %v10603_v4 = vpop.eup %10602 }
0x1bf6   :  { %v6605_v51 = vadd.f32 1.0, %v10603_v4  ;;  %v10605_v39 = vpop.eup %10604 }
0x1bf7   :  { %10608 = vrcp.f32 %v6604_v62  ;;  %v10607_v43 = vpop.eup %10606 }
0x1bf8   :  { %10610 = vrcp.f32 %v6605_v51  ;;  %v6606_v35 = vadd.f32 1.0, %v10607_v43 }
0x1bfa   :  { %10612 = vrcp.f32 %v6606_v35 }
0x1c01   :  { %v10609_v41 = vpop.eup %10608 }
0x1c02   :  { %v6615_v3 = vmul.f32 %v10609_v41, %v10605_v39  ;;  %v10611_v20 = vpop.eup %10610 }
0x1c03   :  { %v6614_v56 = vmul.f32 %v10611_v20, %v12820_v48 }
0x1c04   :  { %v10613_v8 = vpop.eup %10612 }
0x1c05   :  { %v12865_v60 = vadd.f32 %v6615_v3, %v6614_v56 }
0x1c07   :  { %10614 = vtanh.f32 %v12865_v60 }
0x1c11   :  { %v10615_v25 = vpop.eup %10614 }
0x1c12   :  { %v6618_v58 = vmul.f32 %v10615_v25, %v10613_v8 }
0x1c14   :  { %7592 = vst [vmem:[%s13066_s13 + $0x10] sm:$0xff] %v6618_v58  ;;  %6690 = vmatmul.mubr.f32.vlgmr.msra.gmra.mrb[54].mxu0 %v6618_v58  ;;  %6761 = vmatmul.mubr.f32.vlgmr.msra.gmra.mrb[54].mxu1 %v6618_v58 }
0x1c15   :  { %9664 = vmatpush1.bf16.msra.mxu0 %v12606_v55  ;;  %9696 = vmatpush1.bf16.msra.mxu1 %v12609_v53 }
0x1c16   :  { %9666 = vmatprep.subr.bf16.mxu0 %v12614_v47  ;;  %9698 = vmatprep.subr.bf16.mxu1 %v12616_v29 }
0x1c17   :  { %6865 = vmatprep.mubr.f32.mxu0 %v10904_v0  ;;  %6936 = vmatprep.mubr.f32.mxu1 %v10904_v0 }
0x1c19   :  { %9668 = vmatpush1.bf16.msra.mxu0 %v12618_v7  ;;  %9700 = vmatpush1.bf16.msra.mxu1 %v12621_v9 }
0x1c1a   :  { %9670 = vmatprep.subr.bf16.mxu0 %v12626_v1  ;;  %9702 = vmatprep.subr.bf16.mxu1 %v12628_v2 }
0x1c1d   :  { %9672 = vmatpush1.bf16.msra.mxu0 %v12630_v33  ;;  %9704 = vmatpush1.bf16.msra.mxu1 %v12633_v10 }
0x1c1e   :  { %9674 = vmatprep.subr.bf16.mxu0 %v12638_v37  ;;  %9706 = vmatprep.subr.bf16.mxu1 %v12640_v32 }
0x1c21   :  { %9676 = vmatpush1.bf16.msra.mxu0 %v12642_v36  ;;  %9708 = vmatpush1.bf16.msra.mxu1 %v12645_v38 }
0x1c22   :  { %9678 = vmatprep.subr.bf16.mxu0 %v12650_v57  ;;  %9710 = vmatprep.subr.bf16.mxu1 %v12652_v54 }
0x1c25   :  { %9680 = vmatpush1.bf16.msra.mxu0 %v12654_v22  ;;  %9712 = vmatpush1.bf16.msra.mxu1 %v12657_v26 }
0x1c26   :  { %9682 = vmatprep.subr.bf16.mxu0 %v12661_v23  ;;  %9714 = vmatprep.subr.bf16.mxu1 %v12663_v46 }
0x1c29   :  { %9684 = vmatpush1.bf16.msra.mxu0 %v12666_v13  ;;  %9716 = vmatpush1.bf16.msra.mxu1 %v12670_v6 }
0x1c2a   :  { %9686 = vmatprep.subr.bf16.mxu0 %v12672_v42  ;;  %9718 = vmatprep.subr.bf16.mxu1 %v12674_v45 }
0x1c2d   :  { %9688 = vmatpush1.bf16.msra.mxu0 %v12677_v21  ;;  %9720 = vmatpush1.bf16.msra.mxu1 %v12681_v19 }
0x1c2e   :  { %9690 = vmatprep.subr.bf16.mxu0 %v12686_v49  ;;  %9722 = vmatprep.subr.bf16.mxu1 %v12688_v24 }
0x1c31   :  { %9692 = vmatpush1.bf16.msra.mxu0 %v12690_v28  ;;  %9724 = vmatpush1.bf16.msra.mxu1 %v12693_v30 }
0x1c32   :  { %9726 = vmatprep.subr.bf16.mxu0 %v12602_v44  ;;  %9758 = vmatprep.subr.bf16.mxu1 %v12604_v52 }
0x1ce7   :  { %v6691_v48 = vpop.f32.mrb[54].mxu0  ;;  %v6762_v17 = vpop.f32.mrb[54].mxu1 }
0x1ce8   :  { %v10019_v18 = vadd.f32 %v6691_v48, %v12754_v5  ;;  %v6693_v11 = vpop.f32.mrb[55].mxu0  ;;  %v6764_v34 = vpop.f32.mrb[55].mxu1  ;;  %v10035_v16 = vadd.f32 %v6762_v17, %v12766_v63 }
0x1ce9   :  { %v10020_v31 = vadd.f32 %v6693_v11, %v12759_v14  ;;  %v10036_v40 = vadd.f32 %v6764_v34, %v12772_v12 }
0x1cea   :  { %v7593_v61 = vmul.f32 -1.442695, %v10019_v18  ;;  %v7595_v59 = vmul.f32 -1.442695, %v10035_v16 }
0x1ceb   :  { %v7594_v15 = vmul.f32 -1.442695, %v10020_v31 }
0x1cec   :  { %10616 = vpow2.f32 %v7593_v61 }
0x1ced   :  { %10618 = vpow2.f32 %v7594_v15 }
0x1cee   :  { %10620 = vtanh.f32 %v10036_v40 }
0x1cef   :  { %10622 = vpow2.f32 %v7595_v59 }
0x1cf6   :  { %v10617_v27 = vpop.eup %10616 }
0x1cf7   :  { %v6780_v50 = vadd.f32 1.0, %v10617_v27  ;;  %v10619_v62 = vpop.eup %10618 }
0x1cf8   :  { %v6781_v4 = vadd.f32 1.0, %v10619_v62  ;;  %v10621_v51 = vpop.eup %10620 }
0x1cf9   :  { %10624 = vrcp.f32 %v6780_v50  ;;  %v10623_v39 = vpop.eup %10622 }
0x1cfa   :  { %10626 = vrcp.f32 %v6781_v4  ;;  %v6782_v20 = vadd.f32 1.0, %v10623_v39 }
0x1cfc   :  { %10628 = vrcp.f32 %v6782_v20 }
0x1d03   :  { %v10625_v43 = vpop.eup %10624 }
0x1d04   :  { %v6791_v41 = vmul.f32 %v10625_v43, %v10621_v51  ;;  %v10627_v3 = vpop.eup %10626 }
0x1d05   :  { %v6790_v35 = vmul.f32 %v10627_v3, %v12865_v60 }
0x1d06   :  { %v10629_v8 = vpop.eup %10628 }
0x1d07   :  { %v12910_v56 = vadd.f32 %v6791_v41, %v6790_v35 }
0x1d09   :  { %10630 = vtanh.f32 %v12910_v56 }
0x1d13   :  { %v10631_v25 = vpop.eup %10630 }
0x1d14   :  { %v6794_v58 = vmul.f32 %v10631_v25, %v10629_v8 }
0x1d16   :  { %7596 = vst [vmem:[%s13066_s13 + $0x18] sm:$0xff] %v6794_v58  ;;  %6866 = vmatmul.mubr.f32.vlgmr.msra.gmra.mrb[56].mxu0 %v6794_v58  ;;  %6937 = vmatmul.mubr.f32.vlgmr.msra.gmra.mrb[56].mxu1 %v6794_v58 }
0x1d17   :  { %9728 = vmatpush1.bf16.msra.mxu0 %v12606_v55  ;;  %9760 = vmatpush1.bf16.msra.mxu1 %v12609_v53 }
0x1d18   :  { %9730 = vmatprep.subr.bf16.mxu0 %v12614_v47  ;;  %9762 = vmatprep.subr.bf16.mxu1 %v12616_v29 }
0x1d19   :  { %7041 = vmatprep.mubr.f32.mxu0 %v10904_v0  ;;  %7112 = vmatprep.mubr.f32.mxu1 %v10904_v0 }
0x1d1b   :  { %9732 = vmatpush1.bf16.msra.mxu0 %v12618_v7  ;;  %9764 = vmatpush1.bf16.msra.mxu1 %v12621_v9 }
0x1d1c   :  { %9734 = vmatprep.subr.bf16.mxu0 %v12626_v1  ;;  %9766 = vmatprep.subr.bf16.mxu1 %v12628_v2 }
0x1d1f   :  { %9736 = vmatpush1.bf16.msra.mxu0 %v12630_v33  ;;  %9768 = vmatpush1.bf16.msra.mxu1 %v12633_v10 }
0x1d20   :  { %9738 = vmatprep.subr.bf16.mxu0 %v12638_v37  ;;  %9770 = vmatprep.subr.bf16.mxu1 %v12640_v32 }
0x1d23   :  { %9740 = vmatpush1.bf16.msra.mxu0 %v12642_v36  ;;  %9772 = vmatpush1.bf16.msra.mxu1 %v12645_v38 }
0x1d24   :  { %9742 = vmatprep.subr.bf16.mxu0 %v12650_v57  ;;  %9774 = vmatprep.subr.bf16.mxu1 %v12652_v54 }
0x1d27   :  { %9744 = vmatpush1.bf16.msra.mxu0 %v12654_v22  ;;  %9776 = vmatpush1.bf16.msra.mxu1 %v12657_v26 }
0x1d28   :  { %9746 = vmatprep.subr.bf16.mxu0 %v12661_v23  ;;  %9778 = vmatprep.subr.bf16.mxu1 %v12663_v46 }
0x1d2b   :  { %9748 = vmatpush1.bf16.msra.mxu0 %v12666_v13  ;;  %9780 = vmatpush1.bf16.msra.mxu1 %v12670_v6 }
0x1d2c   :  { %9750 = vmatprep.subr.bf16.mxu0 %v12672_v42  ;;  %9782 = vmatprep.subr.bf16.mxu1 %v12674_v45 }
0x1d2f   :  { %9752 = vmatpush1.bf16.msra.mxu0 %v12677_v21  ;;  %9784 = vmatpush1.bf16.msra.mxu1 %v12681_v19 }
0x1d30   :  { %9754 = vmatprep.subr.bf16.mxu0 %v12686_v49  ;;  %9786 = vmatprep.subr.bf16.mxu1 %v12688_v24 }
0x1d33   :  { %9756 = vmatpush1.bf16.msra.mxu0 %v12690_v28  ;;  %9788 = vmatpush1.bf16.msra.mxu1 %v12693_v30 }
0x1d34   :  { %9790 = vmatprep.subr.bf16.mxu0 %v12602_v44  ;;  %9822 = vmatprep.subr.bf16.mxu1 %v12604_v52 }
0x1de9   :  { %v6867_v60 = vpop.f32.mrb[56].mxu0  ;;  %v6938_v48 = vpop.f32.mrb[56].mxu1 }
0x1dea   :  { %v10021_v17 = vadd.f32 %v6867_v60, %v12754_v5  ;;  %v6869_v18 = vpop.f32.mrb[57].mxu0  ;;  %v6940_v11 = vpop.f32.mrb[57].mxu1  ;;  %v10037_v15 = vadd.f32 %v6938_v48, %v12766_v63 }
0x1deb   :  { %v10022_v34 = vadd.f32 %v6869_v18, %v12759_v14  ;;  %v10038_v16 = vadd.f32 %v6940_v11, %v12772_v12 }
0x1dec   :  { %v7597_v31 = vmul.f32 -1.442695, %v10021_v17  ;;  %v7599_v40 = vmul.f32 -1.442695, %v10037_v15 }
0x1ded   :  { %v7598_v61 = vmul.f32 -1.442695, %v10022_v34 }
0x1dee   :  { %10632 = vpow2.f32 %v7597_v31 }
0x1def   :  { %10634 = vpow2.f32 %v7598_v61 }
0x1df0   :  { %10636 = vtanh.f32 %v10038_v16 }
0x1df1   :  { %10638 = vpow2.f32 %v7599_v40 }
0x1df8   :  { %v10633_v59 = vpop.eup %10632 }
0x1df9   :  { %v6956_v27 = vadd.f32 1.0, %v10633_v59  ;;  %v10635_v50 = vpop.eup %10634 }
0x1dfa   :  { %v6957_v62 = vadd.f32 1.0, %v10635_v50  ;;  %v10637_v4 = vpop.eup %10636 }
0x1dfb   :  { %10640 = vrcp.f32 %v6956_v27  ;;  %v10639_v51 = vpop.eup %10638 }
0x1dfc   :  { %10642 = vrcp.f32 %v6957_v62  ;;  %v6958_v3 = vadd.f32 1.0, %v10639_v51 }
0x1dfe   :  { %10644 = vrcp.f32 %v6958_v3 }
0x1e05   :  { %v10641_v39 = vpop.eup %10640 }
0x1e06   :  { %v6967_v43 = vmul.f32 %v10641_v39, %v10637_v4  ;;  %v10643_v41 = vpop.eup %10642 }
0x1e07   :  { %v6966_v20 = vmul.f32 %v10643_v41, %v12910_v56 }
0x1e08   :  { %v10645_v8 = vpop.eup %10644 }
0x1e09   :  { %v12955_v35 = vadd.f32 %v6967_v43, %v6966_v20 }
0x1e0b   :  { %10646 = vtanh.f32 %v12955_v35 }
0x1e15   :  { %v10647_v25 = vpop.eup %10646 }
0x1e16   :  { %v6970_v58 = vmul.f32 %v10647_v25, %v10645_v8 }
0x1e18   :  { %7600 = vst [vmem:[%s13066_s13 + $0x20] sm:$0xff] %v6970_v58  ;;  %7042 = vmatmul.mubr.f32.vlgmr.msra.gmra.mrb[58].mxu0 %v6970_v58  ;;  %7113 = vmatmul.mubr.f32.vlgmr.msra.gmra.mrb[58].mxu1 %v6970_v58 }
0x1e19   :  { %9792 = vmatpush1.bf16.msra.mxu0 %v12606_v55  ;;  %9824 = vmatpush1.bf16.msra.mxu1 %v12609_v53 }
0x1e1a   :  { %9794 = vmatprep.subr.bf16.mxu0 %v12614_v47  ;;  %9826 = vmatprep.subr.bf16.mxu1 %v12616_v29 }
0x1e1b   :  { %7217 = vmatprep.mubr.f32.mxu0 %v10904_v0  ;;  %7288 = vmatprep.mubr.f32.mxu1 %v10904_v0 }
0x1e1d   :  { %9796 = vmatpush1.bf16.msra.mxu0 %v12618_v7  ;;  %9828 = vmatpush1.bf16.msra.mxu1 %v12621_v9 }
0x1e1e   :  { %9798 = vmatprep.subr.bf16.mxu0 %v12626_v1  ;;  %9830 = vmatprep.subr.bf16.mxu1 %v12628_v2 }
0x1e21   :  { %9800 = vmatpush1.bf16.msra.mxu0 %v12630_v33  ;;  %9832 = vmatpush1.bf16.msra.mxu1 %v12633_v10 }
0x1e22   :  { %9802 = vmatprep.subr.bf16.mxu0 %v12638_v37  ;;  %9834 = vmatprep.subr.bf16.mxu1 %v12640_v32 }
0x1e25   :  { %9804 = vmatpush1.bf16.msra.mxu0 %v12642_v36  ;;  %9836 = vmatpush1.bf16.msra.mxu1 %v12645_v38 }
0x1e26   :  { %9806 = vmatprep.subr.bf16.mxu0 %v12650_v57  ;;  %9838 = vmatprep.subr.bf16.mxu1 %v12652_v54 }
0x1e29   :  { %9808 = vmatpush1.bf16.msra.mxu0 %v12654_v22  ;;  %9840 = vmatpush1.bf16.msra.mxu1 %v12657_v26 }
0x1e2a   :  { %9810 = vmatprep.subr.bf16.mxu0 %v12661_v23  ;;  %9842 = vmatprep.subr.bf16.mxu1 %v12663_v46 }
0x1e2d   :  { %9812 = vmatpush1.bf16.msra.mxu0 %v12666_v13  ;;  %9844 = vmatpush1.bf16.msra.mxu1 %v12670_v6 }
0x1e2e   :  { %9814 = vmatprep.subr.bf16.mxu0 %v12672_v42  ;;  %9846 = vmatprep.subr.bf16.mxu1 %v12674_v45 }
0x1e31   :  { %9816 = vmatpush1.bf16.msra.mxu0 %v12677_v21  ;;  %9848 = vmatpush1.bf16.msra.mxu1 %v12681_v19 }
0x1e32   :  { %9818 = vmatprep.subr.bf16.mxu0 %v12686_v49  ;;  %9850 = vmatprep.subr.bf16.mxu1 %v12688_v24 }
0x1e35   :  { %9820 = vmatpush1.bf16.msra.mxu0 %v12690_v28  ;;  %9852 = vmatpush1.bf16.msra.mxu1 %v12693_v30 }
0x1e36   :  { %9854 = vmatprep.subr.bf16.mxu0 %v12602_v44  ;;  %9886 = vmatprep.subr.bf16.mxu1 %v12604_v52 }
0x1eeb   :  { %v7043_v56 = vpop.f32.mrb[58].mxu0  ;;  %v7114_v60 = vpop.f32.mrb[58].mxu1 }
0x1eec   :  { %v10023_v48 = vadd.f32 %v7043_v56, %v12754_v5  ;;  %v7045_v17 = vpop.f32.mrb[59].mxu0  ;;  %v7116_v18 = vpop.f32.mrb[59].mxu1  ;;  %v10039_v61 = vadd.f32 %v7114_v60, %v12766_v63 }
0x1eed   :  { %v10024_v11 = vadd.f32 %v7045_v17, %v12759_v14  ;;  %v10040_v15 = vadd.f32 %v7116_v18, %v12772_v12 }
0x1eee   :  { %v7601_v34 = vmul.f32 -1.442695, %v10023_v48  ;;  %v7603_v16 = vmul.f32 -1.442695, %v10039_v61 }
0x1eef   :  { %v7602_v31 = vmul.f32 -1.442695, %v10024_v11 }
0x1ef0   :  { %10648 = vpow2.f32 %v7601_v34 }
0x1ef1   :  { %10650 = vpow2.f32 %v7602_v31 }
0x1ef2   :  { %10652 = vtanh.f32 %v10040_v15 }
0x1ef3   :  { %10654 = vpow2.f32 %v7603_v16 }
0x1efa   :  { %v10649_v44 = vpop.eup %10648 }
0x1efb   :  { %v7132_v40 = vadd.f32 1.0, %v10649_v44  ;;  %v10651_v52 = vpop.eup %10650 }
0x1efc   :  { %v7133_v59 = vadd.f32 1.0, %v10651_v52  ;;  %v10653_v27 = vpop.eup %10652 }
0x1efd   :  { %10656 = vrcp.f32 %v7132_v40  ;;  %v10655_v50 = vpop.eup %10654 }
0x1efe   :  { %10658 = vrcp.f32 %v7133_v59  ;;  %v7134_v39 = vadd.f32 1.0, %v10655_v50 }
0x1f00   :  { %10660 = vrcp.f32 %v7134_v39 }
0x1f07   :  { %v10657_v62 = vpop.eup %10656 }
0x1f08   :  { %v7143_v4 = vmul.f32 %v10657_v62, %v10653_v27  ;;  %v10659_v51 = vpop.eup %10658 }
0x1f09   :  { %v7142_v43 = vmul.f32 %v10659_v51, %v12955_v35 }
0x1f0a   :  { %v10661_v3 = vpop.eup %10660 }
0x1f0b   :  { %v13000_v41 = vadd.f32 %v7143_v4, %v7142_v43 }
0x1f0d   :  { %10662 = vtanh.f32 %v13000_v41 }
0x1f17   :  { %v10663_v20 = vpop.eup %10662 }
0x1f18   :  { %v7146_v8 = vmul.f32 %v10663_v20, %v10661_v3 }
0x1f1a   :  { %7604 = vst [vmem:[%s13066_s13 + $0x28] sm:$0xff] %v7146_v8  ;;  %7218 = vmatmul.mubr.f32.vlgmr.msra.gmra.mrb[60].mxu0 %v7146_v8  ;;  %7289 = vmatmul.mubr.f32.vlgmr.msra.gmra.mrb[60].mxu1 %v7146_v8 }
0x1f1b   :  { %9856 = vmatpush1.bf16.msra.mxu0 %v12606_v55  ;;  %9888 = vmatpush1.bf16.msra.mxu1 %v12609_v53 }
0x1f1c   :  { %9858 = vmatprep.subr.bf16.mxu0 %v12614_v47  ;;  %9890 = vmatprep.subr.bf16.mxu1 %v12616_v29 }
0x1f1d   :  { %7393 = vmatprep.mubr.f32.mxu0 %v10904_v0  ;;  %7464 = vmatprep.mubr.f32.mxu1 %v10904_v0 }
0x1f1f   :  { %9860 = vmatpush1.bf16.msra.mxu0 %v12618_v7  ;;  %9892 = vmatpush1.bf16.msra.mxu1 %v12621_v9 }
0x1f20   :  { %9862 = vmatprep.subr.bf16.mxu0 %v12626_v1  ;;  %9894 = vmatprep.subr.bf16.mxu1 %v12628_v2 }
0x1f23   :  { %9864 = vmatpush1.bf16.msra.mxu0 %v12630_v33  ;;  %9896 = vmatpush1.bf16.msra.mxu1 %v12633_v10 }
0x1f24   :  { %9866 = vmatprep.subr.bf16.mxu0 %v12638_v37  ;;  %9898 = vmatprep.subr.bf16.mxu1 %v12640_v32 }
0x1f27   :  { %9868 = vmatpush1.bf16.msra.mxu0 %v12642_v36  ;;  %9900 = vmatpush1.bf16.msra.mxu1 %v12645_v38 }
0x1f28   :  { %9870 = vmatprep.subr.bf16.mxu0 %v12650_v57  ;;  %9902 = vmatprep.subr.bf16.mxu1 %v12652_v54 }
0x1f2b   :  { %9872 = vmatpush1.bf16.msra.mxu0 %v12654_v22  ;;  %9904 = vmatpush1.bf16.msra.mxu1 %v12657_v26 }
0x1f2c   :  { %9874 = vmatprep.subr.bf16.mxu0 %v12661_v23  ;;  %9906 = vmatprep.subr.bf16.mxu1 %v12663_v46 }
0x1f2f   :  { %9876 = vmatpush1.bf16.msra.mxu0 %v12666_v13  ;;  %9908 = vmatpush1.bf16.msra.mxu1 %v12670_v6 }
0x1f30   :  { %9878 = vmatprep.subr.bf16.mxu0 %v12672_v42  ;;  %9910 = vmatprep.subr.bf16.mxu1 %v12674_v45 }
0x1f33   :  { %9880 = vmatpush1.bf16.msra.mxu0 %v12677_v21  ;;  %9912 = vmatpush1.bf16.msra.mxu1 %v12681_v19 }
0x1f34   :  { %9882 = vmatprep.subr.bf16.mxu0 %v12686_v49  ;;  %9914 = vmatprep.subr.bf16.mxu1 %v12688_v24 }
0x1f37   :  { %9884 = vmatpush1.bf16.msra.mxu0 %v12690_v28  ;;  %9916 = vmatpush1.bf16.msra.mxu1 %v12693_v30 }
0x1fed   :  { %v7219_v0 = vpop.f32.mrb[60].mxu0  ;;  %v7290_v55 = vpop.f32.mrb[60].mxu1 }
0x1fee   :  { %v10025_v53 = vadd.f32 %v7219_v0, %v12754_v5  ;;  %v7221_v47 = vpop.f32.mrb[61].mxu0  ;;  %v7292_v29 = vpop.f32.mrb[61].mxu1  ;;  %v10041_v2 = vadd.f32 %v7290_v55, %v12766_v63 }
0x1fef   :  { %v10026_v7 = vadd.f32 %v7221_v47, %v12759_v14  ;;  %v10042_v33 = vadd.f32 %v7292_v29, %v12772_v12 }
0x1ff0   :  { %v7605_v9 = vmul.f32 -1.442695, %v10025_v53  ;;  %v7607_v10 = vmul.f32 -1.442695, %v10041_v2 }
0x1ff1   :  { %v7606_v1 = vmul.f32 -1.442695, %v10026_v7 }
0x1ff2   :  { %10664 = vpow2.f32 %v7605_v9 }
0x1ff3   :  { %10666 = vpow2.f32 %v7606_v1 }
0x1ff4   :  { %10668 = vtanh.f32 %v10042_v33 }
0x1ff5   :  { %10670 = vpow2.f32 %v7607_v10 }
0x1ffc   :  { %v10665_v37 = vpop.eup %10664 }
0x1ffd   :  { %v7308_v32 = vadd.f32 1.0, %v10665_v37  ;;  %v10667_v36 = vpop.eup %10666 }
0x1ffe   :  { %v7309_v38 = vadd.f32 1.0, %v10667_v36  ;;  %v10669_v57 = vpop.eup %10668 }
0x1fff   :  { %10672 = vrcp.f32 %v7308_v32  ;;  %v10671_v54 = vpop.eup %10670 }
0x2000   :  { %10674 = vrcp.f32 %v7309_v38  ;;  %v7310_v46 = vadd.f32 1.0, %v10671_v54 }
0x2002   :  { %10676 = vrcp.f32 %v7310_v46 }
0x2009   :  { %v10673_v22 = vpop.eup %10672 }
0x200a   :  { %v7319_v26 = vmul.f32 %v10673_v22, %v10669_v57  ;;  %v10675_v23 = vpop.eup %10674 }
0x200b   :  { %v7318_v13 = vmul.f32 %v10675_v23, %v13000_v41 }
0x200c   :  { %v10677_v42 = vpop.eup %10676 }
0x200d   :  { %v7320_v6 = vadd.f32 %v7319_v26, %v7318_v13 }
0x200f   :  { %10678 = vtanh.f32 %v7320_v6 }
0x2019   :  { %v10679_v45 = vpop.eup %10678 }
0x201a   :  { %v7322_v21 = vmul.f32 %v10679_v45, %v10677_v42 }
0x201c   :  { %7608 = vst [vmem:[%s13066_s13 + $0x30] sm:$0xff] %v7322_v21  ;;  %7394 = vmatmul.mubr.f32.vlgmr.msra.gmra.mrb[62].mxu0 %v7322_v21  ;;  %7465 = vmatmul.mubr.f32.vlgmr.msra.gmra.mrb[62].mxu1 %v7322_v21 }
0x20ef   :  { %v7395_v19 = vpop.f32.mrb[62].mxu0  ;;  %v7466_v49 = vpop.f32.mrb[62].mxu1 }
0x20f0   :  { %v10027_v24 = vadd.f32 %v7395_v19, %v12754_v5  ;;  %v7397_v28 = vpop.f32.mrb[63].mxu0  ;;  %v7468_v30 = vpop.f32.mrb[63].mxu1  ;;  %v10043_v56 = vadd.f32 %v7466_v49, %v12766_v63 }
0x20f1   :  { %v10028_v35 = vadd.f32 %v7397_v28, %v12759_v14  ;;  %v10044_v60 = vadd.f32 %v7468_v30, %v12772_v12 }
0x20f2   :  { %v7609_v25 = vmul.f32 -1.442695, %v10027_v24  ;;  %v7611_v48 = vmul.f32 -1.442695, %v10043_v56 }
0x20f3   :  { %v7610_v58 = vmul.f32 -1.442695, %v10028_v35 }
0x20f4   :  { %10680 = vpow2.f32 %v7609_v25 }
0x20f5   :  { %10682 = vpow2.f32 %v7610_v58 }
0x20f6   :  { %10684 = vtanh.f32 %v10044_v60 }
0x20f7   :  { %10686 = vpow2.f32 %v7611_v48 }
0x20fe   :  { %v10681_v17 = vpop.eup %10680 }
0x20ff   :  { %v7484_v18 = vadd.f32 1.0, %v10681_v17  ;;  %v10683_v11 = vpop.eup %10682 }
0x2100   :  { %v7485_v5 = vadd.f32 1.0, %v10683_v11  ;;  %v10685_v34 = vpop.eup %10684 }
0x2101   :  { %10688 = vrcp.f32 %v7484_v18  ;;  %v10687_v31 = vpop.eup %10686 }
0x2102   :  { %10690 = vrcp.f32 %v7485_v5  ;;  %v7486_v16 = vadd.f32 1.0, %v10687_v31 }
0x2104   :  { %10692 = vrcp.f32 %v7486_v16 }
0x210b   :  { %v10689_v14 = vpop.eup %10688 }
0x210c   :  { %v7495_v61 = vmul.f32 %v10689_v14, %v10685_v34  ;;  %v10691_v15 = vpop.eup %10690 }
0x210d   :  { %v7494_v44 = vmul.f32 %v10691_v15, %v7320_v6 }
0x210e   :  { %v10693_v63 = vpop.eup %10692 }
0x210f   :  { %v7496_v40 = vadd.f32 %v7495_v61, %v7494_v44 }
0x2111   :  { %10694 = vtanh.f32 %v7496_v40 }
0x211b   :  { %v10695_v12 = vpop.eup %10694 }
0x211c   :  { %v7498_v52 = vmul.f32 %v10695_v12, %v10693_v63 }
0x211e   :  { %7612 = vst [vmem:[%s13066_s13 + $0x38] sm:$0xff] %v7498_v52 }
0x211f   :  { %7505 = vsyncpa [#allocation6], 1 }
0x2120   :  { %7506 = vsyncpa [#allocation8], 1 }
0x2121   :  { %7507 = vsyncpa [#allocation11], 1 }
0x2122   :  { %7508 = vsyncpa [#allocation14], 1 }
0x2123   :  { %7509 = vsyncpa [#allocation17], 1 }

</bundles_post_ra>
